<compile_context>
chip_gen: v7x
topology: tpu7x:2x2x1
jax: 0.10.0
libtpu: 0.0.40
codegen_flags: <defaults>
</compile_context>

<pallas_src>
import math

import jax
import jax.numpy as jnp
from jax.experimental import pallas as pl
from jax.experimental.pallas import tpu as pltpu

HIDDEN_DIM = 256
MAX_WORDS = 6000
NUM_LAYERS = 6
N_CLASSES = 4
N_PAD = 128            # lane-padded class dimension
B_PAD = 8              # batch padded to sublane count
NEG_INF = -1e30


# ----------------------------------------------------------------------------
# Pallas kernel: one LSTM layer per grid step + fused classification head
# ----------------------------------------------------------------------------
def lstm_stack_kernel(x_ref, wih_ref, whh_ref, b_ref, h0_ref, c0_ref,
                      fcw_ref, fcb_ref, ow_ref, ob_ref,
                      out_ref, seq_scr, xw_scr):
    """Grid axis = layer index (sequential).

    seq_scr holds the current layer's input sequence as a flat (T*Bp, H) bf16
    buffer (time-major); each layer overwrites it with its own outputs so the
    next grid step (= next layer) consumes them.  Gate order follows PyTorch:
    i, f, g, o.  The head runs only on the last layer (fused epilogue).
    """
    l = pl.program_id(0)
    TB, H = seq_scr.shape          # static python ints
    Bp = h0_ref.shape[1]
    T = TB // Bp

    @pl.when(l == 0)
    def _():
        seq_scr[...] = x_ref[...]                                  # bf16 copy

    wih_t = wih_ref[0]             # (H, 4H) bf16, pre-transposed in wrapper
    whh_t = whh_ref[0]             # (H, 4H) bf16
    b = b_ref[0]                   # (1, 4H) f32 == b_ih + b_hh

    # Batched input projection for the whole sequence of this layer:
    # one M = T*Bp matmul instead of T tiny M = Bp matmuls; bias added once.
    xw_scr[...] = (jnp.dot(seq_scr[...], wih_t,
                           preferred_element_type=jnp.float32)
                   + b)                                            # (T*Bp, 4H) f32

    # Recurrence: h/c carried as values (vregs), static unrolled time loop.
    # TODO(synk): stage W_hh once per layer in the MXU (matmul_push_rhs +
    # matmul_acc_lhs/matmul_pop) instead of re-streaming 512 KiB of weights
    # through vld/MXU every timestep -- generation-specific, see header.
    h = h0_ref[0]                  # (Bp, H) f32, per-layer xavier_normal init
    c = c0_ref[0]
    for t in range(T):
        xw_t = xw_scr[pl.ds(t * Bp, Bp), :]                        # (Bp, 4H) f32
        gates = xw_t + jnp.dot(h.astype(jnp.bfloat16), whh_t,
                               preferred_element_type=jnp.float32)
        i = jax.nn.sigmoid(gates[:, 0 * H:1 * H])
        f = jax.nn.sigmoid(gates[:, 1 * H:2 * H])
        g = jnp.tanh(gates[:, 2 * H:3 * H])
        o = jax.nn.sigmoid(gates[:, 3 * H:4 * H])
        c = f * c + i * g
        h = o * jnp.tanh(c)
        # This layer's output -> next layer's input (stored bf16, no cast pass).
        seq_scr[pl.ds(t * Bp, Bp), :] = h.astype(jnp.bfloat16)

    @pl.when(l == pl.num_programs(0) - 1)
    def _():
        # Fused head on lstm_out[:, -1, :]: fc + relu_ + out + softmax(dim=1).
        # Dropout == identity at eval.  bf16 weights / f32 accumulation; bias,
        # softmax math stay f32 so the -1e30 padded logit lanes vanish exactly.
        z = (jnp.dot(h.astype(jnp.bfloat16), fcw_ref[...],
                     preferred_element_type=jnp.float32) + fcb_ref[...])
        z = jnp.maximum(z, 0.0)
        logits = (jnp.dot(z.astype(jnp.bfloat16), ow_ref[...],
                          preferred_element_type=jnp.float32) + ob_ref[...])
        m = jnp.max(logits, axis=1, keepdims=True)
        e = jnp.exp(logits - m)
        out_ref[...] = e / jnp.sum(e, axis=1, keepdims=True)


# ----------------------------------------------------------------------------
# Wrapper (jitted so the embedding gather / layout glue fuses with the call)
# ----------------------------------------------------------------------------
@jax.jit
def news_classifier_forward(token_ids, params, h0, c0):
    B, T = token_ids.shape
    H, L, Bp = HIDDEN_DIM, NUM_LAYERS, B_PAD

    # Embedding gather + time-major / pad / flatten glue (row 0 of the table is
    # zero, matching padding_idx=0).  All fused into this jit.
    emb = jnp.take(params["embedding"], token_ids, axis=0)        # (B, T, H) bf16
    x = jnp.transpose(emb, (1, 0, 2))                             # (T, B, H)
    x = jnp.pad(x, ((0, 0), (0, Bp - B), (0, 0)))
    x = x.reshape(T * Bp, H)                                      # flat time-major
    h0p = jnp.pad(h0, ((0, 0), (0, Bp - B), (0, 0)))
    c0p = jnp.pad(c0, ((0, 0), (0, Bp - B), (0, 0)))

    probs_p = pl.pallas_call(
        lstm_stack_kernel,
        out_shape=jax.ShapeDtypeStruct((Bp, N_PAD), jnp.float32),
        grid_spec=pltpu.PrefetchScalarGridSpec(
            num_scalar_prefetch=0,
            grid=(L,),
            in_specs=[
                pl.BlockSpec((T * Bp, H), lambda l: (0, 0)),         # embedded seq (bf16)
                pl.BlockSpec((1, H, 4 * H), lambda l: (l, 0, 0)),    # W_ih^T (bf16)
                pl.BlockSpec((1, H, 4 * H), lambda l: (l, 0, 0)),    # W_hh^T (bf16)
                pl.BlockSpec((1, 1, 4 * H), lambda l: (l, 0, 0)),    # b_ih + b_hh (f32)
                pl.BlockSpec((1, Bp, H), lambda l: (l, 0, 0)),       # h0 per layer
                pl.BlockSpec((1, Bp, H), lambda l: (l, 0, 0)),       # c0 per layer
                pl.BlockSpec((H, H), lambda l: (0, 0)),              # fc weight (bf16)
                pl.BlockSpec((1, H), lambda l: (0, 0)),              # fc bias (f32)
                pl.BlockSpec((H, N_PAD), lambda l: (0, 0)),          # out weight pad (bf16)
                pl.BlockSpec((1, N_PAD), lambda l: (0, 0)),          # out bias pad (f32)
            ],
            out_specs=pl.BlockSpec((Bp, N_PAD), lambda l: (0, 0)),
            scratch_shapes=[
                pltpu.VMEM((T * Bp, H), jnp.bfloat16),       # sequence buffer (bf16)
                pltpu.VMEM((T * Bp, 4 * H), jnp.float32),    # batched x@W_ih + b
            ],
        ),
        compiler_params=pltpu.CompilerParams(
            dimension_semantics=("arbitrary",)),             # layers are sequential
    )(x, params["w_ih_t"], params["w_hh_t"], params["b"], h0p, c0p,
      params["fc_w"], params["fc_b"], params["out_w_pad"], params["out_b_pad"])

    return probs_p[:B, :N_CLASSES]


# ----------------------------------------------------------------------------
# Deterministic parameter / state initialization
# ----------------------------------------------------------------------------
def init_params(key, n_classes=N_CLASSES):
    H, L = HIDDEN_DIM, NUM_LAYERS
    keys = jax.random.split(key, 8)
    emb = jax.random.normal(keys[0], (MAX_WORDS, H), jnp.float32)
    emb = emb.at[0].set(0.0)                                   # padding_idx=0
    k = 1.0 / math.sqrt(H)
    w_ih = jax.random.uniform(keys[1], (L, 4 * H, H), jnp.float32, -k, k)
    w_hh = jax.random.uniform(keys[2], (L, 4 * H, H), jnp.float32, -k, k)
    b_ih = jax.random.uniform(keys[3], (L, 4 * H), jnp.float32, -k, k)
    b_hh = jax.random.uniform(keys[4], (L, 4 * H), jnp.float32, -k, k)
    fc_w = jax.random.uniform(keys[5], (H, H), jnp.float32, -k, k)
    fc_b = jnp.zeros((1, H), jnp.float32)
    out_w = jax.random.uniform(keys[6], (H, n_classes), jnp.float32, -k, k)
    out_b = jnp.zeros((1, n_classes), jnp.float32)

    out_w_pad = jnp.pad(out_w, ((0, 0), (0, N_PAD - n_classes)))
    out_b_pad = jnp.concatenate(
        [out_b, jnp.full((1, N_PAD - n_classes), NEG_INF, jnp.float32)], axis=1)

    return dict(
        embedding=emb.astype(jnp.bfloat16),                           # (V, H) bf16
        w_ih_t=jnp.transpose(w_ih, (0, 2, 1)).astype(jnp.bfloat16),   # (L, H, 4H)
        w_hh_t=jnp.transpose(w_hh, (0, 2, 1)).astype(jnp.bfloat16),   # (L, H, 4H)
        b=(b_ih + b_hh)[:, None, :],                                  # (L, 1, 4H) f32
        fc_w=fc_w.astype(jnp.bfloat16),
        fc_b=fc_b,
        out_w_pad=out_w_pad.astype(jnp.bfloat16),
        out_b_pad=out_b_pad,
    )


def xavier_normal_states(key, L, B, H):
    # torch.nn.init.xavier_normal_ on a (L, B, H) tensor:
    # fan_in = B*H, fan_out = L*H, std = sqrt(2 / (fan_in + fan_out)).
    std = math.sqrt(2.0 / (B * H + L * H))
    k1, k2 = jax.random.split(key)
    h = std * jax.random.normal(k1, (L, B, H), jnp.float32)
    c = std * jax.random.normal(k2, (L, B, H), jnp.float32)
    return h, c


# ----------------------------------------------------------------------------
if __name__ == "__main__":
    key = jax.random.PRNGKey(0)
    kp, kx, ks = jax.random.split(key, 3)

    B, T = 2, 8                                   # batch=2, seq_len=8
    params = init_params(kp)
    token_ids = jax.random.randint(kx, (B, T), 0, MAX_WORDS, dtype=jnp.int32)
    h0, c0 = xavier_normal_states(ks, NUM_LAYERS, B, HIDDEN_DIM)

    probs = news_classifier_forward(token_ids, params, h0, c0)
    probs = jax.block_until_ready(probs)

    assert probs.shape == (B, N_CLASSES)
    assert bool(jnp.all(jnp.isfinite(probs)))
    assert bool(jnp.allclose(jnp.sum(probs, axis=1), 1.0, atol=1e-5))
    print("KERNEL_OK")
</pallas_src>

<mosaic_0001>
module attributes {stable_mosaic.version = 11 : i64} {
  func.func @lstm_stack_kernel(%arg0: i32, %arg1: memref<64x256xbf16, #tpu.memory_space<vmem>>, %arg2: memref<1x256x1024xbf16, #tpu.memory_space<vmem>>, %arg3: memref<1x256x1024xbf16, #tpu.memory_space<vmem>>, %arg4: memref<1x1x1024xf32, #tpu.memory_space<vmem>>, %arg5: memref<1x8x256xf32, #tpu.memory_space<vmem>>, %arg6: memref<1x8x256xf32, #tpu.memory_space<vmem>>, %arg7: memref<256x256xbf16, #tpu.memory_space<vmem>>, %arg8: memref<1x256xf32, #tpu.memory_space<vmem>>, %arg9: memref<256x128xbf16, #tpu.memory_space<vmem>>, %arg10: memref<1x128xf32, #tpu.memory_space<vmem>>, %arg11: memref<8x128xf32, #tpu.memory_space<vmem>>, %arg12: memref<64x256xbf16, #tpu.memory_space<vmem>>, %arg13: memref<64x1024xf32, #tpu.memory_space<vmem>>) attributes {dimension_semantics = [#tpu.dimension_semantics<arbitrary>], iteration_bounds = array<i64: 6>, scalar_prefetch = 0 : i64, scratch_operands = 2 : i64, tpu.core_type = #tpu.core_type<tc>, window_params = [{pipeline_mode = #tpu.pipeline_mode<synchronous>, transform_indices = @transform_0, window_bounds = array<i64: 64, 256>}, {transform_indices = @transform_1, window_bounds = array<i64: 1, 256, 1024>}, {transform_indices = @transform_2, window_bounds = array<i64: 1, 256, 1024>}, {transform_indices = @transform_3, window_bounds = array<i64: 1, 1, 1024>}, {transform_indices = @transform_4, window_bounds = array<i64: 1, 8, 256>}, {transform_indices = @transform_5, window_bounds = array<i64: 1, 8, 256>}, {pipeline_mode = #tpu.pipeline_mode<synchronous>, transform_indices = @transform_6, window_bounds = array<i64: 256, 256>}, {pipeline_mode = #tpu.pipeline_mode<synchronous>, transform_indices = @transform_7, window_bounds = array<i64: 1, 256>}, {pipeline_mode = #tpu.pipeline_mode<synchronous>, transform_indices = @transform_8, window_bounds = array<i64: 256, 128>}, {pipeline_mode = #tpu.pipeline_mode<synchronous>, transform_indices = @transform_9, window_bounds = array<i64: 1, 128>}, {pipeline_mode = #tpu.pipeline_mode<synchronous>, transform_indices = @transform_10, window_bounds = array<i64: 8, 128>}]} {
    %c0_i32 = arith.constant 0 : i32
    %0 = arith.cmpi eq, %arg0, %c0_i32 : i32
    %1 = arith.extui %0 : i1 to i32
    %c0_i32_0 = arith.constant 0 : i32
    %2 = arith.cmpi ne, %1, %c0_i32_0 : i32
    scf.if %2 {
      %c0_77 = arith.constant 0 : index
      %c0_78 = arith.constant 0 : index
      %269 = vector.load %arg1[%c0_77, %c0_78] : memref<64x256xbf16, #tpu.memory_space<vmem>>, vector<64x256xbf16>
      %c0_79 = arith.constant 0 : index
      %c0_80 = arith.constant 0 : index
      %270 = vector.load %arg12[%c0_79, %c0_80] : memref<64x256xbf16, #tpu.memory_space<vmem>>, vector<64x256xbf16>
      tpu.vector_store %arg12[%c0_79, %c0_80], %269 {strides = array<i32>} : memref<64x256xbf16, #tpu.memory_space<vmem>>, vector<64x256xbf16>,
    } else {
    }
    %c0 = arith.constant 0 : index
    %c0_1 = arith.constant 0 : index
    %c0_2 = arith.constant 0 : index
    %3 = vector.load %arg2[%c0, %c0_1, %c0_2] : memref<1x256x1024xbf16, #tpu.memory_space<vmem>>, vector<1x256x1024xbf16>
    %4 = vector.shape_cast %3 : vector<1x256x1024xbf16> to vector<256x1024xbf16>
    %c0_3 = arith.constant 0 : index
    %c0_4 = arith.constant 0 : index
    %c0_5 = arith.constant 0 : index
    %5 = vector.load %arg3[%c0_3, %c0_4, %c0_5] : memref<1x256x1024xbf16, #tpu.memory_space<vmem>>, vector<1x256x1024xbf16>
    %6 = vector.shape_cast %5 : vector<1x256x1024xbf16> to vector<256x1024xbf16>
    %c0_6 = arith.constant 0 : index
    %c0_7 = arith.constant 0 : index
    %c0_8 = arith.constant 0 : index
    %7 = vector.load %arg4[%c0_6, %c0_7, %c0_8] : memref<1x1x1024xf32, #tpu.memory_space<vmem>>, vector<1x1x1024xf32>
    %8 = vector.shape_cast %7 : vector<1x1x1024xf32> to vector<1x1024xf32>
    %c0_9 = arith.constant 0 : index
    %c0_10 = arith.constant 0 : index
    %9 = vector.load %arg12[%c0_9, %c0_10] : memref<64x256xbf16, #tpu.memory_space<vmem>>, vector<64x256xbf16>
    %cst = arith.constant dense<0.000000e+00> : vector<64x1024xf32>
    %10 = tpu.matmul %9, %4, %cst {dimension_numbers = #tpu.dot_dimension_numbers<[1], [0], [0], [1], [0, 0, 1, 1], [], []>} : vector<64x256xbf16>, vector<256x1024xbf16>, vector<64x1024xf32> -> vector<64x1024xf32>
    %11 = vector.broadcast %8 : vector<1x1024xf32> to vector<64x1024xf32>
    %12 = arith.addf %10, %11 : vector<64x1024xf32>
    %c0_11 = arith.constant 0 : index
    %c0_12 = arith.constant 0 : index
    %13 = vector.load %arg13[%c0_11, %c0_12] : memref<64x1024xf32, #tpu.memory_space<vmem>>, vector<64x1024xf32>
    tpu.vector_store %arg13[%c0_11, %c0_12], %12 {strides = array<i32>} : memref<64x1024xf32, #tpu.memory_space<vmem>>, vector<64x1024xf32>,
    %c0_13 = arith.constant 0 : index
    %c0_14 = arith.constant 0 : index
    %c0_15 = arith.constant 0 : index
    %14 = vector.load %arg5[%c0_13, %c0_14, %c0_15] : memref<1x8x256xf32, #tpu.memory_space<vmem>>, vector<1x8x256xf32>
    %15 = vector.shape_cast %14 : vector<1x8x256xf32> to vector<8x256xf32>
    %c0_16 = arith.constant 0 : index
    %c0_17 = arith.constant 0 : index
    %c0_18 = arith.constant 0 : index
    %16 = vector.load %arg6[%c0_16, %c0_17, %c0_18] : memref<1x8x256xf32, #tpu.memory_space<vmem>>, vector<1x8x256xf32>
    %17 = vector.shape_cast %16 : vector<1x8x256xf32> to vector<8x256xf32>
    %c0_19 = arith.constant 0 : index
    %c0_20 = arith.constant 0 : index
    %18 = vector.load %arg13[%c0_19, %c0_20] : memref<64x1024xf32, #tpu.memory_space<vmem>>, vector<8x1024xf32>
    %19 = arith.truncf %15 : vector<8x256xf32> to vector<8x256xbf16>
    %cst_21 = arith.constant dense<0.000000e+00> : vector<8x1024xf32>
    %20 = tpu.matmul %19, %6, %cst_21 {dimension_numbers = #tpu.dot_dimension_numbers<[1], [0], [0], [1], [0, 0, 1, 1], [], []>} : vector<8x256xbf16>, vector<256x1024xbf16>, vector<8x1024xf32> -> vector<8x1024xf32>
    %21 = arith.addf %18, %20 : vector<8x1024xf32>
    %22 = vector.extract_strided_slice %21 {offsets = [0, 0], sizes = [8, 256], strides = [1, 1]} : vector<8x1024xf32> to vector<8x256xf32>
    %23 = arith.negf %22 : vector<8x256xf32>
    %24 = math.exp %23 : vector<8x256xf32>
    %cst_22 = arith.constant 1.000000e+00 : f32
    %25 = vector.broadcast %cst_22 : f32 to vector<8x256xf32>
    %26 = arith.addf %25, %24 : vector<8x256xf32>
    %27 = arith.divf %25, %26 : vector<8x256xf32>
    %28 = vector.extract_strided_slice %21 {offsets = [0, 256], sizes = [8, 256], strides = [1, 1]} : vector<8x1024xf32> to vector<8x256xf32>
    %29 = arith.negf %28 : vector<8x256xf32>
    %30 = math.exp %29 : vector<8x256xf32>
    %cst_23 = arith.constant 1.000000e+00 : f32
    %31 = vector.broadcast %cst_23 : f32 to vector<8x256xf32>
    %32 = arith.addf %31, %30 : vector<8x256xf32>
    %33 = arith.divf %31, %32 : vector<8x256xf32>
    %34 = vector.extract_strided_slice %21 {offsets = [0, 512], sizes = [8, 256], strides = [1, 1]} : vector<8x1024xf32> to vector<8x256xf32>
    %35 = math.tanh %34 : vector<8x256xf32>
    %36 = vector.extract_strided_slice %21 {offsets = [0, 768], sizes = [8, 256], strides = [1, 1]} : vector<8x1024xf32> to vector<8x256xf32>
    %37 = arith.negf %36 : vector<8x256xf32>
    %38 = math.exp %37 : vector<8x256xf32>
    %cst_24 = arith.constant 1.000000e+00 : f32
    %39 = vector.broadcast %cst_24 : f32 to vector<8x256xf32>
    %40 = arith.addf %39, %38 : vector<8x256xf32>
    %41 = arith.divf %39, %40 : vector<8x256xf32>
    %42 = arith.mulf %33, %17 : vector<8x256xf32>
    %43 = arith.mulf %27, %35 : vector<8x256xf32>
    %44 = arith.addf %42, %43 : vector<8x256xf32>
    %45 = math.tanh %44 : vector<8x256xf32>
    %46 = arith.mulf %41, %45 : vector<8x256xf32>
    %47 = arith.truncf %46 : vector<8x256xf32> to vector<8x256xbf16>
    %c0_25 = arith.constant 0 : index
    %c0_26 = arith.constant 0 : index
    %48 = vector.load %arg12[%c0_25, %c0_26] : memref<64x256xbf16, #tpu.memory_space<vmem>>, vector<8x256xbf16>
    tpu.vector_store %arg12[%c0_25, %c0_26], %47 {strides = array<i32>} : memref<64x256xbf16, #tpu.memory_space<vmem>>, vector<8x256xbf16>,
    %c8 = arith.constant 8 : index
    %c0_27 = arith.constant 0 : index
    %49 = vector.load %arg13[%c8, %c0_27] : memref<64x1024xf32, #tpu.memory_space<vmem>>, vector<8x1024xf32>
    %50 = arith.truncf %46 : vector<8x256xf32> to vector<8x256xbf16>
    %cst_28 = arith.constant dense<0.000000e+00> : vector<8x1024xf32>
    %51 = tpu.matmul %50, %6, %cst_28 {dimension_numbers = #tpu.dot_dimension_numbers<[1], [0], [0], [1], [0, 0, 1, 1], [], []>} : vector<8x256xbf16>, vector<256x1024xbf16>, vector<8x1024xf32> -> vector<8x1024xf32>
    %52 = arith.addf %49, %51 : vector<8x1024xf32>
    %53 = vector.extract_strided_slice %52 {offsets = [0, 0], sizes = [8, 256], strides = [1, 1]} : vector<8x1024xf32> to vector<8x256xf32>
    %54 = arith.negf %53 : vector<8x256xf32>
    %55 = math.exp %54 : vector<8x256xf32>
    %cst_29 = arith.constant 1.000000e+00 : f32
    %56 = vector.broadcast %cst_29 : f32 to vector<8x256xf32>
    %57 = arith.addf %56, %55 : vector<8x256xf32>
    %58 = arith.divf %56, %57 : vector<8x256xf32>
    %59 = vector.extract_strided_slice %52 {offsets = [0, 256], sizes = [8, 256], strides = [1, 1]} : vector<8x1024xf32> to vector<8x256xf32>
    %60 = arith.negf %59 : vector<8x256xf32>
    %61 = math.exp %60 : vector<8x256xf32>
    %cst_30 = arith.constant 1.000000e+00 : f32
    %62 = vector.broadcast %cst_30 : f32 to vector<8x256xf32>
    %63 = arith.addf %62, %61 : vector<8x256xf32>
    %64 = arith.divf %62, %63 : vector<8x256xf32>
    %65 = vector.extract_strided_slice %52 {offsets = [0, 512], sizes = [8, 256], strides = [1, 1]} : vector<8x1024xf32> to vector<8x256xf32>
    %66 = math.tanh %65 : vector<8x256xf32>
    %67 = vector.extract_strided_slice %52 {offsets = [0, 768], sizes = [8, 256], strides = [1, 1]} : vector<8x1024xf32> to vector<8x256xf32>
    %68 = arith.negf %67 : vector<8x256xf32>
    %69 = math.exp %68 : vector<8x256xf32>
    %cst_31 = arith.constant 1.000000e+00 : f32
    %70 = vector.broadcast %cst_31 : f32 to vector<8x256xf32>
    %71 = arith.addf %70, %69 : vector<8x256xf32>
    %72 = arith.divf %70, %71 : vector<8x256xf32>
    %73 = arith.mulf %64, %44 : vector<8x256xf32>
    %74 = arith.mulf %58, %66 : vector<8x256xf32>
    %75 = arith.addf %73, %74 : vector<8x256xf32>
    %76 = math.tanh %75 : vector<8x256xf32>
    %77 = arith.mulf %72, %76 : vector<8x256xf32>
    %78 = arith.truncf %77 : vector<8x256xf32> to vector<8x256xbf16>
    %c8_32 = arith.constant 8 : index
    %c0_33 = arith.constant 0 : index
    %79 = vector.load %arg12[%c8_32, %c0_33] : memref<64x256xbf16, #tpu.memory_space<vmem>>, vector<8x256xbf16>
    tpu.vector_store %arg12[%c8_32, %c0_33], %78 {strides = array<i32>} : memref<64x256xbf16, #tpu.memory_space<vmem>>, vector<8x256xbf16>,
    %c16 = arith.constant 16 : index
    %c0_34 = arith.constant 0 : index
    %80 = vector.load %arg13[%c16, %c0_34] : memref<64x1024xf32, #tpu.memory_space<vmem>>, vector<8x1024xf32>
    %81 = arith.truncf %77 : vector<8x256xf32> to vector<8x256xbf16>
    %cst_35 = arith.constant dense<0.000000e+00> : vector<8x1024xf32>
    %82 = tpu.matmul %81, %6, %cst_35 {dimension_numbers = #tpu.dot_dimension_numbers<[1], [0], [0], [1], [0, 0, 1, 1], [], []>} : vector<8x256xbf16>, vector<256x1024xbf16>, vector<8x1024xf32> -> vector<8x1024xf32>
    %83 = arith.addf %80, %82 : vector<8x1024xf32>
    %84 = vector.extract_strided_slice %83 {offsets = [0, 0], sizes = [8, 256], strides = [1, 1]} : vector<8x1024xf32> to vector<8x256xf32>
    %85 = arith.negf %84 : vector<8x256xf32>
    %86 = math.exp %85 : vector<8x256xf32>
    %cst_36 = arith.constant 1.000000e+00 : f32
    %87 = vector.broadcast %cst_36 : f32 to vector<8x256xf32>
    %88 = arith.addf %87, %86 : vector<8x256xf32>
    %89 = arith.divf %87, %88 : vector<8x256xf32>
    %90 = vector.extract_strided_slice %83 {offsets = [0, 256], sizes = [8, 256], strides = [1, 1]} : vector<8x1024xf32> to vector<8x256xf32>
    %91 = arith.negf %90 : vector<8x256xf32>
    %92 = math.exp %91 : vector<8x256xf32>
    %cst_37 = arith.constant 1.000000e+00 : f32
    %93 = vector.broadcast %cst_37 : f32 to vector<8x256xf32>
    %94 = arith.addf %93, %92 : vector<8x256xf32>
    %95 = arith.divf %93, %94 : vector<8x256xf32>
    %96 = vector.extract_strided_slice %83 {offsets = [0, 512], sizes = [8, 256], strides = [1, 1]} : vector<8x1024xf32> to vector<8x256xf32>
    %97 = math.tanh %96 : vector<8x256xf32>
    %98 = vector.extract_strided_slice %83 {offsets = [0, 768], sizes = [8, 256], strides = [1, 1]} : vector<8x1024xf32> to vector<8x256xf32>
    %99 = arith.negf %98 : vector<8x256xf32>
    %100 = math.exp %99 : vector<8x256xf32>
    %cst_38 = arith.constant 1.000000e+00 : f32
    %101 = vector.broadcast %cst_38 : f32 to vector<8x256xf32>
    %102 = arith.addf %101, %100 : vector<8x256xf32>
    %103 = arith.divf %101, %102 : vector<8x256xf32>
    %104 = arith.mulf %95, %75 : vector<8x256xf32>
    %105 = arith.mulf %89, %97 : vector<8x256xf32>
    %106 = arith.addf %104, %105 : vector<8x256xf32>
    %107 = math.tanh %106 : vector<8x256xf32>
    %108 = arith.mulf %103, %107 : vector<8x256xf32>
    %109 = arith.truncf %108 : vector<8x256xf32> to vector<8x256xbf16>
    %c16_39 = arith.constant 16 : index
    %c0_40 = arith.constant 0 : index
    %110 = vector.load %arg12[%c16_39, %c0_40] : memref<64x256xbf16, #tpu.memory_space<vmem>>, vector<8x256xbf16>
    tpu.vector_store %arg12[%c16_39, %c0_40], %109 {strides = array<i32>} : memref<64x256xbf16, #tpu.memory_space<vmem>>, vector<8x256xbf16>,
    %c24 = arith.constant 24 : index
    %c0_41 = arith.constant 0 : index
    %111 = vector.load %arg13[%c24, %c0_41] : memref<64x1024xf32, #tpu.memory_space<vmem>>, vector<8x1024xf32>
    %112 = arith.truncf %108 : vector<8x256xf32> to vector<8x256xbf16>
    %cst_42 = arith.constant dense<0.000000e+00> : vector<8x1024xf32>
    %113 = tpu.matmul %112, %6, %cst_42 {dimension_numbers = #tpu.dot_dimension_numbers<[1], [0], [0], [1], [0, 0, 1, 1], [], []>} : vector<8x256xbf16>, vector<256x1024xbf16>, vector<8x1024xf32> -> vector<8x1024xf32>
    %114 = arith.addf %111, %113 : vector<8x1024xf32>
    %115 = vector.extract_strided_slice %114 {offsets = [0, 0], sizes = [8, 256], strides = [1, 1]} : vector<8x1024xf32> to vector<8x256xf32>
    %116 = arith.negf %115 : vector<8x256xf32>
    %117 = math.exp %116 : vector<8x256xf32>
    %cst_43 = arith.constant 1.000000e+00 : f32
    %118 = vector.broadcast %cst_43 : f32 to vector<8x256xf32>
    %119 = arith.addf %118, %117 : vector<8x256xf32>
    %120 = arith.divf %118, %119 : vector<8x256xf32>
    %121 = vector.extract_strided_slice %114 {offsets = [0, 256], sizes = [8, 256], strides = [1, 1]} : vector<8x1024xf32> to vector<8x256xf32>
    %122 = arith.negf %121 : vector<8x256xf32>
    %123 = math.exp %122 : vector<8x256xf32>
    %cst_44 = arith.constant 1.000000e+00 : f32
    %124 = vector.broadcast %cst_44 : f32 to vector<8x256xf32>
    %125 = arith.addf %124, %123 : vector<8x256xf32>
    %126 = arith.divf %124, %125 : vector<8x256xf32>
    %127 = vector.extract_strided_slice %114 {offsets = [0, 512], sizes = [8, 256], strides = [1, 1]} : vector<8x1024xf32> to vector<8x256xf32>
    %128 = math.tanh %127 : vector<8x256xf32>
    %129 = vector.extract_strided_slice %114 {offsets = [0, 768], sizes = [8, 256], strides = [1, 1]} : vector<8x1024xf32> to vector<8x256xf32>
    %130 = arith.negf %129 : vector<8x256xf32>
    %131 = math.exp %130 : vector<8x256xf32>
    %cst_45 = arith.constant 1.000000e+00 : f32
    %132 = vector.broadcast %cst_45 : f32 to vector<8x256xf32>
    %133 = arith.addf %132, %131 : vector<8x256xf32>
    %134 = arith.divf %132, %133 : vector<8x256xf32>
    %135 = arith.mulf %126, %106 : vector<8x256xf32>
    %136 = arith.mulf %120, %128 : vector<8x256xf32>
    %137 = arith.addf %135, %136 : vector<8x256xf32>
    %138 = math.tanh %137 : vector<8x256xf32>
    %139 = arith.mulf %134, %138 : vector<8x256xf32>
    %140 = arith.truncf %139 : vector<8x256xf32> to vector<8x256xbf16>
    %c24_46 = arith.constant 24 : index
    %c0_47 = arith.constant 0 : index
    %141 = vector.load %arg12[%c24_46, %c0_47] : memref<64x256xbf16, #tpu.memory_space<vmem>>, vector<8x256xbf16>
    tpu.vector_store %arg12[%c24_46, %c0_47], %140 {strides = array<i32>} : memref<64x256xbf16, #tpu.memory_space<vmem>>, vector<8x256xbf16>,
    %c32 = arith.constant 32 : index
    %c0_48 = arith.constant 0 : index
    %142 = vector.load %arg13[%c32, %c0_48] : memref<64x1024xf32, #tpu.memory_space<vmem>>, vector<8x1024xf32>
    %143 = arith.truncf %139 : vector<8x256xf32> to vector<8x256xbf16>
    %cst_49 = arith.constant dense<0.000000e+00> : vector<8x1024xf32>
    %144 = tpu.matmul %143, %6, %cst_49 {dimension_numbers = #tpu.dot_dimension_numbers<[1], [0], [0], [1], [0, 0, 1, 1], [], []>} : vector<8x256xbf16>, vector<256x1024xbf16>, vector<8x1024xf32> -> vector<8x1024xf32>
    %145 = arith.addf %142, %144 : vector<8x1024xf32>
    %146 = vector.extract_strided_slice %145 {offsets = [0, 0], sizes = [8, 256], strides = [1, 1]} : vector<8x1024xf32> to vector<8x256xf32>
    %147 = arith.negf %146 : vector<8x256xf32>
    %148 = math.exp %147 : vector<8x256xf32>
    %cst_50 = arith.constant 1.000000e+00 : f32
    %149 = vector.broadcast %cst_50 : f32 to vector<8x256xf32>
    %150 = arith.addf %149, %148 : vector<8x256xf32>
    %151 = arith.divf %149, %150 : vector<8x256xf32>
    %152 = vector.extract_strided_slice %145 {offsets = [0, 256], sizes = [8, 256], strides = [1, 1]} : vector<8x1024xf32> to vector<8x256xf32>
    %153 = arith.negf %152 : vector<8x256xf32>
    %154 = math.exp %153 : vector<8x256xf32>
    %cst_51 = arith.constant 1.000000e+00 : f32
    %155 = vector.broadcast %cst_51 : f32 to vector<8x256xf32>
    %156 = arith.addf %155, %154 : vector<8x256xf32>
    %157 = arith.divf %155, %156 : vector<8x256xf32>
    %158 = vector.extract_strided_slice %145 {offsets = [0, 512], sizes = [8, 256], strides = [1, 1]} : vector<8x1024xf32> to vector<8x256xf32>
    %159 = math.tanh %158 : vector<8x256xf32>
    %160 = vector.extract_strided_slice %145 {offsets = [0, 768], sizes = [8, 256], strides = [1, 1]} : vector<8x1024xf32> to vector<8x256xf32>
    %161 = arith.negf %160 : vector<8x256xf32>
    %162 = math.exp %161 : vector<8x256xf32>
    %cst_52 = arith.constant 1.000000e+00 : f32
    %163 = vector.broadcast %cst_52 : f32 to vector<8x256xf32>
    %164 = arith.addf %163, %162 : vector<8x256xf32>
    %165 = arith.divf %163, %164 : vector<8x256xf32>
    %166 = arith.mulf %157, %137 : vector<8x256xf32>
    %167 = arith.mulf %151, %159 : vector<8x256xf32>
    %168 = arith.addf %166, %167 : vector<8x256xf32>
    %169 = math.tanh %168 : vector<8x256xf32>
    %170 = arith.mulf %165, %169 : vector<8x256xf32>
    %171 = arith.truncf %170 : vector<8x256xf32> to vector<8x256xbf16>
    %c32_53 = arith.constant 32 : index
    %c0_54 = arith.constant 0 : index
    %172 = vector.load %arg12[%c32_53, %c0_54] : memref<64x256xbf16, #tpu.memory_space<vmem>>, vector<8x256xbf16>
    tpu.vector_store %arg12[%c32_53, %c0_54], %171 {strides = array<i32>} : memref<64x256xbf16, #tpu.memory_space<vmem>>, vector<8x256xbf16>,
    %c40 = arith.constant 40 : index
    %c0_55 = arith.constant 0 : index
    %173 = vector.load %arg13[%c40, %c0_55] : memref<64x1024xf32, #tpu.memory_space<vmem>>, vector<8x1024xf32>
    %174 = arith.truncf %170 : vector<8x256xf32> to vector<8x256xbf16>
    %cst_56 = arith.constant dense<0.000000e+00> : vector<8x1024xf32>
    %175 = tpu.matmul %174, %6, %cst_56 {dimension_numbers = #tpu.dot_dimension_numbers<[1], [0], [0], [1], [0, 0, 1, 1], [], []>} : vector<8x256xbf16>, vector<256x1024xbf16>, vector<8x1024xf32> -> vector<8x1024xf32>
    %176 = arith.addf %173, %175 : vector<8x1024xf32>
    %177 = vector.extract_strided_slice %176 {offsets = [0, 0], sizes = [8, 256], strides = [1, 1]} : vector<8x1024xf32> to vector<8x256xf32>
    %178 = arith.negf %177 : vector<8x256xf32>
    %179 = math.exp %178 : vector<8x256xf32>
    %cst_57 = arith.constant 1.000000e+00 : f32
    %180 = vector.broadcast %cst_57 : f32 to vector<8x256xf32>
    %181 = arith.addf %180, %179 : vector<8x256xf32>
    %182 = arith.divf %180, %181 : vector<8x256xf32>
    %183 = vector.extract_strided_slice %176 {offsets = [0, 256], sizes = [8, 256], strides = [1, 1]} : vector<8x1024xf32> to vector<8x256xf32>
    %184 = arith.negf %183 : vector<8x256xf32>
    %185 = math.exp %184 : vector<8x256xf32>
    %cst_58 = arith.constant 1.000000e+00 : f32
    %186 = vector.broadcast %cst_58 : f32 to vector<8x256xf32>
    %187 = arith.addf %186, %185 : vector<8x256xf32>
    %188 = arith.divf %186, %187 : vector<8x256xf32>
    %189 = vector.extract_strided_slice %176 {offsets = [0, 512], sizes = [8, 256], strides = [1, 1]} : vector<8x1024xf32> to vector<8x256xf32>
    %190 = math.tanh %189 : vector<8x256xf32>
    %191 = vector.extract_strided_slice %176 {offsets = [0, 768], sizes = [8, 256], strides = [1, 1]} : vector<8x1024xf32> to vector<8x256xf32>
    %192 = arith.negf %191 : vector<8x256xf32>
    %193 = math.exp %192 : vector<8x256xf32>
    %cst_59 = arith.constant 1.000000e+00 : f32
    %194 = vector.broadcast %cst_59 : f32 to vector<8x256xf32>
    %195 = arith.addf %194, %193 : vector<8x256xf32>
    %196 = arith.divf %194, %195 : vector<8x256xf32>
    %197 = arith.mulf %188, %168 : vector<8x256xf32>
    %198 = arith.mulf %182, %190 : vector<8x256xf32>
    %199 = arith.addf %197, %198 : vector<8x256xf32>
    %200 = math.tanh %199 : vector<8x256xf32>
    %201 = arith.mulf %196, %200 : vector<8x256xf32>
    %202 = arith.truncf %201 : vector<8x256xf32> to vector<8x256xbf16>
    %c40_60 = arith.constant 40 : index
    %c0_61 = arith.constant 0 : index
    %203 = vector.load %arg12[%c40_60, %c0_61] : memref<64x256xbf16, #tpu.memory_space<vmem>>, vector<8x256xbf16>
    tpu.vector_store %arg12[%c40_60, %c0_61], %202 {strides = array<i32>} : memref<64x256xbf16, #tpu.memory_space<vmem>>, vector<8x256xbf16>,
    %c48 = arith.constant 48 : index
    %c0_62 = arith.constant 0 : index
    %204 = vector.load %arg13[%c48, %c0_62] : memref<64x1024xf32, #tpu.memory_space<vmem>>, vector<8x1024xf32>
    %205 = arith.truncf %201 : vector<8x256xf32> to vector<8x256xbf16>
    %cst_63 = arith.constant dense<0.000000e+00> : vector<8x1024xf32>
    %206 = tpu.matmul %205, %6, %cst_63 {dimension_numbers = #tpu.dot_dimension_numbers<[1], [0], [0], [1], [0, 0, 1, 1], [], []>} : vector<8x256xbf16>, vector<256x1024xbf16>, vector<8x1024xf32> -> vector<8x1024xf32>
    %207 = arith.addf %204, %206 : vector<8x1024xf32>
    %208 = vector.extract_strided_slice %207 {offsets = [0, 0], sizes = [8, 256], strides = [1, 1]} : vector<8x1024xf32> to vector<8x256xf32>
    %209 = arith.negf %208 : vector<8x256xf32>
    %210 = math.exp %209 : vector<8x256xf32>
    %cst_64 = arith.constant 1.000000e+00 : f32
    %211 = vector.broadcast %cst_64 : f32 to vector<8x256xf32>
    %212 = arith.addf %211, %210 : vector<8x256xf32>
    %213 = arith.divf %211, %212 : vector<8x256xf32>
    %214 = vector.extract_strided_slice %207 {offsets = [0, 256], sizes = [8, 256], strides = [1, 1]} : vector<8x1024xf32> to vector<8x256xf32>
    %215 = arith.negf %214 : vector<8x256xf32>
    %216 = math.exp %215 : vector<8x256xf32>
    %cst_65 = arith.constant 1.000000e+00 : f32
    %217 = vector.broadcast %cst_65 : f32 to vector<8x256xf32>
    %218 = arith.addf %217, %216 : vector<8x256xf32>
    %219 = arith.divf %217, %218 : vector<8x256xf32>
    %220 = vector.extract_strided_slice %207 {offsets = [0, 512], sizes = [8, 256], strides = [1, 1]} : vector<8x1024xf32> to vector<8x256xf32>
    %221 = math.tanh %220 : vector<8x256xf32>
    %222 = vector.extract_strided_slice %207 {offsets = [0, 768], sizes = [8, 256], strides = [1, 1]} : vector<8x1024xf32> to vector<8x256xf32>
    %223 = arith.negf %222 : vector<8x256xf32>
    %224 = math.exp %223 : vector<8x256xf32>
    %cst_66 = arith.constant 1.000000e+00 : f32
    %225 = vector.broadcast %cst_66 : f32 to vector<8x256xf32>
    %226 = arith.addf %225, %224 : vector<8x256xf32>
    %227 = arith.divf %225, %226 : vector<8x256xf32>
    %228 = arith.mulf %219, %199 : vector<8x256xf32>
    %229 = arith.mulf %213, %221 : vector<8x256xf32>
    %230 = arith.addf %228, %229 : vector<8x256xf32>
    %231 = math.tanh %230 : vector<8x256xf32>
    %232 = arith.mulf %227, %231 : vector<8x256xf32>
    %233 = arith.truncf %232 : vector<8x256xf32> to vector<8x256xbf16>
    %c48_67 = arith.constant 48 : index
    %c0_68 = arith.constant 0 : index
    %234 = vector.load %arg12[%c48_67, %c0_68] : memref<64x256xbf16, #tpu.memory_space<vmem>>, vector<8x256xbf16>
    tpu.vector_store %arg12[%c48_67, %c0_68], %233 {strides = array<i32>} : memref<64x256xbf16, #tpu.memory_space<vmem>>, vector<8x256xbf16>,
    %c56 = arith.constant 56 : index
    %c0_69 = arith.constant 0 : index
    %235 = vector.load %arg13[%c56, %c0_69] : memref<64x1024xf32, #tpu.memory_space<vmem>>, vector<8x1024xf32>
    %236 = arith.truncf %232 : vector<8x256xf32> to vector<8x256xbf16>
    %cst_70 = arith.constant dense<0.000000e+00> : vector<8x1024xf32>
    %237 = tpu.matmul %236, %6, %cst_70 {dimension_numbers = #tpu.dot_dimension_numbers<[1], [0], [0], [1], [0, 0, 1, 1], [], []>} : vector<8x256xbf16>, vector<256x1024xbf16>, vector<8x1024xf32> -> vector<8x1024xf32>
    %238 = arith.addf %235, %237 : vector<8x1024xf32>
    %239 = vector.extract_strided_slice %238 {offsets = [0, 0], sizes = [8, 256], strides = [1, 1]} : vector<8x1024xf32> to vector<8x256xf32>
    %240 = arith.negf %239 : vector<8x256xf32>
    %241 = math.exp %240 : vector<8x256xf32>
    %cst_71 = arith.constant 1.000000e+00 : f32
    %242 = vector.broadcast %cst_71 : f32 to vector<8x256xf32>
    %243 = arith.addf %242, %241 : vector<8x256xf32>
    %244 = arith.divf %242, %243 : vector<8x256xf32>
    %245 = vector.extract_strided_slice %238 {offsets = [0, 256], sizes = [8, 256], strides = [1, 1]} : vector<8x1024xf32> to vector<8x256xf32>
    %246 = arith.negf %245 : vector<8x256xf32>
    %247 = math.exp %246 : vector<8x256xf32>
    %cst_72 = arith.constant 1.000000e+00 : f32
    %248 = vector.broadcast %cst_72 : f32 to vector<8x256xf32>
    %249 = arith.addf %248, %247 : vector<8x256xf32>
    %250 = arith.divf %248, %249 : vector<8x256xf32>
    %251 = vector.extract_strided_slice %238 {offsets = [0, 512], sizes = [8, 256], strides = [1, 1]} : vector<8x1024xf32> to vector<8x256xf32>
    %252 = math.tanh %251 : vector<8x256xf32>
    %253 = vector.extract_strided_slice %238 {offsets = [0, 768], sizes = [8, 256], strides = [1, 1]} : vector<8x1024xf32> to vector<8x256xf32>
    %254 = arith.negf %253 : vector<8x256xf32>
    %255 = math.exp %254 : vector<8x256xf32>
    %cst_73 = arith.constant 1.000000e+00 : f32
    %256 = vector.broadcast %cst_73 : f32 to vector<8x256xf32>
    %257 = arith.addf %256, %255 : vector<8x256xf32>
    %258 = arith.divf %256, %257 : vector<8x256xf32>
    %259 = arith.mulf %250, %230 : vector<8x256xf32>
    %260 = arith.mulf %244, %252 : vector<8x256xf32>
    %261 = arith.addf %259, %260 : vector<8x256xf32>
    %262 = math.tanh %261 : vector<8x256xf32>
    %263 = arith.mulf %258, %262 : vector<8x256xf32>
    %264 = arith.truncf %263 : vector<8x256xf32> to vector<8x256xbf16>
    %c56_74 = arith.constant 56 : index
    %c0_75 = arith.constant 0 : index
    %265 = vector.load %arg12[%c56_74, %c0_75] : memref<64x256xbf16, #tpu.memory_space<vmem>>, vector<8x256xbf16>
    tpu.vector_store %arg12[%c56_74, %c0_75], %264 {strides = array<i32>} : memref<64x256xbf16, #tpu.memory_space<vmem>>, vector<8x256xbf16>,
    %c5_i32 = arith.constant 5 : i32
    %266 = arith.cmpi eq, %arg0, %c5_i32 : i32
    %267 = arith.extui %266 : i1 to i32
    %c0_i32_76 = arith.constant 0 : i32
    %268 = arith.cmpi ne, %267, %c0_i32_76 : i32
    scf.if %268 {
      %269 = arith.truncf %263 : vector<8x256xf32> to vector<8x256xbf16>
      %c0_77 = arith.constant 0 : index
      %c0_78 = arith.constant 0 : index
      %270 = vector.load %arg7[%c0_77, %c0_78] : memref<256x256xbf16, #tpu.memory_space<vmem>>, vector<256x256xbf16>
      %cst_79 = arith.constant dense<0.000000e+00> : vector<8x256xf32>
      %271 = tpu.matmul %269, %270, %cst_79 {dimension_numbers = #tpu.dot_dimension_numbers<[1], [0], [0], [1], [0, 0, 1, 1], [], []>} : vector<8x256xbf16>, vector<256x256xbf16>, vector<8x256xf32> -> vector<8x256xf32>
      %c0_80 = arith.constant 0 : index
      %c0_81 = arith.constant 0 : index
      %272 = vector.load %arg8[%c0_80, %c0_81] : memref<1x256xf32, #tpu.memory_space<vmem>>, vector<1x256xf32>
      %273 = vector.broadcast %272 : vector<1x256xf32> to vector<8x256xf32>
      %274 = arith.addf %271, %273 : vector<8x256xf32>
      %cst_82 = arith.constant 0.000000e+00 : f32
      %275 = vector.broadcast %cst_82 : f32 to vector<8x256xf32>
      %276 = arith.maximumf %274, %275 : vector<8x256xf32>
      %277 = arith.truncf %276 : vector<8x256xf32> to vector<8x256xbf16>
      %c0_83 = arith.constant 0 : index
      %c0_84 = arith.constant 0 : index
      %278 = vector.load %arg9[%c0_83, %c0_84] : memref<256x128xbf16, #tpu.memory_space<vmem>>, vector<256x128xbf16>
      %cst_85 = arith.constant dense<0.000000e+00> : vector<8x128xf32>
      %279 = tpu.matmul %277, %278, %cst_85 {dimension_numbers = #tpu.dot_dimension_numbers<[1], [0], [0], [1], [0, 0, 1, 1], [], []>} : vector<8x256xbf16>, vector<256x128xbf16>, vector<8x128xf32> -> vector<8x128xf32>
      %c0_86 = arith.constant 0 : index
      %c0_87 = arith.constant 0 : index
      %280 = vector.load %arg10[%c0_86, %c0_87] : memref<1x128xf32, #tpu.memory_space<vmem>>, vector<1x128xf32>
      %281 = vector.broadcast %280 : vector<1x128xf32> to vector<8x128xf32>
      %282 = arith.addf %279, %281 : vector<8x128xf32>
      %cst_88 = arith.constant dense<0xFF800000> : vector<8xf32>
      %283 = vector.multi_reduction <maximumf>, %282, %cst_88 [1] : vector<8x128xf32> to vector<8xf32>
      %284 = vector.shape_cast %283 : vector<8xf32> to vector<8x1xf32>
      %285 = vector.broadcast %284 : vector<8x1xf32> to vector<8x128xf32>
      %286 = arith.subf %282, %285 : vector<8x128xf32>
      %287 = math.exp %286 : vector<8x128xf32>
      %cst_89 = arith.constant dense<0.000000e+00> : vector<8xf32>
      %288 = vector.multi_reduction <add>, %287, %cst_89 [1] : vector<8x128xf32> to vector<8xf32>
      %289 = vector.shape_cast %288 : vector<8xf32> to vector<8x1xf32>
      %290 = vector.broadcast %289 : vector<8x1xf32> to vector<8x128xf32>
      %291 = arith.divf %287, %290 : vector<8x128xf32>
      %c0_90 = arith.constant 0 : index
      %c0_91 = arith.constant 0 : index
      %292 = vector.load %arg11[%c0_90, %c0_91] : memref<8x128xf32, #tpu.memory_space<vmem>>, vector<8x128xf32>
      tpu.vector_store %arg11[%c0_90, %c0_91], %291 {strides = array<i32>} : memref<8x128xf32, #tpu.memory_space<vmem>>, vector<8x128xf32>,
    } else {
    }
    return
  }
  func.func @transform_0(%arg0: i32) -> (i32, i32) {
    %c0_i32 = arith.constant 0 : i32
    %c0_i32_0 = arith.constant 0 : i32
    %c0_i32_1 = arith.constant 0 : i32
    return %c0_i32, %c0_i32_0 : i32, i32
  }
  func.func @transform_1(%arg0: i32) -> (i32, i32, i32) {
    %c0_i32 = arith.constant 0 : i32
    %c0_i32_0 = arith.constant 0 : i32
    %c0_i32_1 = arith.constant 0 : i32
    return %arg0, %c0_i32, %c0_i32_0 : i32, i32, i32
  }
  func.func @transform_2(%arg0: i32) -> (i32, i32, i32) {
    %c0_i32 = arith.constant 0 : i32
    %c0_i32_0 = arith.constant 0 : i32
    %c0_i32_1 = arith.constant 0 : i32
    return %arg0, %c0_i32, %c0_i32_0 : i32, i32, i32
  }
  func.func @transform_3(%arg0: i32) -> (i32, i32, i32) {
    %c0_i32 = arith.constant 0 : i32
    %c0_i32_0 = arith.constant 0 : i32
    %c0_i32_1 = arith.constant 0 : i32
    return %arg0, %c0_i32, %c0_i32_0 : i32, i32, i32
  }
  func.func @transform_4(%arg0: i32) -> (i32, i32, i32) {
    %c0_i32 = arith.constant 0 : i32
    %c0_i32_0 = arith.constant 0 : i32
    %c0_i32_1 = arith.constant 0 : i32
    return %arg0, %c0_i32, %c0_i32_0 : i32, i32, i32
  }
  func.func @transform_5(%arg0: i32) -> (i32, i32, i32) {
    %c0_i32 = arith.constant 0 : i32
    %c0_i32_0 = arith.constant 0 : i32
    %c0_i32_1 = arith.constant 0 : i32
    return %arg0, %c0_i32, %c0_i32_0 : i32, i32, i32
  }
  func.func @transform_6(%arg0: i32) -> (i32, i32) {
    %c0_i32 = arith.constant 0 : i32
    %c0_i32_0 = arith.constant 0 : i32
    %c0_i32_1 = arith.constant 0 : i32
    return %c0_i32, %c0_i32_0 : i32, i32
  }
  func.func @transform_7(%arg0: i32) -> (i32, i32) {
    %c0_i32 = arith.constant 0 : i32
    %c0_i32_0 = arith.constant 0 : i32
    %c0_i32_1 = arith.constant 0 : i32
    return %c0_i32, %c0_i32_0 : i32, i32
  }
  func.func @transform_8(%arg0: i32) -> (i32, i32) {
    %c0_i32 = arith.constant 0 : i32
    %c0_i32_0 = arith.constant 0 : i32
    %c0_i32_1 = arith.constant 0 : i32
    return %c0_i32, %c0_i32_0 : i32, i32
  }
  func.func @transform_9(%arg0: i32) -> (i32, i32) {
    %c0_i32 = arith.constant 0 : i32
    %c0_i32_0 = arith.constant 0 : i32
    %c0_i32_1 = arith.constant 0 : i32
    return %c0_i32, %c0_i32_0 : i32, i32
  }
  func.func @transform_10(%arg0: i32) -> (i32, i32) {
    %c0_i32 = arith.constant 0 : i32
    %c0_i32_0 = arith.constant 0 : i32
    %c0_i32_1 = arith.constant 0 : i32
    return %c0_i32, %c0_i32_0 : i32, i32
  }
}

</mosaic_0001>

<bundles_post_ra>
// kernel: news_classifier_forward.1
= control target key start
LH: loop header
LB: loop body
LE: loop exit
PB: predicated region body
PF: predicated region fallthrough
CT: control target
= control target key end

     0   :  { %s8520_s0 = inlined_call_operand.vmem [shape: bf16[64,256], index: 0, kind: input, shape index: {}]   ;;  %s8521_s1 = inlined_call_operand.hbm [shape: bf16[6,256,1024], index: 1, kind: input, shape index: {}]   ;;  %s8522_s2 = inlined_call_operand.hbm [shape: bf16[6,256,1024], index: 2, kind: input, shape index: {}]   ;;  %s8523_s3 = inlined_call_operand.hbm [shape: f32[6,1,1024], index: 3, kind: input, shape index: {}]   ;;  %s8524_s4 = inlined_call_operand.vmem [shape: f32[6,8,256], index: 4, kind: input, shape index: {}]   ;;  %s8525_s5 = inlined_call_operand.vmem [shape: f32[6,8,256], index: 5, kind: input, shape index: {}]   ;;  %s8526_s6 = inlined_call_operand.hbm [shape: bf16[256,256], index: 6, kind: input, shape index: {}]   ;;  %s8527_s7 = inlined_call_operand.hbm [shape: f32[1,256], index: 7, kind: input, shape index: {}]   ;;  %s8528_s8 = inlined_call_operand.hbm [shape: bf16[256,128], index: 8, kind: input, shape index: {}]   ;;  %s8529_s9 = inlined_call_operand.hbm [shape: f32[1,128], index: 9, kind: input, shape index: {}]   ;;  %s8530_s10 = inlined_call_operand.vmem [shape: f32[8,128], index: 10, kind: output, shape index: {}]  }
   0x1   :  { %8815 = sst [smem:[#allocation207_spill]] %s8520_s0 }
   0x2   :  { %8816 = sst [smem:[#allocation208_spill]] %s8522_s2 }
   0x3   :  { %8817 = sst [smem:[#allocation209_spill]] %s8525_s5 }
   0x4   :  { %8818 = sst [smem:[#allocation210_spill]] %s8526_s6 }
   0x5   :  { %8819 = sst [smem:[#allocation211_spill]] %s8528_s8 }
   0x6   :  { %8820 = sst [smem:[#allocation212_spill]] %s8530_s10 }
   0x7   :  { %15 = vsyncpa [#allocation5], 0 }
   0x8   :  { %17 = vsyncpa [#allocation5 + $0x1], 0 }
   0x9   :  { %18 = vsyncpa [#allocation7], 0 }
   0xa   :  { %20 = vsyncpa [#allocation7 + $0x1], 0 }
   0xb   :  { %21 = vsyncpa [#allocation10], 0 }
   0xc   :  { %22 = vsyncpa [#allocation13], 0  ;;  %s6175_s13 = smov 0   ;;  %s6177_s14 = smov 0  }
   0xd   :  { %s6179_s15 = smov 0   ;;  %s6181_s16 = smov 0  }
   0xe LB: > { %8821 = sst [smem:[#allocation19_spill]] %s6101_s15  ;;  %s6194_s17 = sadd.s32 4294967295, %s6105_s16   ;;  %s6105_s16 = sphi %s6181_s16, %s9671_s16   ;;  %s6101_s15 = sphi %s6179_s15, %s9673_s15   ;;  %s6097_s14 = sphi %s6177_s14, %s9675_s14   ;;  %s6093_s13 = sphi %s6175_s13, %s9674_s13  }
   0xf   : > { %p69_p0 = scmp.ne.s32.totalorder %s6097_s14, %s6093_s13  ;;  %p8531_p1 = scmp.eq.s32.totalorder %s6194_s17, 0 }
  0x10   : > { %p5006_p2 = scmp.ge.s32.totalorder %s6105_s16, 1  ;;  %p289_p3 = scmp.lt.s32.totalorder %s6105_s16, 7 }
  0x11   : > { %p6203_p5 = por %p8531_p1, %p69_p0  ;;  %s6107_s20 = smov [#allocation9]  }
  0x12   : > { %p6207_p6 = pnand %p5006_p2, %p289_p3  ;;  %s304_s21 = sshll.u32 %s6107_s20, 4  ;;  %s305_s21 = int_to_ptr.vmem [resolvable:$true] %s304_s21 }
  0x13   : > { %s8822_s18 = scalar_select %p6203_p5, 1, 0 }
  0x14   : > { %s8823_s19 = scalar_select %p6207_p6, 1, 0 }
  0x15   : > { %p5447_p7 = pneg %p6207_p6  ;;  %s6108_s23 = smov [#allocation12]  }
  0x16   : > { %s328_s24 = sshll.u32 %s6108_s23, 4  ;;  %s8825_s6 = sld [smem:[#allocation210_spill]]  ;;  %s6219_s24 = int_to_ptr.vmem [resolvable:$true] %s328_s24 }
  0x17   : > { %p6215_p8 = pnand %p5447_p7, %p8531_p1 }
  0x19   : > { %s8824_s22 = scalar_select %p6215_p8, 1, 0 }
  0x1a   : > { %p6229_p10 = pneg %p6215_p8 }
  0x1c   : > { %s5857_s27 = scalar_lea.hbm %s8825_s6, 4096 }
  0x1d   : > { %p5858_p9 = scmp.ne.s32.totalorder %s8825_s6, %s5857_s27  ;;  %p5864_p13 = scmp.lt.u32.totalorder %s5857_s27, %s8825_s6 }
  0x1e   : > { %s8826_s30 = scalar_select %p6229_p10, 1, 0 }
  0x1f   : > { %p5860_p11 = pnand %p6229_p10, %p5858_p9 }
  0x21   : > { %p5861_p12 = pneg %p5860_p11 }
  0x23   : > { %p5866_p0 = pnand %p5864_p13, %p5861_p12 }
  0x25   : > { %5869 = shalt.err (!%p5866_p0)
}
  0x26   : > { %s5870_s13 = scalar_lea.vmem %s305_s21, 4096  ;;  %p5878_p4 = scmp.lt.s32.totalorder %s305_s21, %s305_s21 }
  0x27   : > { %p5871_p2 = scmp.ne.s32.totalorder %s305_s21, %s5870_s13  ;;  %p5879_p1 = scmp.lt.s32.totalorder %s5870_s13, %s5870_s13 }
  0x29   : > { %p5873_p3 = pnand %p5871_p2, %p6229_p10  ;;  %p5880_p5 = por %p5879_p1, %p5878_p4 }
  0x2b   : > { %p5874_p7 = pneg %p5873_p3 }
  0x2d   : > { %p5881_p6 = pnand %p5880_p5, %p5874_p7 }
  0x2f   : > { %5884 = shalt.err (!%p5881_p6)
}
  0x30   : > { %s6109_s20 = smov 128   ;;  %s6110_s23 = smov 8  }
  0x31   : > { %5450 = dma.hbm_to_vmem [thread:$0]  (!%p6215_p8), %s8825_s6, 4096, %s305_s21, [#allocation10], %s6109_s20, %s6109_s20, %s6110_s23  }
  0x32   : > { %s8827_s8 = sld [smem:[#allocation211_spill]] }
  0x38   : > { %s5885_s29 = scalar_lea.hbm %s8827_s8, 2048 }
  0x39   : > { %p5886_p9 = scmp.ne.s32.totalorder %s8827_s8, %s5885_s29  ;;  %p5892_p5 = scmp.lt.u32.totalorder %s5885_s29, %s8827_s8 }
  0x3b   : > { %p5888_p1 = pnand %p5886_p9, %p6229_p10 }
  0x3d   : > { %p5889_p4 = pneg %p5888_p1 }
  0x3f   : > { %p5894_p6 = pnand %p5892_p5, %p5889_p4 }
  0x41   : > { %5897 = shalt.err (!%p5894_p6)
}
  0x42   : > { %s5898_s21 = scalar_lea.vmem %s6219_s24, 2048  ;;  %p5906_p0 = scmp.lt.s32.totalorder %s6219_s24, %s6219_s24 }
  0x43   : > { %p5899_p11 = scmp.ne.s32.totalorder %s6219_s24, %s5898_s21  ;;  %p5907_p2 = scmp.lt.s32.totalorder %s5898_s21, %s5898_s21 }
  0x45   : > { %p5901_p12 = pnand %p5899_p11, %p6229_p10  ;;  %p5908_p3 = por %p5907_p2, %p5906_p0 }
  0x47   : > { %p5902_p13 = pneg %p5901_p12 }
  0x49   : > { %p5909_p7 = pnand %p5908_p3, %p5902_p13 }
  0x4b   : > { %5912 = shalt.err (!%p5909_p7)
}
  0x4c   : > { %s6111_s20 = smov 64   ;;  %s6112_s10 = smov 4  }
  0x4d   : > { %5456 = dma.hbm_to_vmem [thread:$0]  (!%p6215_p8), %s8827_s8, 2048, %s6219_s24, [#allocation13], %s6111_s20, %s6111_s20, %s6112_s10  }
  0x4e   : > { %s6269_s26 = sadd.s32 1, %s6105_s16   ;;  %s56_s28 = sadd.s32 1, %s6101_s15 }
  0x4f   : > { %8828 = sst [smem:[#allocation20_spill]] %s6269_s26  ;;  %s53_s27 = ssub.s32 %s6105_s16, %s6269_s26 }
  0x50   : > { %p54_p9 = scmp.eq.s32.totalorder %s53_s27, 0  ;;  %p63_p1 = scmp.ne.s32.totalorder %s6101_s15, %s6097_s14 }
  0x51   : > { %p64_p4 = scmp.eq.s32.totalorder %s6105_s16, 0  ;;  %p5474_p6 = scmp.lt.s32.totalorder %s6105_s16, 6 }
  0x52   : > { %s6278_s29 = scalar_select %p54_p9, %s6101_s15, %s56_s28  }
  0x53   : > { %p65_p5 = por %p64_p4, %p63_p1  ;;  %s6282_s11 = sand.u32 1, %s6101_s15  }
  0x54   : > { %8829 = sst [smem:[#allocation21_spill]] %s6278_s29  ;;  %s8535_s12 = sshll.u32 %s6105_s16, 14 }
  0x55   : > { %s8534_s13 = sshll.u32 %s6282_s11, 10  ;;  %p6286_p11 = pnand %p5474_p6, %p65_p5 }
  0x56   : > { %s374_s21 = sand.u32 1, %s6105_s16   ;;  %s8831_s2 = sld [smem:[#allocation208_spill]] }
  0x57   : > { %s8830_s24 = scalar_select %p6286_p11, 1, 0 }
  0x58   : > { %s378_s25 = scalar_lea.vmem [#allocation6], %s8534_s13  ;;  %s6302_s28 = scalar_lea.sflag [#allocation7], %s374_s21 }
  0x59   : > { %s385_s27 = sshll.u32 %s378_s25, 4  ;;  %p6308_p13 = pneg %p6286_p11  ;;  %s6300_s27 = int_to_ptr.vmem [resolvable:$true] %s385_s27 }
  0x5b   : > { %s8832_s8 = scalar_select %p6308_p13, 1, 0 }
  0x5c   : > { %s6296_s23 = scalar_lea.hbm %s8831_s2, %s8535_s12  ;;  %s5918_s13 = scalar_lea.hbm %s8831_s2, 98304 }
  0x5d   : > { %s5913_s6 = scalar_lea.hbm %s6296_s23, 16384  ;;  %p5919_p3 = scmp.lt.u32.totalorder %s6296_s23, %s8831_s2 }
  0x5e   : > { %p5914_p12 = scmp.ne.s32.totalorder %s6296_s23, %s5913_s6  ;;  %p5920_p7 = scmp.lt.u32.totalorder %s5918_s13, %s5913_s6 }
  0x5f   : > { %p5922_p1 = scmp.lt.u32.totalorder %s5913_s6, %s6296_s23 }
  0x60   : > { %p5916_p0 = pnand %p6308_p13, %p5914_p12  ;;  %p5921_p9 = por %p5920_p7, %p5919_p3 }
  0x62   : > { %p5917_p2 = pneg %p5916_p0  ;;  %p5923_p4 = por %p5922_p1, %p5921_p9 }
  0x64   : > { %p5924_p5 = pnand %p5923_p4, %p5917_p2 }
  0x66   : > { %5927 = shalt.err (!%p5924_p5)
}
  0x67   : > { %s5928_s21 = scalar_lea.vmem %s6300_s27, 16384  ;;  %s6113_s20 = smov [#allocation6]  }
  0x68   : > { %p5929_p6 = scmp.ne.s32.totalorder %s6300_s27, %s5928_s21  ;;  %s5933_s10 = sshll.u32 %s6113_s20, 4  ;;  %s5934_s10 = int_to_ptr.vmem [resolvable:$false] %s5933_s10 }
  0x69   : > { %s5935_s12 = scalar_lea.vmem %s5934_s10, 32768  ;;  %p5936_p8 = scmp.lt.s32.totalorder %s6300_s27, %s5934_s10 }
  0x6a   : > { %p5931_p12 = pnand %p5929_p6, %p6308_p13  ;;  %p5937_p10 = scmp.lt.s32.totalorder %s5935_s12, %s5928_s21 }
  0x6c   : > { %p5932_p0 = pneg %p5931_p12  ;;  %p5938_p3 = por %p5937_p10, %p5936_p8 }
  0x6e   : > { %p5939_p7 = pnand %p5938_p3, %p5932_p0 }
  0x70   : > { %5942 = shalt.err (!%p5939_p7)
}
  0x71   : > { %s6114_s6 = smov 512   ;;  %s6115_s13 = smov 32  }
  0x72   : > { %5466 = dma.hbm_to_vmem [thread:$0]  (!%p6286_p11), %s6296_s23, 16384, %s6300_s27, %s6302_s28, %s6114_s6, %s6114_s6, %s6115_s13  }
  0x73   : > { %s6116_s25 = smov [#allocation11]   ;;  %s6117_s10 = smov [#allocation14]  }
  0x74   : > { %s318_s20 = sshll.u32 %s6116_s25, 4  ;;  %s342_s21 = sshll.u32 %s6117_s10, 4  ;;  %s319_s20 = int_to_ptr.vmem [resolvable:$true] %s318_s20  ;;  %s343_s21 = int_to_ptr.vmem [resolvable:$true] %s342_s21 }
  0x75   : > { %s5943_s29 = scalar_lea.hbm %s8527_s7, 32  ;;  %p8833_p10 = scmp.ne.s32.totalorder %s8826_s30, 0 }
  0x76   : > { %p5944_p8 = scmp.ne.s32.totalorder %s8527_s7, %s5943_s29  ;;  %p5950_p1 = scmp.lt.u32.totalorder %s5943_s29, %s8527_s7 }
  0x78   : > { %p5946_p2 = pnand %p5944_p8, %p8833_p10 }
  0x7a   : > { %p5947_p9 = pneg %p5946_p2 }
  0x7c   : > { %p5952_p4 = pnand %p5950_p1, %p5947_p9 }
  0x7e   : > { %5955 = shalt.err (!%p5952_p4)
}
  0x7f   : > { %s5956_s23 = scalar_lea.vmem %s319_s20, 32  ;;  %p5964_p0 = scmp.lt.s32.totalorder %s319_s20, %s319_s20 }
  0x80   : > { %p5957_p5 = scmp.ne.s32.totalorder %s319_s20, %s5956_s23  ;;  %p5965_p3 = scmp.lt.s32.totalorder %s5956_s23, %s5956_s23 }
  0x82   : > { %p5959_p6 = pnand %p5957_p5, %p8833_p10  ;;  %p5966_p7 = por %p5965_p3, %p5964_p0 }
  0x84   : > { %p5960_p12 = pneg %p5959_p6 }
  0x86   : > { %p5967_p11 = pnand %p5966_p7, %p5960_p12 }
  0x88   : > { %5970 = shalt.err (!%p5967_p11)
}
  0x89   : > { %p8834_p8 = scmp.ne.s32.totalorder %s8824_s22, 0  ;;  %s5971_s26 = scalar_lea.hbm %s8529_s9, 16 }
  0x8a   : > { %p5972_p2 = scmp.ne.s32.totalorder %s8529_s9, %s5971_s26  ;;  %p5978_p11 = scmp.lt.u32.totalorder %s5971_s26, %s8529_s9 }
  0x8b   : > { %5453 = dma.hbm_to_vmem [thread:$0]  (!%p8834_p8), %s8527_s7, 32, %s319_s20, [#allocation10]  }
  0x8c   : > { %p5974_p9 = pnand %p5972_p2, %p8833_p10 }
  0x8e   : > { %p5975_p1 = pneg %p5974_p9 }
  0x90   : > { %p5980_p4 = pnand %p5978_p11, %p5975_p1 }
  0x92   : > { %5983 = shalt.err (!%p5980_p4)
}
  0x93   : > { %s5984_s12 = scalar_lea.vmem %s343_s21, 16  ;;  %s5991_s20 = scalar_lea.vmem %s343_s21, 32 }
  0x94   : > { %p5985_p5 = scmp.ne.s32.totalorder %s343_s21, %s5984_s12  ;;  %p5992_p0 = scmp.lt.s32.totalorder %s343_s21, %s343_s21 }
  0x95   : > { %p5993_p3 = scmp.lt.s32.totalorder %s5991_s20, %s5984_s12 }
  0x96   : > { %p5987_p6 = pnand %p5985_p5, %p8833_p10 }
  0x97   : > { %p5994_p7 = por %p5993_p3, %p5992_p0 }
  0x98   : > { %p5988_p12 = pneg %p5987_p6 }
  0x9a   : > { %p5995_p13 = pnand %p5994_p7, %p5988_p12 }
  0x9c   : > { %5998 = shalt.err (!%p5995_p13)
}
  0x9d   : > { %5459 = dma.hbm_to_vmem [thread:$0]  (!%p8834_p8), %s8529_s9, 16, %s343_s21, [#allocation13]  }
  0x9e   : > { %s8835_s30 = sshll.u32 %s6105_s16, 14  ;;  %s8836_s26 = sshll.u32 %s6282_s11, 10 }
  0x9f   : > { %s6376_s5 = scalar_lea.hbm %s8521_s1, %s8835_s30  ;;  %s357_s22 = scalar_lea.vmem [#allocation4], %s8836_s26 }
  0xa0   : > { %s364_s29 = sshll.u32 %s357_s22, 4  ;;  %s5018_s27 = sshll.u32 %s6282_s11, 3  ;;  %s6381_s29 = int_to_ptr.vmem [resolvable:$true] %s364_s29 }
  0xa1   : > { %s354_s25 = scalar_lea.sflag [#allocation5], %s6282_s11  ;;  %s5999_s10 = scalar_lea.hbm %s6376_s5, 16384 }
  0xa2   : > { %p6000_p13 = scmp.ne.s32.totalorder %s6376_s5, %s5999_s10  ;;  %p8837_p10 = scmp.ne.s32.totalorder %s8832_s8, 0 }
  0xa3   : > { %s6004_s20 = scalar_lea.hbm %s8521_s1, 98304  ;;  %p6005_p9 = scmp.lt.u32.totalorder %s6376_s5, %s8521_s1 }
  0xa4   : > { %p6002_p8 = pnand %p6000_p13, %p8837_p10  ;;  %p6006_p1 = scmp.lt.u32.totalorder %s6004_s20, %s5999_s10 }
  0xa5   : > { %p6008_p4 = scmp.lt.u32.totalorder %s5999_s10, %s6376_s5 }
  0xa6   : > { %p6003_p2 = pneg %p6002_p8  ;;  %p6007_p11 = por %p6006_p1, %p6005_p9 }
  0xa8   : > { %p6009_p5 = por %p6008_p4, %p6007_p11 }
  0xaa   : > { %p6010_p6 = pnand %p6009_p5, %p6003_p2 }
  0xac   : > { %6013 = shalt.err (!%p6010_p6)
}
  0xad   : > { %s6014_s30 = scalar_lea.vmem %s6381_s29, 16384  ;;  %s6118_s15 = smov [#allocation4]  }
  0xae   : > { %p6015_p12 = scmp.ne.s32.totalorder %s6381_s29, %s6014_s30  ;;  %s6019_s0 = sshll.u32 %s6118_s15, 4  ;;  %s6020_s0 = int_to_ptr.vmem [resolvable:$false] %s6019_s0 }
  0xaf   : > { %s6021_s26 = scalar_lea.vmem %s6020_s0, 32768  ;;  %p6022_p7 = scmp.lt.s32.totalorder %s6381_s29, %s6020_s0 }
  0xb0   : > { %p6017_p0 = pnand %p6015_p12, %p8837_p10  ;;  %p6023_p13 = scmp.lt.s32.totalorder %s6021_s26, %s6014_s30 }
  0xb2   : > { %p6018_p3 = pneg %p6017_p0  ;;  %p6024_p8 = por %p6023_p13, %p6022_p7 }
  0xb4   : > { %p6025_p9 = pnand %p6024_p8, %p6018_p3 }
  0xb6   : > { %6028 = shalt.err (!%p6025_p9)
}
  0xb7   : > { %p8838_p2 = scmp.ne.s32.totalorder %s8830_s24, 0  ;;  %s5400_s22 = sshll.u32 %s6105_s16, 7 }
  0xb8   : > { %s399_s10 = scalar_lea.vmem [#allocation8], %s5018_s27  ;;  %s405_s23 = scalar_lea.hbm %s8523_s3, %s5400_s22 }
  0xb9   : > { %5463 = dma.hbm_to_vmem [thread:$0]  (!%p8838_p2), %s6376_s5, 16384, %s6381_s29, %s354_s25, %s6114_s6, %s6114_s6, %s6115_s13  }
  0xba   : > { %s407_s21 = sshll.u32 %s399_s10, 4  ;;  %s6029_s2 = scalar_lea.hbm %s405_s23, 128  ;;  %s408_s21 = int_to_ptr.vmem [resolvable:$true] %s407_s21 }
  0xbb   : > { %p6030_p1 = scmp.ne.s32.totalorder %s405_s23, %s6029_s2  ;;  %s6034_s0 = scalar_lea.hbm %s8523_s3, 768 }
  0xbc   : > { %p6035_p5 = scmp.lt.u32.totalorder %s405_s23, %s8523_s3  ;;  %p6036_p6 = scmp.lt.u32.totalorder %s6034_s0, %s6029_s2 }
  0xbd   : > { %p6032_p11 = pnand %p6030_p1, %p8837_p10  ;;  %p6038_p0 = scmp.lt.u32.totalorder %s6029_s2, %s405_s23 }
  0xbe   : > { %p6037_p12 = por %p6036_p6, %p6035_p5 }
  0xbf   : > { %p6033_p4 = pneg %p6032_p11 }
  0xc0   : > { %p6039_p3 = por %p6038_p0, %p6037_p12 }
  0xc2   : > { %p6040_p7 = pnand %p6039_p3, %p6033_p4 }
  0xc4   : > { %6043 = shalt.err (!%p6040_p7)
}
  0xc5   : > { %s6044_s16 = scalar_lea.vmem %s408_s21, 128  ;;  %s6119_s11 = smov [#allocation8]  }
  0xc6   : > { %p6045_p13 = scmp.ne.s32.totalorder %s408_s21, %s6044_s16  ;;  %s6049_s13 = sshll.u32 %s6119_s11, 4  ;;  %s6050_s13 = int_to_ptr.vmem [resolvable:$false] %s6049_s13 }
  0xc7   : > { %s6051_s5 = scalar_lea.vmem %s6050_s13, 256  ;;  %p6052_p1 = scmp.lt.s32.totalorder %s408_s21, %s6050_s13 }
  0xc8   : > { %p6047_p8 = pnand %p6045_p13, %p8837_p10  ;;  %p6053_p11 = scmp.lt.s32.totalorder %s6051_s5, %s6044_s16 }
  0xca   : > { %p6048_p9 = pneg %p6047_p8  ;;  %p6054_p2 = por %p6053_p11, %p6052_p1 }
  0xcc   : > { %p6055_p5 = pnand %p6054_p2, %p6048_p9 }
  0xce   : > { %6058 = shalt.err (!%p6055_p5)
}
  0xcf   : > { %p8839_p6 = scmp.ne.s32.totalorder %s8830_s24, 0  ;;  %p8840_p4 = scmp.ne.s32.totalorder %s8823_s19, 0 }
  0xd1   : > { %5469 = dma.hbm_to_vmem [thread:$0]  (!%p8839_p6), %s405_s23, 128, %s408_s21, %s6302_s28  }
  0xd2   : > { %432 = sbr.rel (%p8840_p4) target bundleno = 3687 (0xe67), region = 60 }
  0xd9   : > { %s434_s8 = sand.u32 1, %s6097_s14   ;;  %p8841_p10 = scmp.ne.s32.totalorder %s8822_s18, 0 }
  0xda   : > { %s5022_s29 = sshll.u32 %s434_s8, 10  ;;  %s435_s27 = scalar_lea.sflag [#allocation5], %s434_s8 }
  0xdb   : > { %s6432_s25 = scalar_lea.vmem [#allocation4], %s5022_s29 }
  0xdc   : > { %6076 = dma.done.wait (%p8841_p10), %s435_s27, 16384  }
  0xdd   : > { %6078 = vsyncadd (%p8841_p10), %s435_s27, 4294950912  ;;  %s443_s24 = sand.u32 1, %s6194_s17   ;;  %s6439_s28 = scalar_lea.vmem [#allocation6], %s5022_s29 }
  0xde   : > { %s444_s22 = scalar_lea.sflag [#allocation7], %s443_s24 }
  0xdf   : > { %6080 = dma.done.wait (%p8841_p10), %s444_s22, 16512  }
  0xe0   : > { %6082 = vsyncadd (%p8841_p10), %s444_s22, 4294950784  ;;  %s5024_s19 = sshll.u32 %s434_s8, 3  ;;  %p8842_p2 = scmp.eq.s32.totalorder %s6194_s17, 0 }
  0xe1   : > { %s6445_s10 = scalar_lea.vmem [#allocation8], %s5024_s19 }
  0xe2   : > { %6084 = dma.done.wait (%p8842_p2), [#allocation10], 4128   ;;  %p8843_p12 = pmov %p8842_p2 }
  0xe3   : > { %p8844_p0 = pmov %p8842_p2 }
  0xe4   : > { %6086 = vsyncadd (%p8843_p12), [#allocation10], 4294963168 }
  0xe5   : > { %6088 = dma.done.wait (%p8844_p0), [#allocation13], 2064   ;;  %p8845_p3 = pmov %p8844_p0 }
  0xe6   : > { %p524_p7 = scmp.lt.s32.totalorder %s6194_s17, 5  ;;  %s8846_s15 = sld [smem:[#allocation209_spill]] }
  0xe7   : > { %6090 = vsyncadd (%p8845_p3), [#allocation13], 4294965232  ;;  %p8847_p13 = scmp.ne.s32.totalorder %s6194_s17, 0 }
  0xe8   : > { %s525_s18 = scalar_select %p524_p7, %s6194_s17, 5 }
  0xe9   : > { %538 = sbr.rel (%p8847_p13) target bundleno = 245 (0xf5), region = 92  ;;  %s8848_s16 = sld [smem:[#allocation207_spill]] (!%p8847_p13) }
  0xea   : > { %s5401_s21 = sshll.u32 %s525_s18, 4 }
  0xeb   : > { %s6460_s23 = scalar_lea.vmem %s8524_s4, %s5401_s21 }
  0xec   : > { %s6465_s0 = scalar_lea.vmem %s8846_s15, %s5401_s21 }
  0xef   : > { %s8849_s11 = smov (!%p8847_p13), %s8848_s16  ;;  %v5521_v0 = vld [vmem:[%s8848_s16] ss:$8 sps:$4 sm:$0xff] (!%p8847_p13)  }
  0xf0   : > { %v5523_v1 = vld [vmem:[%s8849_s11 + $0x4] ss:$8 sps:$4 sm:$0xff]   ;;  %587 = vst [vmem:[#allocation2] sm:$0xff] %v5521_v0  ;;  %v5524_v2 = vld [vmem:[%s8849_s11 + $0x10] ss:$8 sps:$4 sm:$0xff]  }
  0xf1   : > { %v5526_v3 = vld [vmem:[%s8849_s11 + $0x14] ss:$8 sps:$4 sm:$0xff]   ;;  %588 = vst [vmem:[#allocation2 + $0x8] sm:$0xff] %v5523_v1  ;;  %v5527_v4 = vld [vmem:[%s8849_s11 + $0x20] ss:$8 sps:$4 sm:$0xff]   ;;  %589 = vst [vmem:[#allocation2 + $0x10] sm:$0xff] %v5524_v2 }
  0xf2   : > { %v5529_v5 = vld [vmem:[%s8849_s11 + $0x24] ss:$8 sps:$4 sm:$0xff]   ;;  %590 = vst [vmem:[#allocation2 + $0x18] sm:$0xff] %v5526_v3  ;;  %v5530_v6 = vld [vmem:[%s8849_s11 + $0x30] ss:$8 sps:$4 sm:$0xff]   ;;  %591 = vst [vmem:[#allocation2 + $0x20] sm:$0xff] %v5527_v4 }
  0xf3   : > { %592 = vst [vmem:[#allocation2 + $0x28] sm:$0xff] %v5529_v5  ;;  %v5532_v7 = vld [vmem:[%s8849_s11 + $0x34] ss:$8 sps:$4 sm:$0xff]   ;;  %593 = vst [vmem:[#allocation2 + $0x30] sm:$0xff] %v5530_v6 }
  0xf4   : > { %594 = vst [vmem:[#allocation2 + $0x38] sm:$0xff] %v5532_v7 }
  0xf5 PF: > { %v595_v8 = vld [vmem:[%s6432_s25] sm:$0xff]  ;;  %v596_v10 = vld [vmem:[%s6432_s25 + $0x8] sm:$0xff]  ;;  %p5346_p8 = scmp.ne.s32.totalorder %s6194_s17, 5 }
  0xf6   : > { %v599_v9 = vld [vmem:[%s6432_s25 + $0x20] sm:$0xff]  ;;  %v600_v12 = vld [vmem:[%s6432_s25 + $0x28] sm:$0xff] }
  0xf7   : > { %v5043_v11 = vcombine.high %v595_v8, %v599_v9  ;;  %v5042_v13 = vcombine.low %v595_v8, %v599_v9  ;;  %v603_v14 = vld [vmem:[%s6432_s25 + $0x40] sm:$0xff]  ;;  %v5045_v16 = vcombine.high %v596_v10, %v600_v12  ;;  %v5044_v17 = vcombine.low %v596_v10, %v600_v12  ;;  %v604_v19 = vld [vmem:[%s6432_s25 + $0x48] sm:$0xff] }
  0xf8   : > { %v607_v15 = vld [vmem:[%s6432_s25 + $0x60] sm:$0xff]  ;;  %v608_v20 = vld [vmem:[%s6432_s25 + $0x68] sm:$0xff] }
  0xf9   : > { %v5051_v18 = vcombine.high %v603_v14, %v607_v15  ;;  %v611_v21 = vld [vmem:[%s6432_s25 + $0x80] sm:$0xff]  ;;  %1541 = vmatprep.subr.bf16.mxu0 %v5043_v11  ;;  %v5053_v22 = vcombine.high %v604_v19, %v608_v20  ;;  %v612_v24 = vld [vmem:[%s6432_s25 + $0x88] sm:$0xff]  ;;  %1614 = vmatprep.subr.bf16.mxu1 %v5045_v16  ;;  %v5050_v26 = vcombine.low %v603_v14, %v607_v15 }
  0xfa   : > { %v615_v23 = vld [vmem:[%s6432_s25 + $0xa0] sm:$0xff]  ;;  %v616_v25 = vld [vmem:[%s6432_s25 + $0xa8] sm:$0xff]  ;;  %1542 = vmatpush1.bf16.msra.mxu0 %v5042_v13  ;;  %1615 = vmatpush1.bf16.msra.mxu1 %v5044_v17  ;;  %v5052_v27 = vcombine.low %v604_v19, %v608_v20 }
  0xfb   : > { %1543 = vmatprep.subr.bf16.mxu0 %v5051_v18  ;;  %v5059_v28 = vcombine.high %v611_v21, %v615_v23  ;;  %1616 = vmatprep.subr.bf16.mxu1 %v5053_v22  ;;  %v5061_v29 = vcombine.high %v612_v24, %v616_v25  ;;  %v619_v30 = vld [vmem:[%s6432_s25 + $0xc0] sm:$0xff]  ;;  %v620_v32 = vld [vmem:[%s6432_s25 + $0xc8] sm:$0xff]  ;;  %v5058_v34 = vcombine.low %v611_v21, %v615_v23 }
  0xfc   : > { %v623_v31 = vld [vmem:[%s6432_s25 + $0xe0] sm:$0xff]  ;;  %v624_v33 = vld [vmem:[%s6432_s25 + $0xe8] sm:$0xff]  ;;  %v5060_v35 = vcombine.low %v612_v24, %v616_v25 }
  0xfd   : > { %v5067_v36 = vcombine.high %v619_v30, %v623_v31  ;;  %v5069_v37 = vcombine.high %v620_v32, %v624_v33  ;;  %v627_v38 = vld [vmem:[%s6432_s25 + $0x100] sm:$0xff]  ;;  %v628_v40 = vld [vmem:[%s6432_s25 + $0x108] sm:$0xff]  ;;  %v5066_v42 = vcombine.low %v619_v30, %v623_v31  ;;  %v5068_v43 = vcombine.low %v620_v32, %v624_v33 }
  0xfe   : > { %1544 = vmatpush1.bf16.msra.mxu0 %v5050_v26  ;;  %1617 = vmatpush1.bf16.msra.mxu1 %v5052_v27  ;;  %v631_v39 = vld [vmem:[%s6432_s25 + $0x120] sm:$0xff]  ;;  %v632_v41 = vld [vmem:[%s6432_s25 + $0x128] sm:$0xff] }
  0xff   : > { %1545 = vmatprep.subr.bf16.mxu0 %v5059_v28  ;;  %1618 = vmatprep.subr.bf16.mxu1 %v5061_v29  ;;  %v5075_v44 = vcombine.high %v627_v38, %v631_v39  ;;  %v5077_v45 = vcombine.high %v628_v40, %v632_v41  ;;  %v635_v46 = vld [vmem:[%s6432_s25 + $0x140] sm:$0xff]  ;;  %v636_v48 = vld [vmem:[%s6432_s25 + $0x148] sm:$0xff]  ;;  %v5074_v50 = vcombine.low %v627_v38, %v631_v39 }
 0x100   : > { %v639_v47 = vld [vmem:[%s6432_s25 + $0x160] sm:$0xff]  ;;  %v640_v49 = vld [vmem:[%s6432_s25 + $0x168] sm:$0xff]  ;;  %v5076_v51 = vcombine.low %v628_v40, %v632_v41 }
 0x101   : > { %v5083_v52 = vcombine.high %v635_v46, %v639_v47  ;;  %v5085_v53 = vcombine.high %v636_v48, %v640_v49  ;;  %v643_v54 = vld [vmem:[%s6432_s25 + $0x180] sm:$0xff]  ;;  %v644_v56 = vld [vmem:[%s6432_s25 + $0x188] sm:$0xff]  ;;  %v5082_v58 = vcombine.low %v635_v46, %v639_v47  ;;  %v5084_v59 = vcombine.low %v636_v48, %v640_v49 }
 0x102   : > { %1546 = vmatpush1.bf16.msra.mxu0 %v5058_v34  ;;  %1619 = vmatpush1.bf16.msra.mxu1 %v5060_v35  ;;  %v647_v55 = vld [vmem:[%s6432_s25 + $0x1a0] sm:$0xff]  ;;  %v648_v57 = vld [vmem:[%s6432_s25 + $0x1a8] sm:$0xff] }
 0x103   : > { %1547 = vmatprep.subr.bf16.mxu0 %v5067_v36  ;;  %1620 = vmatprep.subr.bf16.mxu1 %v5069_v37  ;;  %v5091_v60 = vcombine.high %v643_v54, %v647_v55  ;;  %v6521_v61 = vld [vmem:[#allocation2 + $0x8] sm:$0xff]  ;;  %v5093_v62 = vcombine.high %v644_v56, %v648_v57  ;;  %v651_v63 = vld [vmem:[%s6432_s25 + $0x1c0] sm:$0xff]  ;;  %v5090_v3 = vcombine.low %v643_v54, %v647_v55 }
 0x104   : > { %v655_v0 = vld [vmem:[%s6432_s25 + $0x1e0] sm:$0xff]  ;;  %1573 = vmatprep.mubr.bf16.mxu0 %v6521_v61  ;;  %v652_v1 = vld [vmem:[%s6432_s25 + $0x1c8] sm:$0xff]  ;;  %1646 = vmatprep.mubr.bf16.mxu1 %v6521_v61  ;;  %v5092_v4 = vcombine.low %v644_v56, %v648_v57 }
 0x105   : > { %v656_v2 = vld [vmem:[%s6432_s25 + $0x1e8] sm:$0xff]  ;;  %v5099_v5 = vcombine.high %v651_v63, %v655_v0  ;;  %v659_v7 = vld [vmem:[%s6432_s25 + $0x200] sm:$0xff]  ;;  %v5098_v11 = vcombine.low %v651_v63, %v655_v0 }
 0x106   : > { %1548 = vmatpush1.bf16.msra.mxu0 %v5066_v42  ;;  %1621 = vmatpush1.bf16.msra.mxu1 %v5068_v43  ;;  %v5101_v6 = vcombine.high %v652_v1, %v656_v2  ;;  %v663_v8 = vld [vmem:[%s6432_s25 + $0x220] sm:$0xff]  ;;  %v660_v9 = vld [vmem:[%s6432_s25 + $0x208] sm:$0xff]  ;;  %v5100_v12 = vcombine.low %v652_v1, %v656_v2 }
 0x107   : > { %1549 = vmatprep.subr.bf16.mxu0 %v5075_v44  ;;  %1622 = vmatprep.subr.bf16.mxu1 %v5077_v45  ;;  %v664_v10 = vld [vmem:[%s6432_s25 + $0x228] sm:$0xff]  ;;  %v5107_v13 = vcombine.high %v659_v7, %v663_v8  ;;  %v667_v15 = vld [vmem:[%s6432_s25 + $0x240] sm:$0xff]  ;;  %v5106_v19 = vcombine.low %v659_v7, %v663_v8  ;;  %v597_v8 = vld [vmem:[%s6432_s25 + $0x10] sm:$0xff] }
 0x108   : > { %v5109_v14 = vcombine.high %v660_v9, %v664_v10  ;;  %v671_v16 = vld [vmem:[%s6432_s25 + $0x260] sm:$0xff]  ;;  %v668_v17 = vld [vmem:[%s6432_s25 + $0x248] sm:$0xff]  ;;  %v5108_v20 = vcombine.low %v660_v9, %v664_v10  ;;  %v601_v9 = vld [vmem:[%s6432_s25 + $0x30] sm:$0xff] }
 0x109   : > { %v672_v18 = vld [vmem:[%s6432_s25 + $0x268] sm:$0xff]  ;;  %v5115_v21 = vcombine.high %v667_v15, %v671_v16  ;;  %v675_v23 = vld [vmem:[%s6432_s25 + $0x280] sm:$0xff]  ;;  %v5114_v27 = vcombine.low %v667_v15, %v671_v16  ;;  %v598_v10 = vld [vmem:[%s6432_s25 + $0x18] sm:$0xff] }
 0x10a   : > { %1550 = vmatpush1.bf16.msra.mxu0 %v5074_v50  ;;  %1623 = vmatpush1.bf16.msra.mxu1 %v5076_v51  ;;  %v5117_v22 = vcombine.high %v668_v17, %v672_v18  ;;  %v679_v24 = vld [vmem:[%s6432_s25 + $0x2a0] sm:$0xff]  ;;  %v676_v25 = vld [vmem:[%s6432_s25 + $0x288] sm:$0xff]  ;;  %v5116_v28 = vcombine.low %v668_v17, %v672_v18  ;;  %v605_v16 = vld [vmem:[%s6432_s25 + $0x50] sm:$0xff] }
 0x10b   : > { %1551 = vmatprep.subr.bf16.mxu0 %v5083_v52  ;;  %1624 = vmatprep.subr.bf16.mxu1 %v5085_v53  ;;  %v680_v26 = vld [vmem:[%s6432_s25 + $0x2a8] sm:$0xff]  ;;  %v5123_v29 = vcombine.high %v675_v23, %v679_v24  ;;  %v683_v31 = vld [vmem:[%s6432_s25 + $0x2c0] sm:$0xff]  ;;  %v5122_v35 = vcombine.low %v675_v23, %v679_v24  ;;  %v609_v17 = vld [vmem:[%s6432_s25 + $0x70] sm:$0xff] }
 0x10c   : > { %v5125_v30 = vcombine.high %v676_v25, %v680_v26  ;;  %v687_v32 = vld [vmem:[%s6432_s25 + $0x2e0] sm:$0xff]  ;;  %v684_v33 = vld [vmem:[%s6432_s25 + $0x2c8] sm:$0xff]  ;;  %v5124_v36 = vcombine.low %v676_v25, %v680_v26  ;;  %v606_v18 = vld [vmem:[%s6432_s25 + $0x58] sm:$0xff]  ;;  %v5055_v23 = vcombine.high %v605_v16, %v609_v17 }
 0x10d   : > { %v688_v34 = vld [vmem:[%s6432_s25 + $0x2e8] sm:$0xff]  ;;  %v5131_v37 = vcombine.high %v683_v31, %v687_v32  ;;  %v691_v39 = vld [vmem:[%s6432_s25 + $0x300] sm:$0xff]  ;;  %v5130_v43 = vcombine.low %v683_v31, %v687_v32  ;;  %v613_v25 = vld [vmem:[%s6432_s25 + $0x90] sm:$0xff] }
 0x10e   : > { %1552 = vmatpush1.bf16.msra.mxu0 %v5082_v58  ;;  %1625 = vmatpush1.bf16.msra.mxu1 %v5084_v59  ;;  %v5133_v38 = vcombine.high %v684_v33, %v688_v34  ;;  %v695_v40 = vld [vmem:[%s6432_s25 + $0x320] sm:$0xff]  ;;  %v692_v41 = vld [vmem:[%s6432_s25 + $0x308] sm:$0xff]  ;;  %v5132_v44 = vcombine.low %v684_v33, %v688_v34  ;;  %v617_v26 = vld [vmem:[%s6432_s25 + $0xb0] sm:$0xff] }
 0x10f   : > { %1553 = vmatprep.subr.bf16.mxu0 %v5091_v60  ;;  %1626 = vmatprep.subr.bf16.mxu1 %v5093_v62  ;;  %v696_v42 = vld [vmem:[%s6432_s25 + $0x328] sm:$0xff]  ;;  %v5139_v45 = vcombine.high %v691_v39, %v695_v40  ;;  %v699_v47 = vld [vmem:[%s6432_s25 + $0x340] sm:$0xff]  ;;  %v5138_v51 = vcombine.low %v691_v39, %v695_v40  ;;  %v5063_v32 = vcombine.high %v613_v25, %v617_v26  ;;  %v621_v34 = vld [vmem:[%s6432_s25 + $0xd0] sm:$0xff] }
 0x110   : > { %v5141_v46 = vcombine.high %v692_v41, %v696_v42  ;;  %v703_v48 = vld [vmem:[%s6432_s25 + $0x360] sm:$0xff]  ;;  %v700_v49 = vld [vmem:[%s6432_s25 + $0x348] sm:$0xff]  ;;  %v5140_v52 = vcombine.low %v692_v41, %v696_v42  ;;  %v6585_v39 = vld [vmem:[#allocation2 + $0x10] sm:$0xff] }
 0x111   : > { %v704_v50 = vld [vmem:[%s6432_s25 + $0x368] sm:$0xff]  ;;  %v5147_v53 = vcombine.high %v699_v47, %v703_v48  ;;  %v707_v55 = vld [vmem:[%s6432_s25 + $0x380] sm:$0xff]  ;;  %v5146_v59 = vcombine.low %v699_v47, %v703_v48 }
 0x112   : > { %1554 = vmatpush1.bf16.msra.mxu0 %v5090_v3  ;;  %1627 = vmatpush1.bf16.msra.mxu1 %v5092_v4  ;;  %v5149_v54 = vcombine.high %v700_v49, %v704_v50  ;;  %v711_v56 = vld [vmem:[%s6432_s25 + $0x3a0] sm:$0xff]  ;;  %v708_v57 = vld [vmem:[%s6432_s25 + $0x388] sm:$0xff]  ;;  %v5148_v60 = vcombine.low %v700_v49, %v704_v50 }
 0x113   : > { %1555 = vmatprep.subr.bf16.mxu0 %v5099_v5  ;;  %1628 = vmatprep.subr.bf16.mxu1 %v5101_v6  ;;  %v712_v58 = vld [vmem:[%s6432_s25 + $0x3a8] sm:$0xff]  ;;  %v5155_v62 = vcombine.high %v707_v55, %v711_v56  ;;  %v715_v0 = vld [vmem:[%s6432_s25 + $0x3c0] sm:$0xff]  ;;  %v5154_v4 = vcombine.low %v707_v55, %v711_v56  ;;  %v642_v55 = vld [vmem:[%s6432_s25 + $0x178] sm:$0xff] }
 0x114   : > { %v5157_v63 = vcombine.high %v708_v57, %v712_v58  ;;  %v719_v1 = vld [vmem:[%s6432_s25 + $0x3e0] sm:$0xff]  ;;  %v716_v2 = vld [vmem:[%s6432_s25 + $0x3c8] sm:$0xff]  ;;  %v5156_v5 = vcombine.low %v708_v57, %v712_v58 }
 0x115   : > { %v720_v3 = vld [vmem:[%s6432_s25 + $0x3e8] sm:$0xff]  ;;  %v5163_v6 = vcombine.high %v715_v0, %v719_v1  ;;  %v6601_v57 = vld [vmem:[#allocation2 + $0x20] sm:$0xff] }
 0x116   : > { %1556 = vmatpush1.bf16.msra.mxu0 %v5098_v11  ;;  %1629 = vmatpush1.bf16.msra.mxu1 %v5100_v12  ;;  %v5165_v7 = vcombine.high %v716_v2, %v720_v3  ;;  %v602_v11 = vld [vmem:[%s6432_s25 + $0x38] sm:$0xff]  ;;  %v5162_v12 = vcombine.low %v715_v0, %v719_v1  ;;  %v6592_v47 = vld [vmem:[#allocation2 + $0x28] sm:$0xff] }
 0x117   : > { %1557 = vmatprep.subr.bf16.mxu0 %v5107_v13  ;;  %1630 = vmatprep.subr.bf16.mxu1 %v5109_v14  ;;  %v5164_v13 = vcombine.low %v716_v2, %v720_v3  ;;  %v5047_v14 = vcombine.high %v597_v8, %v601_v9  ;;  %v5049_v15 = vcombine.high %v598_v10, %v602_v11  ;;  %v646_v0 = vld [vmem:[%s6432_s25 + $0x198] sm:$0xff] }
 0x118   : > { %v650_v1 = vld [vmem:[%s6432_s25 + $0x1b8] sm:$0xff] }
 0x119   : > { %v6608_v2 = vld [vmem:[#allocation2 + $0x38] sm:$0xff] }
 0x11a   : > { %1558 = vmatpush1.bf16.msra.mxu0 %v5106_v19  ;;  %1631 = vmatpush1.bf16.msra.mxu1 %v5108_v20  ;;  %v610_v19 = vld [vmem:[%s6432_s25 + $0x78] sm:$0xff]  ;;  %v6569_v20 = vld [vmem:[#allocation2] sm:$0xff] }
 0x11b   : > { %1559 = vmatprep.subr.bf16.mxu0 %v5115_v21  ;;  %1632 = vmatprep.subr.bf16.mxu1 %v5117_v22  ;;  %v5046_v21 = vcombine.low %v597_v8, %v601_v9  ;;  %v5048_v22 = vcombine.low %v598_v10, %v602_v11  ;;  %v5057_v24 = vcombine.high %v606_v18, %v610_v19  ;;  %v657_v8 = vld [vmem:[%s6432_s25 + $0x1f0] sm:$0xff]  ;;  %v654_v9 = vld [vmem:[%s6432_s25 + $0x1d8] sm:$0xff] }
 0x11c   : > { %v5056_v31 = vcombine.low %v606_v18, %v610_v19  ;;  %v658_v10 = vld [vmem:[%s6432_s25 + $0x1f8] sm:$0xff] }
 0x11d   : > { %v662_v18 = vld [vmem:[%s6432_s25 + $0x218] sm:$0xff] }
 0x11e   : > { %1560 = vmatpush1.bf16.msra.mxu0 %v5114_v27  ;;  %1633 = vmatpush1.bf16.msra.mxu1 %v5116_v28  ;;  %v614_v27 = vld [vmem:[%s6432_s25 + $0x98] sm:$0xff] }
 0x11f   : > { %1561 = vmatprep.subr.bf16.mxu0 %v5123_v29  ;;  %1634 = vmatprep.subr.bf16.mxu1 %v5125_v30  ;;  %v618_v28 = vld [vmem:[%s6432_s25 + $0xb8] sm:$0xff]  ;;  %v5054_v30 = vcombine.low %v605_v16, %v609_v17  ;;  %v661_v16 = vld [vmem:[%s6432_s25 + $0x210] sm:$0xff] }
 0x120   : > { %v6576_v29 = vld [vmem:[#allocation2 + $0x18] sm:$0xff]  ;;  %v5065_v33 = vcombine.high %v614_v27, %v618_v28  ;;  %v5064_v40 = vcombine.low %v614_v27, %v618_v28  ;;  %v665_v17 = vld [vmem:[%s6432_s25 + $0x230] sm:$0xff] }
 0x121   : > { %v666_v19 = vld [vmem:[%s6432_s25 + $0x238] sm:$0xff] }
 0x122   : > { %1562 = vmatpush1.bf16.msra.mxu0 %v5122_v35  ;;  %1635 = vmatpush1.bf16.msra.mxu1 %v5124_v36  ;;  %v625_v35 = vld [vmem:[%s6432_s25 + $0xf0] sm:$0xff]  ;;  %v622_v36 = vld [vmem:[%s6432_s25 + $0xd8] sm:$0xff] }
 0x123   : > { %1563 = vmatprep.subr.bf16.mxu0 %v5131_v37  ;;  %1636 = vmatprep.subr.bf16.mxu1 %v5133_v38  ;;  %v626_v37 = vld [vmem:[%s6432_s25 + $0xf8] sm:$0xff]  ;;  %v5062_v38 = vcombine.low %v613_v25, %v617_v26  ;;  %v5071_v41 = vcombine.high %v621_v34, %v625_v35  ;;  %v5070_v48 = vcombine.low %v621_v34, %v625_v35  ;;  %v669_v25 = vld [vmem:[%s6432_s25 + $0x250] sm:$0xff] }
 0x124   : > { %v5073_v42 = vcombine.high %v622_v36, %v626_v37  ;;  %v5072_v49 = vcombine.low %v622_v36, %v626_v37  ;;  %v673_v26 = vld [vmem:[%s6432_s25 + $0x270] sm:$0xff]  ;;  %v670_v27 = vld [vmem:[%s6432_s25 + $0x258] sm:$0xff] }
 0x125   : > { %v674_v28 = vld [vmem:[%s6432_s25 + $0x278] sm:$0xff]  ;;  %v677_v34 = vld [vmem:[%s6432_s25 + $0x290] sm:$0xff] }
 0x126   : > { %1564 = vmatpush1.bf16.msra.mxu0 %v5130_v43  ;;  %1637 = vmatpush1.bf16.msra.mxu1 %v5132_v44  ;;  %v629_v43 = vld [vmem:[%s6432_s25 + $0x110] sm:$0xff]  ;;  %v678_v36 = vld [vmem:[%s6432_s25 + $0x298] sm:$0xff] }
 0x127   : > { %1565 = vmatprep.subr.bf16.mxu0 %v5139_v45  ;;  %1638 = vmatprep.subr.bf16.mxu1 %v5141_v46  ;;  %v633_v44 = vld [vmem:[%s6432_s25 + $0x130] sm:$0xff]  ;;  %v630_v45 = vld [vmem:[%s6432_s25 + $0x118] sm:$0xff] }
 0x128   : > { %v634_v46 = vld [vmem:[%s6432_s25 + $0x138] sm:$0xff]  ;;  %v5079_v50 = vcombine.high %v629_v43, %v633_v44  ;;  %v5078_v56 = vcombine.low %v629_v43, %v633_v44  ;;  %v681_v35 = vld [vmem:[%s6432_s25 + $0x2b0] sm:$0xff] }
 0x129   : > { %v5080_v58 = vcombine.low %v630_v45, %v634_v46  ;;  %v682_v37 = vld [vmem:[%s6432_s25 + $0x2b8] sm:$0xff]  ;;  %v689_v43 = vld [vmem:[%s6432_s25 + $0x2f0] sm:$0xff] }
 0x12a   : > { %1566 = vmatpush1.bf16.msra.mxu0 %v5138_v51  ;;  %1639 = vmatpush1.bf16.msra.mxu1 %v5140_v52  ;;  %v5081_v51 = vcombine.high %v630_v45, %v634_v46  ;;  %v637_v52 = vld [vmem:[%s6432_s25 + $0x150] sm:$0xff]  ;;  %v686_v44 = vld [vmem:[%s6432_s25 + $0x2d8] sm:$0xff]  ;;  %v5126_v46 = vcombine.low %v677_v34, %v681_v35 }
 0x12b   : > { %1567 = vmatprep.subr.bf16.mxu0 %v5147_v53  ;;  %1640 = vmatprep.subr.bf16.mxu1 %v5149_v54  ;;  %v641_v53 = vld [vmem:[%s6432_s25 + $0x170] sm:$0xff]  ;;  %v638_v54 = vld [vmem:[%s6432_s25 + $0x158] sm:$0xff] }
 0x12c   : > { %v5086_v3 = vcombine.low %v637_v52, %v641_v53  ;;  %v690_v45 = vld [vmem:[%s6432_s25 + $0x2f8] sm:$0xff] }
 0x12e   : > { %1568 = vmatpush1.bf16.msra.mxu0 %v5146_v59  ;;  %1641 = vmatpush1.bf16.msra.mxu1 %v5148_v60  ;;  %v5087_v59 = vcombine.high %v637_v52, %v641_v53  ;;  %v5089_v60 = vcombine.high %v638_v54, %v642_v55  ;;  %v697_v52 = vld [vmem:[%s6432_s25 + $0x330] sm:$0xff]  ;;  %v694_v53 = vld [vmem:[%s6432_s25 + $0x318] sm:$0xff] }
 0x12f   : > { %1569 = vmatprep.subr.bf16.mxu0 %v5155_v62  ;;  %1642 = vmatprep.subr.bf16.mxu1 %v5157_v63  ;;  %v645_v62 = vld [vmem:[%s6432_s25 + $0x190] sm:$0xff] }
 0x130   : > { %v649_v63 = vld [vmem:[%s6432_s25 + $0x1b0] sm:$0xff] }
 0x131   : > { %v5094_v11 = vcombine.low %v645_v62, %v649_v63 }
 0x132   : > { %1570 = vmatpush1.bf16.msra.mxu0 %v5154_v4  ;;  %1643 = vmatpush1.bf16.msra.mxu1 %v5156_v5  ;;  %v5088_v4 = vcombine.low %v638_v54, %v642_v55  ;;  %v5095_v5 = vcombine.high %v645_v62, %v649_v63  ;;  %v698_v54 = vld [vmem:[%s6432_s25 + $0x338] sm:$0xff]  ;;  %v705_v62 = vld [vmem:[%s6432_s25 + $0x370] sm:$0xff] }
 0x133   : > { %1571 = vmatprep.subr.bf16.mxu0 %v5163_v6  ;;  %1644 = vmatprep.subr.bf16.mxu1 %v5165_v7  ;;  %v5097_v6 = vcombine.high %v646_v0, %v650_v1  ;;  %v653_v7 = vld [vmem:[%s6432_s25 + $0x1d0] sm:$0xff]  ;;  %v702_v63 = vld [vmem:[%s6432_s25 + $0x358] sm:$0xff] }
 0x136   : > { %1572 = vmatpush1.bf16.msra.mxu0 %v5162_v12  ;;  %1645 = vmatpush1.bf16.msra.mxu1 %v5164_v13  ;;  %v6617_v12 = vld [vmem:[#allocation2 + $0x30] sm:$0xff]  ;;  %v5096_v13 = vcombine.low %v646_v0, %v650_v1  ;;  %v706_v0 = vld [vmem:[%s6432_s25 + $0x378] sm:$0xff] }
 0x137   : > { %1687 = vmatprep.subr.bf16.mxu0 %v5047_v14  ;;  %1760 = vmatprep.subr.bf16.mxu1 %v5049_v15  ;;  %v5103_v14 = vcombine.high %v653_v7, %v657_v8  ;;  %v5105_v15 = vcombine.high %v654_v9, %v658_v10 }
 0x139   : > { %1574 = vmatmul.mubr.bf16.vlgmr.msra.gmra.mrb[0].mxu0 %v6569_v20  ;;  %1647 = vmatmul.mubr.bf16.vlgmr.msra.gmra.mrb[0].mxu1 %v6569_v20 }
 0x13a   : > { %1688 = vmatpush1.bf16.msra.mxu0 %v5046_v21  ;;  %1761 = vmatpush1.bf16.msra.mxu1 %v5048_v22  ;;  %v5102_v21 = vcombine.low %v653_v7, %v657_v8  ;;  %v5104_v22 = vcombine.low %v654_v9, %v658_v10  ;;  %v713_v7 = vld [vmem:[%s6432_s25 + $0x3b0] sm:$0xff]  ;;  %v710_v8 = vld [vmem:[%s6432_s25 + $0x398] sm:$0xff] }
 0x13b   : > { %1689 = vmatprep.subr.bf16.mxu0 %v5055_v23  ;;  %1762 = vmatprep.subr.bf16.mxu1 %v5057_v24  ;;  %v5111_v23 = vcombine.high %v661_v16, %v665_v17  ;;  %v5113_v24 = vcombine.high %v662_v18, %v666_v19  ;;  %v714_v9 = vld [vmem:[%s6432_s25 + $0x3b8] sm:$0xff] }
 0x13c   : > { %1583 = vmatprep.mubr.bf16.mxu0 %v6576_v29  ;;  %1656 = vmatprep.mubr.bf16.mxu1 %v6576_v29 }
 0x13e   : > { %1690 = vmatpush1.bf16.msra.mxu0 %v5054_v30  ;;  %1763 = vmatpush1.bf16.msra.mxu1 %v5056_v31  ;;  %v5110_v30 = vcombine.low %v661_v16, %v665_v17  ;;  %v5112_v31 = vcombine.low %v662_v18, %v666_v19  ;;  %v721_v16 = vld [vmem:[%s6432_s25 + $0x3f0] sm:$0xff]  ;;  %v718_v17 = vld [vmem:[%s6432_s25 + $0x3d8] sm:$0xff] }
 0x13f   : > { %1691 = vmatprep.subr.bf16.mxu0 %v5063_v32  ;;  %1764 = vmatprep.subr.bf16.mxu1 %v5065_v33  ;;  %v5119_v32 = vcombine.high %v669_v25, %v673_v26  ;;  %v5121_v33 = vcombine.high %v670_v27, %v674_v28  ;;  %v722_v18 = vld [vmem:[%s6432_s25 + $0x3f8] sm:$0xff] }
 0x141   : > { %1584 = vmatmul.mubr.bf16.gmra.mrb[4].mxu0 %v6585_v39  ;;  %1657 = vmatmul.mubr.bf16.gmra.mrb[4].mxu1 %v6585_v39 }
 0x142   : > { %1692 = vmatpush1.bf16.msra.mxu0 %v5062_v38  ;;  %1765 = vmatpush1.bf16.msra.mxu1 %v5064_v40  ;;  %v5118_v38 = vcombine.low %v669_v25, %v673_v26  ;;  %v5127_v40 = vcombine.high %v677_v34, %v681_v35  ;;  %v727_v25 = vld [vmem:[%s6439_s28 + $0x20] sm:$0xff]  ;;  %v724_v26 = vld [vmem:[%s6439_s28 + $0x8] sm:$0xff] }
 0x143   : > { %1693 = vmatprep.subr.bf16.mxu0 %v5071_v41  ;;  %1766 = vmatprep.subr.bf16.mxu1 %v5073_v42  ;;  %v5129_v41 = vcombine.high %v678_v36, %v682_v37  ;;  %v685_v42 = vld [vmem:[%s6432_s25 + $0x2d0] sm:$0xff]  ;;  %v735_v34 = vld [vmem:[%s6439_s28 + $0x60] sm:$0xff]  ;;  %v732_v35 = vld [vmem:[%s6439_s28 + $0x48] sm:$0xff] }
 0x144   : > { %1593 = vmatprep.mubr.bf16.mxu0 %v6592_v47  ;;  %1666 = vmatprep.mubr.bf16.mxu1 %v6592_v47  ;;  %v5134_v55 = vcombine.low %v685_v42, %v689_v43 }
 0x146   : > { %1694 = vmatpush1.bf16.msra.mxu0 %v5070_v48  ;;  %1767 = vmatpush1.bf16.msra.mxu1 %v5072_v49  ;;  %v5128_v48 = vcombine.low %v678_v36, %v682_v37  ;;  %v5135_v49 = vcombine.high %v685_v42, %v689_v43  ;;  %v736_v36 = vld [vmem:[%s6439_s28 + $0x68] sm:$0xff]  ;;  %v743_v42 = vld [vmem:[%s6439_s28 + $0xa0] sm:$0xff] }
 0x147   : > { %1695 = vmatprep.subr.bf16.mxu0 %v5079_v50  ;;  %1768 = vmatprep.subr.bf16.mxu1 %v5081_v51  ;;  %v5137_v50 = vcombine.high %v686_v44, %v690_v45  ;;  %v693_v51 = vld [vmem:[%s6432_s25 + $0x310] sm:$0xff]  ;;  %v740_v43 = vld [vmem:[%s6439_s28 + $0x88] sm:$0xff] }
 0x148   : > { %v5142_v1 = vcombine.low %v693_v51, %v697_v52 }
 0x149   : > { %1594 = vmatmul.mubr.bf16.gmra.mrb[8].mxu0 %v6601_v57  ;;  %1667 = vmatmul.mubr.bf16.gmra.mrb[8].mxu1 %v6601_v57 }
 0x14a   : > { %1696 = vmatpush1.bf16.msra.mxu0 %v5078_v56  ;;  %1769 = vmatpush1.bf16.msra.mxu1 %v5080_v58  ;;  %v5136_v56 = vcombine.low %v686_v44, %v690_v45  ;;  %v5143_v58 = vcombine.high %v693_v51, %v697_v52  ;;  %v744_v44 = vld [vmem:[%s6439_s28 + $0xa8] sm:$0xff] }
 0x14b   : > { %1697 = vmatprep.subr.bf16.mxu0 %v5087_v59  ;;  %1770 = vmatprep.subr.bf16.mxu1 %v5089_v60  ;;  %v5145_v59 = vcombine.high %v694_v53, %v698_v54  ;;  %v701_v60 = vld [vmem:[%s6432_s25 + $0x350] sm:$0xff]  ;;  %v748_v51 = vld [vmem:[%s6439_s28 + $0xc8] sm:$0xff] }
 0x14c   : > { %1603 = vmatprep.mubr.bf16.mxu0 %v6608_v2  ;;  %1676 = vmatprep.mubr.bf16.mxu1 %v6608_v2  ;;  %v5150_v10 = vcombine.low %v701_v60, %v705_v62  ;;  %v752_v52 = vld [vmem:[%s6439_s28 + $0xe8] sm:$0xff] }
 0x14e   : > { %1698 = vmatpush1.bf16.msra.mxu0 %v5086_v3  ;;  %1771 = vmatpush1.bf16.msra.mxu1 %v5088_v4  ;;  %v5144_v3 = vcombine.low %v694_v53, %v698_v54  ;;  %v5151_v4 = vcombine.high %v701_v60, %v705_v62  ;;  %v6706_v54 = vcombine.low %v740_v43, %v744_v44  ;;  %v760_v60 = vld [vmem:[%s6439_s28 + $0x128] sm:$0xff] }
 0x14f   : > { %1699 = vmatprep.subr.bf16.mxu0 %v5095_v5  ;;  %1772 = vmatprep.subr.bf16.mxu1 %v5097_v6  ;;  %v5153_v5 = vcombine.high %v702_v63, %v706_v0  ;;  %v709_v6 = vld [vmem:[%s6432_s25 + $0x390] sm:$0xff] }
 0x150   : > { %v5158_v19 = vcombine.low %v709_v6, %v713_v7  ;;  %8861 = vst [vmem:[#allocation33_spill] sm:$0xff] %v6706_v54 }
 0x151   : > { %1604 = vmatmul.mubr.bf16.gmra.mrb[12].mxu0 %v6617_v12  ;;  %1677 = vmatmul.mubr.bf16.gmra.mrb[12].mxu1 %v6617_v12 }
 0x152   : > { %1700 = vmatpush1.bf16.msra.mxu0 %v5094_v11  ;;  %1773 = vmatpush1.bf16.msra.mxu1 %v5096_v13  ;;  %v5152_v11 = vcombine.low %v702_v63, %v706_v0  ;;  %v5159_v13 = vcombine.high %v709_v6, %v713_v7  ;;  %v6724_v63 = vcombine.low %v748_v51, %v752_v52 }
 0x153   : > { %1701 = vmatprep.subr.bf16.mxu0 %v5103_v14  ;;  %1774 = vmatprep.subr.bf16.mxu1 %v5105_v15  ;;  %v5161_v14 = vcombine.high %v710_v8, %v714_v9  ;;  %v717_v15 = vld [vmem:[%s6432_s25 + $0x3d0] sm:$0xff] }
 0x154   : > { %1719 = vmatprep.mubr.bf16.mxu0 %v6521_v61  ;;  %1792 = vmatprep.mubr.bf16.mxu1 %v6521_v61  ;;  %v5120_v61 = vcombine.low %v670_v27, %v674_v28  ;;  %v728_v27 = vld [vmem:[%s6439_s28 + $0x28] sm:$0xff]  ;;  %v5166_v28 = vcombine.low %v717_v15, %v721_v16  ;;  %8865 = vst [vmem:[#allocation37_spill] sm:$0xff] %v6724_v63 }
 0x156   : > { %1702 = vmatpush1.bf16.msra.mxu0 %v5102_v21  ;;  %1775 = vmatpush1.bf16.msra.mxu1 %v5104_v22  ;;  %v5160_v21 = vcombine.low %v710_v8, %v714_v9  ;;  %v5167_v22 = vcombine.high %v717_v15, %v721_v16 }
 0x157   : > { %1703 = vmatprep.subr.bf16.mxu0 %v5111_v23  ;;  %1776 = vmatprep.subr.bf16.mxu1 %v5113_v24  ;;  %v5169_v23 = vcombine.high %v718_v17, %v722_v18  ;;  %v723_v24 = vld [vmem:[%s6439_s28] sm:$0xff] }
 0x158   : > { %v6667_v37 = vcombine.low %v723_v24, %v727_v25 }
 0x15a   : > { %1704 = vmatpush1.bf16.msra.mxu0 %v5110_v30  ;;  %1777 = vmatpush1.bf16.msra.mxu1 %v5112_v31  ;;  %v5168_v30 = vcombine.low %v718_v17, %v722_v18  ;;  %v6659_v31 = vcombine.high %v723_v24, %v727_v25  ;;  %8852 = vst [vmem:[#allocation24_spill] sm:$0xff] %v6667_v37  ;;  %v779_v18 = vld [vmem:[%s6439_s28 + $0x1c0] sm:$0xff] }
 0x15b   : > { %1705 = vmatprep.subr.bf16.mxu0 %v5119_v32  ;;  %1778 = vmatprep.subr.bf16.mxu1 %v5121_v33  ;;  %v6661_v32 = vcombine.high %v724_v26, %v728_v27  ;;  %v731_v33 = vld [vmem:[%s6439_s28 + $0x40] sm:$0xff] }
 0x15c   : > { %8850 = vst [vmem:[#allocation22_spill] sm:$0xff] %v6659_v31  ;;  %v6684_v45 = vcombine.low %v731_v33, %v735_v34 }
 0x15d   : > { %8851 = vst [vmem:[#allocation23_spill] sm:$0xff] %v6661_v32 }
 0x15e   : > { %1706 = vmatpush1.bf16.msra.mxu0 %v5118_v38  ;;  %1779 = vmatpush1.bf16.msra.mxu1 %v5120_v61  ;;  %v6670_v38 = vcombine.low %v724_v26, %v728_v27  ;;  %v6672_v61 = vcombine.high %v731_v33, %v735_v34  ;;  %8856 = vst [vmem:[#allocation28_spill] sm:$0xff] %v6684_v45  ;;  %v787_v27 = vld [vmem:[%s6439_s28 + $0x200] sm:$0xff]  ;;  %v792_v33 = vld [vmem:[%s6439_s28 + $0x228] sm:$0xff] }
 0x15f   : > { %1707 = vmatprep.subr.bf16.mxu0 %v5127_v40  ;;  %1780 = vmatprep.subr.bf16.mxu1 %v5129_v41  ;;  %v6675_v40 = vcombine.high %v732_v35, %v736_v36  ;;  %v739_v41 = vld [vmem:[%s6439_s28 + $0x80] sm:$0xff] }
 0x160   : > { %8853 = vst [vmem:[#allocation25_spill] sm:$0xff] %v6670_v38  ;;  %8854 = vst [vmem:[#allocation26_spill] sm:$0xff] %v6672_v61  ;;  %v6702_v53 = vcombine.low %v739_v41, %v743_v42 }
 0x161   : > { %8855 = vst [vmem:[#allocation27_spill] sm:$0xff] %v6675_v40 }
 0x162   : > { %1708 = vmatpush1.bf16.msra.mxu0 %v5126_v46  ;;  %1781 = vmatpush1.bf16.msra.mxu1 %v5128_v48  ;;  %v6688_v46 = vcombine.low %v732_v35, %v736_v36  ;;  %v6690_v48 = vcombine.high %v739_v41, %v743_v42  ;;  %8860 = vst [vmem:[#allocation32_spill] sm:$0xff] %v6702_v53  ;;  %v795_v42 = vld [vmem:[%s6439_s28 + $0x240] sm:$0xff] }
 0x163   : > { %1709 = vmatprep.subr.bf16.mxu0 %v5135_v49  ;;  %1782 = vmatprep.subr.bf16.mxu1 %v5137_v50  ;;  %v6693_v49 = vcombine.high %v740_v43, %v744_v44  ;;  %v747_v50 = vld [vmem:[%s6439_s28 + $0xc0] sm:$0xff]  ;;  %v800_v44 = vld [vmem:[%s6439_s28 + $0x268] sm:$0xff] }
 0x164   : > { %8857 = vst [vmem:[#allocation29_spill] sm:$0xff] %v6688_v46  ;;  %8858 = vst [vmem:[#allocation30_spill] sm:$0xff] %v6690_v48  ;;  %v799_v43 = vld [vmem:[%s6439_s28 + $0x260] sm:$0xff] }
 0x165   : > { %8859 = vst [vmem:[#allocation31_spill] sm:$0xff] %v6693_v49 }
 0x166   : > { %1710 = vmatpush1.bf16.msra.mxu0 %v5134_v55  ;;  %1783 = vmatpush1.bf16.msra.mxu1 %v5136_v56  ;;  %v6711_v56 = vcombine.high %v748_v51, %v752_v52  ;;  %v6819_v51 = vcombine.high %v795_v42, %v799_v43 }
 0x167   : > { %1711 = vmatprep.subr.bf16.mxu0 %v5143_v58  ;;  %1784 = vmatprep.subr.bf16.mxu1 %v5145_v59  ;;  %v755_v58 = vld [vmem:[%s6439_s28 + $0x100] sm:$0xff]  ;;  %v756_v59 = vld [vmem:[%s6439_s28 + $0x108] sm:$0xff] }
 0x168   : > { %8863 = vst [vmem:[#allocation35_spill] sm:$0xff] %v6711_v56  ;;  %v6742_v7 = vcombine.low %v756_v59, %v760_v60  ;;  %8886 = vst [vmem:[#allocation58_spill] sm:$0xff] %v6819_v51 }
 0x16a   : > { %1712 = vmatpush1.bf16.msra.mxu0 %v5142_v1  ;;  %1785 = vmatpush1.bf16.msra.mxu1 %v5144_v3  ;;  %v6729_v1 = vcombine.high %v756_v59, %v760_v60  ;;  %v763_v3 = vld [vmem:[%s6439_s28 + $0x140] sm:$0xff]  ;;  %8869 = vst [vmem:[#allocation41_spill] sm:$0xff] %v6742_v7  ;;  %v804_v59 = vld [vmem:[%s6439_s28 + $0x288] sm:$0xff] }
 0x16b   : > { %1713 = vmatprep.subr.bf16.mxu0 %v5151_v4  ;;  %1786 = vmatprep.subr.bf16.mxu1 %v5153_v5  ;;  %v767_v4 = vld [vmem:[%s6439_s28 + $0x160] sm:$0xff]  ;;  %v768_v5 = vld [vmem:[%s6439_s28 + $0x168] sm:$0xff] }
 0x16c   : > { %8867 = vst [vmem:[#allocation39_spill] sm:$0xff] %v6729_v1  ;;  %v6744_v8 = vcombine.high %v763_v3, %v767_v4  ;;  %v808_v60 = vld [vmem:[%s6439_s28 + $0x2a8] sm:$0xff] }
 0x16e   : > { %1714 = vmatpush1.bf16.msra.mxu0 %v5150_v10  ;;  %1787 = vmatpush1.bf16.msra.mxu1 %v5152_v11  ;;  %8870 = vst [vmem:[#allocation42_spill] sm:$0xff] %v6744_v8  ;;  %v771_v10 = vld [vmem:[%s6439_s28 + $0x180] sm:$0xff]  ;;  %v772_v11 = vld [vmem:[%s6439_s28 + $0x188] sm:$0xff] }
 0x16f   : > { %1715 = vmatprep.subr.bf16.mxu0 %v5159_v13  ;;  %1788 = vmatprep.subr.bf16.mxu1 %v5161_v14  ;;  %v776_v13 = vld [vmem:[%s6439_s28 + $0x1a8] sm:$0xff]  ;;  %v6755_v14 = vcombine.low %v763_v3, %v767_v4  ;;  %v6829_v3 = vcombine.low %v795_v42, %v799_v43 }
 0x170   : > { %v6765_v17 = vcombine.high %v772_v11, %v776_v13  ;;  %v6779_v24 = vcombine.low %v772_v11, %v776_v13  ;;  %v812_v11 = vld [vmem:[%s6439_s28 + $0x2c8] sm:$0xff] }
 0x171   : > { %8872 = vst [vmem:[#allocation44_spill] sm:$0xff] %v6755_v14  ;;  %8888 = vst [vmem:[#allocation60_spill] sm:$0xff] %v6829_v3  ;;  %v816_v13 = vld [vmem:[%s6439_s28 + $0x2e8] sm:$0xff] }
 0x172   : > { %1716 = vmatpush1.bf16.msra.mxu0 %v5158_v19  ;;  %1789 = vmatpush1.bf16.msra.mxu1 %v5160_v21  ;;  %8875 = vst [vmem:[#allocation47_spill] sm:$0xff] %v6765_v17  ;;  %v783_v19 = vld [vmem:[%s6439_s28 + $0x1e0] sm:$0xff]  ;;  %v784_v21 = vld [vmem:[%s6439_s28 + $0x1e8] sm:$0xff]  ;;  %8877 = vst [vmem:[#allocation49_spill] sm:$0xff] %v6779_v24  ;;  %v6865_v42 = vcombine.low %v812_v11, %v816_v13 }
 0x173   : > { %1717 = vmatprep.subr.bf16.mxu0 %v5167_v22  ;;  %1790 = vmatprep.subr.bf16.mxu1 %v5169_v23  ;;  %v1898_v22 = vld [vmem:[%s6460_s23 + $0x8] sm:$0xff]  ;;  %v6781_v25 = vcombine.high %v779_v18, %v783_v19  ;;  %v6794_v34 = vcombine.low %v779_v18, %v783_v19  ;;  %v6849_v19 = vcombine.low %v804_v59, %v808_v60 }
 0x174   : > { %8897 = vst [vmem:[#allocation69_spill] sm:$0xff] %v6865_v42 }
 0x175   : > { %8878 = vst [vmem:[#allocation50_spill] sm:$0xff] %v6781_v25  ;;  %8880 = vst [vmem:[#allocation52_spill] sm:$0xff] %v6794_v34 }
 0x176   : > { %1718 = vmatpush1.bf16.msra.mxu0 %v5166_v28  ;;  %1791 = vmatpush1.bf16.msra.mxu1 %v5168_v30  ;;  %v6788_v28 = vpack.c.bf16 %v1898_v22, %v1898_v22  ;;  %v788_v30 = vld [vmem:[%s6439_s28 + $0x208] sm:$0xff]  ;;  %8893 = vst [vmem:[#allocation65_spill] sm:$0xff] %v6849_v19  ;;  %v819_v22 = vld [vmem:[%s6439_s28 + $0x300] sm:$0xff] }
 0x177   : > { %2551 = vmatprep.subr.bf16.mxu0 %v6659_v31  ;;  %2592 = vmatprep.subr.bf16.mxu1 %v6661_v32  ;;  %v6804_v41 = vcombine.high %v788_v30, %v792_v33 }
 0x179   : > { %1720 = vmatmul.mubr.bf16.vlgmr.msra.gmra.mrb[16].mxu0 %v6569_v20  ;;  %1793 = vmatmul.mubr.bf16.vlgmr.msra.gmra.mrb[16].mxu1 %v6569_v20  ;;  %v751_v20 = vld [vmem:[%s6439_s28 + $0xe0] sm:$0xff]  ;;  %8883 = vst [vmem:[#allocation55_spill] sm:$0xff] %v6804_v41 }
 0x17a   : > { %2552 = vmatpush1.bf16.msra.mxu0 %v6667_v37  ;;  %2593 = vmatpush1.bf16.msra.mxu1 %v6670_v38  ;;  %v6708_v55 = vcombine.high %v747_v50, %v751_v20  ;;  %v6719_v62 = vcombine.low %v747_v50, %v751_v20  ;;  %v6817_v20 = vcombine.low %v788_v30, %v792_v33  ;;  %v824_v30 = vld [vmem:[%s6439_s28 + $0x328] sm:$0xff] }
 0x17b   : > { %2553 = vmatprep.subr.bf16.mxu0 %v6672_v61  ;;  %2594 = vmatprep.subr.bf16.mxu1 %v6675_v40 }
 0x17c   : > { %1729 = vmatprep.mubr.bf16.mxu0 %v6576_v29  ;;  %1802 = vmatprep.mubr.bf16.mxu1 %v6576_v29  ;;  %8862 = vst [vmem:[#allocation34_spill] sm:$0xff] %v6708_v55  ;;  %v759_v29 = vld [vmem:[%s6439_s28 + $0x120] sm:$0xff]  ;;  %8864 = vst [vmem:[#allocation36_spill] sm:$0xff] %v6719_v62 }
 0x17d   : > { %v6726_v0 = vcombine.high %v755_v58, %v759_v29  ;;  %v6738_v6 = vcombine.low %v755_v58, %v759_v29  ;;  %8885 = vst [vmem:[#allocation57_spill] sm:$0xff] %v6817_v20  ;;  %v803_v58 = vld [vmem:[%s6439_s28 + $0x280] sm:$0xff] }
 0x17e   : > { %2554 = vmatpush1.bf16.msra.mxu0 %v6684_v45  ;;  %2595 = vmatpush1.bf16.msra.mxu1 %v6688_v46  ;;  %v807_v29 = vld [vmem:[%s6439_s28 + $0x2a0] sm:$0xff] }
 0x17f   : > { %2555 = vmatprep.subr.bf16.mxu0 %v6690_v48  ;;  %2596 = vmatprep.subr.bf16.mxu1 %v6693_v49  ;;  %8866 = vst [vmem:[#allocation38_spill] sm:$0xff] %v6726_v0  ;;  %8868 = vst [vmem:[#allocation40_spill] sm:$0xff] %v6738_v6  ;;  %v6845_v18 = vcombine.low %v803_v58, %v807_v29 }
 0x181   : > { %1730 = vmatmul.mubr.bf16.gmra.mrb[20].mxu0 %v6585_v39  ;;  %1803 = vmatmul.mubr.bf16.gmra.mrb[20].mxu1 %v6585_v39  ;;  %v764_v39 = vld [vmem:[%s6439_s28 + $0x148] sm:$0xff]  ;;  %8892 = vst [vmem:[#allocation64_spill] sm:$0xff] %v6845_v18 }
 0x182   : > { %2556 = vmatpush1.bf16.msra.mxu0 %v6702_v53  ;;  %2597 = vmatpush1.bf16.msra.mxu1 %v6706_v54  ;;  %v6747_v9 = vcombine.high %v764_v39, %v768_v5  ;;  %v6760_v15 = vcombine.low %v764_v39, %v768_v5  ;;  %v6835_v39 = vcombine.high %v803_v58, %v807_v29  ;;  %v831_v58 = vld [vmem:[%s6439_s28 + $0x360] sm:$0xff]  ;;  %v828_v29 = vld [vmem:[%s6439_s28 + $0x348] sm:$0xff] }
 0x183   : > { %2557 = vmatprep.subr.bf16.mxu0 %v6708_v55  ;;  %2598 = vmatprep.subr.bf16.mxu1 %v6711_v56  ;;  %v6838_v5 = vcombine.high %v804_v59, %v808_v60  ;;  %v832_v59 = vld [vmem:[%s6439_s28 + $0x368] sm:$0xff] }
 0x184   : > { %1739 = vmatprep.mubr.bf16.mxu0 %v6592_v47  ;;  %1812 = vmatprep.mubr.bf16.mxu1 %v6592_v47  ;;  %8871 = vst [vmem:[#allocation43_spill] sm:$0xff] %v6747_v9  ;;  %v775_v47 = vld [vmem:[%s6439_s28 + $0x1a0] sm:$0xff]  ;;  %8873 = vst [vmem:[#allocation45_spill] sm:$0xff] %v6760_v15 }
 0x185   : > { %v6762_v16 = vcombine.high %v771_v10, %v775_v47  ;;  %v6775_v23 = vcombine.low %v771_v10, %v775_v47  ;;  %8890 = vst [vmem:[#allocation62_spill] sm:$0xff] %v6835_v39  ;;  %8891 = vst [vmem:[#allocation63_spill] sm:$0xff] %v6838_v5  ;;  %v811_v10 = vld [vmem:[%s6439_s28 + $0x2c0] sm:$0xff] }
 0x186   : > { %2558 = vmatpush1.bf16.msra.mxu0 %v6719_v62  ;;  %2599 = vmatpush1.bf16.msra.mxu1 %v6724_v63  ;;  %v815_v47 = vld [vmem:[%s6439_s28 + $0x2e0] sm:$0xff] }
 0x187   : > { %2559 = vmatprep.subr.bf16.mxu0 %v6726_v0  ;;  %2600 = vmatprep.subr.bf16.mxu1 %v6729_v1  ;;  %8874 = vst [vmem:[#allocation46_spill] sm:$0xff] %v6762_v16  ;;  %8876 = vst [vmem:[#allocation48_spill] sm:$0xff] %v6775_v23  ;;  %v6861_v33 = vcombine.low %v811_v10, %v815_v47 }
 0x189   : > { %1740 = vmatmul.mubr.bf16.gmra.mrb[24].mxu0 %v6601_v57  ;;  %1813 = vmatmul.mubr.bf16.gmra.mrb[24].mxu1 %v6601_v57  ;;  %v780_v57 = vld [vmem:[%s6439_s28 + $0x1c8] sm:$0xff]  ;;  %8896 = vst [vmem:[#allocation68_spill] sm:$0xff] %v6861_v33 }
 0x18a   : > { %2560 = vmatpush1.bf16.msra.mxu0 %v6738_v6  ;;  %2601 = vmatpush1.bf16.msra.mxu1 %v6742_v7  ;;  %v6784_v26 = vcombine.high %v780_v57, %v784_v21  ;;  %v6799_v35 = vcombine.low %v780_v57, %v784_v21  ;;  %v6851_v57 = vcombine.high %v811_v10, %v815_v47 }
 0x18b   : > { %2561 = vmatprep.subr.bf16.mxu0 %v6744_v8  ;;  %2602 = vmatprep.subr.bf16.mxu1 %v6747_v9  ;;  %v6854_v21 = vcombine.high %v812_v11, %v816_v13  ;;  %v6886_v11 = vcombine.high %v828_v29, %v832_v59  ;;  %v835_v13 = vld [vmem:[%s6439_s28 + $0x380] sm:$0xff] }
 0x18c   : > { %1749 = vmatprep.mubr.bf16.mxu0 %v6608_v2  ;;  %1822 = vmatprep.mubr.bf16.mxu1 %v6608_v2  ;;  %8879 = vst [vmem:[#allocation51_spill] sm:$0xff] %v6784_v26  ;;  %v791_v2 = vld [vmem:[%s6439_s28 + $0x220] sm:$0xff]  ;;  %8881 = vst [vmem:[#allocation53_spill] sm:$0xff] %v6799_v35 }
 0x18d   : > { %v6801_v36 = vcombine.high %v787_v27, %v791_v2  ;;  %v6813_v50 = vcombine.low %v787_v27, %v791_v2  ;;  %8894 = vst [vmem:[#allocation66_spill] sm:$0xff] %v6851_v57  ;;  %8895 = vst [vmem:[#allocation67_spill] sm:$0xff] %v6854_v21  ;;  %v823_v27 = vld [vmem:[%s6439_s28 + $0x320] sm:$0xff]  ;;  %v820_v2 = vld [vmem:[%s6439_s28 + $0x308] sm:$0xff] }
 0x18e   : > { %2562 = vmatpush1.bf16.msra.mxu0 %v6755_v14  ;;  %2603 = vmatpush1.bf16.msra.mxu1 %v6760_v15  ;;  %v6867_v43 = vcombine.high %v819_v22, %v823_v27  ;;  %v6877_v60 = vcombine.low %v819_v22, %v823_v27  ;;  %v6881_v10 = vcombine.low %v820_v2, %v824_v30  ;;  %v836_v22 = vld [vmem:[%s6439_s28 + $0x388] sm:$0xff] }
 0x18f   : > { %2563 = vmatprep.subr.bf16.mxu0 %v6762_v16  ;;  %2604 = vmatprep.subr.bf16.mxu1 %v6765_v17  ;;  %8882 = vst [vmem:[#allocation54_spill] sm:$0xff] %v6801_v36  ;;  %8884 = vst [vmem:[#allocation56_spill] sm:$0xff] %v6813_v50  ;;  %v840_v27 = vld [vmem:[%s6439_s28 + $0x3a8] sm:$0xff] }
 0x190   : > { %8898 = vst [vmem:[#allocation70_spill] sm:$0xff] %v6867_v43  ;;  %8900 = vst [vmem:[#allocation72_spill] sm:$0xff] %v6877_v60 }
 0x191   : > { %1750 = vmatmul.mubr.bf16.gmra.mrb[28].mxu0 %v6617_v12  ;;  %1823 = vmatmul.mubr.bf16.gmra.mrb[28].mxu1 %v6617_v12  ;;  %v796_v12 = vld [vmem:[%s6439_s28 + $0x248] sm:$0xff]  ;;  %8901 = vst [vmem:[#allocation73_spill] sm:$0xff] %v6881_v10  ;;  %8903 = vst [vmem:[#allocation75_spill] sm:$0xff] %v6886_v11 }
 0x192   : > { %2564 = vmatpush1.bf16.msra.mxu0 %v6775_v23  ;;  %2605 = vmatpush1.bf16.msra.mxu1 %v6779_v24  ;;  %v6822_v52 = vcombine.high %v796_v12, %v800_v44  ;;  %v6833_v4 = vcombine.low %v796_v12, %v800_v44  ;;  %v6870_v12 = vcombine.high %v820_v2, %v824_v30  ;;  %v827_v44 = vld [vmem:[%s6439_s28 + $0x340] sm:$0xff] }
 0x193   : > { %2565 = vmatprep.subr.bf16.mxu0 %v6781_v25  ;;  %2606 = vmatprep.subr.bf16.mxu1 %v6784_v26  ;;  %v6883_v47 = vcombine.high %v827_v44, %v831_v58  ;;  %v6897_v2 = vcombine.low %v828_v29, %v832_v59  ;;  %v6913_v29 = vcombine.low %v836_v22, %v840_v27 }
 0x194   : > { %2583 = vmatprep.mubr.bf16.mxu0 %v6788_v28  ;;  %2624 = vmatprep.mubr.bf16.mxu1 %v6788_v28  ;;  %8887 = vst [vmem:[#allocation59_spill] sm:$0xff] %v6822_v52  ;;  %8889 = vst [vmem:[#allocation61_spill] sm:$0xff] %v6833_v4 }
 0x195   : > { %8899 = vst [vmem:[#allocation71_spill] sm:$0xff] %v6870_v12  ;;  %8902 = vst [vmem:[#allocation74_spill] sm:$0xff] %v6883_v47 }
 0x196   : > { %2566 = vmatpush1.bf16.msra.mxu0 %v6794_v34  ;;  %2607 = vmatpush1.bf16.msra.mxu1 %v6799_v35  ;;  %8905 = vst [vmem:[#allocation77_spill] sm:$0xff] %v6897_v2  ;;  %8909 = vst [vmem:[#allocation81_spill] sm:$0xff] %v6913_v29 }
 0x197   : > { %2567 = vmatprep.subr.bf16.mxu0 %v6801_v36  ;;  %2608 = vmatprep.subr.bf16.mxu1 %v6804_v41 }
 0x19a   : > { %2568 = vmatpush1.bf16.msra.mxu0 %v6813_v50  ;;  %2609 = vmatpush1.bf16.msra.mxu1 %v6817_v20 }
 0x19b   : > { %2569 = vmatprep.subr.bf16.mxu0 %v6819_v51  ;;  %2610 = vmatprep.subr.bf16.mxu1 %v6822_v52 }
 0x19e   : > { %2570 = vmatpush1.bf16.msra.mxu0 %v6829_v3  ;;  %2611 = vmatpush1.bf16.msra.mxu1 %v6833_v4 }
 0x19f   : > { %2571 = vmatprep.subr.bf16.mxu0 %v6835_v39  ;;  %2612 = vmatprep.subr.bf16.mxu1 %v6838_v5 }
 0x1a2   : > { %2572 = vmatpush1.bf16.msra.mxu0 %v6845_v18  ;;  %2613 = vmatpush1.bf16.msra.mxu1 %v6849_v19  ;;  %v850_v19 = vld [vmem:[%s6439_s28 + $0x3f8] sm:$0xff] }
 0x1a3   : > { %2573 = vmatprep.subr.bf16.mxu0 %v6851_v57  ;;  %2614 = vmatprep.subr.bf16.mxu1 %v6854_v21  ;;  %v729_v21 = vld [vmem:[%s6439_s28 + $0x30] sm:$0xff] }
 0x1a4   : > { %v745_v57 = vld [vmem:[%s6439_s28 + $0xb0] sm:$0xff] }
 0x1a6   : > { %2574 = vmatpush1.bf16.msra.mxu0 %v6861_v33  ;;  %2615 = vmatpush1.bf16.msra.mxu1 %v6865_v42  ;;  %v839_v33 = vld [vmem:[%s6439_s28 + $0x3a0] sm:$0xff]  ;;  %v6893_v42 = vcombine.low %v827_v44, %v831_v58  ;;  %v844_v44 = vld [vmem:[%s6439_s28 + $0x3c8] sm:$0xff] }
 0x1a7   : > { %2575 = vmatprep.subr.bf16.mxu0 %v6867_v43  ;;  %2616 = vmatprep.subr.bf16.mxu1 %v6870_v12  ;;  %v6899_v30 = vcombine.high %v835_v13, %v839_v33  ;;  %v6902_v12 = vcombine.high %v836_v22, %v840_v27  ;;  %v843_v43 = vld [vmem:[%s6439_s28 + $0x3c0] sm:$0xff]  ;;  %v848_v58 = vld [vmem:[%s6439_s28 + $0x3e8] sm:$0xff] }
 0x1a8   : > { %8904 = vst [vmem:[#allocation76_spill] sm:$0xff] %v6893_v42  ;;  %v1897_v22 = vld [vmem:[%s6460_s23] sm:$0xff]  ;;  %v6930_v27 = vcombine.low %v844_v44, %v848_v58 }
 0x1a9   : > { %8906 = vst [vmem:[#allocation78_spill] sm:$0xff] %v6899_v30  ;;  %8907 = vst [vmem:[#allocation79_spill] sm:$0xff] %v6902_v12 }
 0x1aa   : > { %2576 = vmatpush1.bf16.msra.mxu0 %v6877_v60  ;;  %2617 = vmatpush1.bf16.msra.mxu1 %v6881_v10  ;;  %v847_v60 = vld [vmem:[%s6439_s28 + $0x3e0] sm:$0xff]  ;;  %v725_v10 = vld [vmem:[%s6439_s28 + $0x10] sm:$0xff]  ;;  %8913 = vst [vmem:[#allocation85_spill] sm:$0xff] %v6930_v27 }
 0x1ab   : > { %2577 = vmatprep.subr.bf16.mxu0 %v6883_v47  ;;  %2618 = vmatprep.subr.bf16.mxu1 %v6886_v11  ;;  %v6909_v47 = vcombine.low %v835_v13, %v839_v33  ;;  %v6915_v59 = vcombine.high %v843_v43, %v847_v60  ;;  %v6918_v11 = vcombine.high %v844_v44, %v848_v58  ;;  %v726_v33 = vld [vmem:[%s6439_s28 + $0x18] sm:$0xff] }
 0x1ac   : > { %v730_v13 = vld [vmem:[%s6439_s28 + $0x38] sm:$0xff]  ;;  %v6944_v44 = vcombine.low %v725_v10, %v729_v21 }
 0x1ad   : > { %8908 = vst [vmem:[#allocation80_spill] sm:$0xff] %v6909_v47  ;;  %8910 = vst [vmem:[#allocation82_spill] sm:$0xff] %v6915_v59  ;;  %v6948_v58 = vcombine.low %v726_v33, %v730_v13 }
 0x1ae   : > { %2578 = vmatpush1.bf16.msra.mxu0 %v6893_v42  ;;  %2619 = vmatpush1.bf16.msra.mxu1 %v6897_v2  ;;  %8911 = vst [vmem:[#allocation83_spill] sm:$0xff] %v6918_v11  ;;  %v6925_v2 = vcombine.low %v843_v43, %v847_v60  ;;  %v733_v42 = vld [vmem:[%s6439_s28 + $0x50] sm:$0xff]  ;;  %v6939_v43 = vpack.c.bf16 %v1897_v22, %v1897_v22  ;;  %v734_v60 = vld [vmem:[%s6439_s28 + $0x58] sm:$0xff]  ;;  %8916 = vst [vmem:[#allocation88_spill] sm:$0xff] %v6944_v44 }
 0x1af   : > { %2579 = vmatprep.subr.bf16.mxu0 %v6899_v30  ;;  %2620 = vmatprep.subr.bf16.mxu1 %v6902_v12  ;;  %v6932_v12 = vcombine.high %v725_v10, %v729_v21  ;;  %v6935_v30 = vcombine.high %v726_v33, %v730_v13  ;;  %8917 = vst [vmem:[#allocation89_spill] sm:$0xff] %v6948_v58  ;;  %v741_v22 = vld [vmem:[%s6439_s28 + $0x90] sm:$0xff]  ;;  %v742_v21 = vld [vmem:[%s6439_s28 + $0x98] sm:$0xff] }
 0x1b0   : > { %8912 = vst [vmem:[#allocation84_spill] sm:$0xff] %v6925_v2  ;;  %v746_v10 = vld [vmem:[%s6439_s28 + $0xb8] sm:$0xff] }
 0x1b1   : > { %8914 = vst [vmem:[#allocation86_spill] sm:$0xff] %v6932_v12  ;;  %8915 = vst [vmem:[#allocation87_spill] sm:$0xff] %v6935_v30 }
 0x1b2   : > { %2580 = vmatpush1.bf16.msra.mxu0 %v6909_v47  ;;  %2621 = vmatpush1.bf16.msra.mxu1 %v6913_v29  ;;  %v737_v47 = vld [vmem:[%s6439_s28 + $0x70] sm:$0xff]  ;;  %v738_v29 = vld [vmem:[%s6439_s28 + $0x78] sm:$0xff] }
 0x1b3   : > { %2581 = vmatprep.subr.bf16.mxu0 %v6915_v59  ;;  %2622 = vmatprep.subr.bf16.mxu1 %v6918_v11  ;;  %v6950_v11 = vcombine.high %v733_v42, %v737_v47  ;;  %v6953_v59 = vcombine.high %v734_v60, %v738_v29  ;;  %v6962_v33 = vcombine.low %v733_v42, %v737_v47  ;;  %v750_v42 = vld [vmem:[%s6439_s28 + $0xd8] sm:$0xff] }
 0x1b4   : > { %v6966_v13 = vcombine.low %v734_v60, %v738_v29  ;;  %v754_v47 = vld [vmem:[%s6439_s28 + $0xf8] sm:$0xff]  ;;  %v6980_v29 = vcombine.low %v741_v22, %v745_v57  ;;  %v6984_v60 = vcombine.low %v742_v21, %v746_v10 }
 0x1b5   : > { %8918 = vst [vmem:[#allocation90_spill] sm:$0xff] %v6950_v11  ;;  %8919 = vst [vmem:[#allocation91_spill] sm:$0xff] %v6953_v59 }
 0x1b6   : > { %2582 = vmatpush1.bf16.msra.mxu0 %v6925_v2  ;;  %2623 = vmatpush1.bf16.msra.mxu1 %v6930_v27  ;;  %8920 = vst [vmem:[#allocation92_spill] sm:$0xff] %v6962_v33  ;;  %8921 = vst [vmem:[#allocation93_spill] sm:$0xff] %v6966_v13  ;;  %v749_v27 = vld [vmem:[%s6439_s28 + $0xd0] sm:$0xff] }
 0x1b7   : > { %2633 = vmatprep.subr.bf16.mxu0 %v6932_v12  ;;  %2674 = vmatprep.subr.bf16.mxu1 %v6935_v30  ;;  %v6968_v30 = vcombine.high %v741_v22, %v745_v57  ;;  %v6971_v12 = vcombine.high %v742_v21, %v746_v10  ;;  %v753_v2 = vld [vmem:[%s6439_s28 + $0xf0] sm:$0xff]  ;;  %8924 = vst [vmem:[#allocation96_spill] sm:$0xff] %v6980_v29  ;;  %8925 = vst [vmem:[#allocation97_spill] sm:$0xff] %v6984_v60  ;;  %v758_v57 = vld [vmem:[%s6439_s28 + $0x118] sm:$0xff] }
 0x1b8   : > { %v762_v22 = vld [vmem:[%s6439_s28 + $0x138] sm:$0xff]  ;;  %v7000_v21 = vcombine.low %v750_v42, %v754_v47 }
 0x1b9   : > { %2584 = vmatmul.mubr.bf16.vlgmr.msra.gmra.mrb[32].mxu0 %v6939_v43  ;;  %2625 = vmatmul.mubr.bf16.vlgmr.msra.gmra.mrb[32].mxu1 %v6939_v43  ;;  %8922 = vst [vmem:[#allocation94_spill] sm:$0xff] %v6968_v30  ;;  %8923 = vst [vmem:[#allocation95_spill] sm:$0xff] %v6971_v12 }
 0x1ba   : > { %2634 = vmatpush1.bf16.msra.mxu0 %v6944_v44  ;;  %2675 = vmatpush1.bf16.msra.mxu1 %v6948_v58  ;;  %8929 = vst [vmem:[#allocation101_spill] sm:$0xff] %v7000_v21  ;;  %v849_v58 = vld [vmem:[%s6439_s28 + $0x3f0] sm:$0xff]  ;;  %v846_v44 = vld [vmem:[%s6439_s28 + $0x3d8] sm:$0xff] }
 0x1bb   : > { %2635 = vmatprep.subr.bf16.mxu0 %v6950_v11  ;;  %2676 = vmatprep.subr.bf16.mxu1 %v6953_v59  ;;  %v6986_v59 = vcombine.high %v749_v27, %v753_v2  ;;  %v6989_v11 = vcombine.high %v750_v42, %v754_v47  ;;  %v7016_v42 = vcombine.low %v758_v57, %v762_v22 }
 0x1bc   : > { %2665 = vmatprep.mubr.bf16.mxu0 %v6788_v28  ;;  %2706 = vmatprep.mubr.bf16.mxu1 %v6788_v28  ;;  %v757_v28 = vld [vmem:[%s6439_s28 + $0x110] sm:$0xff] }
 0x1bd   : > { %8926 = vst [vmem:[#allocation98_spill] sm:$0xff] %v6986_v59  ;;  %8927 = vst [vmem:[#allocation99_spill] sm:$0xff] %v6989_v11 }
 0x1be   : > { %2636 = vmatpush1.bf16.msra.mxu0 %v6962_v33  ;;  %2677 = vmatpush1.bf16.msra.mxu1 %v6966_v13  ;;  %v761_v33 = vld [vmem:[%s6439_s28 + $0x130] sm:$0xff]  ;;  %v6996_v13 = vcombine.low %v749_v27, %v753_v2  ;;  %v766_v2 = vld [vmem:[%s6439_s28 + $0x158] sm:$0xff]  ;;  %8933 = vst [vmem:[#allocation105_spill] sm:$0xff] %v7016_v42 }
 0x1bf   : > { %2637 = vmatprep.subr.bf16.mxu0 %v6968_v30  ;;  %2678 = vmatprep.subr.bf16.mxu1 %v6971_v12  ;;  %v7002_v10 = vcombine.high %v757_v28, %v761_v33  ;;  %v7005_v12 = vcombine.high %v758_v57, %v762_v22  ;;  %v765_v30 = vld [vmem:[%s6439_s28 + $0x150] sm:$0xff]  ;;  %v770_v27 = vld [vmem:[%s6439_s28 + $0x178] sm:$0xff] }
 0x1c0   : > { %8928 = vst [vmem:[#allocation100_spill] sm:$0xff] %v6996_v13  ;;  %v7032_v57 = vcombine.low %v766_v2, %v770_v27 }
 0x1c1   : > { %8930 = vst [vmem:[#allocation102_spill] sm:$0xff] %v7002_v10  ;;  %8931 = vst [vmem:[#allocation103_spill] sm:$0xff] %v7005_v12 }
 0x1c2   : > { %2638 = vmatpush1.bf16.msra.mxu0 %v6980_v29  ;;  %2679 = vmatpush1.bf16.msra.mxu1 %v6984_v60  ;;  %v769_v29 = vld [vmem:[%s6439_s28 + $0x170] sm:$0xff]  ;;  %v7012_v60 = vcombine.low %v757_v28, %v761_v33  ;;  %v774_v33 = vld [vmem:[%s6439_s28 + $0x198] sm:$0xff]  ;;  %8937 = vst [vmem:[#allocation109_spill] sm:$0xff] %v7032_v57 }
 0x1c3   : > { %2639 = vmatprep.subr.bf16.mxu0 %v6986_v59  ;;  %2680 = vmatprep.subr.bf16.mxu1 %v6989_v11  ;;  %v7018_v47 = vcombine.high %v765_v30, %v769_v29  ;;  %v7021_v11 = vcombine.high %v766_v2, %v770_v27  ;;  %v773_v59 = vld [vmem:[%s6439_s28 + $0x190] sm:$0xff]  ;;  %v778_v28 = vld [vmem:[%s6439_s28 + $0x1b8] sm:$0xff] }
 0x1c4   : > { %8932 = vst [vmem:[#allocation104_spill] sm:$0xff] %v7012_v60  ;;  %v7048_v2 = vcombine.low %v774_v33, %v778_v28 }
 0x1c5   : > { %8934 = vst [vmem:[#allocation106_spill] sm:$0xff] %v7018_v47  ;;  %8935 = vst [vmem:[#allocation107_spill] sm:$0xff] %v7021_v11 }
 0x1c6   : > { %2640 = vmatpush1.bf16.msra.mxu0 %v6996_v13  ;;  %2681 = vmatpush1.bf16.msra.mxu1 %v7000_v21  ;;  %v777_v13 = vld [vmem:[%s6439_s28 + $0x1b0] sm:$0xff]  ;;  %v7028_v21 = vcombine.low %v765_v30, %v769_v29  ;;  %v782_v30 = vld [vmem:[%s6439_s28 + $0x1d8] sm:$0xff]  ;;  %8941 = vst [vmem:[#allocation113_spill] sm:$0xff] %v7048_v2 }
 0x1c7   : > { %2641 = vmatprep.subr.bf16.mxu0 %v7002_v10  ;;  %2682 = vmatprep.subr.bf16.mxu1 %v7005_v12  ;;  %v7034_v22 = vcombine.high %v773_v59, %v777_v13  ;;  %v7037_v12 = vcombine.high %v774_v33, %v778_v28  ;;  %v781_v10 = vld [vmem:[%s6439_s28 + $0x1d0] sm:$0xff]  ;;  %v786_v29 = vld [vmem:[%s6439_s28 + $0x1f8] sm:$0xff] }
 0x1c8   : > { %8936 = vst [vmem:[#allocation108_spill] sm:$0xff] %v7028_v21  ;;  %v7064_v33 = vcombine.low %v782_v30, %v786_v29 }
 0x1c9   : > { %8938 = vst [vmem:[#allocation110_spill] sm:$0xff] %v7034_v22  ;;  %8939 = vst [vmem:[#allocation111_spill] sm:$0xff] %v7037_v12 }
 0x1ca   : > { %2642 = vmatpush1.bf16.msra.mxu0 %v7012_v60  ;;  %2683 = vmatpush1.bf16.msra.mxu1 %v7016_v42  ;;  %v785_v60 = vld [vmem:[%s6439_s28 + $0x1f0] sm:$0xff]  ;;  %v7044_v42 = vcombine.low %v773_v59, %v777_v13  ;;  %v790_v59 = vld [vmem:[%s6439_s28 + $0x218] sm:$0xff]  ;;  %8945 = vst [vmem:[#allocation117_spill] sm:$0xff] %v7064_v33 }
 0x1cb   : > { %2643 = vmatprep.subr.bf16.mxu0 %v7018_v47  ;;  %2684 = vmatprep.subr.bf16.mxu1 %v7021_v11  ;;  %v7050_v27 = vcombine.high %v781_v10, %v785_v60  ;;  %v7053_v11 = vcombine.high %v782_v30, %v786_v29  ;;  %v789_v47 = vld [vmem:[%s6439_s28 + $0x210] sm:$0xff]  ;;  %v794_v13 = vld [vmem:[%s6439_s28 + $0x238] sm:$0xff] }
 0x1cc   : > { %8940 = vst [vmem:[#allocation112_spill] sm:$0xff] %v7044_v42  ;;  %v7080_v30 = vcombine.low %v790_v59, %v794_v13 }
 0x1cd   : > { %8942 = vst [vmem:[#allocation114_spill] sm:$0xff] %v7050_v27  ;;  %8943 = vst [vmem:[#allocation115_spill] sm:$0xff] %v7053_v11 }
 0x1ce   : > { %2644 = vmatpush1.bf16.msra.mxu0 %v7028_v21  ;;  %2685 = vmatpush1.bf16.msra.mxu1 %v7032_v57  ;;  %v793_v21 = vld [vmem:[%s6439_s28 + $0x230] sm:$0xff]  ;;  %v7060_v57 = vcombine.low %v781_v10, %v785_v60  ;;  %v798_v60 = vld [vmem:[%s6439_s28 + $0x258] sm:$0xff]  ;;  %8949 = vst [vmem:[#allocation121_spill] sm:$0xff] %v7080_v30 }
 0x1cf   : > { %2645 = vmatprep.subr.bf16.mxu0 %v7034_v22  ;;  %2686 = vmatprep.subr.bf16.mxu1 %v7037_v12  ;;  %v7066_v28 = vcombine.high %v789_v47, %v793_v21  ;;  %v7069_v12 = vcombine.high %v790_v59, %v794_v13  ;;  %v797_v22 = vld [vmem:[%s6439_s28 + $0x250] sm:$0xff]  ;;  %v802_v10 = vld [vmem:[%s6439_s28 + $0x278] sm:$0xff] }
 0x1d0   : > { %8944 = vst [vmem:[#allocation116_spill] sm:$0xff] %v7060_v57  ;;  %v7096_v59 = vcombine.low %v798_v60, %v802_v10 }
 0x1d1   : > { %8946 = vst [vmem:[#allocation118_spill] sm:$0xff] %v7066_v28  ;;  %8947 = vst [vmem:[#allocation119_spill] sm:$0xff] %v7069_v12 }
 0x1d2   : > { %2646 = vmatpush1.bf16.msra.mxu0 %v7044_v42  ;;  %2687 = vmatpush1.bf16.msra.mxu1 %v7048_v2  ;;  %v801_v42 = vld [vmem:[%s6439_s28 + $0x270] sm:$0xff]  ;;  %v7076_v2 = vcombine.low %v789_v47, %v793_v21  ;;  %v806_v21 = vld [vmem:[%s6439_s28 + $0x298] sm:$0xff]  ;;  %8953 = vst [vmem:[#allocation125_spill] sm:$0xff] %v7096_v59 }
 0x1d3   : > { %2647 = vmatprep.subr.bf16.mxu0 %v7050_v27  ;;  %2688 = vmatprep.subr.bf16.mxu1 %v7053_v11  ;;  %v7082_v29 = vcombine.high %v797_v22, %v801_v42  ;;  %v7085_v11 = vcombine.high %v798_v60, %v802_v10  ;;  %v805_v27 = vld [vmem:[%s6439_s28 + $0x290] sm:$0xff]  ;;  %v810_v47 = vld [vmem:[%s6439_s28 + $0x2b8] sm:$0xff] }
 0x1d4   : > { %8948 = vst [vmem:[#allocation120_spill] sm:$0xff] %v7076_v2  ;;  %v7112_v60 = vcombine.low %v806_v21, %v810_v47 }
 0x1d5   : > { %8950 = vst [vmem:[#allocation122_spill] sm:$0xff] %v7082_v29  ;;  %8951 = vst [vmem:[#allocation123_spill] sm:$0xff] %v7085_v11 }
 0x1d6   : > { %2648 = vmatpush1.bf16.msra.mxu0 %v7060_v57  ;;  %2689 = vmatpush1.bf16.msra.mxu1 %v7064_v33  ;;  %v809_v57 = vld [vmem:[%s6439_s28 + $0x2b0] sm:$0xff]  ;;  %v7092_v33 = vcombine.low %v797_v22, %v801_v42  ;;  %v814_v42 = vld [vmem:[%s6439_s28 + $0x2d8] sm:$0xff]  ;;  %8957 = vst [vmem:[#allocation129_spill] sm:$0xff] %v7112_v60 }
 0x1d7   : > { %2649 = vmatprep.subr.bf16.mxu0 %v7066_v28  ;;  %2690 = vmatprep.subr.bf16.mxu1 %v7069_v12  ;;  %v7098_v13 = vcombine.high %v805_v27, %v809_v57  ;;  %v7101_v12 = vcombine.high %v806_v21, %v810_v47  ;;  %v813_v28 = vld [vmem:[%s6439_s28 + $0x2d0] sm:$0xff]  ;;  %v818_v22 = vld [vmem:[%s6439_s28 + $0x2f8] sm:$0xff] }
 0x1d8   : > { %8952 = vst [vmem:[#allocation124_spill] sm:$0xff] %v7092_v33  ;;  %v7128_v21 = vcombine.low %v814_v42, %v818_v22 }
 0x1d9   : > { %8954 = vst [vmem:[#allocation126_spill] sm:$0xff] %v7098_v13  ;;  %8955 = vst [vmem:[#allocation127_spill] sm:$0xff] %v7101_v12 }
 0x1da   : > { %2650 = vmatpush1.bf16.msra.mxu0 %v7076_v2  ;;  %2691 = vmatpush1.bf16.msra.mxu1 %v7080_v30  ;;  %v817_v2 = vld [vmem:[%s6439_s28 + $0x2f0] sm:$0xff]  ;;  %v7108_v30 = vcombine.low %v805_v27, %v809_v57  ;;  %v822_v57 = vld [vmem:[%s6439_s28 + $0x318] sm:$0xff]  ;;  %8961 = vst [vmem:[#allocation133_spill] sm:$0xff] %v7128_v21 }
 0x1db   : > { %2651 = vmatprep.subr.bf16.mxu0 %v7082_v29  ;;  %2692 = vmatprep.subr.bf16.mxu1 %v7085_v11  ;;  %v7114_v10 = vcombine.high %v813_v28, %v817_v2  ;;  %v7117_v11 = vcombine.high %v814_v42, %v818_v22  ;;  %v821_v29 = vld [vmem:[%s6439_s28 + $0x310] sm:$0xff]  ;;  %v826_v27 = vld [vmem:[%s6439_s28 + $0x338] sm:$0xff] }
 0x1dc   : > { %8956 = vst [vmem:[#allocation128_spill] sm:$0xff] %v7108_v30  ;;  %v7144_v42 = vcombine.low %v822_v57, %v826_v27 }
 0x1dd   : > { %8958 = vst [vmem:[#allocation130_spill] sm:$0xff] %v7114_v10  ;;  %8959 = vst [vmem:[#allocation131_spill] sm:$0xff] %v7117_v11 }
 0x1de   : > { %2652 = vmatpush1.bf16.msra.mxu0 %v7092_v33  ;;  %2693 = vmatpush1.bf16.msra.mxu1 %v7096_v59  ;;  %v825_v33 = vld [vmem:[%s6439_s28 + $0x330] sm:$0xff]  ;;  %v7124_v59 = vcombine.low %v813_v28, %v817_v2  ;;  %v830_v2 = vld [vmem:[%s6439_s28 + $0x358] sm:$0xff]  ;;  %8965 = vst [vmem:[#allocation137_spill] sm:$0xff] %v7144_v42 }
 0x1df   : > { %2653 = vmatprep.subr.bf16.mxu0 %v7098_v13  ;;  %2694 = vmatprep.subr.bf16.mxu1 %v7101_v12  ;;  %v7130_v47 = vcombine.high %v821_v29, %v825_v33  ;;  %v7133_v12 = vcombine.high %v822_v57, %v826_v27  ;;  %v829_v13 = vld [vmem:[%s6439_s28 + $0x350] sm:$0xff]  ;;  %v834_v28 = vld [vmem:[%s6439_s28 + $0x378] sm:$0xff] }
 0x1e0   : > { %8960 = vst [vmem:[#allocation132_spill] sm:$0xff] %v7124_v59  ;;  %v7160_v57 = vcombine.low %v830_v2, %v834_v28 }
 0x1e1   : > { %8962 = vst [vmem:[#allocation134_spill] sm:$0xff] %v7130_v47  ;;  %8963 = vst [vmem:[#allocation135_spill] sm:$0xff] %v7133_v12 }
 0x1e2   : > { %2654 = vmatpush1.bf16.msra.mxu0 %v7108_v30  ;;  %2695 = vmatpush1.bf16.msra.mxu1 %v7112_v60  ;;  %v833_v30 = vld [vmem:[%s6439_s28 + $0x370] sm:$0xff]  ;;  %v7140_v60 = vcombine.low %v821_v29, %v825_v33  ;;  %v838_v33 = vld [vmem:[%s6439_s28 + $0x398] sm:$0xff]  ;;  %8969 = vst [vmem:[#allocation141_spill] sm:$0xff] %v7160_v57 }
 0x1e3   : > { %2655 = vmatprep.subr.bf16.mxu0 %v7114_v10  ;;  %2696 = vmatprep.subr.bf16.mxu1 %v7117_v11  ;;  %v7146_v22 = vcombine.high %v829_v13, %v833_v30  ;;  %v7149_v11 = vcombine.high %v830_v2, %v834_v28  ;;  %v837_v10 = vld [vmem:[%s6439_s28 + $0x390] sm:$0xff]  ;;  %v842_v29 = vld [vmem:[%s6439_s28 + $0x3b8] sm:$0xff]  ;;  %v7181_v28 = vcombine.high %v846_v44, %v850_v19 }
 0x1e4   : > { %8964 = vst [vmem:[#allocation136_spill] sm:$0xff] %v7140_v60 }
 0x1e5   : > { %8966 = vst [vmem:[#allocation138_spill] sm:$0xff] %v7146_v22  ;;  %8967 = vst [vmem:[#allocation139_spill] sm:$0xff] %v7149_v11 }
 0x1e6   : > { %2656 = vmatpush1.bf16.msra.mxu0 %v7124_v59  ;;  %2697 = vmatpush1.bf16.msra.mxu1 %v7128_v21  ;;  %v841_v59 = vld [vmem:[%s6439_s28 + $0x3b0] sm:$0xff]  ;;  %v7156_v21 = vcombine.low %v829_v13, %v833_v30  ;;  %v7176_v13 = vcombine.low %v838_v33, %v842_v29  ;;  %8975 = vst [vmem:[#allocation147_spill] sm:$0xff] %v7181_v28 }
 0x1e7   : > { %2657 = vmatprep.subr.bf16.mxu0 %v7130_v47  ;;  %2698 = vmatprep.subr.bf16.mxu1 %v7133_v12  ;;  %v7162_v27 = vcombine.high %v837_v10, %v841_v59  ;;  %v7165_v12 = vcombine.high %v838_v33, %v842_v29  ;;  %v845_v47 = vld [vmem:[%s6439_s28 + $0x3d0] sm:$0xff]  ;;  %v7172_v30 = vcombine.low %v837_v10, %v841_v59  ;;  %s9670_s28 = sld [smem:[#allocation212_spill]] (!%p5346_p8) }
 0x1e8   : > { %8968 = vst [vmem:[#allocation140_spill] sm:$0xff] %v7156_v21  ;;  %8973 = vst [vmem:[#allocation145_spill] sm:$0xff] %v7176_v13  ;;  %v7178_v2 = vcombine.high %v845_v47, %v849_v58  ;;  %v7188_v59 = vcombine.low %v846_v44, %v850_v19  ;;  %v861_v19 = vlaneseq }
 0x1e9   : > { %8970 = vst [vmem:[#allocation142_spill] sm:$0xff] %v7162_v27  ;;  %8971 = vst [vmem:[#allocation143_spill] sm:$0xff] %v7165_v12 }
 0x1ea   : > { %2658 = vmatpush1.bf16.msra.mxu0 %v7140_v60  ;;  %2699 = vmatpush1.bf16.msra.mxu1 %v7144_v42  ;;  %8972 = vst [vmem:[#allocation144_spill] sm:$0xff] %v7172_v30  ;;  %8974 = vst [vmem:[#allocation146_spill] sm:$0xff] %v7178_v2 }
 0x1eb   : > { %2659 = vmatprep.subr.bf16.mxu0 %v7146_v22  ;;  %2700 = vmatprep.subr.bf16.mxu1 %v7149_v11  ;;  %v7184_v11 = vcombine.low %v845_v47, %v849_v58  ;;  %8977 = vst [vmem:[#allocation149_spill] sm:$0xff] %v7188_v59  ;;  %v7216_v58 = vld [vmem:[%s6445_s10] sm:$0xff] }
 0x1ed   : > { %8976 = vst [vmem:[#allocation148_spill] sm:$0xff] %v7184_v11 }
 0x1ee   : > { %2660 = vmatpush1.bf16.msra.mxu0 %v7156_v21  ;;  %2701 = vmatpush1.bf16.msra.mxu1 %v7160_v57 }
 0x1ef   : > { %2661 = vmatprep.subr.bf16.mxu0 %v7162_v27  ;;  %2702 = vmatprep.subr.bf16.mxu1 %v7165_v12 }
 0x1f2   : > { %2662 = vmatpush1.bf16.msra.mxu0 %v7172_v30  ;;  %2703 = vmatpush1.bf16.msra.mxu1 %v7176_v13 }
 0x1f3   : > { %2663 = vmatprep.subr.bf16.mxu0 %v7178_v2  ;;  %2704 = vmatprep.subr.bf16.mxu1 %v7181_v28 }
 0x1f6   : > { %2664 = vmatpush1.bf16.msra.mxu0 %v7184_v11  ;;  %2705 = vmatpush1.bf16.msra.mxu1 %v7188_v59 }
 0x1f7   : > { %2783 = vmatprep.subr.bf16.mxu0 %v6659_v31  ;;  %2824 = vmatprep.subr.bf16.mxu1 %v6661_v32 }
 0x1f9   : > { %2666 = vmatmul.mubr.bf16.vlgmr.msra.gmra.mrb[36].mxu0 %v6939_v43  ;;  %2707 = vmatmul.mubr.bf16.vlgmr.msra.gmra.mrb[36].mxu1 %v6939_v43  ;;  %v7206_v43 = vshrl.u32 %v861_v19, 7 }
 0x1fa   : > { %2784 = vmatpush1.bf16.msra.mxu0 %v6667_v37  ;;  %2825 = vmatpush1.bf16.msra.mxu1 %v6670_v38 }
 0x1fb   : > { %2785 = vmatprep.subr.bf16.mxu0 %v6672_v61  ;;  %2826 = vmatprep.subr.bf16.mxu1 %v6675_v40  ;;  %8978 = vst [vmem:[#allocation150_spill] sm:$0xff] %v7206_v43  ;;  %v8696_v44 = vsub.s32 0, %v7206_v43  ;;  %v871_v10 = vsub.s32 2, %v7206_v43  ;;  %v875_v29 = vsub.s32 3, %v7206_v43 }
 0x1fd   : > { %v7225_v33 = vrot.slane %v7216_v58, %v8696_v44  ;;  %v8979_v44 = vsub.s32 1, %v7206_v43 }
 0x1fe   : > { %2786 = vmatpush1.bf16.msra.mxu0 %v6684_v45  ;;  %2827 = vmatpush1.bf16.msra.mxu1 %v6688_v46 }
 0x1ff   : > { %2787 = vmatprep.subr.bf16.mxu0 %v6690_v48  ;;  %2828 = vmatprep.subr.bf16.mxu1 %v6693_v49 }
 0x202   : > { %2788 = vmatpush1.bf16.msra.mxu0 %v6702_v53  ;;  %2829 = vmatpush1.bf16.msra.mxu1 %v6706_v54 }
 0x203   : > { %2789 = vmatprep.subr.bf16.mxu0 %v6708_v55  ;;  %2830 = vmatprep.subr.bf16.mxu1 %v6711_v56 }
 0x206   : > { %2790 = vmatpush1.bf16.msra.mxu0 %v6719_v62  ;;  %2831 = vmatpush1.bf16.msra.mxu1 %v6724_v63 }
 0x207   : > { %2791 = vmatprep.subr.bf16.mxu0 %v6726_v0  ;;  %2832 = vmatprep.subr.bf16.mxu1 %v6729_v1  ;;  %v7233_v0 = vrot.slane %v7216_v58, %v871_v10  ;;  %v7243_v1 = vrot.slane %v7216_v58, %v8979_v44 }
 0x20a   : > { %2792 = vmatpush1.bf16.msra.mxu0 %v6738_v6  ;;  %2833 = vmatpush1.bf16.msra.mxu1 %v6742_v7 }
 0x20b   : > { %2793 = vmatprep.subr.bf16.mxu0 %v6744_v8  ;;  %2834 = vmatprep.subr.bf16.mxu1 %v6747_v9  ;;  %v7249_v8 = vrot.slane %v7216_v58, %v875_v29 }
 0x20c   : > { %v7230_v19 = vpop.f32.mrb[0].mxu0  ;;  %v7236_v47 = vpop.f32.mrb[0].mxu1 }
 0x20d   : > { %v7238_v6 = vpop.f32.mrb[1].mxu0  ;;  %v7245_v63 = vpop.f32.mrb[1].mxu1 }
 0x20e   : > { %v1579_v7 = vpop.f32.mrb[2].mxu0  ;;  %2794 = vmatpush1.bf16.msra.mxu0 %v6755_v14  ;;  %v1652_v9 = vpop.f32.mrb[2].mxu1  ;;  %2835 = vmatpush1.bf16.msra.mxu1 %v6760_v15 }
 0x20f   : > { %v7252_v10 = vadd.f32 %v1579_v7, %v7225_v33  ;;  %v1581_v62 = vpop.f32.mrb[3].mxu0  ;;  %2795 = vmatprep.subr.bf16.mxu0 %v6762_v16  ;;  %v7257_v44 = vadd.f32 %v1652_v9, %v7233_v0  ;;  %v1654_v55 = vpop.f32.mrb[3].mxu1  ;;  %2836 = vmatprep.subr.bf16.mxu1 %v6765_v17 }
 0x210   : > { %v7260_v56 = vadd.f32 %v1581_v62, %v7243_v1  ;;  %v7264_v29 = vadd.f32 %v1654_v55, %v7249_v8 }
 0x211   : > { %8980 = vst [vmem:[#allocation151_spill] sm:$0xff] %v7252_v10  ;;  %8981 = vst [vmem:[#allocation152_spill] sm:$0xff] %v7257_v44 }
 0x212   : > { %8982 = vst [vmem:[#allocation153_spill] sm:$0xff] %v7260_v56  ;;  %8983 = vst [vmem:[#allocation154_spill] sm:$0xff] %v7264_v29  ;;  %2796 = vmatpush1.bf16.msra.mxu0 %v6775_v23  ;;  %2837 = vmatpush1.bf16.msra.mxu1 %v6779_v24 }
 0x213   : > { %2797 = vmatprep.subr.bf16.mxu0 %v6781_v25  ;;  %2838 = vmatprep.subr.bf16.mxu1 %v6784_v26 }
 0x214   : > { %v1585_v7 = vpop.f32.mrb[4].mxu0  ;;  %v1658_v62 = vpop.f32.mrb[4].mxu1 }
 0x215   : > { %v7271_v9 = vadd.f32 %v1585_v7, %v7225_v33  ;;  %v1587_v56 = vpop.f32.mrb[5].mxu0  ;;  %v7274_v44 = vadd.f32 %v1658_v62, %v7233_v0  ;;  %v1660_v29 = vpop.f32.mrb[5].mxu1 }
 0x216   : > { %v7277_v55 = vadd.f32 %v1587_v56, %v7243_v1  ;;  %v1589_v10 = vpop.f32.mrb[6].mxu0  ;;  %2798 = vmatpush1.bf16.msra.mxu0 %v6794_v34  ;;  %v7281_v25 = vadd.f32 %v1660_v29, %v7249_v8  ;;  %v1662_v7 = vpop.f32.mrb[6].mxu1  ;;  %2839 = vmatpush1.bf16.msra.mxu1 %v6799_v35 }
 0x217   : > { %8984 = vst [vmem:[#allocation155_spill] sm:$0xff] %v7271_v9  ;;  %8985 = vst [vmem:[#allocation156_spill] sm:$0xff] %v7274_v44  ;;  %v7284_v26 = vadd.f32 %v1589_v10, %v7225_v33  ;;  %v1591_v9 = vpop.f32.mrb[7].mxu0  ;;  %2799 = vmatprep.subr.bf16.mxu0 %v6801_v36  ;;  %v7289_v62 = vadd.f32 %v1662_v7, %v7233_v0  ;;  %2840 = vmatprep.subr.bf16.mxu1 %v6804_v41 }
 0x218   : > { %8986 = vst [vmem:[#allocation157_spill] sm:$0xff] %v7277_v55  ;;  %8987 = vst [vmem:[#allocation158_spill] sm:$0xff] %v7281_v25  ;;  %v7292_v56 = vadd.f32 %v1591_v9, %v7243_v1  ;;  %v1664_v55 = vpop.f32.mrb[7].mxu1 }
 0x219   : > { %8988 = vst [vmem:[#allocation159_spill] sm:$0xff] %v7284_v26  ;;  %8989 = vst [vmem:[#allocation160_spill] sm:$0xff] %v7289_v62  ;;  %v7296_v29 = vadd.f32 %v1664_v55, %v7249_v8 }
 0x21a   : > { %8990 = vst [vmem:[#allocation161_spill] sm:$0xff] %v7292_v56  ;;  %2800 = vmatpush1.bf16.msra.mxu0 %v6813_v50  ;;  %2841 = vmatpush1.bf16.msra.mxu1 %v6817_v20 }
 0x21b   : > { %8991 = vst [vmem:[#allocation162_spill] sm:$0xff] %v7296_v29  ;;  %2801 = vmatprep.subr.bf16.mxu0 %v6819_v51  ;;  %2842 = vmatprep.subr.bf16.mxu1 %v6822_v52 }
 0x21c   : > { %v1595_v10 = vpop.f32.mrb[8].mxu0  ;;  %v1668_v9 = vpop.f32.mrb[8].mxu1 }
 0x21d   : > { %v7303_v7 = vadd.f32 %v1595_v10, %v7225_v33  ;;  %v1597_v56 = vpop.f32.mrb[9].mxu0  ;;  %v7306_v62 = vadd.f32 %v1668_v9, %v7233_v0  ;;  %v1670_v29 = vpop.f32.mrb[9].mxu1 }
 0x21e   : > { %v7309_v55 = vadd.f32 %v1597_v56, %v7243_v1  ;;  %v1599_v26 = vpop.f32.mrb[10].mxu0  ;;  %2802 = vmatpush1.bf16.msra.mxu0 %v6829_v3  ;;  %v7313_v25 = vadd.f32 %v1670_v29, %v7249_v8  ;;  %v1672_v10 = vpop.f32.mrb[10].mxu1  ;;  %2843 = vmatpush1.bf16.msra.mxu1 %v6833_v4 }
 0x21f   : > { %8992 = vst [vmem:[#allocation163_spill] sm:$0xff] %v7303_v7  ;;  %8993 = vst [vmem:[#allocation164_spill] sm:$0xff] %v7306_v62  ;;  %v7316_v44 = vadd.f32 %v1599_v26, %v7225_v33  ;;  %v1601_v7 = vpop.f32.mrb[11].mxu0  ;;  %2803 = vmatprep.subr.bf16.mxu0 %v6835_v39  ;;  %v7321_v9 = vadd.f32 %v1672_v10, %v7233_v0  ;;  %2844 = vmatprep.subr.bf16.mxu1 %v6838_v5  ;;  %v9000_v26 = vld [vmem:[#allocation65_spill] sm:$0xff]  ;;  %v9002_v62 = vld [vmem:[#allocation67_spill] sm:$0xff] }
 0x220   : > { %8994 = vst [vmem:[#allocation165_spill] sm:$0xff] %v7309_v55  ;;  %8995 = vst [vmem:[#allocation166_spill] sm:$0xff] %v7313_v25  ;;  %v7324_v56 = vadd.f32 %v1601_v7, %v7243_v1  ;;  %v1674_v55 = vpop.f32.mrb[11].mxu1  ;;  %v9006_v5 = vld [vmem:[#allocation68_spill] sm:$0xff]  ;;  %v9010_v39 = vld [vmem:[#allocation70_spill] sm:$0xff] }
 0x221   : > { %8996 = vst [vmem:[#allocation167_spill] sm:$0xff] %v7316_v44  ;;  %8997 = vst [vmem:[#allocation168_spill] sm:$0xff] %v7321_v9  ;;  %v7328_v29 = vadd.f32 %v1674_v55, %v7249_v8  ;;  %v9001_v44 = vld [vmem:[#allocation66_spill] sm:$0xff] }
 0x222   : > { %8998 = vst [vmem:[#allocation169_spill] sm:$0xff] %v7324_v56  ;;  %2804 = vmatpush1.bf16.msra.mxu0 %v6845_v18  ;;  %2845 = vmatpush1.bf16.msra.mxu1 %v9000_v26  ;;  %v9009_v26 = vld [vmem:[#allocation69_spill] sm:$0xff] }
 0x223   : > { %8999 = vst [vmem:[#allocation170_spill] sm:$0xff] %v7328_v29  ;;  %2805 = vmatprep.subr.bf16.mxu0 %v9001_v44  ;;  %2846 = vmatprep.subr.bf16.mxu1 %v9002_v62 }
 0x224   : > { %v1605_v25 = vpop.f32.mrb[12].mxu0  ;;  %v1678_v7 = vpop.f32.mrb[12].mxu1 }
 0x225   : > { %v7335_v10 = vadd.f32 %v1605_v25, %v7225_v33  ;;  %v1607_v56 = vpop.f32.mrb[13].mxu0  ;;  %v7338_v9 = vadd.f32 %v1678_v7, %v7233_v0  ;;  %v1680_v29 = vpop.f32.mrb[13].mxu1 }
 0x226   : > { %v7341_v55 = vadd.f32 %v1607_v56, %v7243_v1  ;;  %v1609_v18 = vpop.f32.mrb[14].mxu0  ;;  %2806 = vmatpush1.bf16.msra.mxu0 %v9006_v5  ;;  %v7345_v44 = vadd.f32 %v1680_v29, %v7249_v8  ;;  %v1682_v25 = vpop.f32.mrb[14].mxu1  ;;  %2847 = vmatpush1.bf16.msra.mxu1 %v9009_v26  ;;  %v9018_v26 = vld [vmem:[#allocation75_spill] sm:$0xff] }
 0x227   : > { %9003 = vst [vmem:[#allocation171_spill] sm:$0xff] %v7335_v10  ;;  %9004 = vst [vmem:[#allocation172_spill] sm:$0xff] %v7338_v9  ;;  %v7348_v62 = vadd.f32 %v1609_v18, %v7225_v33  ;;  %v1611_v10 = vpop.f32.mrb[15].mxu0  ;;  %2807 = vmatprep.subr.bf16.mxu0 %v9010_v39  ;;  %v7353_v7 = vadd.f32 %v1682_v25, %v7233_v0  ;;  %v9013_v9 = vld [vmem:[#allocation71_spill] sm:$0xff]  ;;  %v9015_v18 = vld [vmem:[#allocation72_spill] sm:$0xff] }
 0x228   : > { %9005 = vst [vmem:[#allocation173_spill] sm:$0xff] %v7341_v55  ;;  %9007 = vst [vmem:[#allocation174_spill] sm:$0xff] %v7345_v44  ;;  %v7356_v56 = vadd.f32 %v1611_v10, %v7243_v1  ;;  %v1684_v55 = vpop.f32.mrb[15].mxu1  ;;  %2848 = vmatprep.subr.bf16.mxu1 %v9013_v9  ;;  %v9017_v44 = vld [vmem:[#allocation74_spill] sm:$0xff]  ;;  %v9019_v39 = vld [vmem:[#allocation76_spill] sm:$0xff] }
 0x229   : > { %9008 = vst [vmem:[#allocation175_spill] sm:$0xff] %v7348_v62  ;;  %9011 = vst [vmem:[#allocation176_spill] sm:$0xff] %v7353_v7  ;;  %v7360_v29 = vadd.f32 %v1684_v55, %v7249_v8  ;;  %v9016_v62 = vld [vmem:[#allocation73_spill] sm:$0xff]  ;;  %v9021_v10 = vld [vmem:[#allocation78_spill] sm:$0xff] }
 0x22a   : > { %9012 = vst [vmem:[#allocation177_spill] sm:$0xff] %v7356_v56  ;;  %2808 = vmatpush1.bf16.msra.mxu0 %v9015_v18  ;;  %2849 = vmatpush1.bf16.msra.mxu1 %v9016_v62  ;;  %v9020_v25 = vld [vmem:[#allocation77_spill] sm:$0xff]  ;;  %v9022_v56 = vld [vmem:[#allocation79_spill] sm:$0xff]  ;;  %v9023_v7 = vld [vmem:[#allocation80_spill] sm:$0xff] }
 0x22b   : > { %9014 = vst [vmem:[#allocation178_spill] sm:$0xff] %v7360_v29  ;;  %2809 = vmatprep.subr.bf16.mxu0 %v9017_v44  ;;  %2850 = vmatprep.subr.bf16.mxu1 %v9018_v26  ;;  %v9024_v55 = vld [vmem:[#allocation81_spill] sm:$0xff]  ;;  %v9025_v29 = vld [vmem:[#allocation82_spill] sm:$0xff]  ;;  %v9026_v18 = vld [vmem:[#allocation83_spill] sm:$0xff] }
 0x22c   : > { %v9027_v62 = vld [vmem:[#allocation84_spill] sm:$0xff]  ;;  %v9028_v44 = vld [vmem:[#allocation85_spill] sm:$0xff]  ;;  %v9029_v26 = vld [vmem:[#allocation86_spill] sm:$0xff] }
 0x22e   : > { %2810 = vmatpush1.bf16.msra.mxu0 %v9019_v39  ;;  %2851 = vmatpush1.bf16.msra.mxu1 %v9020_v25  ;;  %v9030_v39 = vld [vmem:[#allocation87_spill] sm:$0xff] }
 0x22f   : > { %2811 = vmatprep.subr.bf16.mxu0 %v9021_v10  ;;  %2852 = vmatprep.subr.bf16.mxu1 %v9022_v56  ;;  %v879_v10 = vsub.s32 4, %v7206_v43  ;;  %v887_v56 = vsub.s32 6, %v7206_v43 }
 0x232   : > { %2812 = vmatpush1.bf16.msra.mxu0 %v9023_v7  ;;  %2853 = vmatpush1.bf16.msra.mxu1 %v9024_v55  ;;  %v883_v7 = vsub.s32 5, %v7206_v43  ;;  %v7382_v55 = vrot.slane %v7216_v58, %v879_v10 }
 0x233   : > { %2813 = vmatprep.subr.bf16.mxu0 %v9025_v29  ;;  %2854 = vmatprep.subr.bf16.mxu1 %v9026_v18  ;;  %v891_v29 = vsub.s32 7, %v7206_v43 }
 0x235   : > { %v7400_v10 = vrot.slane %v7216_v58, %v891_v29 }
 0x236   : > { %2814 = vmatpush1.bf16.msra.mxu0 %v9027_v62  ;;  %2855 = vmatpush1.bf16.msra.mxu1 %v9028_v44  ;;  %v7388_v62 = vrot.slane %v7216_v58, %v887_v56 }
 0x237   : > { %2865 = vmatprep.subr.bf16.mxu0 %v9029_v26  ;;  %2906 = vmatprep.subr.bf16.mxu1 %v9030_v39  ;;  %v7395_v39 = vrot.slane %v7216_v58, %v883_v7 }
 0x24c   : > { %v7385_v18 = vpop.f32.mrb[16].mxu0  ;;  %v7390_v44 = vpop.f32.mrb[16].mxu1 }
 0x24d   : > { %v7392_v26 = vpop.f32.mrb[17].mxu0  ;;  %v7397_v25 = vpop.f32.mrb[17].mxu1 }
 0x24e   : > { %v1725_v9 = vpop.f32.mrb[18].mxu0  ;;  %v1798_v5 = vpop.f32.mrb[18].mxu1 }
 0x24f   : > { %v7403_v43 = vadd.f32 %v1725_v9, %v7382_v55  ;;  %v1727_v4 = vpop.f32.mrb[19].mxu0  ;;  %v7406_v56 = vadd.f32 %v1798_v5, %v7388_v62  ;;  %v1800_v52 = vpop.f32.mrb[19].mxu1 }
 0x250   : > { %v7409_v3 = vadd.f32 %v1727_v4, %v7395_v39  ;;  %v7412_v7 = vadd.f32 %v1800_v52, %v7400_v10 }
 0x251   : > { %9031 = vst [vmem:[#allocation179_spill] sm:$0xff] %v7403_v43  ;;  %9032 = vst [vmem:[#allocation180_spill] sm:$0xff] %v7406_v56 }
 0x252   : > { %9033 = vst [vmem:[#allocation181_spill] sm:$0xff] %v7409_v3  ;;  %9034 = vst [vmem:[#allocation182_spill] sm:$0xff] %v7412_v7 }
 0x254   : > { %v1731_v51 = vpop.f32.mrb[20].mxu0  ;;  %v1804_v58 = vpop.f32.mrb[20].mxu1 }
 0x255   : > { %v7415_v20 = vadd.f32 %v1731_v51, %v7382_v55  ;;  %v1733_v29 = vpop.f32.mrb[21].mxu0  ;;  %v7418_v9 = vadd.f32 %v1804_v58, %v7388_v62  ;;  %v1806_v5 = vpop.f32.mrb[21].mxu1 }
 0x256   : > { %v7421_v43 = vadd.f32 %v1733_v29, %v7395_v39  ;;  %v1735_v56 = vpop.f32.mrb[22].mxu0  ;;  %v7424_v4 = vadd.f32 %v1806_v5, %v7400_v10  ;;  %v1808_v7 = vpop.f32.mrb[22].mxu1 }
 0x257   : > { %9035 = vst [vmem:[#allocation183_spill] sm:$0xff] %v7415_v20  ;;  %9036 = vst [vmem:[#allocation184_spill] sm:$0xff] %v7418_v9  ;;  %v7427_v52 = vadd.f32 %v1735_v56, %v7382_v55  ;;  %v1737_v3 = vpop.f32.mrb[23].mxu0  ;;  %v7430_v51 = vadd.f32 %v1808_v7, %v7388_v62  ;;  %v1810_v58 = vpop.f32.mrb[23].mxu1 }
 0x258   : > { %9037 = vst [vmem:[#allocation185_spill] sm:$0xff] %v7421_v43  ;;  %9038 = vst [vmem:[#allocation186_spill] sm:$0xff] %v7424_v4  ;;  %v7433_v20 = vadd.f32 %v1737_v3, %v7395_v39  ;;  %v7436_v29 = vadd.f32 %v1810_v58, %v7400_v10 }
 0x259   : > { %9039 = vst [vmem:[#allocation187_spill] sm:$0xff] %v7427_v52  ;;  %9040 = vst [vmem:[#allocation188_spill] sm:$0xff] %v7430_v51 }
 0x25a   : > { %9041 = vst [vmem:[#allocation189_spill] sm:$0xff] %v7433_v20  ;;  %9042 = vst [vmem:[#allocation190_spill] sm:$0xff] %v7436_v29 }
 0x25c   : > { %v1741_v43 = vpop.f32.mrb[24].mxu0  ;;  %v1814_v5 = vpop.f32.mrb[24].mxu1 }
 0x25d   : > { %v7439_v9 = vadd.f32 %v1741_v43, %v7382_v55  ;;  %v1743_v4 = vpop.f32.mrb[25].mxu0  ;;  %v7442_v56 = vadd.f32 %v1814_v5, %v7388_v62  ;;  %v1816_v7 = vpop.f32.mrb[25].mxu1 }
 0x25e   : > { %v7445_v52 = vadd.f32 %v1743_v4, %v7395_v39  ;;  %v1745_v51 = vpop.f32.mrb[26].mxu0  ;;  %v7448_v3 = vadd.f32 %v1816_v7, %v7400_v10  ;;  %v1818_v29 = vpop.f32.mrb[26].mxu1 }
 0x25f   : > { %9043 = vst [vmem:[#allocation191_spill] sm:$0xff] %v7439_v9  ;;  %9044 = vst [vmem:[#allocation192_spill] sm:$0xff] %v7442_v56  ;;  %v7451_v58 = vadd.f32 %v1745_v51, %v7382_v55  ;;  %v1747_v20 = vpop.f32.mrb[27].mxu0  ;;  %v7454_v43 = vadd.f32 %v1818_v29, %v7388_v62  ;;  %v1820_v5 = vpop.f32.mrb[27].mxu1 }
 0x260   : > { %9045 = vst [vmem:[#allocation193_spill] sm:$0xff] %v7445_v52  ;;  %9046 = vst [vmem:[#allocation194_spill] sm:$0xff] %v7448_v3  ;;  %v7457_v9 = vadd.f32 %v1747_v20, %v7395_v39  ;;  %v7460_v4 = vadd.f32 %v1820_v5, %v7400_v10 }
 0x261   : > { %9047 = vst [vmem:[#allocation195_spill] sm:$0xff] %v7451_v58  ;;  %9048 = vst [vmem:[#allocation196_spill] sm:$0xff] %v7454_v43 }
 0x262   : > { %9049 = vst [vmem:[#allocation197_spill] sm:$0xff] %v7457_v9  ;;  %9050 = vst [vmem:[#allocation198_spill] sm:$0xff] %v7460_v4 }
 0x264   : > { %v1751_v52 = vpop.f32.mrb[28].mxu0  ;;  %v1824_v7 = vpop.f32.mrb[28].mxu1 }
 0x265   : > { %v7463_v56 = vadd.f32 %v1751_v52, %v7382_v55  ;;  %v1753_v3 = vpop.f32.mrb[29].mxu0  ;;  %v7466_v51 = vadd.f32 %v1824_v7, %v7388_v62  ;;  %v1826_v29 = vpop.f32.mrb[29].mxu1 }
 0x266   : > { %v7469_v58 = vadd.f32 %v1753_v3, %v7395_v39  ;;  %v1755_v43 = vpop.f32.mrb[30].mxu0  ;;  %v7472_v20 = vadd.f32 %v1826_v29, %v7400_v10  ;;  %v1828_v4 = vpop.f32.mrb[30].mxu1  ;;  %v1649_v29 = vadd.f32 %v7236_v47, %v7233_v0 }
 0x267   : > { %9051 = vst [vmem:[#allocation199_spill] sm:$0xff] %v7463_v56  ;;  %9052 = vst [vmem:[#allocation200_spill] sm:$0xff] %v7466_v51  ;;  %v7475_v5 = vadd.f32 %v1755_v43, %v7382_v55  ;;  %v1757_v9 = vpop.f32.mrb[31].mxu0  ;;  %v7478_v52 = vadd.f32 %v1828_v4, %v7388_v62  ;;  %v1830_v7 = vpop.f32.mrb[31].mxu1  ;;  %v1578_v43 = vadd.f32 %v7238_v6, %v7243_v1 }
 0x268   : > { %9053 = vst [vmem:[#allocation201_spill] sm:$0xff] %v7469_v58  ;;  %9054 = vst [vmem:[#allocation202_spill] sm:$0xff] %v7472_v20  ;;  %v7481_v56 = vadd.f32 %v1757_v9, %v7395_v39  ;;  %v7484_v3 = vadd.f32 %v1830_v7, %v7400_v10  ;;  %v1576_v58 = vadd.f32 %v7230_v19, %v7225_v33 }
 0x269   : > { %9055 = vst [vmem:[#allocation203_spill] sm:$0xff] %v7475_v5  ;;  %9056 = vst [vmem:[#allocation204_spill] sm:$0xff] %v7478_v52  ;;  %v1651_v4 = vadd.f32 %v7245_v63, %v7249_v8 }
 0x26a   : > { %9057 = vst [vmem:[#allocation205_spill] sm:$0xff] %v7481_v56  ;;  %9058 = vst [vmem:[#allocation206_spill] sm:$0xff] %v7484_v3 }
 0x28c   : > { %v2585_v5 = vpop.f32.mrb[32].mxu0  ;;  %v2626_v9 = vpop.f32.mrb[32].mxu1 }
 0x28d   : > { %v2715_v52 = vadd.f32 %v2585_v5, %v1576_v58  ;;  %v2587_v56 = vpop.f32.mrb[33].mxu0  ;;  %v2717_v20 = vadd.f32 %v2626_v9, %v1649_v29  ;;  %v2628_v7 = vpop.f32.mrb[33].mxu1 }
 0x28e   : > { %v2716_v51 = vadd.f32 %v2587_v56, %v1578_v43  ;;  %v2589_v3 = vpop.f32.mrb[34].mxu0  ;;  %v2718_v50 = vadd.f32 %v2628_v7, %v1651_v4  ;;  %v2630_v41 = vpop.f32.mrb[34].mxu1 }
 0x28f   : > { %v2590_v33 = vpop.f32.mrb[35].mxu0  ;;  %v2631_v19 = vpop.f32.mrb[35].mxu1  ;;  %v5298_v36 = vmul.f32 -1.442695, %v2715_v52  ;;  %v5300_v0 = vmul.f32 -1.442695, %v2717_v20  ;;  %v1722_v41 = vadd.f32 %v7385_v18, %v7382_v55 }
 0x290   : > { %v5299_v47 = vmul.f32 -1.442695, %v2716_v51  ;;  %v5301_v35 = vmul.f32 -1.442695, %v2718_v50  ;;  %v1795_v51 = vadd.f32 %v7390_v44, %v7388_v62  ;;  %v1797_v50 = vadd.f32 %v7397_v25, %v7400_v10  ;;  %v1899_v19 = vld [vmem:[%s6465_s0] sm:$0xff] }
 0x291   : > { %5533 = vpow2.f32 %v5298_v36  ;;  %v1724_v36 = vadd.f32 %v7392_v26, %v7395_v39 }
 0x292   : > { %5535 = vpow2.f32 %v5300_v0 }
 0x293   : > { %5537 = vpow2.f32 %v5299_v47  ;;  %v1900_v47 = vld [vmem:[%s6465_s0 + $0x8] sm:$0xff] }
 0x294   : > { %5539 = vpow2.f32 %v5301_v35 }
 0x29b   : > { %v5534_v63 = vpop.eup %5533 }
 0x29c   : > { %v5536_v1 = vpop.eup %5535  ;;  %v2729_v58 = vadd.f32 1.0, %v5534_v63 }
 0x29d   : > { %v5538_v6 = vpop.eup %5537  ;;  %v2741_v56 = vadd.f32 1.0, %v5536_v1 }
 0x29e   : > { %v5540_v8 = vpop.eup %5539  ;;  %v2730_v5 = vadd.f32 1.0, %v5538_v6  ;;  %5541 = vrcp.f32 %v2729_v58 }
 0x29f   : > { %v2742_v3 = vadd.f32 1.0, %v5540_v8  ;;  %5543 = vrcp.f32 %v2741_v56 }
 0x2a0   : > { %5545 = vrcp.f32 %v2730_v5 }
 0x2a1   : > { %5547 = vrcp.f32 %v2742_v3 }
 0x2a8   : > { %v5542_v25 = vpop.eup %5541 }
 0x2a9   : > { %v5544_v10 = vpop.eup %5543 }
 0x2aa   : > { %v5546_v33 = vpop.eup %5545  ;;  %v2761_v6 = vmul.f32 %v5544_v10, %v1899_v19  ;;  %v9066_v10 = vld [vmem:[#allocation95_spill] sm:$0xff]  ;;  %v9068_v19 = vld [vmem:[#allocation97_spill] sm:$0xff] }
 0x2ab   : > { %v5548_v0 = vpop.eup %5547 }
 0x2ac   : > { %v2762_v58 = vmul.f32 %v5548_v0, %v1900_v47  ;;  %v9069_v0 = vld [vmem:[#allocation98_spill] sm:$0xff]  ;;  %v9070_v47 = vld [vmem:[#allocation99_spill] sm:$0xff] }
 0x2cc   : > { %v2667_v35 = vpop.f32.mrb[36].mxu0  ;;  %v2708_v52 = vpop.f32.mrb[36].mxu1 }
 0x2cd   : > { %v2719_v20 = vadd.f32 %v2667_v35, %v1722_v41  ;;  %v2669_v29 = vpop.f32.mrb[37].mxu0  ;;  %v2721_v43 = vadd.f32 %v2708_v52, %v1795_v51  ;;  %v2710_v18 = vpop.f32.mrb[37].mxu1 }
 0x2ce   : > { %v2720_v4 = vadd.f32 %v2669_v29, %v1724_v36  ;;  %v2671_v55 = vpop.f32.mrb[38].mxu0  ;;  %v2722_v44 = vadd.f32 %v2710_v18, %v1797_v50  ;;  %v2712_v62 = vpop.f32.mrb[38].mxu1 }
 0x2cf   : > { %5549 = vtanh.f32 %v2719_v20  ;;  %v2672_v39 = vpop.f32.mrb[39].mxu0  ;;  %v5302_v26 = vmul.f32 -1.442695, %v2721_v43  ;;  %v2713_v9 = vpop.f32.mrb[39].mxu1  ;;  %v9060_v62 = vld [vmem:[#allocation89_spill] sm:$0xff] }
 0x2d0   : > { %5551 = vtanh.f32 %v2720_v4  ;;  %v5303_v7 = vmul.f32 -1.442695, %v2722_v44  ;;  %v9059_v44 = vld [vmem:[#allocation88_spill] sm:$0xff]  ;;  %v9061_v39 = vld [vmem:[#allocation90_spill] sm:$0xff] }
 0x2d1   : > { %5553 = vpow2.f32 %v5302_v26  ;;  %v9062_v26 = vld [vmem:[#allocation91_spill] sm:$0xff]  ;;  %v9063_v9 = vld [vmem:[#allocation92_spill] sm:$0xff] }
 0x2d2   : > { %5555 = vpow2.f32 %v5303_v7  ;;  %v9064_v7 = vld [vmem:[#allocation93_spill] sm:$0xff] }
 0x2d9   : > { %v5550_v63 = vpop.eup %5549 }
 0x2da   : > { %v5552_v1 = vpop.eup %5551  ;;  %v2763_v8 = vmul.f32 %v5550_v63, %v5542_v25  ;;  %v9065_v25 = vld [vmem:[#allocation94_spill] sm:$0xff]  ;;  %v9071_v63 = vld [vmem:[#allocation100_spill] sm:$0xff] }
 0x2db   : > { %v2764_v56 = vmul.f32 %v5552_v1, %v5546_v33  ;;  %v5554_v5 = vpop.eup %5553  ;;  %v9067_v33 = vld [vmem:[#allocation96_spill] sm:$0xff]  ;;  %v9072_v1 = vld [vmem:[#allocation101_spill] sm:$0xff] }
 0x2dc   : > { %v7504_v3 = vadd.f32 %v2763_v8, %v2761_v6  ;;  %v5556_v41 = vpop.eup %5555  ;;  %v2755_v51 = vadd.f32 1.0, %v5554_v5  ;;  %v9073_v6 = vld [vmem:[#allocation102_spill] sm:$0xff]  ;;  %v9074_v8 = vld [vmem:[#allocation103_spill] sm:$0xff] }
 0x2dd   : > { %v7506_v36 = vadd.f32 %v2764_v56, %v2762_v58  ;;  %v2756_v35 = vadd.f32 1.0, %v5556_v41  ;;  %v9075_v58 = vld [vmem:[#allocation104_spill] sm:$0xff]  ;;  %v9076_v56 = vld [vmem:[#allocation105_spill] sm:$0xff]  ;;  %v9077_v5 = vld [vmem:[#allocation106_spill] sm:$0xff] }
 0x2de   : > { %5557 = vtanh.f32 %v7504_v3  ;;  %v9078_v41 = vld [vmem:[#allocation107_spill] sm:$0xff] }
 0x2df   : > { %5559 = vrcp.f32 %v2755_v51  ;;  %v9079_v51 = vld [vmem:[#allocation108_spill] sm:$0xff] }
 0x2e0   : > { %5561 = vtanh.f32 %v7506_v36 }
 0x2e1   : > { %5563 = vrcp.f32 %v2756_v35  ;;  %v9080_v35 = vld [vmem:[#allocation109_spill] sm:$0xff] }
 0x2e8   : > { %v5558_v50 = vpop.eup %5557 }
 0x2e9   : > { %v5560_v20 = vpop.eup %5559 }
 0x2ea   : > { %v5562_v52 = vpop.eup %5561  ;;  %v2769_v29 = vmul.f32 %v5560_v20, %v5558_v50  ;;  %v9081_v50 = vld [vmem:[#allocation110_spill] sm:$0xff]  ;;  %v9082_v20 = vld [vmem:[#allocation111_spill] sm:$0xff] }
 0x2eb   : > { %v5564_v43 = vpop.eup %5563 }
 0x2ec   : > { %v2770_v4 = vmul.f32 %v5564_v43, %v5562_v52  ;;  %v7510_v18 = vpack.c.bf16 %v2769_v29, %v2769_v29  ;;  %v9083_v52 = vld [vmem:[#allocation112_spill] sm:$0xff]  ;;  %v9084_v29 = vld [vmem:[#allocation113_spill] sm:$0xff]  ;;  %v9085_v43 = vld [vmem:[#allocation114_spill] sm:$0xff] }
 0x2ee   : > { %v2772_v55 = vpack.c.bf16 %v2770_v4, %v2770_v4  ;;  %2773 = vst [vmem:[#allocation2] sm:$0xf] %v7510_v18  ;;  %v9086_v4 = vld [vmem:[#allocation115_spill] sm:$0xff] }
 0x2f0   : > { %2774 = vst [vmem:[#allocation2 + $0x8] sm:$0xf] %v2772_v55  ;;  %2815 = vmatprep.mubr.bf16.mxu0 %v2772_v55  ;;  %2856 = vmatprep.mubr.bf16.mxu1 %v2772_v55 }
 0x2f1   : > { %2816 = vmatmul.mubr.bf16.vlgmr.msra.gmra.mrb[40].mxu0 %v7510_v18  ;;  %2857 = vmatmul.mubr.bf16.vlgmr.msra.gmra.mrb[40].mxu1 %v7510_v18 }
 0x2f2   : > { %2866 = vmatpush1.bf16.msra.mxu0 %v9059_v44  ;;  %2907 = vmatpush1.bf16.msra.mxu1 %v9060_v62 }
 0x2f3   : > { %2897 = vmatprep.mubr.bf16.mxu0 %v2772_v55  ;;  %2938 = vmatprep.mubr.bf16.mxu1 %v2772_v55  ;;  %v9087_v55 = vld [vmem:[#allocation116_spill] sm:$0xff] }
 0x2f4   : > { %2867 = vmatprep.subr.bf16.mxu0 %v9061_v39  ;;  %2908 = vmatprep.subr.bf16.mxu1 %v9062_v26 }
 0x2f6   : > { %2868 = vmatpush1.bf16.msra.mxu0 %v9063_v9  ;;  %2909 = vmatpush1.bf16.msra.mxu1 %v9064_v7 }
 0x2f7   : > { %2869 = vmatprep.subr.bf16.mxu0 %v9065_v25  ;;  %2910 = vmatprep.subr.bf16.mxu1 %v9066_v10 }
 0x2fa   : > { %2870 = vmatpush1.bf16.msra.mxu0 %v9067_v33  ;;  %2911 = vmatpush1.bf16.msra.mxu1 %v9068_v19 }
 0x2fb   : > { %2871 = vmatprep.subr.bf16.mxu0 %v9069_v0  ;;  %2912 = vmatprep.subr.bf16.mxu1 %v9070_v47 }
 0x2fe   : > { %2872 = vmatpush1.bf16.msra.mxu0 %v9071_v63  ;;  %2913 = vmatpush1.bf16.msra.mxu1 %v9072_v1 }
 0x2ff   : > { %2873 = vmatprep.subr.bf16.mxu0 %v9073_v6  ;;  %2914 = vmatprep.subr.bf16.mxu1 %v9074_v8 }
 0x302   : > { %2874 = vmatpush1.bf16.msra.mxu0 %v9075_v58  ;;  %2915 = vmatpush1.bf16.msra.mxu1 %v9076_v56 }
 0x303   : > { %2875 = vmatprep.subr.bf16.mxu0 %v9077_v5  ;;  %2916 = vmatprep.subr.bf16.mxu1 %v9078_v41  ;;  %v9088_v5 = vld [vmem:[#allocation117_spill] sm:$0xff]  ;;  %v9089_v41 = vld [vmem:[#allocation118_spill] sm:$0xff] }
 0x306   : > { %2876 = vmatpush1.bf16.msra.mxu0 %v9079_v51  ;;  %2917 = vmatpush1.bf16.msra.mxu1 %v9080_v35  ;;  %v9090_v51 = vld [vmem:[#allocation119_spill] sm:$0xff]  ;;  %v9091_v35 = vld [vmem:[#allocation120_spill] sm:$0xff] }
 0x307   : > { %2877 = vmatprep.subr.bf16.mxu0 %v9081_v50  ;;  %2918 = vmatprep.subr.bf16.mxu1 %v9082_v20  ;;  %v9092_v50 = vld [vmem:[#allocation121_spill] sm:$0xff]  ;;  %v9093_v20 = vld [vmem:[#allocation122_spill] sm:$0xff] }
 0x30a   : > { %2878 = vmatpush1.bf16.msra.mxu0 %v9083_v52  ;;  %2919 = vmatpush1.bf16.msra.mxu1 %v9084_v29  ;;  %v9094_v52 = vld [vmem:[#allocation123_spill] sm:$0xff]  ;;  %v9095_v29 = vld [vmem:[#allocation124_spill] sm:$0xff] }
 0x30b   : > { %2879 = vmatprep.subr.bf16.mxu0 %v9085_v43  ;;  %2920 = vmatprep.subr.bf16.mxu1 %v9086_v4  ;;  %v9096_v43 = vld [vmem:[#allocation125_spill] sm:$0xff]  ;;  %v9097_v4 = vld [vmem:[#allocation126_spill] sm:$0xff] }
 0x30e   : > { %2880 = vmatpush1.bf16.msra.mxu0 %v9087_v55  ;;  %2921 = vmatpush1.bf16.msra.mxu1 %v9088_v5  ;;  %v9098_v55 = vld [vmem:[#allocation127_spill] sm:$0xff]  ;;  %v9099_v5 = vld [vmem:[#allocation128_spill] sm:$0xff] }
 0x30f   : > { %2881 = vmatprep.subr.bf16.mxu0 %v9089_v41  ;;  %2922 = vmatprep.subr.bf16.mxu1 %v9090_v51  ;;  %v9100_v41 = vld [vmem:[#allocation129_spill] sm:$0xff]  ;;  %v9101_v51 = vld [vmem:[#allocation130_spill] sm:$0xff] }
 0x312   : > { %2882 = vmatpush1.bf16.msra.mxu0 %v9091_v35  ;;  %2923 = vmatpush1.bf16.msra.mxu1 %v9092_v50  ;;  %v9102_v35 = vld [vmem:[#allocation131_spill] sm:$0xff]  ;;  %v9103_v50 = vld [vmem:[#allocation132_spill] sm:$0xff] }
 0x313   : > { %2883 = vmatprep.subr.bf16.mxu0 %v9093_v20  ;;  %2924 = vmatprep.subr.bf16.mxu1 %v9094_v52  ;;  %v9104_v20 = vld [vmem:[#allocation133_spill] sm:$0xff]  ;;  %v9105_v52 = vld [vmem:[#allocation134_spill] sm:$0xff] }
 0x316   : > { %2884 = vmatpush1.bf16.msra.mxu0 %v9095_v29  ;;  %2925 = vmatpush1.bf16.msra.mxu1 %v9096_v43  ;;  %v9106_v29 = vld [vmem:[#allocation135_spill] sm:$0xff] }
 0x317   : > { %2885 = vmatprep.subr.bf16.mxu0 %v9097_v4  ;;  %2926 = vmatprep.subr.bf16.mxu1 %v9098_v55 }
 0x31a   : > { %2886 = vmatpush1.bf16.msra.mxu0 %v9099_v5  ;;  %2927 = vmatpush1.bf16.msra.mxu1 %v9100_v41  ;;  %v9107_v5 = vld [vmem:[#allocation139_spill] sm:$0xff] }
 0x31b   : > { %2887 = vmatprep.subr.bf16.mxu0 %v9101_v51  ;;  %2928 = vmatprep.subr.bf16.mxu1 %v9102_v35 }
 0x31e   : > { %2888 = vmatpush1.bf16.msra.mxu0 %v9103_v50  ;;  %2929 = vmatpush1.bf16.msra.mxu1 %v9104_v20 }
 0x31f   : > { %2889 = vmatprep.subr.bf16.mxu0 %v9105_v52  ;;  %2930 = vmatprep.subr.bf16.mxu1 %v9106_v29 }
 0x322   : > { %2890 = vmatpush1.bf16.msra.mxu0 %v7140_v60  ;;  %2931 = vmatpush1.bf16.msra.mxu1 %v7144_v42 }
 0x323   : > { %2891 = vmatprep.subr.bf16.mxu0 %v7146_v22  ;;  %2932 = vmatprep.subr.bf16.mxu1 %v9107_v5 }
 0x326   : > { %2892 = vmatpush1.bf16.msra.mxu0 %v7156_v21  ;;  %2933 = vmatpush1.bf16.msra.mxu1 %v7160_v57 }
 0x327   : > { %2893 = vmatprep.subr.bf16.mxu0 %v7162_v27  ;;  %2934 = vmatprep.subr.bf16.mxu1 %v7165_v12 }
 0x32a   : > { %2894 = vmatpush1.bf16.msra.mxu0 %v7172_v30  ;;  %2935 = vmatpush1.bf16.msra.mxu1 %v7176_v13 }
 0x32b   : > { %2895 = vmatprep.subr.bf16.mxu0 %v7178_v2  ;;  %2936 = vmatprep.subr.bf16.mxu1 %v7181_v28 }
 0x32e   : > { %2896 = vmatpush1.bf16.msra.mxu0 %v7184_v11  ;;  %2937 = vmatpush1.bf16.msra.mxu1 %v7188_v59 }
 0x32f   : > { %3021 = vmatprep.subr.bf16.mxu0 %v6659_v31  ;;  %3062 = vmatprep.subr.bf16.mxu1 %v6661_v32 }
 0x331   : > { %2898 = vmatmul.mubr.bf16.vlgmr.msra.gmra.mrb[44].mxu0 %v7510_v18  ;;  %2939 = vmatmul.mubr.bf16.vlgmr.msra.gmra.mrb[44].mxu1 %v7510_v18  ;;  %v9108_v18 = vld [vmem:[#allocation34_spill] sm:$0xff] }
 0x332   : > { %3022 = vmatpush1.bf16.msra.mxu0 %v6667_v37  ;;  %3063 = vmatpush1.bf16.msra.mxu1 %v6670_v38  ;;  %v9109_v37 = vld [vmem:[#allocation35_spill] sm:$0xff]  ;;  %v9110_v38 = vld [vmem:[#allocation36_spill] sm:$0xff] }
 0x333   : > { %3023 = vmatprep.subr.bf16.mxu0 %v6672_v61  ;;  %3064 = vmatprep.subr.bf16.mxu1 %v6675_v40  ;;  %v9111_v61 = vld [vmem:[#allocation37_spill] sm:$0xff]  ;;  %v9112_v40 = vld [vmem:[#allocation38_spill] sm:$0xff] }
 0x336   : > { %3024 = vmatpush1.bf16.msra.mxu0 %v6684_v45  ;;  %3065 = vmatpush1.bf16.msra.mxu1 %v6688_v46  ;;  %v9113_v45 = vld [vmem:[#allocation39_spill] sm:$0xff]  ;;  %v9114_v46 = vld [vmem:[#allocation40_spill] sm:$0xff] }
 0x337   : > { %3025 = vmatprep.subr.bf16.mxu0 %v6690_v48  ;;  %3066 = vmatprep.subr.bf16.mxu1 %v6693_v49  ;;  %v9115_v48 = vld [vmem:[#allocation41_spill] sm:$0xff]  ;;  %v9116_v49 = vld [vmem:[#allocation42_spill] sm:$0xff] }
 0x33a   : > { %3026 = vmatpush1.bf16.msra.mxu0 %v6702_v53  ;;  %3067 = vmatpush1.bf16.msra.mxu1 %v6706_v54  ;;  %v9117_v53 = vld [vmem:[#allocation43_spill] sm:$0xff] }
 0x33b   : > { %3027 = vmatprep.subr.bf16.mxu0 %v9108_v18  ;;  %3068 = vmatprep.subr.bf16.mxu1 %v9109_v37  ;;  %v9158_v37 = vld [vmem:[#allocation154_spill] sm:$0xff] }
 0x33e   : > { %3028 = vmatpush1.bf16.msra.mxu0 %v9110_v38  ;;  %3069 = vmatpush1.bf16.msra.mxu1 %v9111_v61  ;;  %v9157_v38 = vld [vmem:[#allocation153_spill] sm:$0xff] }
 0x33f   : > { %3029 = vmatprep.subr.bf16.mxu0 %v9112_v40  ;;  %3070 = vmatprep.subr.bf16.mxu1 %v9113_v45  ;;  %v9118_v45 = vld [vmem:[#allocation50_spill] sm:$0xff]  ;;  %v9156_v40 = vld [vmem:[#allocation152_spill] sm:$0xff] }
 0x342   : > { %3030 = vmatpush1.bf16.msra.mxu0 %v9114_v46  ;;  %3071 = vmatpush1.bf16.msra.mxu1 %v9115_v48  ;;  %v9119_v46 = vld [vmem:[#allocation51_spill] sm:$0xff] }
 0x343   : > { %3031 = vmatprep.subr.bf16.mxu0 %v9116_v49  ;;  %3072 = vmatprep.subr.bf16.mxu1 %v9117_v53  ;;  %v9120_v49 = vld [vmem:[#allocation53_spill] sm:$0xff]  ;;  %v9121_v53 = vld [vmem:[#allocation54_spill] sm:$0xff]  ;;  %v9155_v48 = vld [vmem:[#allocation151_spill] sm:$0xff] }
 0x346   : > { %3032 = vmatpush1.bf16.msra.mxu0 %v6755_v14  ;;  %3073 = vmatpush1.bf16.msra.mxu1 %v6760_v15  ;;  %v9122_v14 = vld [vmem:[#allocation55_spill] sm:$0xff]  ;;  %v9123_v15 = vld [vmem:[#allocation56_spill] sm:$0xff] }
 0x347   : > { %3033 = vmatprep.subr.bf16.mxu0 %v6762_v16  ;;  %3074 = vmatprep.subr.bf16.mxu1 %v6765_v17  ;;  %v9124_v16 = vld [vmem:[#allocation57_spill] sm:$0xff]  ;;  %v9125_v17 = vld [vmem:[#allocation58_spill] sm:$0xff] }
 0x34a   : > { %3034 = vmatpush1.bf16.msra.mxu0 %v6775_v23  ;;  %3075 = vmatpush1.bf16.msra.mxu1 %v6779_v24  ;;  %v9126_v23 = vld [vmem:[#allocation59_spill] sm:$0xff]  ;;  %v9127_v24 = vld [vmem:[#allocation60_spill] sm:$0xff] }
 0x34b   : > { %3035 = vmatprep.subr.bf16.mxu0 %v9118_v45  ;;  %3076 = vmatprep.subr.bf16.mxu1 %v9119_v46  ;;  %v9128_v45 = vld [vmem:[#allocation61_spill] sm:$0xff]  ;;  %v9129_v46 = vld [vmem:[#allocation62_spill] sm:$0xff] }
 0x34e   : > { %3036 = vmatpush1.bf16.msra.mxu0 %v6794_v34  ;;  %3077 = vmatpush1.bf16.msra.mxu1 %v9120_v49  ;;  %v9130_v34 = vld [vmem:[#allocation63_spill] sm:$0xff]  ;;  %v9131_v49 = vld [vmem:[#allocation64_spill] sm:$0xff] }
 0x34f   : > { %3037 = vmatprep.subr.bf16.mxu0 %v9121_v53  ;;  %3078 = vmatprep.subr.bf16.mxu1 %v9122_v14  ;;  %v9132_v53 = vld [vmem:[#allocation65_spill] sm:$0xff]  ;;  %v9133_v14 = vld [vmem:[#allocation66_spill] sm:$0xff] }
 0x352   : > { %3038 = vmatpush1.bf16.msra.mxu0 %v9123_v15  ;;  %3079 = vmatpush1.bf16.msra.mxu1 %v9124_v16  ;;  %v9134_v15 = vld [vmem:[#allocation67_spill] sm:$0xff]  ;;  %v9135_v16 = vld [vmem:[#allocation68_spill] sm:$0xff] }
 0x353   : > { %3039 = vmatprep.subr.bf16.mxu0 %v9125_v17  ;;  %3080 = vmatprep.subr.bf16.mxu1 %v9126_v23  ;;  %v9136_v17 = vld [vmem:[#allocation69_spill] sm:$0xff]  ;;  %v9137_v23 = vld [vmem:[#allocation70_spill] sm:$0xff] }
 0x356   : > { %3040 = vmatpush1.bf16.msra.mxu0 %v9127_v24  ;;  %3081 = vmatpush1.bf16.msra.mxu1 %v9128_v45  ;;  %v9138_v24 = vld [vmem:[#allocation71_spill] sm:$0xff]  ;;  %v9139_v45 = vld [vmem:[#allocation72_spill] sm:$0xff] }
 0x357   : > { %3041 = vmatprep.subr.bf16.mxu0 %v9129_v46  ;;  %3082 = vmatprep.subr.bf16.mxu1 %v9130_v34  ;;  %v9140_v46 = vld [vmem:[#allocation73_spill] sm:$0xff]  ;;  %v9141_v34 = vld [vmem:[#allocation74_spill] sm:$0xff] }
 0x35a   : > { %3042 = vmatpush1.bf16.msra.mxu0 %v9131_v49  ;;  %3083 = vmatpush1.bf16.msra.mxu1 %v9132_v53  ;;  %v9142_v49 = vld [vmem:[#allocation75_spill] sm:$0xff]  ;;  %v9143_v53 = vld [vmem:[#allocation76_spill] sm:$0xff] }
 0x35b   : > { %3043 = vmatprep.subr.bf16.mxu0 %v9133_v14  ;;  %3084 = vmatprep.subr.bf16.mxu1 %v9134_v15  ;;  %v9144_v14 = vld [vmem:[#allocation77_spill] sm:$0xff]  ;;  %v9145_v15 = vld [vmem:[#allocation78_spill] sm:$0xff] }
 0x35e   : > { %3044 = vmatpush1.bf16.msra.mxu0 %v9135_v16  ;;  %3085 = vmatpush1.bf16.msra.mxu1 %v9136_v17  ;;  %v9146_v16 = vld [vmem:[#allocation79_spill] sm:$0xff]  ;;  %v9147_v17 = vld [vmem:[#allocation80_spill] sm:$0xff] }
 0x35f   : > { %3045 = vmatprep.subr.bf16.mxu0 %v9137_v23  ;;  %3086 = vmatprep.subr.bf16.mxu1 %v9138_v24  ;;  %v9148_v23 = vld [vmem:[#allocation81_spill] sm:$0xff]  ;;  %v9149_v24 = vld [vmem:[#allocation82_spill] sm:$0xff] }
 0x362   : > { %3046 = vmatpush1.bf16.msra.mxu0 %v9139_v45  ;;  %3087 = vmatpush1.bf16.msra.mxu1 %v9140_v46  ;;  %v9150_v45 = vld [vmem:[#allocation83_spill] sm:$0xff]  ;;  %v9151_v46 = vld [vmem:[#allocation84_spill] sm:$0xff] }
 0x363   : > { %3047 = vmatprep.subr.bf16.mxu0 %v9141_v34  ;;  %3088 = vmatprep.subr.bf16.mxu1 %v9142_v49  ;;  %v9152_v34 = vld [vmem:[#allocation85_spill] sm:$0xff]  ;;  %v9153_v49 = vld [vmem:[#allocation86_spill] sm:$0xff] }
 0x366   : > { %3048 = vmatpush1.bf16.msra.mxu0 %v9143_v53  ;;  %3089 = vmatpush1.bf16.msra.mxu1 %v9144_v14  ;;  %v9154_v53 = vld [vmem:[#allocation87_spill] sm:$0xff] }
 0x367   : > { %3049 = vmatprep.subr.bf16.mxu0 %v9145_v15  ;;  %3090 = vmatprep.subr.bf16.mxu1 %v9146_v16 }
 0x36a   : > { %3050 = vmatpush1.bf16.msra.mxu0 %v9147_v17  ;;  %3091 = vmatpush1.bf16.msra.mxu1 %v9148_v23 }
 0x36b   : > { %3051 = vmatprep.subr.bf16.mxu0 %v9149_v24  ;;  %3092 = vmatprep.subr.bf16.mxu1 %v9150_v45 }
 0x36e   : > { %3052 = vmatpush1.bf16.msra.mxu0 %v9151_v46  ;;  %3093 = vmatpush1.bf16.msra.mxu1 %v9152_v34 }
 0x36f   : > { %3103 = vmatprep.subr.bf16.mxu0 %v9153_v49  ;;  %3144 = vmatprep.subr.bf16.mxu1 %v9154_v53 }
 0x3c4   : > { %v2817_v14 = vpop.f32.mrb[40].mxu0  ;;  %v2858_v15 = vpop.f32.mrb[40].mxu1 }
 0x3c5   : > { %v2947_v16 = vadd.f32 %v2817_v14, %v9155_v48  ;;  %v2949_v17 = vadd.f32 %v2858_v15, %v9156_v40  ;;  %v2819_v61 = vpop.f32.mrb[41].mxu0  ;;  %v2860_v23 = vpop.f32.mrb[41].mxu1 }
 0x3c6   : > { %v2948_v24 = vadd.f32 %v2819_v61, %v9157_v38  ;;  %v2950_v45 = vadd.f32 %v2860_v23, %v9158_v37  ;;  %v2821_v18 = vpop.f32.mrb[42].mxu0  ;;  %v2862_v46 = vpop.f32.mrb[42].mxu1 }
 0x3c7   : > { %v2822_v54 = vpop.f32.mrb[43].mxu0  ;;  %v2863_v34 = vpop.f32.mrb[43].mxu1  ;;  %v5304_v32 = vmul.f32 -1.442695, %v2947_v16  ;;  %v5306_v49 = vmul.f32 -1.442695, %v2949_v17 }
 0x3c8   : > { %v5305_v31 = vmul.f32 -1.442695, %v2948_v24  ;;  %v5307_v53 = vmul.f32 -1.442695, %v2950_v45  ;;  %v9159_v16 = vld [vmem:[#allocation179_spill] sm:$0xff]  ;;  %v9160_v45 = vld [vmem:[#allocation180_spill] sm:$0xff] }
 0x3c9   : > { %5565 = vpow2.f32 %v5304_v32  ;;  %v9162_v24 = vld [vmem:[#allocation182_spill] sm:$0xff] }
 0x3ca   : > { %5567 = vpow2.f32 %v5306_v49 }
 0x3cb   : > { %5569 = vpow2.f32 %v5305_v31 }
 0x3cc   : > { %5571 = vpow2.f32 %v5307_v53  ;;  %v9161_v53 = vld [vmem:[#allocation181_spill] sm:$0xff] }
 0x3d3   : > { %v5566_v48 = vpop.eup %5565 }
 0x3d4   : > { %v5568_v40 = vpop.eup %5567  ;;  %v2961_v59 = vadd.f32 1.0, %v5566_v48 }
 0x3d5   : > { %v5570_v14 = vpop.eup %5569  ;;  %v2973_v38 = vadd.f32 1.0, %v5568_v40 }
 0x3d6   : > { %v5572_v15 = vpop.eup %5571  ;;  %v2962_v61 = vadd.f32 1.0, %v5570_v14  ;;  %5573 = vrcp.f32 %v2961_v59 }
 0x3d7   : > { %v2974_v37 = vadd.f32 1.0, %v5572_v15  ;;  %5575 = vrcp.f32 %v2973_v38 }
 0x3d8   : > { %5577 = vrcp.f32 %v2962_v61 }
 0x3d9   : > { %5579 = vrcp.f32 %v2974_v37 }
 0x3e0   : > { %v5574_v38 = vpop.eup %5573 }
 0x3e1   : > { %v5576_v61 = vpop.eup %5575 }
 0x404   : > { %v2899_v46 = vpop.f32.mrb[44].mxu0  ;;  %v2940_v54 = vpop.f32.mrb[44].mxu1 }
 0x405   : > { %v2951_v17 = vadd.f32 %v2899_v46, %v9159_v16  ;;  %v2953_v32 = vadd.f32 %v2940_v54, %v9160_v45  ;;  %v2901_v49 = vpop.f32.mrb[45].mxu0  ;;  %v2942_v31 = vpop.f32.mrb[45].mxu1  ;;  %v2993_v45 = vmul.f32 %v5576_v61, %v7504_v3 }
 0x406   : > { %v2952_v23 = vadd.f32 %v2901_v49, %v9161_v53  ;;  %v2954_v34 = vadd.f32 %v2942_v31, %v9162_v24  ;;  %v2903_v18 = vpop.f32.mrb[46].mxu0  ;;  %v2944_v48 = vpop.f32.mrb[46].mxu1 }
 0x407   : > { %5581 = vtanh.f32 %v2951_v17  ;;  %v5308_v40 = vmul.f32 -1.442695, %v2953_v32  ;;  %v2904_v59 = vpop.f32.mrb[47].mxu0  ;;  %v2945_v14 = vpop.f32.mrb[47].mxu1 }
 0x408   : > { %5583 = vtanh.f32 %v2952_v23  ;;  %v5309_v15 = vmul.f32 -1.442695, %v2954_v34  ;;  %v5578_v46 = vpop.eup %5577 }
 0x409   : > { %5585 = vpow2.f32 %v5308_v40  ;;  %v5580_v54 = vpop.eup %5579 }
 0x40a   : > { %5587 = vpow2.f32 %v5309_v15  ;;  %v2994_v53 = vmul.f32 %v5580_v54, %v7506_v36  ;;  %v9163_v54 = vld [vmem:[#allocation106_spill] sm:$0xff] }
 0x411   : > { %v5582_v16 = vpop.eup %5581 }
 0x412   : > { %v5584_v37 = vpop.eup %5583  ;;  %v2995_v49 = vmul.f32 %v5582_v16, %v5574_v38  ;;  %v9164_v16 = vld [vmem:[#allocation107_spill] sm:$0xff] }
 0x413   : > { %v5586_v31 = vpop.eup %5585  ;;  %v2996_v17 = vmul.f32 %v5584_v37, %v5578_v46  ;;  %v9165_v37 = vld [vmem:[#allocation108_spill] sm:$0xff] }
 0x414   : > { %v5588_v32 = vpop.eup %5587  ;;  %v7655_v24 = vadd.f32 %v2995_v49, %v2993_v45  ;;  %v2987_v23 = vadd.f32 1.0, %v5586_v31  ;;  %v9166_v45 = vld [vmem:[#allocation109_spill] sm:$0xff]  ;;  %v9167_v49 = vld [vmem:[#allocation110_spill] sm:$0xff]  ;;  %v9168_v31 = vld [vmem:[#allocation111_spill] sm:$0xff] }
 0x415   : > { %v7657_v34 = vadd.f32 %v2996_v17, %v2994_v53  ;;  %v2988_v18 = vadd.f32 1.0, %v5588_v32  ;;  %v9169_v53 = vld [vmem:[#allocation112_spill] sm:$0xff]  ;;  %v9170_v17 = vld [vmem:[#allocation113_spill] sm:$0xff]  ;;  %v9171_v32 = vld [vmem:[#allocation114_spill] sm:$0xff] }
 0x416   : > { %5589 = vtanh.f32 %v7655_v24 }
 0x417   : > { %5591 = vrcp.f32 %v2987_v23  ;;  %v9172_v23 = vld [vmem:[#allocation115_spill] sm:$0xff] }
 0x418   : > { %5593 = vtanh.f32 %v7657_v34 }
 0x419   : > { %5595 = vrcp.f32 %v2988_v18  ;;  %v9173_v18 = vld [vmem:[#allocation116_spill] sm:$0xff] }
 0x420   : > { %v5590_v48 = vpop.eup %5589 }
 0x421   : > { %v5592_v3 = vpop.eup %5591 }
 0x422   : > { %v5594_v40 = vpop.eup %5593  ;;  %v3001_v59 = vmul.f32 %v5592_v3, %v5590_v48  ;;  %v9174_v48 = vld [vmem:[#allocation117_spill] sm:$0xff]  ;;  %v9175_v3 = vld [vmem:[#allocation118_spill] sm:$0xff] }
 0x423   : > { %v5596_v14 = vpop.eup %5595 }
 0x424   : > { %v3002_v36 = vmul.f32 %v5596_v14, %v5594_v40  ;;  %v7661_v15 = vpack.c.bf16 %v3001_v59, %v3001_v59  ;;  %v9176_v40 = vld [vmem:[#allocation119_spill] sm:$0xff]  ;;  %v9177_v59 = vld [vmem:[#allocation120_spill] sm:$0xff]  ;;  %v9178_v14 = vld [vmem:[#allocation121_spill] sm:$0xff] }
 0x426   : > { %v3004_v38 = vpack.c.bf16 %v3002_v36, %v3002_v36  ;;  %v3007_v61 = vrot.slane %v7661_v15, 4  ;;  %v9179_v36 = vld [vmem:[#allocation122_spill] sm:$0xff] }
 0x428   : > { %v3008_v46 = vrot.slane %v3004_v38, 4  ;;  %3053 = vmatprep.mubr.bf16.mxu0 %v3004_v38  ;;  %3094 = vmatprep.mubr.bf16.mxu1 %v3004_v38  ;;  %3011 = vst [vmem:[#allocation2] sm:$0xf0] %v3007_v61  ;;  %v9181_v61 = vld [vmem:[#allocation124_spill] sm:$0xff] }
 0x429   : > { %3054 = vmatmul.mubr.bf16.vlgmr.msra.gmra.mrb[48].mxu0 %v7661_v15  ;;  %3095 = vmatmul.mubr.bf16.vlgmr.msra.gmra.mrb[48].mxu1 %v7661_v15 }
 0x42a   : > { %3012 = vst [vmem:[#allocation2 + $0x8] sm:$0xf0] %v3008_v46  ;;  %3104 = vmatpush1.bf16.msra.mxu0 %v9059_v44  ;;  %3145 = vmatpush1.bf16.msra.mxu1 %v9060_v62  ;;  %v9182_v46 = vld [vmem:[#allocation128_spill] sm:$0xff] }
 0x42b   : > { %3135 = vmatprep.mubr.bf16.mxu0 %v3004_v38  ;;  %3176 = vmatprep.mubr.bf16.mxu1 %v3004_v38  ;;  %v9180_v38 = vld [vmem:[#allocation123_spill] sm:$0xff] }
 0x42c   : > { %3105 = vmatprep.subr.bf16.mxu0 %v9061_v39  ;;  %3146 = vmatprep.subr.bf16.mxu1 %v9062_v26 }
 0x42e   : > { %3106 = vmatpush1.bf16.msra.mxu0 %v9063_v9  ;;  %3147 = vmatpush1.bf16.msra.mxu1 %v9064_v7 }
 0x42f   : > { %3107 = vmatprep.subr.bf16.mxu0 %v9065_v25  ;;  %3148 = vmatprep.subr.bf16.mxu1 %v9066_v10 }
 0x432   : > { %3108 = vmatpush1.bf16.msra.mxu0 %v9067_v33  ;;  %3149 = vmatpush1.bf16.msra.mxu1 %v9068_v19 }
 0x433   : > { %3109 = vmatprep.subr.bf16.mxu0 %v9069_v0  ;;  %3150 = vmatprep.subr.bf16.mxu1 %v9070_v47 }
 0x436   : > { %3110 = vmatpush1.bf16.msra.mxu0 %v9071_v63  ;;  %3151 = vmatpush1.bf16.msra.mxu1 %v9072_v1 }
 0x437   : > { %3111 = vmatprep.subr.bf16.mxu0 %v9073_v6  ;;  %3152 = vmatprep.subr.bf16.mxu1 %v9074_v8 }
 0x43a   : > { %3112 = vmatpush1.bf16.msra.mxu0 %v9075_v58  ;;  %3153 = vmatpush1.bf16.msra.mxu1 %v9076_v56 }
 0x43b   : > { %3113 = vmatprep.subr.bf16.mxu0 %v9163_v54  ;;  %3154 = vmatprep.subr.bf16.mxu1 %v9164_v16 }
 0x43e   : > { %3114 = vmatpush1.bf16.msra.mxu0 %v9165_v37  ;;  %3155 = vmatpush1.bf16.msra.mxu1 %v9166_v45 }
 0x43f   : > { %3115 = vmatprep.subr.bf16.mxu0 %v9167_v49  ;;  %3156 = vmatprep.subr.bf16.mxu1 %v9168_v31 }
 0x442   : > { %3116 = vmatpush1.bf16.msra.mxu0 %v9169_v53  ;;  %3157 = vmatpush1.bf16.msra.mxu1 %v9170_v17 }
 0x443   : > { %3117 = vmatprep.subr.bf16.mxu0 %v9171_v32  ;;  %3158 = vmatprep.subr.bf16.mxu1 %v9172_v23 }
 0x446   : > { %3118 = vmatpush1.bf16.msra.mxu0 %v9173_v18  ;;  %3159 = vmatpush1.bf16.msra.mxu1 %v9174_v48 }
 0x447   : > { %3119 = vmatprep.subr.bf16.mxu0 %v9175_v3  ;;  %3160 = vmatprep.subr.bf16.mxu1 %v9176_v40 }
 0x44a   : > { %3120 = vmatpush1.bf16.msra.mxu0 %v9177_v59  ;;  %3161 = vmatpush1.bf16.msra.mxu1 %v9178_v14 }
 0x44b   : > { %3121 = vmatprep.subr.bf16.mxu0 %v9179_v36  ;;  %3162 = vmatprep.subr.bf16.mxu1 %v9180_v38 }
 0x44e   : > { %3122 = vmatpush1.bf16.msra.mxu0 %v9181_v61  ;;  %3163 = vmatpush1.bf16.msra.mxu1 %v9096_v43 }
 0x44f   : > { %3123 = vmatprep.subr.bf16.mxu0 %v9097_v4  ;;  %3164 = vmatprep.subr.bf16.mxu1 %v9098_v55 }
 0x452   : > { %3124 = vmatpush1.bf16.msra.mxu0 %v9182_v46  ;;  %3165 = vmatpush1.bf16.msra.mxu1 %v9100_v41 }
 0x453   : > { %3125 = vmatprep.subr.bf16.mxu0 %v9101_v51  ;;  %3166 = vmatprep.subr.bf16.mxu1 %v9102_v35 }
 0x456   : > { %3126 = vmatpush1.bf16.msra.mxu0 %v9103_v50  ;;  %3167 = vmatpush1.bf16.msra.mxu1 %v9104_v20 }
 0x457   : > { %3127 = vmatprep.subr.bf16.mxu0 %v9105_v52  ;;  %3168 = vmatprep.subr.bf16.mxu1 %v9106_v29  ;;  %v9252_v29 = vld [vmem:[#allocation157_spill] sm:$0xff]  ;;  %v9253_v52 = vld [vmem:[#allocation158_spill] sm:$0xff] }
 0x45a   : > { %3128 = vmatpush1.bf16.msra.mxu0 %v7140_v60  ;;  %3169 = vmatpush1.bf16.msra.mxu1 %v7144_v42  ;;  %v9251_v42 = vld [vmem:[#allocation156_spill] sm:$0xff] }
 0x45b   : > { %3129 = vmatprep.subr.bf16.mxu0 %v7146_v22  ;;  %3170 = vmatprep.subr.bf16.mxu1 %v9107_v5  ;;  %v9183_v22 = vld [vmem:[#allocation149_spill] sm:$0xff]  ;;  %v9184_v5 = vld [vmem:[#allocation22_spill] sm:$0xff] }
 0x45e   : > { %3130 = vmatpush1.bf16.msra.mxu0 %v7156_v21  ;;  %3171 = vmatpush1.bf16.msra.mxu1 %v7160_v57  ;;  %v9185_v21 = vld [vmem:[#allocation23_spill] sm:$0xff] }
 0x45f   : > { %3131 = vmatprep.subr.bf16.mxu0 %v7162_v27  ;;  %3172 = vmatprep.subr.bf16.mxu1 %v7165_v12  ;;  %v9186_v12 = vld [vmem:[#allocation24_spill] sm:$0xff]  ;;  %v9195_v27 = vld [vmem:[#allocation33_spill] sm:$0xff]  ;;  %v9250_v57 = vld [vmem:[#allocation155_spill] sm:$0xff] }
 0x462   : > { %3132 = vmatpush1.bf16.msra.mxu0 %v7172_v30  ;;  %3173 = vmatpush1.bf16.msra.mxu1 %v7176_v13  ;;  %v9187_v30 = vld [vmem:[#allocation25_spill] sm:$0xff]  ;;  %v9188_v13 = vld [vmem:[#allocation26_spill] sm:$0xff] }
 0x463   : > { %3133 = vmatprep.subr.bf16.mxu0 %v7178_v2  ;;  %3174 = vmatprep.subr.bf16.mxu1 %v7181_v28  ;;  %v9189_v2 = vld [vmem:[#allocation27_spill] sm:$0xff]  ;;  %v9190_v28 = vld [vmem:[#allocation28_spill] sm:$0xff] }
 0x466   : > { %3134 = vmatpush1.bf16.msra.mxu0 %v7184_v11  ;;  %3175 = vmatpush1.bf16.msra.mxu1 %v9183_v22  ;;  %v9191_v11 = vld [vmem:[#allocation29_spill] sm:$0xff]  ;;  %v9192_v22 = vld [vmem:[#allocation30_spill] sm:$0xff] }
 0x467   : > { %3253 = vmatprep.subr.bf16.mxu0 %v9184_v5  ;;  %3294 = vmatprep.subr.bf16.mxu1 %v9185_v21  ;;  %v9193_v5 = vld [vmem:[#allocation31_spill] sm:$0xff]  ;;  %v9194_v21 = vld [vmem:[#allocation32_spill] sm:$0xff] }
 0x469   : > { %3136 = vmatmul.mubr.bf16.vlgmr.msra.gmra.mrb[52].mxu0 %v7661_v15  ;;  %3177 = vmatmul.mubr.bf16.vlgmr.msra.gmra.mrb[52].mxu1 %v7661_v15  ;;  %v9196_v15 = vld [vmem:[#allocation34_spill] sm:$0xff] }
 0x46a   : > { %3254 = vmatpush1.bf16.msra.mxu0 %v9186_v12  ;;  %3295 = vmatpush1.bf16.msra.mxu1 %v9187_v30  ;;  %v9197_v12 = vld [vmem:[#allocation35_spill] sm:$0xff]  ;;  %v9198_v30 = vld [vmem:[#allocation36_spill] sm:$0xff] }
 0x46b   : > { %3255 = vmatprep.subr.bf16.mxu0 %v9188_v13  ;;  %3296 = vmatprep.subr.bf16.mxu1 %v9189_v2  ;;  %v9199_v13 = vld [vmem:[#allocation37_spill] sm:$0xff]  ;;  %v9200_v2 = vld [vmem:[#allocation38_spill] sm:$0xff] }
 0x46e   : > { %3256 = vmatpush1.bf16.msra.mxu0 %v9190_v28  ;;  %3297 = vmatpush1.bf16.msra.mxu1 %v9191_v11  ;;  %v9201_v28 = vld [vmem:[#allocation39_spill] sm:$0xff]  ;;  %v9202_v11 = vld [vmem:[#allocation40_spill] sm:$0xff] }
 0x46f   : > { %3257 = vmatprep.subr.bf16.mxu0 %v9192_v22  ;;  %3298 = vmatprep.subr.bf16.mxu1 %v9193_v5  ;;  %v9203_v22 = vld [vmem:[#allocation41_spill] sm:$0xff]  ;;  %v9204_v5 = vld [vmem:[#allocation42_spill] sm:$0xff] }
 0x472   : > { %3258 = vmatpush1.bf16.msra.mxu0 %v9194_v21  ;;  %3299 = vmatpush1.bf16.msra.mxu1 %v9195_v27  ;;  %v9205_v21 = vld [vmem:[#allocation43_spill] sm:$0xff]  ;;  %v9206_v27 = vld [vmem:[#allocation44_spill] sm:$0xff] }
 0x473   : > { %3259 = vmatprep.subr.bf16.mxu0 %v9196_v15  ;;  %3300 = vmatprep.subr.bf16.mxu1 %v9197_v12  ;;  %v9207_v15 = vld [vmem:[#allocation45_spill] sm:$0xff]  ;;  %v9208_v12 = vld [vmem:[#allocation46_spill] sm:$0xff] }
 0x476   : > { %3260 = vmatpush1.bf16.msra.mxu0 %v9198_v30  ;;  %3301 = vmatpush1.bf16.msra.mxu1 %v9199_v13  ;;  %v9209_v30 = vld [vmem:[#allocation47_spill] sm:$0xff]  ;;  %v9210_v13 = vld [vmem:[#allocation48_spill] sm:$0xff] }
 0x477   : > { %3261 = vmatprep.subr.bf16.mxu0 %v9200_v2  ;;  %3302 = vmatprep.subr.bf16.mxu1 %v9201_v28  ;;  %v9211_v2 = vld [vmem:[#allocation49_spill] sm:$0xff]  ;;  %v9212_v28 = vld [vmem:[#allocation50_spill] sm:$0xff] }
 0x47a   : > { %3262 = vmatpush1.bf16.msra.mxu0 %v9202_v11  ;;  %3303 = vmatpush1.bf16.msra.mxu1 %v9203_v22  ;;  %v9213_v11 = vld [vmem:[#allocation51_spill] sm:$0xff]  ;;  %v9214_v22 = vld [vmem:[#allocation52_spill] sm:$0xff] }
 0x47b   : > { %3263 = vmatprep.subr.bf16.mxu0 %v9204_v5  ;;  %3304 = vmatprep.subr.bf16.mxu1 %v9205_v21  ;;  %v9215_v5 = vld [vmem:[#allocation53_spill] sm:$0xff]  ;;  %v9216_v21 = vld [vmem:[#allocation54_spill] sm:$0xff] }
 0x47e   : > { %3264 = vmatpush1.bf16.msra.mxu0 %v9206_v27  ;;  %3305 = vmatpush1.bf16.msra.mxu1 %v9207_v15  ;;  %v9217_v27 = vld [vmem:[#allocation55_spill] sm:$0xff]  ;;  %v9218_v15 = vld [vmem:[#allocation56_spill] sm:$0xff] }
 0x47f   : > { %3265 = vmatprep.subr.bf16.mxu0 %v9208_v12  ;;  %3306 = vmatprep.subr.bf16.mxu1 %v9209_v30  ;;  %v9219_v12 = vld [vmem:[#allocation57_spill] sm:$0xff]  ;;  %v9220_v30 = vld [vmem:[#allocation58_spill] sm:$0xff] }
 0x482   : > { %3266 = vmatpush1.bf16.msra.mxu0 %v9210_v13  ;;  %3307 = vmatpush1.bf16.msra.mxu1 %v9211_v2  ;;  %v9221_v13 = vld [vmem:[#allocation59_spill] sm:$0xff]  ;;  %v9222_v2 = vld [vmem:[#allocation60_spill] sm:$0xff] }
 0x483   : > { %3267 = vmatprep.subr.bf16.mxu0 %v9212_v28  ;;  %3308 = vmatprep.subr.bf16.mxu1 %v9213_v11  ;;  %v9223_v28 = vld [vmem:[#allocation61_spill] sm:$0xff]  ;;  %v9224_v11 = vld [vmem:[#allocation62_spill] sm:$0xff] }
 0x486   : > { %3268 = vmatpush1.bf16.msra.mxu0 %v9214_v22  ;;  %3309 = vmatpush1.bf16.msra.mxu1 %v9215_v5  ;;  %v9225_v22 = vld [vmem:[#allocation63_spill] sm:$0xff]  ;;  %v9226_v5 = vld [vmem:[#allocation64_spill] sm:$0xff] }
 0x487   : > { %3269 = vmatprep.subr.bf16.mxu0 %v9216_v21  ;;  %3310 = vmatprep.subr.bf16.mxu1 %v9217_v27  ;;  %v9227_v21 = vld [vmem:[#allocation65_spill] sm:$0xff]  ;;  %v9228_v27 = vld [vmem:[#allocation66_spill] sm:$0xff] }
 0x48a   : > { %3270 = vmatpush1.bf16.msra.mxu0 %v9218_v15  ;;  %3311 = vmatpush1.bf16.msra.mxu1 %v9219_v12  ;;  %v9229_v15 = vld [vmem:[#allocation67_spill] sm:$0xff]  ;;  %v9230_v12 = vld [vmem:[#allocation68_spill] sm:$0xff] }
 0x48b   : > { %3271 = vmatprep.subr.bf16.mxu0 %v9220_v30  ;;  %3312 = vmatprep.subr.bf16.mxu1 %v9221_v13  ;;  %v9231_v30 = vld [vmem:[#allocation69_spill] sm:$0xff]  ;;  %v9232_v13 = vld [vmem:[#allocation70_spill] sm:$0xff] }
 0x48e   : > { %3272 = vmatpush1.bf16.msra.mxu0 %v9222_v2  ;;  %3313 = vmatpush1.bf16.msra.mxu1 %v9223_v28  ;;  %v9233_v2 = vld [vmem:[#allocation71_spill] sm:$0xff]  ;;  %v9234_v28 = vld [vmem:[#allocation72_spill] sm:$0xff] }
 0x48f   : > { %3273 = vmatprep.subr.bf16.mxu0 %v9224_v11  ;;  %3314 = vmatprep.subr.bf16.mxu1 %v9225_v22  ;;  %v9235_v11 = vld [vmem:[#allocation73_spill] sm:$0xff]  ;;  %v9236_v22 = vld [vmem:[#allocation74_spill] sm:$0xff] }
 0x492   : > { %3274 = vmatpush1.bf16.msra.mxu0 %v9226_v5  ;;  %3315 = vmatpush1.bf16.msra.mxu1 %v9227_v21  ;;  %v9237_v5 = vld [vmem:[#allocation75_spill] sm:$0xff]  ;;  %v9238_v21 = vld [vmem:[#allocation76_spill] sm:$0xff] }
 0x493   : > { %3275 = vmatprep.subr.bf16.mxu0 %v9228_v27  ;;  %3316 = vmatprep.subr.bf16.mxu1 %v9229_v15  ;;  %v9239_v27 = vld [vmem:[#allocation77_spill] sm:$0xff]  ;;  %v9240_v15 = vld [vmem:[#allocation78_spill] sm:$0xff] }
 0x496   : > { %3276 = vmatpush1.bf16.msra.mxu0 %v9230_v12  ;;  %3317 = vmatpush1.bf16.msra.mxu1 %v9231_v30  ;;  %v9241_v12 = vld [vmem:[#allocation79_spill] sm:$0xff]  ;;  %v9242_v30 = vld [vmem:[#allocation80_spill] sm:$0xff] }
 0x497   : > { %3277 = vmatprep.subr.bf16.mxu0 %v9232_v13  ;;  %3318 = vmatprep.subr.bf16.mxu1 %v9233_v2  ;;  %v9243_v13 = vld [vmem:[#allocation81_spill] sm:$0xff]  ;;  %v9244_v2 = vld [vmem:[#allocation82_spill] sm:$0xff] }
 0x49a   : > { %3278 = vmatpush1.bf16.msra.mxu0 %v9234_v28  ;;  %3319 = vmatpush1.bf16.msra.mxu1 %v9235_v11  ;;  %v9245_v28 = vld [vmem:[#allocation83_spill] sm:$0xff]  ;;  %v9246_v11 = vld [vmem:[#allocation84_spill] sm:$0xff] }
 0x49b   : > { %3279 = vmatprep.subr.bf16.mxu0 %v9236_v22  ;;  %3320 = vmatprep.subr.bf16.mxu1 %v9237_v5  ;;  %v9247_v22 = vld [vmem:[#allocation85_spill] sm:$0xff]  ;;  %v9248_v5 = vld [vmem:[#allocation86_spill] sm:$0xff] }
 0x49e   : > { %3280 = vmatpush1.bf16.msra.mxu0 %v9238_v21  ;;  %3321 = vmatpush1.bf16.msra.mxu1 %v9239_v27  ;;  %v9249_v21 = vld [vmem:[#allocation87_spill] sm:$0xff] }
 0x49f   : > { %3281 = vmatprep.subr.bf16.mxu0 %v9240_v15  ;;  %3322 = vmatprep.subr.bf16.mxu1 %v9241_v12 }
 0x4a2   : > { %3282 = vmatpush1.bf16.msra.mxu0 %v9242_v30  ;;  %3323 = vmatpush1.bf16.msra.mxu1 %v9243_v13 }
 0x4a3   : > { %3283 = vmatprep.subr.bf16.mxu0 %v9244_v2  ;;  %3324 = vmatprep.subr.bf16.mxu1 %v9245_v28 }
 0x4a6   : > { %3284 = vmatpush1.bf16.msra.mxu0 %v9246_v11  ;;  %3325 = vmatpush1.bf16.msra.mxu1 %v9247_v22 }
 0x4a7   : > { %3335 = vmatprep.subr.bf16.mxu0 %v9248_v5  ;;  %3376 = vmatprep.subr.bf16.mxu1 %v9249_v21 }
 0x4fc   : > { %v3055_v27 = vpop.f32.mrb[48].mxu0  ;;  %v3096_v15 = vpop.f32.mrb[48].mxu1 }
 0x4fd   : > { %v3185_v12 = vadd.f32 %v3055_v27, %v9250_v57  ;;  %v3187_v30 = vadd.f32 %v3096_v15, %v9251_v42  ;;  %v3057_v60 = vpop.f32.mrb[49].mxu0  ;;  %v3098_v13 = vpop.f32.mrb[49].mxu1 }
 0x4fe   : > { %v3186_v2 = vadd.f32 %v3057_v60, %v9252_v29  ;;  %v3188_v28 = vadd.f32 %v3098_v13, %v9253_v52  ;;  %v3059_v20 = vpop.f32.mrb[50].mxu0  ;;  %v3100_v11 = vpop.f32.mrb[50].mxu1 }
 0x4ff   : > { %v3060_v50 = vpop.f32.mrb[51].mxu0  ;;  %v3101_v22 = vpop.f32.mrb[51].mxu1  ;;  %v5310_v35 = vmul.f32 -1.442695, %v3185_v12  ;;  %v5312_v5 = vmul.f32 -1.442695, %v3187_v30 }
 0x500   : > { %v5311_v51 = vmul.f32 -1.442695, %v3186_v2  ;;  %v5313_v21 = vmul.f32 -1.442695, %v3188_v28  ;;  %v9254_v12 = vld [vmem:[#allocation183_spill] sm:$0xff]  ;;  %v9255_v2 = vld [vmem:[#allocation184_spill] sm:$0xff] }
 0x501   : > { %5597 = vpow2.f32 %v5310_v35  ;;  %v9257_v50 = vld [vmem:[#allocation186_spill] sm:$0xff] }
 0x502   : > { %5599 = vpow2.f32 %v5312_v5 }
 0x503   : > { %5601 = vpow2.f32 %v5311_v51 }
 0x504   : > { %5603 = vpow2.f32 %v5313_v21  ;;  %v9256_v21 = vld [vmem:[#allocation185_spill] sm:$0xff] }
 0x50b   : > { %v5598_v57 = vpop.eup %5597 }
 0x50c   : > { %v5600_v42 = vpop.eup %5599  ;;  %v3199_v41 = vadd.f32 1.0, %v5598_v57 }
 0x50d   : > { %v5602_v27 = vpop.eup %5601  ;;  %v3211_v60 = vadd.f32 1.0, %v5600_v42 }
 0x50e   : > { %v5604_v15 = vpop.eup %5603  ;;  %v3200_v29 = vadd.f32 1.0, %v5602_v27  ;;  %5605 = vrcp.f32 %v3199_v41 }
 0x50f   : > { %v3212_v13 = vadd.f32 1.0, %v5604_v15  ;;  %5607 = vrcp.f32 %v3211_v60 }
 0x510   : > { %5609 = vrcp.f32 %v3200_v29 }
 0x511   : > { %5611 = vrcp.f32 %v3212_v13 }
 0x518   : > { %v5606_v60 = vpop.eup %5605 }
 0x519   : > { %v5608_v29 = vpop.eup %5607 }
 0x53c   : > { %v3137_v11 = vpop.f32.mrb[52].mxu0  ;;  %v3178_v22 = vpop.f32.mrb[52].mxu1 }
 0x53d   : > { %v3189_v30 = vadd.f32 %v3137_v11, %v9254_v12  ;;  %v3191_v28 = vadd.f32 %v3178_v22, %v9255_v2  ;;  %v3139_v5 = vpop.f32.mrb[53].mxu0  ;;  %v3180_v51 = vpop.f32.mrb[53].mxu1  ;;  %v3231_v2 = vmul.f32 %v5608_v29, %v7655_v24  ;;  %v9258_v29 = vld [vmem:[#allocation129_spill] sm:$0xff] }
 0x53e   : > { %v3190_v35 = vadd.f32 %v3139_v5, %v9256_v21  ;;  %v3192_v20 = vadd.f32 %v3180_v51, %v9257_v50  ;;  %v3141_v52 = vpop.f32.mrb[54].mxu0  ;;  %v3182_v57 = vpop.f32.mrb[54].mxu1 }
 0x53f   : > { %5613 = vtanh.f32 %v3189_v30  ;;  %v5314_v42 = vmul.f32 -1.442695, %v3191_v28  ;;  %v3142_v41 = vpop.f32.mrb[55].mxu0  ;;  %v3183_v27 = vpop.f32.mrb[55].mxu1 }
 0x540   : > { %5615 = vtanh.f32 %v3190_v35  ;;  %v5315_v15 = vmul.f32 -1.442695, %v3192_v20  ;;  %v5610_v11 = vpop.eup %5609 }
 0x541   : > { %5617 = vpow2.f32 %v5314_v42  ;;  %v5612_v22 = vpop.eup %5611 }
 0x542   : > { %5619 = vpow2.f32 %v5315_v15  ;;  %v3232_v21 = vmul.f32 %v5612_v22, %v7657_v34  ;;  %v9260_v22 = vld [vmem:[#allocation131_spill] sm:$0xff] }
 0x549   : > { %v5614_v12 = vpop.eup %5613 }
 0x54a   : > { %v5616_v13 = vpop.eup %5615  ;;  %v3233_v5 = vmul.f32 %v5614_v12, %v5606_v60  ;;  %v9261_v12 = vld [vmem:[#allocation132_spill] sm:$0xff] }
 0x54b   : > { %v5618_v51 = vpop.eup %5617  ;;  %v3234_v30 = vmul.f32 %v5616_v13, %v5610_v11  ;;  %v9259_v11 = vld [vmem:[#allocation130_spill] sm:$0xff]  ;;  %v9262_v13 = vld [vmem:[#allocation133_spill] sm:$0xff] }
 0x54c   : > { %v5620_v28 = vpop.eup %5619  ;;  %v7806_v50 = vadd.f32 %v3233_v5, %v3231_v2  ;;  %v3225_v35 = vadd.f32 1.0, %v5618_v51  ;;  %v9263_v2 = vld [vmem:[#allocation134_spill] sm:$0xff]  ;;  %v9264_v5 = vld [vmem:[#allocation135_spill] sm:$0xff]  ;;  %v9265_v51 = vld [vmem:[#allocation136_spill] sm:$0xff] }
 0x54d   : > { %v7808_v20 = vadd.f32 %v3234_v30, %v3232_v21  ;;  %v3226_v52 = vadd.f32 1.0, %v5620_v28  ;;  %v9266_v21 = vld [vmem:[#allocation137_spill] sm:$0xff]  ;;  %v9267_v30 = vld [vmem:[#allocation138_spill] sm:$0xff]  ;;  %v9268_v28 = vld [vmem:[#allocation139_spill] sm:$0xff] }
 0x54e   : > { %5621 = vtanh.f32 %v7806_v50 }
 0x54f   : > { %5623 = vrcp.f32 %v3225_v35  ;;  %v9269_v35 = vld [vmem:[#allocation140_spill] sm:$0xff] }
 0x550   : > { %5625 = vtanh.f32 %v7808_v20 }
 0x551   : > { %5627 = vrcp.f32 %v3226_v52  ;;  %v9270_v52 = vld [vmem:[#allocation141_spill] sm:$0xff] }
 0x558   : > { %v5622_v57 = vpop.eup %5621 }
 0x559   : > { %v5624_v24 = vpop.eup %5623 }
 0x55a   : > { %v5626_v42 = vpop.eup %5625  ;;  %v3239_v41 = vmul.f32 %v5624_v24, %v5622_v57  ;;  %v9271_v57 = vld [vmem:[#allocation142_spill] sm:$0xff]  ;;  %v9272_v24 = vld [vmem:[#allocation143_spill] sm:$0xff] }
 0x55b   : > { %v5628_v27 = vpop.eup %5627 }
 0x55c   : > { %v3240_v34 = vmul.f32 %v5628_v27, %v5626_v42  ;;  %v7812_v15 = vpack.c.bf16 %v3239_v41, %v3239_v41  ;;  %v9273_v42 = vld [vmem:[#allocation144_spill] sm:$0xff]  ;;  %v9274_v41 = vld [vmem:[#allocation145_spill] sm:$0xff]  ;;  %v9275_v27 = vld [vmem:[#allocation146_spill] sm:$0xff] }
 0x55e   : > { %v3242_v60 = vpack.c.bf16 %v3240_v34, %v3240_v34  ;;  %3243 = vst [vmem:[#allocation2 + $0x10] sm:$0xf] %v7812_v15  ;;  %v9276_v34 = vld [vmem:[#allocation147_spill] sm:$0xff] }
 0x560   : > { %3244 = vst [vmem:[#allocation2 + $0x18] sm:$0xf] %v3242_v60  ;;  %3285 = vmatprep.mubr.bf16.mxu0 %v3242_v60  ;;  %3326 = vmatprep.mubr.bf16.mxu1 %v3242_v60 }
 0x561   : > { %3286 = vmatmul.mubr.bf16.vlgmr.msra.gmra.mrb[56].mxu0 %v7812_v15  ;;  %3327 = vmatmul.mubr.bf16.vlgmr.msra.gmra.mrb[56].mxu1 %v7812_v15 }
 0x562   : > { %3336 = vmatpush1.bf16.msra.mxu0 %v9059_v44  ;;  %3377 = vmatpush1.bf16.msra.mxu1 %v9060_v62 }
 0x563   : > { %3367 = vmatprep.mubr.bf16.mxu0 %v3242_v60  ;;  %3408 = vmatprep.mubr.bf16.mxu1 %v3242_v60  ;;  %v9277_v60 = vld [vmem:[#allocation148_spill] sm:$0xff] }
 0x564   : > { %3337 = vmatprep.subr.bf16.mxu0 %v9061_v39  ;;  %3378 = vmatprep.subr.bf16.mxu1 %v9062_v26 }
 0x566   : > { %3338 = vmatpush1.bf16.msra.mxu0 %v9063_v9  ;;  %3379 = vmatpush1.bf16.msra.mxu1 %v9064_v7 }
 0x567   : > { %3339 = vmatprep.subr.bf16.mxu0 %v9065_v25  ;;  %3380 = vmatprep.subr.bf16.mxu1 %v9066_v10 }
 0x56a   : > { %3340 = vmatpush1.bf16.msra.mxu0 %v9067_v33  ;;  %3381 = vmatpush1.bf16.msra.mxu1 %v9068_v19 }
 0x56b   : > { %3341 = vmatprep.subr.bf16.mxu0 %v9069_v0  ;;  %3382 = vmatprep.subr.bf16.mxu1 %v9070_v47 }
 0x56e   : > { %3342 = vmatpush1.bf16.msra.mxu0 %v9071_v63  ;;  %3383 = vmatpush1.bf16.msra.mxu1 %v9072_v1 }
 0x56f   : > { %3343 = vmatprep.subr.bf16.mxu0 %v9073_v6  ;;  %3384 = vmatprep.subr.bf16.mxu1 %v9074_v8 }
 0x572   : > { %3344 = vmatpush1.bf16.msra.mxu0 %v9075_v58  ;;  %3385 = vmatpush1.bf16.msra.mxu1 %v9076_v56 }
 0x573   : > { %3345 = vmatprep.subr.bf16.mxu0 %v9163_v54  ;;  %3386 = vmatprep.subr.bf16.mxu1 %v9164_v16 }
 0x576   : > { %3346 = vmatpush1.bf16.msra.mxu0 %v9165_v37  ;;  %3387 = vmatpush1.bf16.msra.mxu1 %v9166_v45 }
 0x577   : > { %3347 = vmatprep.subr.bf16.mxu0 %v9167_v49  ;;  %3388 = vmatprep.subr.bf16.mxu1 %v9168_v31 }
 0x57a   : > { %3348 = vmatpush1.bf16.msra.mxu0 %v9169_v53  ;;  %3389 = vmatpush1.bf16.msra.mxu1 %v9170_v17 }
 0x57b   : > { %3349 = vmatprep.subr.bf16.mxu0 %v9171_v32  ;;  %3390 = vmatprep.subr.bf16.mxu1 %v9172_v23 }
 0x57e   : > { %3350 = vmatpush1.bf16.msra.mxu0 %v9173_v18  ;;  %3391 = vmatpush1.bf16.msra.mxu1 %v9174_v48 }
 0x57f   : > { %3351 = vmatprep.subr.bf16.mxu0 %v9175_v3  ;;  %3392 = vmatprep.subr.bf16.mxu1 %v9176_v40 }
 0x582   : > { %3352 = vmatpush1.bf16.msra.mxu0 %v9177_v59  ;;  %3393 = vmatpush1.bf16.msra.mxu1 %v9178_v14 }
 0x583   : > { %3353 = vmatprep.subr.bf16.mxu0 %v9179_v36  ;;  %3394 = vmatprep.subr.bf16.mxu1 %v9180_v38 }
 0x586   : > { %3354 = vmatpush1.bf16.msra.mxu0 %v9181_v61  ;;  %3395 = vmatpush1.bf16.msra.mxu1 %v9096_v43 }
 0x587   : > { %3355 = vmatprep.subr.bf16.mxu0 %v9097_v4  ;;  %3396 = vmatprep.subr.bf16.mxu1 %v9098_v55 }
 0x58a   : > { %3356 = vmatpush1.bf16.msra.mxu0 %v9182_v46  ;;  %3397 = vmatpush1.bf16.msra.mxu1 %v9258_v29 }
 0x58b   : > { %3357 = vmatprep.subr.bf16.mxu0 %v9259_v11  ;;  %3398 = vmatprep.subr.bf16.mxu1 %v9260_v22 }
 0x58e   : > { %3358 = vmatpush1.bf16.msra.mxu0 %v9261_v12  ;;  %3399 = vmatpush1.bf16.msra.mxu1 %v9262_v13 }
 0x58f   : > { %3359 = vmatprep.subr.bf16.mxu0 %v9263_v2  ;;  %3400 = vmatprep.subr.bf16.mxu1 %v9264_v5  ;;  %v9347_v5 = vld [vmem:[#allocation161_spill] sm:$0xff]  ;;  %v9348_v2 = vld [vmem:[#allocation162_spill] sm:$0xff] }
 0x592   : > { %3360 = vmatpush1.bf16.msra.mxu0 %v9265_v51  ;;  %3401 = vmatpush1.bf16.msra.mxu1 %v9266_v21  ;;  %v9346_v21 = vld [vmem:[#allocation160_spill] sm:$0xff] }
 0x593   : > { %3361 = vmatprep.subr.bf16.mxu0 %v9267_v30  ;;  %3402 = vmatprep.subr.bf16.mxu1 %v9268_v28  ;;  %v9278_v30 = vld [vmem:[#allocation149_spill] sm:$0xff]  ;;  %v9279_v28 = vld [vmem:[#allocation22_spill] sm:$0xff] }
 0x596   : > { %3362 = vmatpush1.bf16.msra.mxu0 %v9269_v35  ;;  %3403 = vmatpush1.bf16.msra.mxu1 %v9270_v52  ;;  %v9280_v35 = vld [vmem:[#allocation23_spill] sm:$0xff] }
 0x597   : > { %3363 = vmatprep.subr.bf16.mxu0 %v9271_v57  ;;  %3404 = vmatprep.subr.bf16.mxu1 %v9272_v24  ;;  %v9281_v24 = vld [vmem:[#allocation24_spill] sm:$0xff]  ;;  %v9290_v57 = vld [vmem:[#allocation33_spill] sm:$0xff]  ;;  %v9345_v52 = vld [vmem:[#allocation159_spill] sm:$0xff] }
 0x59a   : > { %3364 = vmatpush1.bf16.msra.mxu0 %v9273_v42  ;;  %3405 = vmatpush1.bf16.msra.mxu1 %v9274_v41  ;;  %v9282_v42 = vld [vmem:[#allocation25_spill] sm:$0xff]  ;;  %v9283_v41 = vld [vmem:[#allocation26_spill] sm:$0xff] }
 0x59b   : > { %3365 = vmatprep.subr.bf16.mxu0 %v9275_v27  ;;  %3406 = vmatprep.subr.bf16.mxu1 %v9276_v34  ;;  %v9284_v27 = vld [vmem:[#allocation27_spill] sm:$0xff]  ;;  %v9285_v34 = vld [vmem:[#allocation28_spill] sm:$0xff] }
 0x59e   : > { %3366 = vmatpush1.bf16.msra.mxu0 %v9277_v60  ;;  %3407 = vmatpush1.bf16.msra.mxu1 %v9278_v30  ;;  %v9286_v60 = vld [vmem:[#allocation29_spill] sm:$0xff]  ;;  %v9287_v30 = vld [vmem:[#allocation30_spill] sm:$0xff] }
 0x59f   : > { %3491 = vmatprep.subr.bf16.mxu0 %v9279_v28  ;;  %3532 = vmatprep.subr.bf16.mxu1 %v9280_v35  ;;  %v9288_v28 = vld [vmem:[#allocation31_spill] sm:$0xff]  ;;  %v9289_v35 = vld [vmem:[#allocation32_spill] sm:$0xff] }
 0x5a1   : > { %3368 = vmatmul.mubr.bf16.vlgmr.msra.gmra.mrb[60].mxu0 %v7812_v15  ;;  %3409 = vmatmul.mubr.bf16.vlgmr.msra.gmra.mrb[60].mxu1 %v7812_v15  ;;  %v9291_v15 = vld [vmem:[#allocation34_spill] sm:$0xff] }
 0x5a2   : > { %3492 = vmatpush1.bf16.msra.mxu0 %v9281_v24  ;;  %3533 = vmatpush1.bf16.msra.mxu1 %v9282_v42  ;;  %v9292_v24 = vld [vmem:[#allocation35_spill] sm:$0xff]  ;;  %v9293_v42 = vld [vmem:[#allocation36_spill] sm:$0xff] }
 0x5a3   : > { %3493 = vmatprep.subr.bf16.mxu0 %v9283_v41  ;;  %3534 = vmatprep.subr.bf16.mxu1 %v9284_v27  ;;  %v9294_v41 = vld [vmem:[#allocation37_spill] sm:$0xff]  ;;  %v9295_v27 = vld [vmem:[#allocation38_spill] sm:$0xff] }
 0x5a6   : > { %3494 = vmatpush1.bf16.msra.mxu0 %v9285_v34  ;;  %3535 = vmatpush1.bf16.msra.mxu1 %v9286_v60  ;;  %v9296_v34 = vld [vmem:[#allocation39_spill] sm:$0xff]  ;;  %v9297_v60 = vld [vmem:[#allocation40_spill] sm:$0xff] }
 0x5a7   : > { %3495 = vmatprep.subr.bf16.mxu0 %v9287_v30  ;;  %3536 = vmatprep.subr.bf16.mxu1 %v9288_v28  ;;  %v9298_v30 = vld [vmem:[#allocation41_spill] sm:$0xff]  ;;  %v9299_v28 = vld [vmem:[#allocation42_spill] sm:$0xff] }
 0x5aa   : > { %3496 = vmatpush1.bf16.msra.mxu0 %v9289_v35  ;;  %3537 = vmatpush1.bf16.msra.mxu1 %v9290_v57  ;;  %v9300_v35 = vld [vmem:[#allocation43_spill] sm:$0xff]  ;;  %v9301_v57 = vld [vmem:[#allocation44_spill] sm:$0xff] }
 0x5ab   : > { %3497 = vmatprep.subr.bf16.mxu0 %v9291_v15  ;;  %3538 = vmatprep.subr.bf16.mxu1 %v9292_v24  ;;  %v9302_v15 = vld [vmem:[#allocation45_spill] sm:$0xff]  ;;  %v9303_v24 = vld [vmem:[#allocation46_spill] sm:$0xff] }
 0x5ae   : > { %3498 = vmatpush1.bf16.msra.mxu0 %v9293_v42  ;;  %3539 = vmatpush1.bf16.msra.mxu1 %v9294_v41  ;;  %v9304_v42 = vld [vmem:[#allocation47_spill] sm:$0xff]  ;;  %v9305_v41 = vld [vmem:[#allocation48_spill] sm:$0xff] }
 0x5af   : > { %3499 = vmatprep.subr.bf16.mxu0 %v9295_v27  ;;  %3540 = vmatprep.subr.bf16.mxu1 %v9296_v34  ;;  %v9306_v27 = vld [vmem:[#allocation49_spill] sm:$0xff]  ;;  %v9307_v34 = vld [vmem:[#allocation50_spill] sm:$0xff] }
 0x5b2   : > { %3500 = vmatpush1.bf16.msra.mxu0 %v9297_v60  ;;  %3541 = vmatpush1.bf16.msra.mxu1 %v9298_v30  ;;  %v9308_v60 = vld [vmem:[#allocation51_spill] sm:$0xff]  ;;  %v9309_v30 = vld [vmem:[#allocation52_spill] sm:$0xff] }
 0x5b3   : > { %3501 = vmatprep.subr.bf16.mxu0 %v9299_v28  ;;  %3542 = vmatprep.subr.bf16.mxu1 %v9300_v35  ;;  %v9310_v28 = vld [vmem:[#allocation53_spill] sm:$0xff]  ;;  %v9311_v35 = vld [vmem:[#allocation54_spill] sm:$0xff] }
 0x5b6   : > { %3502 = vmatpush1.bf16.msra.mxu0 %v9301_v57  ;;  %3543 = vmatpush1.bf16.msra.mxu1 %v9302_v15  ;;  %v9312_v57 = vld [vmem:[#allocation55_spill] sm:$0xff]  ;;  %v9313_v15 = vld [vmem:[#allocation56_spill] sm:$0xff] }
 0x5b7   : > { %3503 = vmatprep.subr.bf16.mxu0 %v9303_v24  ;;  %3544 = vmatprep.subr.bf16.mxu1 %v9304_v42  ;;  %v9314_v24 = vld [vmem:[#allocation57_spill] sm:$0xff]  ;;  %v9315_v42 = vld [vmem:[#allocation58_spill] sm:$0xff] }
 0x5ba   : > { %3504 = vmatpush1.bf16.msra.mxu0 %v9305_v41  ;;  %3545 = vmatpush1.bf16.msra.mxu1 %v9306_v27  ;;  %v9316_v41 = vld [vmem:[#allocation59_spill] sm:$0xff]  ;;  %v9317_v27 = vld [vmem:[#allocation60_spill] sm:$0xff] }
 0x5bb   : > { %3505 = vmatprep.subr.bf16.mxu0 %v9307_v34  ;;  %3546 = vmatprep.subr.bf16.mxu1 %v9308_v60  ;;  %v9318_v34 = vld [vmem:[#allocation61_spill] sm:$0xff]  ;;  %v9319_v60 = vld [vmem:[#allocation62_spill] sm:$0xff] }
 0x5be   : > { %3506 = vmatpush1.bf16.msra.mxu0 %v9309_v30  ;;  %3547 = vmatpush1.bf16.msra.mxu1 %v9310_v28  ;;  %v9320_v30 = vld [vmem:[#allocation63_spill] sm:$0xff]  ;;  %v9321_v28 = vld [vmem:[#allocation64_spill] sm:$0xff] }
 0x5bf   : > { %3507 = vmatprep.subr.bf16.mxu0 %v9311_v35  ;;  %3548 = vmatprep.subr.bf16.mxu1 %v9312_v57  ;;  %v9322_v35 = vld [vmem:[#allocation65_spill] sm:$0xff]  ;;  %v9323_v57 = vld [vmem:[#allocation66_spill] sm:$0xff] }
 0x5c2   : > { %3508 = vmatpush1.bf16.msra.mxu0 %v9313_v15  ;;  %3549 = vmatpush1.bf16.msra.mxu1 %v9314_v24  ;;  %v9324_v15 = vld [vmem:[#allocation67_spill] sm:$0xff]  ;;  %v9325_v24 = vld [vmem:[#allocation68_spill] sm:$0xff] }
 0x5c3   : > { %3509 = vmatprep.subr.bf16.mxu0 %v9315_v42  ;;  %3550 = vmatprep.subr.bf16.mxu1 %v9316_v41  ;;  %v9326_v42 = vld [vmem:[#allocation69_spill] sm:$0xff]  ;;  %v9327_v41 = vld [vmem:[#allocation70_spill] sm:$0xff] }
 0x5c6   : > { %3510 = vmatpush1.bf16.msra.mxu0 %v9317_v27  ;;  %3551 = vmatpush1.bf16.msra.mxu1 %v9318_v34  ;;  %v9328_v27 = vld [vmem:[#allocation71_spill] sm:$0xff]  ;;  %v9329_v34 = vld [vmem:[#allocation72_spill] sm:$0xff] }
 0x5c7   : > { %3511 = vmatprep.subr.bf16.mxu0 %v9319_v60  ;;  %3552 = vmatprep.subr.bf16.mxu1 %v9320_v30  ;;  %v9330_v60 = vld [vmem:[#allocation73_spill] sm:$0xff]  ;;  %v9331_v30 = vld [vmem:[#allocation74_spill] sm:$0xff] }
 0x5ca   : > { %3512 = vmatpush1.bf16.msra.mxu0 %v9321_v28  ;;  %3553 = vmatpush1.bf16.msra.mxu1 %v9322_v35  ;;  %v9332_v28 = vld [vmem:[#allocation75_spill] sm:$0xff]  ;;  %v9333_v35 = vld [vmem:[#allocation76_spill] sm:$0xff] }
 0x5cb   : > { %3513 = vmatprep.subr.bf16.mxu0 %v9323_v57  ;;  %3554 = vmatprep.subr.bf16.mxu1 %v9324_v15  ;;  %v9334_v57 = vld [vmem:[#allocation77_spill] sm:$0xff]  ;;  %v9335_v15 = vld [vmem:[#allocation78_spill] sm:$0xff] }
 0x5ce   : > { %3514 = vmatpush1.bf16.msra.mxu0 %v9325_v24  ;;  %3555 = vmatpush1.bf16.msra.mxu1 %v9326_v42  ;;  %v9336_v24 = vld [vmem:[#allocation79_spill] sm:$0xff]  ;;  %v9337_v42 = vld [vmem:[#allocation80_spill] sm:$0xff] }
 0x5cf   : > { %3515 = vmatprep.subr.bf16.mxu0 %v9327_v41  ;;  %3556 = vmatprep.subr.bf16.mxu1 %v9328_v27  ;;  %v9338_v41 = vld [vmem:[#allocation81_spill] sm:$0xff]  ;;  %v9339_v27 = vld [vmem:[#allocation82_spill] sm:$0xff] }
 0x5d2   : > { %3516 = vmatpush1.bf16.msra.mxu0 %v9329_v34  ;;  %3557 = vmatpush1.bf16.msra.mxu1 %v9330_v60  ;;  %v9340_v34 = vld [vmem:[#allocation83_spill] sm:$0xff]  ;;  %v9341_v60 = vld [vmem:[#allocation84_spill] sm:$0xff] }
 0x5d3   : > { %3517 = vmatprep.subr.bf16.mxu0 %v9331_v30  ;;  %3558 = vmatprep.subr.bf16.mxu1 %v9332_v28  ;;  %v9342_v30 = vld [vmem:[#allocation85_spill] sm:$0xff]  ;;  %v9343_v28 = vld [vmem:[#allocation86_spill] sm:$0xff] }
 0x5d6   : > { %3518 = vmatpush1.bf16.msra.mxu0 %v9333_v35  ;;  %3559 = vmatpush1.bf16.msra.mxu1 %v9334_v57  ;;  %v9344_v35 = vld [vmem:[#allocation87_spill] sm:$0xff] }
 0x5d7   : > { %3519 = vmatprep.subr.bf16.mxu0 %v9335_v15  ;;  %3560 = vmatprep.subr.bf16.mxu1 %v9336_v24 }
 0x5da   : > { %3520 = vmatpush1.bf16.msra.mxu0 %v9337_v42  ;;  %3561 = vmatpush1.bf16.msra.mxu1 %v9338_v41 }
 0x5db   : > { %3521 = vmatprep.subr.bf16.mxu0 %v9339_v27  ;;  %3562 = vmatprep.subr.bf16.mxu1 %v9340_v34 }
 0x5de   : > { %3522 = vmatpush1.bf16.msra.mxu0 %v9341_v60  ;;  %3563 = vmatpush1.bf16.msra.mxu1 %v9342_v30 }
 0x5df   : > { %3573 = vmatprep.subr.bf16.mxu0 %v9343_v28  ;;  %3614 = vmatprep.subr.bf16.mxu1 %v9344_v35 }
 0x634   : > { %v3287_v57 = vpop.f32.mrb[56].mxu0  ;;  %v3328_v15 = vpop.f32.mrb[56].mxu1 }
 0x635   : > { %v3417_v24 = vadd.f32 %v3287_v57, %v9345_v52  ;;  %v3419_v42 = vadd.f32 %v3328_v15, %v9346_v21  ;;  %v3289_v51 = vpop.f32.mrb[57].mxu0  ;;  %v3330_v41 = vpop.f32.mrb[57].mxu1 }
 0x636   : > { %v3418_v27 = vadd.f32 %v3289_v51, %v9347_v5  ;;  %v3420_v34 = vadd.f32 %v3330_v41, %v9348_v2  ;;  %v3291_v13 = vpop.f32.mrb[58].mxu0  ;;  %v3332_v60 = vpop.f32.mrb[58].mxu1 }
 0x637   : > { %v3292_v12 = vpop.f32.mrb[59].mxu0  ;;  %v3333_v30 = vpop.f32.mrb[59].mxu1  ;;  %v5316_v22 = vmul.f32 -1.442695, %v3417_v24  ;;  %v5318_v28 = vmul.f32 -1.442695, %v3419_v42 }
 0x638   : > { %v5317_v11 = vmul.f32 -1.442695, %v3418_v27  ;;  %v5319_v35 = vmul.f32 -1.442695, %v3420_v34  ;;  %v9349_v30 = vld [vmem:[#allocation187_spill] sm:$0xff]  ;;  %v9350_v42 = vld [vmem:[#allocation188_spill] sm:$0xff] }
 0x639   : > { %5629 = vpow2.f32 %v5316_v22  ;;  %v9352_v27 = vld [vmem:[#allocation190_spill] sm:$0xff] }
 0x63a   : > { %5631 = vpow2.f32 %v5318_v28 }
 0x63b   : > { %5633 = vpow2.f32 %v5317_v11 }
 0x63c   : > { %5635 = vpow2.f32 %v5319_v35  ;;  %v9351_v35 = vld [vmem:[#allocation189_spill] sm:$0xff] }
 0x643   : > { %v5630_v52 = vpop.eup %5629 }
 0x644   : > { %v5632_v21 = vpop.eup %5631  ;;  %v3431_v29 = vadd.f32 1.0, %v5630_v52 }
 0x645   : > { %v5634_v57 = vpop.eup %5633  ;;  %v3443_v5 = vadd.f32 1.0, %v5632_v21 }
 0x646   : > { %v5636_v15 = vpop.eup %5635  ;;  %v3432_v51 = vadd.f32 1.0, %v5634_v57  ;;  %5637 = vrcp.f32 %v3431_v29 }
 0x647   : > { %v3444_v2 = vadd.f32 1.0, %v5636_v15  ;;  %5639 = vrcp.f32 %v3443_v5 }
 0x648   : > { %5641 = vrcp.f32 %v3432_v51 }
 0x649   : > { %5643 = vrcp.f32 %v3444_v2 }
 0x650   : > { %v5638_v5 = vpop.eup %5637 }
 0x651   : > { %v5640_v51 = vpop.eup %5639 }
 0x674   : > { %v3369_v12 = vpop.f32.mrb[60].mxu0  ;;  %v3410_v13 = vpop.f32.mrb[60].mxu1 }
 0x675   : > { %v3421_v24 = vadd.f32 %v3369_v12, %v9349_v30  ;;  %v3423_v22 = vadd.f32 %v3410_v13, %v9350_v42  ;;  %v3371_v28 = vpop.f32.mrb[61].mxu0  ;;  %v3412_v11 = vpop.f32.mrb[61].mxu1  ;;  %v3463_v42 = vmul.f32 %v5640_v51, %v7806_v50 }
 0x676   : > { %v3422_v41 = vadd.f32 %v3371_v28, %v9351_v35  ;;  %v3424_v34 = vadd.f32 %v3412_v11, %v9352_v27  ;;  %v3373_v60 = vpop.f32.mrb[62].mxu0  ;;  %v3414_v52 = vpop.f32.mrb[62].mxu1 }
 0x677   : > { %5645 = vtanh.f32 %v3421_v24  ;;  %v5320_v21 = vmul.f32 -1.442695, %v3423_v22  ;;  %v3374_v29 = vpop.f32.mrb[63].mxu0  ;;  %v3415_v57 = vpop.f32.mrb[63].mxu1 }
 0x678   : > { %5647 = vtanh.f32 %v3422_v41  ;;  %v5321_v15 = vmul.f32 -1.442695, %v3424_v34  ;;  %v5642_v12 = vpop.eup %5641 }
 0x679   : > { %5649 = vpow2.f32 %v5320_v21  ;;  %v5644_v13 = vpop.eup %5643 }
 0x67a   : > { %5651 = vpow2.f32 %v5321_v15  ;;  %v3464_v35 = vmul.f32 %v5644_v13, %v7808_v20  ;;  %v9353_v13 = vld [vmem:[#allocation129_spill] sm:$0xff] }
 0x681   : > { %v5646_v30 = vpop.eup %5645 }
 0x682   : > { %v5648_v2 = vpop.eup %5647  ;;  %v3465_v28 = vmul.f32 %v5646_v30, %v5638_v5  ;;  %v9354_v30 = vld [vmem:[#allocation130_spill] sm:$0xff] }
 0x683   : > { %v5650_v11 = vpop.eup %5649  ;;  %v3466_v24 = vmul.f32 %v5648_v2, %v5642_v12  ;;  %v9355_v2 = vld [vmem:[#allocation131_spill] sm:$0xff] }
 0x684   : > { %v5652_v22 = vpop.eup %5651  ;;  %v7957_v27 = vadd.f32 %v3465_v28, %v3463_v42  ;;  %v3457_v41 = vadd.f32 1.0, %v5650_v11  ;;  %v9356_v42 = vld [vmem:[#allocation132_spill] sm:$0xff]  ;;  %v9357_v28 = vld [vmem:[#allocation133_spill] sm:$0xff]  ;;  %v9358_v11 = vld [vmem:[#allocation134_spill] sm:$0xff] }
 0x685   : > { %v7959_v34 = vadd.f32 %v3466_v24, %v3464_v35  ;;  %v3458_v60 = vadd.f32 1.0, %v5652_v22  ;;  %v9359_v35 = vld [vmem:[#allocation135_spill] sm:$0xff]  ;;  %v9360_v24 = vld [vmem:[#allocation136_spill] sm:$0xff]  ;;  %v9361_v22 = vld [vmem:[#allocation137_spill] sm:$0xff] }
 0x686   : > { %5653 = vtanh.f32 %v7957_v27 }
 0x687   : > { %5655 = vrcp.f32 %v3457_v41  ;;  %v9362_v41 = vld [vmem:[#allocation138_spill] sm:$0xff] }
 0x688   : > { %5657 = vtanh.f32 %v7959_v34 }
 0x689   : > { %5659 = vrcp.f32 %v3458_v60  ;;  %v9363_v60 = vld [vmem:[#allocation139_spill] sm:$0xff] }
 0x690   : > { %v5654_v52 = vpop.eup %5653 }
 0x691   : > { %v5656_v50 = vpop.eup %5655 }
 0x692   : > { %v5658_v21 = vpop.eup %5657  ;;  %v3471_v29 = vmul.f32 %v5656_v50, %v5654_v52  ;;  %v9364_v52 = vld [vmem:[#allocation140_spill] sm:$0xff]  ;;  %v9365_v50 = vld [vmem:[#allocation141_spill] sm:$0xff] }
 0x693   : > { %v5660_v57 = vpop.eup %5659 }
 0x694   : > { %v3472_v20 = vmul.f32 %v5660_v57, %v5658_v21  ;;  %v7963_v15 = vpack.c.bf16 %v3471_v29, %v3471_v29  ;;  %v9366_v21 = vld [vmem:[#allocation142_spill] sm:$0xff]  ;;  %v9367_v29 = vld [vmem:[#allocation143_spill] sm:$0xff]  ;;  %v9368_v57 = vld [vmem:[#allocation144_spill] sm:$0xff] }
 0x696   : > { %v3474_v5 = vpack.c.bf16 %v3472_v20, %v3472_v20  ;;  %v3477_v51 = vrot.slane %v7963_v15, 4  ;;  %v9369_v20 = vld [vmem:[#allocation145_spill] sm:$0xff] }
 0x698   : > { %v3478_v12 = vrot.slane %v3474_v5, 4  ;;  %3523 = vmatprep.mubr.bf16.mxu0 %v3474_v5  ;;  %3564 = vmatprep.mubr.bf16.mxu1 %v3474_v5  ;;  %3481 = vst [vmem:[#allocation2 + $0x10] sm:$0xf0] %v3477_v51  ;;  %v9371_v51 = vld [vmem:[#allocation147_spill] sm:$0xff] }
 0x699   : > { %3524 = vmatmul.mubr.bf16.vlgmr.msra.gmra.mrb[64].mxu0 %v7963_v15  ;;  %3565 = vmatmul.mubr.bf16.vlgmr.msra.gmra.mrb[64].mxu1 %v7963_v15 }
 0x69a   : > { %3482 = vst [vmem:[#allocation2 + $0x18] sm:$0xf0] %v3478_v12  ;;  %3574 = vmatpush1.bf16.msra.mxu0 %v9059_v44  ;;  %3615 = vmatpush1.bf16.msra.mxu1 %v9060_v62  ;;  %v9372_v12 = vld [vmem:[#allocation148_spill] sm:$0xff] }
 0x69b   : > { %3605 = vmatprep.mubr.bf16.mxu0 %v3474_v5  ;;  %3646 = vmatprep.mubr.bf16.mxu1 %v3474_v5  ;;  %v9370_v5 = vld [vmem:[#allocation146_spill] sm:$0xff] }
 0x69c   : > { %3575 = vmatprep.subr.bf16.mxu0 %v9061_v39  ;;  %3616 = vmatprep.subr.bf16.mxu1 %v9062_v26 }
 0x69e   : > { %3576 = vmatpush1.bf16.msra.mxu0 %v9063_v9  ;;  %3617 = vmatpush1.bf16.msra.mxu1 %v9064_v7 }
 0x69f   : > { %3577 = vmatprep.subr.bf16.mxu0 %v9065_v25  ;;  %3618 = vmatprep.subr.bf16.mxu1 %v9066_v10 }
 0x6a2   : > { %3578 = vmatpush1.bf16.msra.mxu0 %v9067_v33  ;;  %3619 = vmatpush1.bf16.msra.mxu1 %v9068_v19 }
 0x6a3   : > { %3579 = vmatprep.subr.bf16.mxu0 %v9069_v0  ;;  %3620 = vmatprep.subr.bf16.mxu1 %v9070_v47 }
 0x6a6   : > { %3580 = vmatpush1.bf16.msra.mxu0 %v9071_v63  ;;  %3621 = vmatpush1.bf16.msra.mxu1 %v9072_v1 }
 0x6a7   : > { %3581 = vmatprep.subr.bf16.mxu0 %v9073_v6  ;;  %3622 = vmatprep.subr.bf16.mxu1 %v9074_v8 }
 0x6aa   : > { %3582 = vmatpush1.bf16.msra.mxu0 %v9075_v58  ;;  %3623 = vmatpush1.bf16.msra.mxu1 %v9076_v56 }
 0x6ab   : > { %3583 = vmatprep.subr.bf16.mxu0 %v9163_v54  ;;  %3624 = vmatprep.subr.bf16.mxu1 %v9164_v16 }
 0x6ae   : > { %3584 = vmatpush1.bf16.msra.mxu0 %v9165_v37  ;;  %3625 = vmatpush1.bf16.msra.mxu1 %v9166_v45 }
 0x6af   : > { %3585 = vmatprep.subr.bf16.mxu0 %v9167_v49  ;;  %3626 = vmatprep.subr.bf16.mxu1 %v9168_v31 }
 0x6b2   : > { %3586 = vmatpush1.bf16.msra.mxu0 %v9169_v53  ;;  %3627 = vmatpush1.bf16.msra.mxu1 %v9170_v17 }
 0x6b3   : > { %3587 = vmatprep.subr.bf16.mxu0 %v9171_v32  ;;  %3628 = vmatprep.subr.bf16.mxu1 %v9172_v23 }
 0x6b6   : > { %3588 = vmatpush1.bf16.msra.mxu0 %v9173_v18  ;;  %3629 = vmatpush1.bf16.msra.mxu1 %v9174_v48 }
 0x6b7   : > { %3589 = vmatprep.subr.bf16.mxu0 %v9175_v3  ;;  %3630 = vmatprep.subr.bf16.mxu1 %v9176_v40 }
 0x6ba   : > { %3590 = vmatpush1.bf16.msra.mxu0 %v9177_v59  ;;  %3631 = vmatpush1.bf16.msra.mxu1 %v9178_v14 }
 0x6bb   : > { %3591 = vmatprep.subr.bf16.mxu0 %v9179_v36  ;;  %3632 = vmatprep.subr.bf16.mxu1 %v9180_v38 }
 0x6be   : > { %3592 = vmatpush1.bf16.msra.mxu0 %v9181_v61  ;;  %3633 = vmatpush1.bf16.msra.mxu1 %v9096_v43 }
 0x6bf   : > { %3593 = vmatprep.subr.bf16.mxu0 %v9097_v4  ;;  %3634 = vmatprep.subr.bf16.mxu1 %v9098_v55 }
 0x6c2   : > { %3594 = vmatpush1.bf16.msra.mxu0 %v9182_v46  ;;  %3635 = vmatpush1.bf16.msra.mxu1 %v9353_v13 }
 0x6c3   : > { %3595 = vmatprep.subr.bf16.mxu0 %v9354_v30  ;;  %3636 = vmatprep.subr.bf16.mxu1 %v9355_v2 }
 0x6c6   : > { %3596 = vmatpush1.bf16.msra.mxu0 %v9356_v42  ;;  %3637 = vmatpush1.bf16.msra.mxu1 %v9357_v28 }
 0x6c7   : > { %3597 = vmatprep.subr.bf16.mxu0 %v9358_v11  ;;  %3638 = vmatprep.subr.bf16.mxu1 %v9359_v35  ;;  %v9442_v35 = vld [vmem:[#allocation165_spill] sm:$0xff]  ;;  %v9443_v11 = vld [vmem:[#allocation166_spill] sm:$0xff] }
 0x6ca   : > { %3598 = vmatpush1.bf16.msra.mxu0 %v9360_v24  ;;  %3639 = vmatpush1.bf16.msra.mxu1 %v9361_v22  ;;  %v9441_v22 = vld [vmem:[#allocation164_spill] sm:$0xff] }
 0x6cb   : > { %3599 = vmatprep.subr.bf16.mxu0 %v9362_v41  ;;  %3640 = vmatprep.subr.bf16.mxu1 %v9363_v60  ;;  %v9373_v41 = vld [vmem:[#allocation149_spill] sm:$0xff]  ;;  %v9374_v60 = vld [vmem:[#allocation22_spill] sm:$0xff] }
 0x6ce   : > { %3600 = vmatpush1.bf16.msra.mxu0 %v9364_v52  ;;  %3641 = vmatpush1.bf16.msra.mxu1 %v9365_v50  ;;  %v9375_v52 = vld [vmem:[#allocation23_spill] sm:$0xff] }
 0x6cf   : > { %3601 = vmatprep.subr.bf16.mxu0 %v9366_v21  ;;  %3642 = vmatprep.subr.bf16.mxu1 %v9367_v29  ;;  %v9376_v29 = vld [vmem:[#allocation24_spill] sm:$0xff]  ;;  %v9385_v21 = vld [vmem:[#allocation33_spill] sm:$0xff]  ;;  %v9440_v50 = vld [vmem:[#allocation163_spill] sm:$0xff] }
 0x6d2   : > { %3602 = vmatpush1.bf16.msra.mxu0 %v9368_v57  ;;  %3643 = vmatpush1.bf16.msra.mxu1 %v9369_v20  ;;  %v9377_v57 = vld [vmem:[#allocation25_spill] sm:$0xff]  ;;  %v9378_v20 = vld [vmem:[#allocation26_spill] sm:$0xff] }
 0x6d3   : > { %3603 = vmatprep.subr.bf16.mxu0 %v9370_v5  ;;  %3644 = vmatprep.subr.bf16.mxu1 %v9371_v51  ;;  %v9379_v5 = vld [vmem:[#allocation27_spill] sm:$0xff]  ;;  %v9380_v51 = vld [vmem:[#allocation28_spill] sm:$0xff] }
 0x6d6   : > { %3604 = vmatpush1.bf16.msra.mxu0 %v9372_v12  ;;  %3645 = vmatpush1.bf16.msra.mxu1 %v9373_v41  ;;  %v9381_v12 = vld [vmem:[#allocation29_spill] sm:$0xff]  ;;  %v9382_v41 = vld [vmem:[#allocation30_spill] sm:$0xff] }
 0x6d7   : > { %3723 = vmatprep.subr.bf16.mxu0 %v9374_v60  ;;  %3764 = vmatprep.subr.bf16.mxu1 %v9375_v52  ;;  %v9383_v60 = vld [vmem:[#allocation31_spill] sm:$0xff]  ;;  %v9384_v52 = vld [vmem:[#allocation32_spill] sm:$0xff] }
 0x6d9   : > { %3606 = vmatmul.mubr.bf16.vlgmr.msra.gmra.mrb[68].mxu0 %v7963_v15  ;;  %3647 = vmatmul.mubr.bf16.vlgmr.msra.gmra.mrb[68].mxu1 %v7963_v15  ;;  %v9386_v15 = vld [vmem:[#allocation34_spill] sm:$0xff] }
 0x6da   : > { %3724 = vmatpush1.bf16.msra.mxu0 %v9376_v29  ;;  %3765 = vmatpush1.bf16.msra.mxu1 %v9377_v57  ;;  %v9387_v29 = vld [vmem:[#allocation35_spill] sm:$0xff]  ;;  %v9388_v57 = vld [vmem:[#allocation36_spill] sm:$0xff] }
 0x6db   : > { %3725 = vmatprep.subr.bf16.mxu0 %v9378_v20  ;;  %3766 = vmatprep.subr.bf16.mxu1 %v9379_v5  ;;  %v9389_v20 = vld [vmem:[#allocation37_spill] sm:$0xff]  ;;  %v9390_v5 = vld [vmem:[#allocation38_spill] sm:$0xff] }
 0x6de   : > { %3726 = vmatpush1.bf16.msra.mxu0 %v9380_v51  ;;  %3767 = vmatpush1.bf16.msra.mxu1 %v9381_v12  ;;  %v9391_v51 = vld [vmem:[#allocation39_spill] sm:$0xff]  ;;  %v9392_v12 = vld [vmem:[#allocation40_spill] sm:$0xff] }
 0x6df   : > { %3727 = vmatprep.subr.bf16.mxu0 %v9382_v41  ;;  %3768 = vmatprep.subr.bf16.mxu1 %v9383_v60  ;;  %v9393_v41 = vld [vmem:[#allocation41_spill] sm:$0xff]  ;;  %v9394_v60 = vld [vmem:[#allocation42_spill] sm:$0xff] }
 0x6e2   : > { %3728 = vmatpush1.bf16.msra.mxu0 %v9384_v52  ;;  %3769 = vmatpush1.bf16.msra.mxu1 %v9385_v21  ;;  %v9395_v52 = vld [vmem:[#allocation43_spill] sm:$0xff]  ;;  %v9396_v21 = vld [vmem:[#allocation44_spill] sm:$0xff] }
 0x6e3   : > { %3729 = vmatprep.subr.bf16.mxu0 %v9386_v15  ;;  %3770 = vmatprep.subr.bf16.mxu1 %v9387_v29  ;;  %v9397_v15 = vld [vmem:[#allocation45_spill] sm:$0xff]  ;;  %v9398_v29 = vld [vmem:[#allocation46_spill] sm:$0xff] }
 0x6e6   : > { %3730 = vmatpush1.bf16.msra.mxu0 %v9388_v57  ;;  %3771 = vmatpush1.bf16.msra.mxu1 %v9389_v20  ;;  %v9399_v57 = vld [vmem:[#allocation47_spill] sm:$0xff]  ;;  %v9400_v20 = vld [vmem:[#allocation48_spill] sm:$0xff] }
 0x6e7   : > { %3731 = vmatprep.subr.bf16.mxu0 %v9390_v5  ;;  %3772 = vmatprep.subr.bf16.mxu1 %v9391_v51  ;;  %v9401_v5 = vld [vmem:[#allocation49_spill] sm:$0xff]  ;;  %v9402_v51 = vld [vmem:[#allocation50_spill] sm:$0xff] }
 0x6ea   : > { %3732 = vmatpush1.bf16.msra.mxu0 %v9392_v12  ;;  %3773 = vmatpush1.bf16.msra.mxu1 %v9393_v41  ;;  %v9403_v12 = vld [vmem:[#allocation51_spill] sm:$0xff]  ;;  %v9404_v41 = vld [vmem:[#allocation52_spill] sm:$0xff] }
 0x6eb   : > { %3733 = vmatprep.subr.bf16.mxu0 %v9394_v60  ;;  %3774 = vmatprep.subr.bf16.mxu1 %v9395_v52  ;;  %v9405_v60 = vld [vmem:[#allocation53_spill] sm:$0xff]  ;;  %v9406_v52 = vld [vmem:[#allocation54_spill] sm:$0xff] }
 0x6ee   : > { %3734 = vmatpush1.bf16.msra.mxu0 %v9396_v21  ;;  %3775 = vmatpush1.bf16.msra.mxu1 %v9397_v15  ;;  %v9407_v21 = vld [vmem:[#allocation55_spill] sm:$0xff]  ;;  %v9408_v15 = vld [vmem:[#allocation56_spill] sm:$0xff] }
 0x6ef   : > { %3735 = vmatprep.subr.bf16.mxu0 %v9398_v29  ;;  %3776 = vmatprep.subr.bf16.mxu1 %v9399_v57  ;;  %v9409_v29 = vld [vmem:[#allocation57_spill] sm:$0xff]  ;;  %v9410_v57 = vld [vmem:[#allocation58_spill] sm:$0xff] }
 0x6f2   : > { %3736 = vmatpush1.bf16.msra.mxu0 %v9400_v20  ;;  %3777 = vmatpush1.bf16.msra.mxu1 %v9401_v5  ;;  %v9411_v20 = vld [vmem:[#allocation59_spill] sm:$0xff]  ;;  %v9412_v5 = vld [vmem:[#allocation60_spill] sm:$0xff] }
 0x6f3   : > { %3737 = vmatprep.subr.bf16.mxu0 %v9402_v51  ;;  %3778 = vmatprep.subr.bf16.mxu1 %v9403_v12  ;;  %v9413_v51 = vld [vmem:[#allocation61_spill] sm:$0xff]  ;;  %v9414_v12 = vld [vmem:[#allocation62_spill] sm:$0xff] }
 0x6f6   : > { %3738 = vmatpush1.bf16.msra.mxu0 %v9404_v41  ;;  %3779 = vmatpush1.bf16.msra.mxu1 %v9405_v60  ;;  %v9415_v41 = vld [vmem:[#allocation63_spill] sm:$0xff]  ;;  %v9416_v60 = vld [vmem:[#allocation64_spill] sm:$0xff] }
 0x6f7   : > { %3739 = vmatprep.subr.bf16.mxu0 %v9406_v52  ;;  %3780 = vmatprep.subr.bf16.mxu1 %v9407_v21  ;;  %v9417_v52 = vld [vmem:[#allocation65_spill] sm:$0xff]  ;;  %v9418_v21 = vld [vmem:[#allocation66_spill] sm:$0xff] }
 0x6fa   : > { %3740 = vmatpush1.bf16.msra.mxu0 %v9408_v15  ;;  %3781 = vmatpush1.bf16.msra.mxu1 %v9409_v29  ;;  %v9419_v15 = vld [vmem:[#allocation67_spill] sm:$0xff]  ;;  %v9420_v29 = vld [vmem:[#allocation68_spill] sm:$0xff] }
 0x6fb   : > { %3741 = vmatprep.subr.bf16.mxu0 %v9410_v57  ;;  %3782 = vmatprep.subr.bf16.mxu1 %v9411_v20  ;;  %v9421_v57 = vld [vmem:[#allocation69_spill] sm:$0xff]  ;;  %v9422_v20 = vld [vmem:[#allocation70_spill] sm:$0xff] }
 0x6fe   : > { %3742 = vmatpush1.bf16.msra.mxu0 %v9412_v5  ;;  %3783 = vmatpush1.bf16.msra.mxu1 %v9413_v51  ;;  %v9423_v5 = vld [vmem:[#allocation71_spill] sm:$0xff]  ;;  %v9424_v51 = vld [vmem:[#allocation72_spill] sm:$0xff] }
 0x6ff   : > { %3743 = vmatprep.subr.bf16.mxu0 %v9414_v12  ;;  %3784 = vmatprep.subr.bf16.mxu1 %v9415_v41  ;;  %v9425_v12 = vld [vmem:[#allocation73_spill] sm:$0xff]  ;;  %v9426_v41 = vld [vmem:[#allocation74_spill] sm:$0xff] }
 0x702   : > { %3744 = vmatpush1.bf16.msra.mxu0 %v9416_v60  ;;  %3785 = vmatpush1.bf16.msra.mxu1 %v9417_v52  ;;  %v9427_v60 = vld [vmem:[#allocation75_spill] sm:$0xff]  ;;  %v9428_v52 = vld [vmem:[#allocation76_spill] sm:$0xff] }
 0x703   : > { %3745 = vmatprep.subr.bf16.mxu0 %v9418_v21  ;;  %3786 = vmatprep.subr.bf16.mxu1 %v9419_v15  ;;  %v9429_v21 = vld [vmem:[#allocation77_spill] sm:$0xff]  ;;  %v9430_v15 = vld [vmem:[#allocation78_spill] sm:$0xff] }
 0x706   : > { %3746 = vmatpush1.bf16.msra.mxu0 %v9420_v29  ;;  %3787 = vmatpush1.bf16.msra.mxu1 %v9421_v57  ;;  %v9431_v29 = vld [vmem:[#allocation79_spill] sm:$0xff]  ;;  %v9432_v57 = vld [vmem:[#allocation80_spill] sm:$0xff] }
 0x707   : > { %3747 = vmatprep.subr.bf16.mxu0 %v9422_v20  ;;  %3788 = vmatprep.subr.bf16.mxu1 %v9423_v5  ;;  %v9433_v20 = vld [vmem:[#allocation81_spill] sm:$0xff]  ;;  %v9434_v5 = vld [vmem:[#allocation82_spill] sm:$0xff] }
 0x70a   : > { %3748 = vmatpush1.bf16.msra.mxu0 %v9424_v51  ;;  %3789 = vmatpush1.bf16.msra.mxu1 %v9425_v12  ;;  %v9435_v51 = vld [vmem:[#allocation83_spill] sm:$0xff]  ;;  %v9436_v12 = vld [vmem:[#allocation84_spill] sm:$0xff] }
 0x70b   : > { %3749 = vmatprep.subr.bf16.mxu0 %v9426_v41  ;;  %3790 = vmatprep.subr.bf16.mxu1 %v9427_v60  ;;  %v9437_v41 = vld [vmem:[#allocation85_spill] sm:$0xff]  ;;  %v9438_v60 = vld [vmem:[#allocation86_spill] sm:$0xff] }
 0x70e   : > { %3750 = vmatpush1.bf16.msra.mxu0 %v9428_v52  ;;  %3791 = vmatpush1.bf16.msra.mxu1 %v9429_v21  ;;  %v9439_v52 = vld [vmem:[#allocation87_spill] sm:$0xff] }
 0x70f   : > { %3751 = vmatprep.subr.bf16.mxu0 %v9430_v15  ;;  %3792 = vmatprep.subr.bf16.mxu1 %v9431_v29 }
 0x712   : > { %3752 = vmatpush1.bf16.msra.mxu0 %v9432_v57  ;;  %3793 = vmatpush1.bf16.msra.mxu1 %v9433_v20 }
 0x713   : > { %3753 = vmatprep.subr.bf16.mxu0 %v9434_v5  ;;  %3794 = vmatprep.subr.bf16.mxu1 %v9435_v51 }
 0x716   : > { %3754 = vmatpush1.bf16.msra.mxu0 %v9436_v12  ;;  %3795 = vmatpush1.bf16.msra.mxu1 %v9437_v41 }
 0x717   : > { %3805 = vmatprep.subr.bf16.mxu0 %v9438_v60  ;;  %3846 = vmatprep.subr.bf16.mxu1 %v9439_v52 }
 0x76c   : > { %v3525_v21 = vpop.f32.mrb[64].mxu0  ;;  %v3566_v15 = vpop.f32.mrb[64].mxu1 }
 0x76d   : > { %v3655_v29 = vadd.f32 %v3525_v21, %v9440_v50  ;;  %v3657_v57 = vadd.f32 %v3566_v15, %v9441_v22  ;;  %v3527_v24 = vpop.f32.mrb[65].mxu0  ;;  %v3568_v20 = vpop.f32.mrb[65].mxu1 }
 0x76e   : > { %v3656_v5 = vadd.f32 %v3527_v24, %v9442_v35  ;;  %v3658_v51 = vadd.f32 %v3568_v20, %v9443_v11  ;;  %v3529_v28 = vpop.f32.mrb[66].mxu0  ;;  %v3570_v12 = vpop.f32.mrb[66].mxu1 }
 0x76f   : > { %v3530_v42 = vpop.f32.mrb[67].mxu0  ;;  %v3571_v41 = vpop.f32.mrb[67].mxu1  ;;  %v5322_v2 = vmul.f32 -1.442695, %v3655_v29  ;;  %v5324_v60 = vmul.f32 -1.442695, %v3657_v57 }
 0x770   : > { %v5323_v30 = vmul.f32 -1.442695, %v3656_v5  ;;  %v5325_v52 = vmul.f32 -1.442695, %v3658_v51  ;;  %v9444_v41 = vld [vmem:[#allocation191_spill] sm:$0xff]  ;;  %v9445_v57 = vld [vmem:[#allocation192_spill] sm:$0xff] }
 0x771   : > { %5661 = vpow2.f32 %v5322_v2  ;;  %v9447_v5 = vld [vmem:[#allocation194_spill] sm:$0xff] }
 0x772   : > { %5663 = vpow2.f32 %v5324_v60 }
 0x773   : > { %5665 = vpow2.f32 %v5323_v30 }
 0x774   : > { %5667 = vpow2.f32 %v5325_v52  ;;  %v9446_v52 = vld [vmem:[#allocation193_spill] sm:$0xff] }
 0x77b   : > { %v5662_v50 = vpop.eup %5661 }
 0x77c   : > { %v5664_v22 = vpop.eup %5663  ;;  %v3669_v13 = vadd.f32 1.0, %v5662_v50 }
 0x77d   : > { %v5666_v21 = vpop.eup %5665  ;;  %v3681_v35 = vadd.f32 1.0, %v5664_v22 }
 0x77e   : > { %v5668_v15 = vpop.eup %5667  ;;  %v3670_v24 = vadd.f32 1.0, %v5666_v21  ;;  %5669 = vrcp.f32 %v3669_v13 }
 0x77f   : > { %v3682_v11 = vadd.f32 1.0, %v5668_v15  ;;  %5671 = vrcp.f32 %v3681_v35 }
 0x780   : > { %5673 = vrcp.f32 %v3670_v24 }
 0x781   : > { %5675 = vrcp.f32 %v3682_v11 }
 0x788   : > { %v5670_v35 = vpop.eup %5669 }
 0x789   : > { %v5672_v24 = vpop.eup %5671 }
 0x7ac   : > { %v3607_v42 = vpop.f32.mrb[68].mxu0  ;;  %v3648_v28 = vpop.f32.mrb[68].mxu1 }
 0x7ad   : > { %v3659_v29 = vadd.f32 %v3607_v42, %v9444_v41  ;;  %v3661_v2 = vadd.f32 %v3648_v28, %v9445_v57  ;;  %v3609_v60 = vpop.f32.mrb[69].mxu0  ;;  %v3650_v30 = vpop.f32.mrb[69].mxu1  ;;  %v3701_v57 = vmul.f32 %v5672_v24, %v7957_v27  ;;  %v9448_v24 = vld [vmem:[#allocation129_spill] sm:$0xff] }
 0x7ae   : > { %v3660_v20 = vadd.f32 %v3609_v60, %v9446_v52  ;;  %v3662_v51 = vadd.f32 %v3650_v30, %v9447_v5  ;;  %v3611_v12 = vpop.f32.mrb[70].mxu0  ;;  %v3652_v50 = vpop.f32.mrb[70].mxu1 }
 0x7af   : > { %5677 = vtanh.f32 %v3659_v29  ;;  %v5326_v22 = vmul.f32 -1.442695, %v3661_v2  ;;  %v3612_v13 = vpop.f32.mrb[71].mxu0  ;;  %v3653_v21 = vpop.f32.mrb[71].mxu1 }
 0x7b0   : > { %5679 = vtanh.f32 %v3660_v20  ;;  %v5327_v15 = vmul.f32 -1.442695, %v3662_v51  ;;  %v5674_v42 = vpop.eup %5673 }
 0x7b1   : > { %5681 = vpow2.f32 %v5326_v22  ;;  %v5676_v28 = vpop.eup %5675 }
 0x7b2   : > { %5683 = vpow2.f32 %v5327_v15  ;;  %v3702_v52 = vmul.f32 %v5676_v28, %v7959_v34  ;;  %v9450_v28 = vld [vmem:[#allocation131_spill] sm:$0xff] }
 0x7b9   : > { %v5678_v41 = vpop.eup %5677 }
 0x7ba   : > { %v5680_v11 = vpop.eup %5679  ;;  %v3703_v60 = vmul.f32 %v5678_v41, %v5670_v35  ;;  %v9451_v41 = vld [vmem:[#allocation132_spill] sm:$0xff] }
 0x7bb   : > { %v5682_v30 = vpop.eup %5681  ;;  %v3704_v29 = vmul.f32 %v5680_v11, %v5674_v42  ;;  %v9449_v42 = vld [vmem:[#allocation130_spill] sm:$0xff]  ;;  %v9452_v11 = vld [vmem:[#allocation133_spill] sm:$0xff] }
 0x7bc   : > { %v5684_v2 = vpop.eup %5683  ;;  %v8108_v5 = vadd.f32 %v3703_v60, %v3701_v57  ;;  %v3695_v20 = vadd.f32 1.0, %v5682_v30  ;;  %v9453_v57 = vld [vmem:[#allocation134_spill] sm:$0xff]  ;;  %v9454_v60 = vld [vmem:[#allocation135_spill] sm:$0xff]  ;;  %v9455_v30 = vld [vmem:[#allocation136_spill] sm:$0xff] }
 0x7bd   : > { %v8110_v51 = vadd.f32 %v3704_v29, %v3702_v52  ;;  %v3696_v12 = vadd.f32 1.0, %v5684_v2  ;;  %v9456_v52 = vld [vmem:[#allocation137_spill] sm:$0xff]  ;;  %v9457_v29 = vld [vmem:[#allocation138_spill] sm:$0xff]  ;;  %v9458_v2 = vld [vmem:[#allocation139_spill] sm:$0xff] }
 0x7be   : > { %5685 = vtanh.f32 %v8108_v5 }
 0x7bf   : > { %5687 = vrcp.f32 %v3695_v20  ;;  %v9459_v20 = vld [vmem:[#allocation140_spill] sm:$0xff] }
 0x7c0   : > { %5689 = vtanh.f32 %v8110_v51 }
 0x7c1   : > { %5691 = vrcp.f32 %v3696_v12  ;;  %v9460_v12 = vld [vmem:[#allocation141_spill] sm:$0xff] }
 0x7c8   : > { %v5686_v50 = vpop.eup %5685 }
 0x7c9   : > { %v5688_v27 = vpop.eup %5687 }
 0x7ca   : > { %v5690_v22 = vpop.eup %5689  ;;  %v3709_v13 = vmul.f32 %v5688_v27, %v5686_v50  ;;  %v9461_v50 = vld [vmem:[#allocation142_spill] sm:$0xff]  ;;  %v9462_v27 = vld [vmem:[#allocation143_spill] sm:$0xff] }
 0x7cb   : > { %v5692_v21 = vpop.eup %5691 }
 0x7cc   : > { %v3710_v34 = vmul.f32 %v5692_v21, %v5690_v22  ;;  %v8114_v15 = vpack.c.bf16 %v3709_v13, %v3709_v13  ;;  %v9463_v22 = vld [vmem:[#allocation144_spill] sm:$0xff]  ;;  %v9464_v13 = vld [vmem:[#allocation145_spill] sm:$0xff]  ;;  %v9465_v21 = vld [vmem:[#allocation146_spill] sm:$0xff] }
 0x7ce   : > { %v3712_v35 = vpack.c.bf16 %v3710_v34, %v3710_v34  ;;  %3713 = vst [vmem:[#allocation2 + $0x20] sm:$0xf] %v8114_v15  ;;  %v9466_v34 = vld [vmem:[#allocation147_spill] sm:$0xff] }
 0x7d0   : > { %3714 = vst [vmem:[#allocation2 + $0x28] sm:$0xf] %v3712_v35  ;;  %3755 = vmatprep.mubr.bf16.mxu0 %v3712_v35  ;;  %3796 = vmatprep.mubr.bf16.mxu1 %v3712_v35 }
 0x7d1   : > { %3756 = vmatmul.mubr.bf16.vlgmr.msra.gmra.mrb[72].mxu0 %v8114_v15  ;;  %3797 = vmatmul.mubr.bf16.vlgmr.msra.gmra.mrb[72].mxu1 %v8114_v15 }
 0x7d2   : > { %3806 = vmatpush1.bf16.msra.mxu0 %v9059_v44  ;;  %3847 = vmatpush1.bf16.msra.mxu1 %v9060_v62 }
 0x7d3   : > { %3837 = vmatprep.mubr.bf16.mxu0 %v3712_v35  ;;  %3878 = vmatprep.mubr.bf16.mxu1 %v3712_v35  ;;  %v9467_v35 = vld [vmem:[#allocation148_spill] sm:$0xff] }
 0x7d4   : > { %3807 = vmatprep.subr.bf16.mxu0 %v9061_v39  ;;  %3848 = vmatprep.subr.bf16.mxu1 %v9062_v26 }
 0x7d6   : > { %3808 = vmatpush1.bf16.msra.mxu0 %v9063_v9  ;;  %3849 = vmatpush1.bf16.msra.mxu1 %v9064_v7 }
 0x7d7   : > { %3809 = vmatprep.subr.bf16.mxu0 %v9065_v25  ;;  %3850 = vmatprep.subr.bf16.mxu1 %v9066_v10 }
 0x7da   : > { %3810 = vmatpush1.bf16.msra.mxu0 %v9067_v33  ;;  %3851 = vmatpush1.bf16.msra.mxu1 %v9068_v19 }
 0x7db   : > { %3811 = vmatprep.subr.bf16.mxu0 %v9069_v0  ;;  %3852 = vmatprep.subr.bf16.mxu1 %v9070_v47 }
 0x7de   : > { %3812 = vmatpush1.bf16.msra.mxu0 %v9071_v63  ;;  %3853 = vmatpush1.bf16.msra.mxu1 %v9072_v1 }
 0x7df   : > { %3813 = vmatprep.subr.bf16.mxu0 %v9073_v6  ;;  %3854 = vmatprep.subr.bf16.mxu1 %v9074_v8 }
 0x7e2   : > { %3814 = vmatpush1.bf16.msra.mxu0 %v9075_v58  ;;  %3855 = vmatpush1.bf16.msra.mxu1 %v9076_v56 }
 0x7e3   : > { %3815 = vmatprep.subr.bf16.mxu0 %v9163_v54  ;;  %3856 = vmatprep.subr.bf16.mxu1 %v9164_v16 }
 0x7e6   : > { %3816 = vmatpush1.bf16.msra.mxu0 %v9165_v37  ;;  %3857 = vmatpush1.bf16.msra.mxu1 %v9166_v45 }
 0x7e7   : > { %3817 = vmatprep.subr.bf16.mxu0 %v9167_v49  ;;  %3858 = vmatprep.subr.bf16.mxu1 %v9168_v31 }
 0x7ea   : > { %3818 = vmatpush1.bf16.msra.mxu0 %v9169_v53  ;;  %3859 = vmatpush1.bf16.msra.mxu1 %v9170_v17 }
 0x7eb   : > { %3819 = vmatprep.subr.bf16.mxu0 %v9171_v32  ;;  %3860 = vmatprep.subr.bf16.mxu1 %v9172_v23 }
 0x7ee   : > { %3820 = vmatpush1.bf16.msra.mxu0 %v9173_v18  ;;  %3861 = vmatpush1.bf16.msra.mxu1 %v9174_v48 }
 0x7ef   : > { %3821 = vmatprep.subr.bf16.mxu0 %v9175_v3  ;;  %3862 = vmatprep.subr.bf16.mxu1 %v9176_v40 }
 0x7f2   : > { %3822 = vmatpush1.bf16.msra.mxu0 %v9177_v59  ;;  %3863 = vmatpush1.bf16.msra.mxu1 %v9178_v14 }
 0x7f3   : > { %3823 = vmatprep.subr.bf16.mxu0 %v9179_v36  ;;  %3864 = vmatprep.subr.bf16.mxu1 %v9180_v38 }
 0x7f6   : > { %3824 = vmatpush1.bf16.msra.mxu0 %v9181_v61  ;;  %3865 = vmatpush1.bf16.msra.mxu1 %v9096_v43 }
 0x7f7   : > { %3825 = vmatprep.subr.bf16.mxu0 %v9097_v4  ;;  %3866 = vmatprep.subr.bf16.mxu1 %v9098_v55 }
 0x7fa   : > { %3826 = vmatpush1.bf16.msra.mxu0 %v9182_v46  ;;  %3867 = vmatpush1.bf16.msra.mxu1 %v9448_v24 }
 0x7fb   : > { %3827 = vmatprep.subr.bf16.mxu0 %v9449_v42  ;;  %3868 = vmatprep.subr.bf16.mxu1 %v9450_v28 }
 0x7fe   : > { %3828 = vmatpush1.bf16.msra.mxu0 %v9451_v41  ;;  %3869 = vmatpush1.bf16.msra.mxu1 %v9452_v11 }
 0x7ff   : > { %3829 = vmatprep.subr.bf16.mxu0 %v9453_v57  ;;  %3870 = vmatprep.subr.bf16.mxu1 %v9454_v60  ;;  %v9537_v60 = vld [vmem:[#allocation169_spill] sm:$0xff]  ;;  %v9538_v57 = vld [vmem:[#allocation170_spill] sm:$0xff] }
 0x802   : > { %3830 = vmatpush1.bf16.msra.mxu0 %v9455_v30  ;;  %3871 = vmatpush1.bf16.msra.mxu1 %v9456_v52  ;;  %v9536_v52 = vld [vmem:[#allocation168_spill] sm:$0xff] }
 0x803   : > { %3831 = vmatprep.subr.bf16.mxu0 %v9457_v29  ;;  %3872 = vmatprep.subr.bf16.mxu1 %v9458_v2  ;;  %v9468_v29 = vld [vmem:[#allocation149_spill] sm:$0xff]  ;;  %v9469_v2 = vld [vmem:[#allocation22_spill] sm:$0xff] }
 0x806   : > { %3832 = vmatpush1.bf16.msra.mxu0 %v9459_v20  ;;  %3873 = vmatpush1.bf16.msra.mxu1 %v9460_v12  ;;  %v9470_v20 = vld [vmem:[#allocation23_spill] sm:$0xff] }
 0x807   : > { %3833 = vmatprep.subr.bf16.mxu0 %v9461_v50  ;;  %3874 = vmatprep.subr.bf16.mxu1 %v9462_v27  ;;  %v9471_v27 = vld [vmem:[#allocation24_spill] sm:$0xff]  ;;  %v9480_v50 = vld [vmem:[#allocation33_spill] sm:$0xff]  ;;  %v9535_v12 = vld [vmem:[#allocation167_spill] sm:$0xff] }
 0x80a   : > { %3834 = vmatpush1.bf16.msra.mxu0 %v9463_v22  ;;  %3875 = vmatpush1.bf16.msra.mxu1 %v9464_v13  ;;  %v9472_v22 = vld [vmem:[#allocation25_spill] sm:$0xff]  ;;  %v9473_v13 = vld [vmem:[#allocation26_spill] sm:$0xff] }
 0x80b   : > { %3835 = vmatprep.subr.bf16.mxu0 %v9465_v21  ;;  %3876 = vmatprep.subr.bf16.mxu1 %v9466_v34  ;;  %v9474_v21 = vld [vmem:[#allocation27_spill] sm:$0xff]  ;;  %v9475_v34 = vld [vmem:[#allocation28_spill] sm:$0xff] }
 0x80e   : > { %3836 = vmatpush1.bf16.msra.mxu0 %v9467_v35  ;;  %3877 = vmatpush1.bf16.msra.mxu1 %v9468_v29  ;;  %v9476_v35 = vld [vmem:[#allocation29_spill] sm:$0xff]  ;;  %v9477_v29 = vld [vmem:[#allocation30_spill] sm:$0xff] }
 0x80f   : > { %3961 = vmatprep.subr.bf16.mxu0 %v9469_v2  ;;  %4002 = vmatprep.subr.bf16.mxu1 %v9470_v20  ;;  %v9478_v2 = vld [vmem:[#allocation31_spill] sm:$0xff]  ;;  %v9479_v20 = vld [vmem:[#allocation32_spill] sm:$0xff] }
 0x811   : > { %3838 = vmatmul.mubr.bf16.vlgmr.msra.gmra.mrb[76].mxu0 %v8114_v15  ;;  %3879 = vmatmul.mubr.bf16.vlgmr.msra.gmra.mrb[76].mxu1 %v8114_v15  ;;  %v9481_v15 = vld [vmem:[#allocation34_spill] sm:$0xff] }
 0x812   : > { %3962 = vmatpush1.bf16.msra.mxu0 %v9471_v27  ;;  %4003 = vmatpush1.bf16.msra.mxu1 %v9472_v22  ;;  %v9482_v27 = vld [vmem:[#allocation35_spill] sm:$0xff]  ;;  %v9483_v22 = vld [vmem:[#allocation36_spill] sm:$0xff] }
 0x813   : > { %3963 = vmatprep.subr.bf16.mxu0 %v9473_v13  ;;  %4004 = vmatprep.subr.bf16.mxu1 %v9474_v21  ;;  %v9484_v13 = vld [vmem:[#allocation37_spill] sm:$0xff]  ;;  %v9485_v21 = vld [vmem:[#allocation38_spill] sm:$0xff] }
 0x816   : > { %3964 = vmatpush1.bf16.msra.mxu0 %v9475_v34  ;;  %4005 = vmatpush1.bf16.msra.mxu1 %v9476_v35  ;;  %v9486_v34 = vld [vmem:[#allocation39_spill] sm:$0xff]  ;;  %v9487_v35 = vld [vmem:[#allocation40_spill] sm:$0xff] }
 0x817   : > { %3965 = vmatprep.subr.bf16.mxu0 %v9477_v29  ;;  %4006 = vmatprep.subr.bf16.mxu1 %v9478_v2  ;;  %v9488_v29 = vld [vmem:[#allocation41_spill] sm:$0xff]  ;;  %v9489_v2 = vld [vmem:[#allocation42_spill] sm:$0xff] }
 0x81a   : > { %3966 = vmatpush1.bf16.msra.mxu0 %v9479_v20  ;;  %4007 = vmatpush1.bf16.msra.mxu1 %v9480_v50  ;;  %v9490_v20 = vld [vmem:[#allocation43_spill] sm:$0xff]  ;;  %v9491_v50 = vld [vmem:[#allocation44_spill] sm:$0xff] }
 0x81b   : > { %3967 = vmatprep.subr.bf16.mxu0 %v9481_v15  ;;  %4008 = vmatprep.subr.bf16.mxu1 %v9482_v27  ;;  %v9492_v15 = vld [vmem:[#allocation45_spill] sm:$0xff]  ;;  %v9493_v27 = vld [vmem:[#allocation46_spill] sm:$0xff] }
 0x81e   : > { %3968 = vmatpush1.bf16.msra.mxu0 %v9483_v22  ;;  %4009 = vmatpush1.bf16.msra.mxu1 %v9484_v13  ;;  %v9494_v22 = vld [vmem:[#allocation47_spill] sm:$0xff]  ;;  %v9495_v13 = vld [vmem:[#allocation48_spill] sm:$0xff] }
 0x81f   : > { %3969 = vmatprep.subr.bf16.mxu0 %v9485_v21  ;;  %4010 = vmatprep.subr.bf16.mxu1 %v9486_v34  ;;  %v9496_v21 = vld [vmem:[#allocation49_spill] sm:$0xff]  ;;  %v9497_v34 = vld [vmem:[#allocation50_spill] sm:$0xff] }
 0x822   : > { %3970 = vmatpush1.bf16.msra.mxu0 %v9487_v35  ;;  %4011 = vmatpush1.bf16.msra.mxu1 %v9488_v29  ;;  %v9498_v35 = vld [vmem:[#allocation51_spill] sm:$0xff]  ;;  %v9499_v29 = vld [vmem:[#allocation52_spill] sm:$0xff] }
 0x823   : > { %3971 = vmatprep.subr.bf16.mxu0 %v9489_v2  ;;  %4012 = vmatprep.subr.bf16.mxu1 %v9490_v20  ;;  %v9500_v2 = vld [vmem:[#allocation53_spill] sm:$0xff]  ;;  %v9501_v20 = vld [vmem:[#allocation54_spill] sm:$0xff] }
 0x826   : > { %3972 = vmatpush1.bf16.msra.mxu0 %v9491_v50  ;;  %4013 = vmatpush1.bf16.msra.mxu1 %v9492_v15  ;;  %v9502_v50 = vld [vmem:[#allocation55_spill] sm:$0xff]  ;;  %v9503_v15 = vld [vmem:[#allocation56_spill] sm:$0xff] }
 0x827   : > { %3973 = vmatprep.subr.bf16.mxu0 %v9493_v27  ;;  %4014 = vmatprep.subr.bf16.mxu1 %v9494_v22  ;;  %v9504_v27 = vld [vmem:[#allocation57_spill] sm:$0xff]  ;;  %v9505_v22 = vld [vmem:[#allocation58_spill] sm:$0xff] }
 0x82a   : > { %3974 = vmatpush1.bf16.msra.mxu0 %v9495_v13  ;;  %4015 = vmatpush1.bf16.msra.mxu1 %v9496_v21  ;;  %v9506_v13 = vld [vmem:[#allocation59_spill] sm:$0xff]  ;;  %v9507_v21 = vld [vmem:[#allocation60_spill] sm:$0xff] }
 0x82b   : > { %3975 = vmatprep.subr.bf16.mxu0 %v9497_v34  ;;  %4016 = vmatprep.subr.bf16.mxu1 %v9498_v35  ;;  %v9508_v34 = vld [vmem:[#allocation61_spill] sm:$0xff]  ;;  %v9509_v35 = vld [vmem:[#allocation62_spill] sm:$0xff] }
 0x82e   : > { %3976 = vmatpush1.bf16.msra.mxu0 %v9499_v29  ;;  %4017 = vmatpush1.bf16.msra.mxu1 %v9500_v2  ;;  %v9510_v29 = vld [vmem:[#allocation63_spill] sm:$0xff]  ;;  %v9511_v2 = vld [vmem:[#allocation64_spill] sm:$0xff] }
 0x82f   : > { %3977 = vmatprep.subr.bf16.mxu0 %v9501_v20  ;;  %4018 = vmatprep.subr.bf16.mxu1 %v9502_v50  ;;  %v9512_v20 = vld [vmem:[#allocation65_spill] sm:$0xff]  ;;  %v9513_v50 = vld [vmem:[#allocation66_spill] sm:$0xff] }
 0x832   : > { %3978 = vmatpush1.bf16.msra.mxu0 %v9503_v15  ;;  %4019 = vmatpush1.bf16.msra.mxu1 %v9504_v27  ;;  %v9514_v15 = vld [vmem:[#allocation67_spill] sm:$0xff]  ;;  %v9515_v27 = vld [vmem:[#allocation68_spill] sm:$0xff] }
 0x833   : > { %3979 = vmatprep.subr.bf16.mxu0 %v9505_v22  ;;  %4020 = vmatprep.subr.bf16.mxu1 %v9506_v13  ;;  %v9516_v22 = vld [vmem:[#allocation69_spill] sm:$0xff]  ;;  %v9517_v13 = vld [vmem:[#allocation70_spill] sm:$0xff] }
 0x836   : > { %3980 = vmatpush1.bf16.msra.mxu0 %v9507_v21  ;;  %4021 = vmatpush1.bf16.msra.mxu1 %v9508_v34  ;;  %v9518_v21 = vld [vmem:[#allocation71_spill] sm:$0xff]  ;;  %v9519_v34 = vld [vmem:[#allocation72_spill] sm:$0xff] }
 0x837   : > { %3981 = vmatprep.subr.bf16.mxu0 %v9509_v35  ;;  %4022 = vmatprep.subr.bf16.mxu1 %v9510_v29  ;;  %v9520_v35 = vld [vmem:[#allocation73_spill] sm:$0xff]  ;;  %v9521_v29 = vld [vmem:[#allocation74_spill] sm:$0xff] }
 0x83a   : > { %3982 = vmatpush1.bf16.msra.mxu0 %v9511_v2  ;;  %4023 = vmatpush1.bf16.msra.mxu1 %v9512_v20  ;;  %v9522_v2 = vld [vmem:[#allocation75_spill] sm:$0xff]  ;;  %v9523_v20 = vld [vmem:[#allocation76_spill] sm:$0xff] }
 0x83b   : > { %3983 = vmatprep.subr.bf16.mxu0 %v9513_v50  ;;  %4024 = vmatprep.subr.bf16.mxu1 %v9514_v15  ;;  %v9524_v50 = vld [vmem:[#allocation77_spill] sm:$0xff]  ;;  %v9525_v15 = vld [vmem:[#allocation78_spill] sm:$0xff] }
 0x83e   : > { %3984 = vmatpush1.bf16.msra.mxu0 %v9515_v27  ;;  %4025 = vmatpush1.bf16.msra.mxu1 %v9516_v22  ;;  %v9526_v27 = vld [vmem:[#allocation79_spill] sm:$0xff]  ;;  %v9527_v22 = vld [vmem:[#allocation80_spill] sm:$0xff] }
 0x83f   : > { %3985 = vmatprep.subr.bf16.mxu0 %v9517_v13  ;;  %4026 = vmatprep.subr.bf16.mxu1 %v9518_v21  ;;  %v9528_v13 = vld [vmem:[#allocation81_spill] sm:$0xff]  ;;  %v9529_v21 = vld [vmem:[#allocation82_spill] sm:$0xff] }
 0x842   : > { %3986 = vmatpush1.bf16.msra.mxu0 %v9519_v34  ;;  %4027 = vmatpush1.bf16.msra.mxu1 %v9520_v35  ;;  %v9530_v34 = vld [vmem:[#allocation83_spill] sm:$0xff]  ;;  %v9531_v35 = vld [vmem:[#allocation84_spill] sm:$0xff] }
 0x843   : > { %3987 = vmatprep.subr.bf16.mxu0 %v9521_v29  ;;  %4028 = vmatprep.subr.bf16.mxu1 %v9522_v2  ;;  %v9532_v29 = vld [vmem:[#allocation85_spill] sm:$0xff]  ;;  %v9533_v2 = vld [vmem:[#allocation86_spill] sm:$0xff] }
 0x846   : > { %3988 = vmatpush1.bf16.msra.mxu0 %v9523_v20  ;;  %4029 = vmatpush1.bf16.msra.mxu1 %v9524_v50  ;;  %v9534_v20 = vld [vmem:[#allocation87_spill] sm:$0xff] }
 0x847   : > { %3989 = vmatprep.subr.bf16.mxu0 %v9525_v15  ;;  %4030 = vmatprep.subr.bf16.mxu1 %v9526_v27 }
 0x84a   : > { %3990 = vmatpush1.bf16.msra.mxu0 %v9527_v22  ;;  %4031 = vmatpush1.bf16.msra.mxu1 %v9528_v13 }
 0x84b   : > { %3991 = vmatprep.subr.bf16.mxu0 %v9529_v21  ;;  %4032 = vmatprep.subr.bf16.mxu1 %v9530_v34 }
 0x84e   : > { %3992 = vmatpush1.bf16.msra.mxu0 %v9531_v35  ;;  %4033 = vmatpush1.bf16.msra.mxu1 %v9532_v29 }
 0x84f   : > { %4043 = vmatprep.subr.bf16.mxu0 %v9533_v2  ;;  %4084 = vmatprep.subr.bf16.mxu1 %v9534_v20 }
 0x8a4   : > { %v3757_v50 = vpop.f32.mrb[72].mxu0  ;;  %v3798_v15 = vpop.f32.mrb[72].mxu1 }
 0x8a5   : > { %v3887_v27 = vadd.f32 %v3757_v50, %v9535_v12  ;;  %v3889_v22 = vadd.f32 %v3798_v15, %v9536_v52  ;;  %v3759_v30 = vpop.f32.mrb[73].mxu0  ;;  %v3800_v13 = vpop.f32.mrb[73].mxu1 }
 0x8a6   : > { %v3888_v21 = vadd.f32 %v3759_v30, %v9537_v60  ;;  %v3890_v34 = vadd.f32 %v3800_v13, %v9538_v57  ;;  %v3761_v11 = vpop.f32.mrb[74].mxu0  ;;  %v3802_v35 = vpop.f32.mrb[74].mxu1 }
 0x8a7   : > { %v3762_v41 = vpop.f32.mrb[75].mxu0  ;;  %v3803_v29 = vpop.f32.mrb[75].mxu1  ;;  %v5328_v28 = vmul.f32 -1.442695, %v3887_v27  ;;  %v5330_v2 = vmul.f32 -1.442695, %v3889_v22 }
 0x8a8   : > { %v5329_v42 = vmul.f32 -1.442695, %v3888_v21  ;;  %v5331_v20 = vmul.f32 -1.442695, %v3890_v34  ;;  %v9539_v29 = vld [vmem:[#allocation195_spill] sm:$0xff]  ;;  %v9540_v22 = vld [vmem:[#allocation196_spill] sm:$0xff] }
 0x8a9   : > { %5693 = vpow2.f32 %v5328_v28  ;;  %v9542_v21 = vld [vmem:[#allocation198_spill] sm:$0xff] }
 0x8aa   : > { %5695 = vpow2.f32 %v5330_v2 }
 0x8ab   : > { %5697 = vpow2.f32 %v5329_v42 }
 0x8ac   : > { %5699 = vpow2.f32 %v5331_v20  ;;  %v9541_v20 = vld [vmem:[#allocation197_spill] sm:$0xff] }
 0x8b3   : > { %v5694_v12 = vpop.eup %5693 }
 0x8b4   : > { %v5696_v52 = vpop.eup %5695  ;;  %v3901_v24 = vadd.f32 1.0, %v5694_v12 }
 0x8b5   : > { %v5698_v50 = vpop.eup %5697  ;;  %v3913_v60 = vadd.f32 1.0, %v5696_v52 }
 0x8b6   : > { %v5700_v15 = vpop.eup %5699  ;;  %v3902_v30 = vadd.f32 1.0, %v5698_v50  ;;  %5701 = vrcp.f32 %v3901_v24 }
 0x8b7   : > { %v3914_v57 = vadd.f32 1.0, %v5700_v15  ;;  %5703 = vrcp.f32 %v3913_v60 }
 0x8b8   : > { %5705 = vrcp.f32 %v3902_v30 }
 0x8b9   : > { %5707 = vrcp.f32 %v3914_v57 }
 0x8c0   : > { %v5702_v60 = vpop.eup %5701 }
 0x8c1   : > { %v5704_v30 = vpop.eup %5703 }
 0x8e4   : > { %v3839_v41 = vpop.f32.mrb[76].mxu0  ;;  %v3880_v11 = vpop.f32.mrb[76].mxu1 }
 0x8e5   : > { %v3891_v27 = vadd.f32 %v3839_v41, %v9539_v29  ;;  %v3893_v28 = vadd.f32 %v3880_v11, %v9540_v22  ;;  %v3841_v2 = vpop.f32.mrb[77].mxu0  ;;  %v3882_v42 = vpop.f32.mrb[77].mxu1  ;;  %v3933_v22 = vmul.f32 %v5704_v30, %v8108_v5 }
 0x8e6   : > { %v3892_v13 = vadd.f32 %v3841_v2, %v9541_v20  ;;  %v3894_v34 = vadd.f32 %v3882_v42, %v9542_v21  ;;  %v3843_v35 = vpop.f32.mrb[78].mxu0  ;;  %v3884_v12 = vpop.f32.mrb[78].mxu1 }
 0x8e7   : > { %5709 = vtanh.f32 %v3891_v27  ;;  %v5332_v52 = vmul.f32 -1.442695, %v3893_v28  ;;  %v3844_v24 = vpop.f32.mrb[79].mxu0  ;;  %v3885_v50 = vpop.f32.mrb[79].mxu1 }
 0x8e8   : > { %5711 = vtanh.f32 %v3892_v13  ;;  %v5333_v15 = vmul.f32 -1.442695, %v3894_v34  ;;  %v5706_v41 = vpop.eup %5705 }
 0x8e9   : > { %5713 = vpow2.f32 %v5332_v52  ;;  %v5708_v11 = vpop.eup %5707 }
 0x8ea   : > { %5715 = vpow2.f32 %v5333_v15  ;;  %v3934_v20 = vmul.f32 %v5708_v11, %v8110_v51  ;;  %v9543_v11 = vld [vmem:[#allocation129_spill] sm:$0xff] }
 0x8f1   : > { %v5710_v29 = vpop.eup %5709 }
 0x8f2   : > { %v5712_v57 = vpop.eup %5711  ;;  %v3935_v2 = vmul.f32 %v5710_v29, %v5702_v60  ;;  %v9544_v29 = vld [vmem:[#allocation130_spill] sm:$0xff] }
 0x8f3   : > { %v5714_v42 = vpop.eup %5713  ;;  %v3936_v27 = vmul.f32 %v5712_v57, %v5706_v41  ;;  %v9545_v57 = vld [vmem:[#allocation131_spill] sm:$0xff] }
 0x8f4   : > { %v5716_v28 = vpop.eup %5715  ;;  %v8259_v21 = vadd.f32 %v3935_v2, %v3933_v22  ;;  %v3927_v13 = vadd.f32 1.0, %v5714_v42  ;;  %v9546_v22 = vld [vmem:[#allocation132_spill] sm:$0xff]  ;;  %v9547_v2 = vld [vmem:[#allocation133_spill] sm:$0xff]  ;;  %v9548_v42 = vld [vmem:[#allocation134_spill] sm:$0xff] }
 0x8f5   : > { %v8261_v34 = vadd.f32 %v3936_v27, %v3934_v20  ;;  %v3928_v35 = vadd.f32 1.0, %v5716_v28  ;;  %v9549_v20 = vld [vmem:[#allocation135_spill] sm:$0xff]  ;;  %v9550_v27 = vld [vmem:[#allocation136_spill] sm:$0xff]  ;;  %v9551_v28 = vld [vmem:[#allocation137_spill] sm:$0xff] }
 0x8f6   : > { %5717 = vtanh.f32 %v8259_v21 }
 0x8f7   : > { %5719 = vrcp.f32 %v3927_v13  ;;  %v9552_v13 = vld [vmem:[#allocation138_spill] sm:$0xff] }
 0x8f8   : > { %5721 = vtanh.f32 %v8261_v34 }
 0x8f9   : > { %5723 = vrcp.f32 %v3928_v35  ;;  %v9553_v35 = vld [vmem:[#allocation139_spill] sm:$0xff] }
 0x900   : > { %v5718_v12 = vpop.eup %5717 }
 0x901   : > { %v5720_v5 = vpop.eup %5719 }
 0x902   : > { %v5722_v52 = vpop.eup %5721  ;;  %v3941_v24 = vmul.f32 %v5720_v5, %v5718_v12  ;;  %v9554_v12 = vld [vmem:[#allocation140_spill] sm:$0xff]  ;;  %v9555_v5 = vld [vmem:[#allocation141_spill] sm:$0xff] }
 0x903   : > { %v5724_v50 = vpop.eup %5723 }
 0x904   : > { %v3942_v51 = vmul.f32 %v5724_v50, %v5722_v52  ;;  %v8265_v15 = vpack.c.bf16 %v3941_v24, %v3941_v24  ;;  %v9556_v52 = vld [vmem:[#allocation142_spill] sm:$0xff]  ;;  %v9557_v24 = vld [vmem:[#allocation143_spill] sm:$0xff]  ;;  %v9558_v50 = vld [vmem:[#allocation144_spill] sm:$0xff] }
 0x906   : > { %v3944_v60 = vpack.c.bf16 %v3942_v51, %v3942_v51  ;;  %v3947_v30 = vrot.slane %v8265_v15, 4  ;;  %v9559_v51 = vld [vmem:[#allocation145_spill] sm:$0xff] }
 0x908   : > { %v3948_v41 = vrot.slane %v3944_v60, 4  ;;  %3993 = vmatprep.mubr.bf16.mxu0 %v3944_v60  ;;  %4034 = vmatprep.mubr.bf16.mxu1 %v3944_v60  ;;  %3951 = vst [vmem:[#allocation2 + $0x20] sm:$0xf0] %v3947_v30  ;;  %v9561_v30 = vld [vmem:[#allocation147_spill] sm:$0xff] }
 0x909   : > { %3994 = vmatmul.mubr.bf16.vlgmr.msra.gmra.mrb[80].mxu0 %v8265_v15  ;;  %4035 = vmatmul.mubr.bf16.vlgmr.msra.gmra.mrb[80].mxu1 %v8265_v15 }
 0x90a   : > { %3952 = vst [vmem:[#allocation2 + $0x28] sm:$0xf0] %v3948_v41  ;;  %4044 = vmatpush1.bf16.msra.mxu0 %v9059_v44  ;;  %4085 = vmatpush1.bf16.msra.mxu1 %v9060_v62  ;;  %v9562_v41 = vld [vmem:[#allocation148_spill] sm:$0xff] }
 0x90b   : > { %4075 = vmatprep.mubr.bf16.mxu0 %v3944_v60  ;;  %4116 = vmatprep.mubr.bf16.mxu1 %v3944_v60  ;;  %v9560_v60 = vld [vmem:[#allocation146_spill] sm:$0xff] }
 0x90c   : > { %4045 = vmatprep.subr.bf16.mxu0 %v9061_v39  ;;  %4086 = vmatprep.subr.bf16.mxu1 %v9062_v26 }
 0x90e   : > { %4046 = vmatpush1.bf16.msra.mxu0 %v9063_v9  ;;  %4087 = vmatpush1.bf16.msra.mxu1 %v9064_v7 }
 0x90f   : > { %4047 = vmatprep.subr.bf16.mxu0 %v9065_v25  ;;  %4088 = vmatprep.subr.bf16.mxu1 %v9066_v10 }
 0x912   : > { %4048 = vmatpush1.bf16.msra.mxu0 %v9067_v33  ;;  %4089 = vmatpush1.bf16.msra.mxu1 %v9068_v19 }
 0x913   : > { %4049 = vmatprep.subr.bf16.mxu0 %v9069_v0  ;;  %4090 = vmatprep.subr.bf16.mxu1 %v9070_v47 }
 0x916   : > { %4050 = vmatpush1.bf16.msra.mxu0 %v9071_v63  ;;  %4091 = vmatpush1.bf16.msra.mxu1 %v9072_v1 }
 0x917   : > { %4051 = vmatprep.subr.bf16.mxu0 %v9073_v6  ;;  %4092 = vmatprep.subr.bf16.mxu1 %v9074_v8 }
 0x91a   : > { %4052 = vmatpush1.bf16.msra.mxu0 %v9075_v58  ;;  %4093 = vmatpush1.bf16.msra.mxu1 %v9076_v56 }
 0x91b   : > { %4053 = vmatprep.subr.bf16.mxu0 %v9163_v54  ;;  %4094 = vmatprep.subr.bf16.mxu1 %v9164_v16 }
 0x91e   : > { %4054 = vmatpush1.bf16.msra.mxu0 %v9165_v37  ;;  %4095 = vmatpush1.bf16.msra.mxu1 %v9166_v45 }
 0x91f   : > { %4055 = vmatprep.subr.bf16.mxu0 %v9167_v49  ;;  %4096 = vmatprep.subr.bf16.mxu1 %v9168_v31 }
 0x922   : > { %4056 = vmatpush1.bf16.msra.mxu0 %v9169_v53  ;;  %4097 = vmatpush1.bf16.msra.mxu1 %v9170_v17 }
 0x923   : > { %4057 = vmatprep.subr.bf16.mxu0 %v9171_v32  ;;  %4098 = vmatprep.subr.bf16.mxu1 %v9172_v23 }
 0x926   : > { %4058 = vmatpush1.bf16.msra.mxu0 %v9173_v18  ;;  %4099 = vmatpush1.bf16.msra.mxu1 %v9174_v48 }
 0x927   : > { %4059 = vmatprep.subr.bf16.mxu0 %v9175_v3  ;;  %4100 = vmatprep.subr.bf16.mxu1 %v9176_v40 }
 0x92a   : > { %4060 = vmatpush1.bf16.msra.mxu0 %v9177_v59  ;;  %4101 = vmatpush1.bf16.msra.mxu1 %v9178_v14 }
 0x92b   : > { %4061 = vmatprep.subr.bf16.mxu0 %v9179_v36  ;;  %4102 = vmatprep.subr.bf16.mxu1 %v9180_v38 }
 0x92e   : > { %4062 = vmatpush1.bf16.msra.mxu0 %v9181_v61  ;;  %4103 = vmatpush1.bf16.msra.mxu1 %v9096_v43 }
 0x92f   : > { %4063 = vmatprep.subr.bf16.mxu0 %v9097_v4  ;;  %4104 = vmatprep.subr.bf16.mxu1 %v9098_v55 }
 0x932   : > { %4064 = vmatpush1.bf16.msra.mxu0 %v9182_v46  ;;  %4105 = vmatpush1.bf16.msra.mxu1 %v9543_v11 }
 0x933   : > { %4065 = vmatprep.subr.bf16.mxu0 %v9544_v29  ;;  %4106 = vmatprep.subr.bf16.mxu1 %v9545_v57 }
 0x936   : > { %4066 = vmatpush1.bf16.msra.mxu0 %v9546_v22  ;;  %4107 = vmatpush1.bf16.msra.mxu1 %v9547_v2 }
 0x937   : > { %4067 = vmatprep.subr.bf16.mxu0 %v9548_v42  ;;  %4108 = vmatprep.subr.bf16.mxu1 %v9549_v20  ;;  %v9632_v20 = vld [vmem:[#allocation173_spill] sm:$0xff]  ;;  %v9633_v42 = vld [vmem:[#allocation174_spill] sm:$0xff] }
 0x93a   : > { %4068 = vmatpush1.bf16.msra.mxu0 %v9550_v27  ;;  %4109 = vmatpush1.bf16.msra.mxu1 %v9551_v28  ;;  %v9631_v28 = vld [vmem:[#allocation172_spill] sm:$0xff] }
 0x93b   : > { %4069 = vmatprep.subr.bf16.mxu0 %v9552_v13  ;;  %4110 = vmatprep.subr.bf16.mxu1 %v9553_v35  ;;  %v9563_v13 = vld [vmem:[#allocation149_spill] sm:$0xff]  ;;  %v9564_v35 = vld [vmem:[#allocation22_spill] sm:$0xff] }
 0x93e   : > { %4070 = vmatpush1.bf16.msra.mxu0 %v9554_v12  ;;  %4111 = vmatpush1.bf16.msra.mxu1 %v9555_v5  ;;  %v9565_v12 = vld [vmem:[#allocation23_spill] sm:$0xff] }
 0x93f   : > { %4071 = vmatprep.subr.bf16.mxu0 %v9556_v52  ;;  %4112 = vmatprep.subr.bf16.mxu1 %v9557_v24  ;;  %v9566_v24 = vld [vmem:[#allocation24_spill] sm:$0xff]  ;;  %v9575_v52 = vld [vmem:[#allocation33_spill] sm:$0xff]  ;;  %v9630_v5 = vld [vmem:[#allocation171_spill] sm:$0xff] }
 0x942   : > { %4072 = vmatpush1.bf16.msra.mxu0 %v9558_v50  ;;  %4113 = vmatpush1.bf16.msra.mxu1 %v9559_v51  ;;  %v9567_v50 = vld [vmem:[#allocation25_spill] sm:$0xff]  ;;  %v9568_v51 = vld [vmem:[#allocation26_spill] sm:$0xff] }
 0x943   : > { %4073 = vmatprep.subr.bf16.mxu0 %v9560_v60  ;;  %4114 = vmatprep.subr.bf16.mxu1 %v9561_v30  ;;  %v9569_v60 = vld [vmem:[#allocation27_spill] sm:$0xff]  ;;  %v9570_v30 = vld [vmem:[#allocation28_spill] sm:$0xff] }
 0x946   : > { %4074 = vmatpush1.bf16.msra.mxu0 %v9562_v41  ;;  %4115 = vmatpush1.bf16.msra.mxu1 %v9563_v13  ;;  %v9571_v41 = vld [vmem:[#allocation29_spill] sm:$0xff]  ;;  %v9572_v13 = vld [vmem:[#allocation30_spill] sm:$0xff] }
 0x947   : > { %4193 = vmatprep.subr.bf16.mxu0 %v9564_v35  ;;  %4234 = vmatprep.subr.bf16.mxu1 %v9565_v12  ;;  %v9573_v35 = vld [vmem:[#allocation31_spill] sm:$0xff]  ;;  %v9574_v12 = vld [vmem:[#allocation32_spill] sm:$0xff] }
 0x949   : > { %4076 = vmatmul.mubr.bf16.vlgmr.msra.gmra.mrb[84].mxu0 %v8265_v15  ;;  %4117 = vmatmul.mubr.bf16.vlgmr.msra.gmra.mrb[84].mxu1 %v8265_v15  ;;  %v9576_v15 = vld [vmem:[#allocation34_spill] sm:$0xff] }
 0x94a   : > { %4194 = vmatpush1.bf16.msra.mxu0 %v9566_v24  ;;  %4235 = vmatpush1.bf16.msra.mxu1 %v9567_v50  ;;  %v9577_v24 = vld [vmem:[#allocation35_spill] sm:$0xff]  ;;  %v9578_v50 = vld [vmem:[#allocation36_spill] sm:$0xff] }
 0x94b   : > { %4195 = vmatprep.subr.bf16.mxu0 %v9568_v51  ;;  %4236 = vmatprep.subr.bf16.mxu1 %v9569_v60  ;;  %v9579_v51 = vld [vmem:[#allocation37_spill] sm:$0xff]  ;;  %v9580_v60 = vld [vmem:[#allocation38_spill] sm:$0xff] }
 0x94e   : > { %4196 = vmatpush1.bf16.msra.mxu0 %v9570_v30  ;;  %4237 = vmatpush1.bf16.msra.mxu1 %v9571_v41  ;;  %v9581_v30 = vld [vmem:[#allocation39_spill] sm:$0xff]  ;;  %v9582_v41 = vld [vmem:[#allocation40_spill] sm:$0xff] }
 0x94f   : > { %4197 = vmatprep.subr.bf16.mxu0 %v9572_v13  ;;  %4238 = vmatprep.subr.bf16.mxu1 %v9573_v35  ;;  %v9583_v13 = vld [vmem:[#allocation41_spill] sm:$0xff]  ;;  %v9584_v35 = vld [vmem:[#allocation42_spill] sm:$0xff] }
 0x952   : > { %4198 = vmatpush1.bf16.msra.mxu0 %v9574_v12  ;;  %4239 = vmatpush1.bf16.msra.mxu1 %v9575_v52  ;;  %v9585_v12 = vld [vmem:[#allocation43_spill] sm:$0xff]  ;;  %v9586_v52 = vld [vmem:[#allocation44_spill] sm:$0xff] }
 0x953   : > { %4199 = vmatprep.subr.bf16.mxu0 %v9576_v15  ;;  %4240 = vmatprep.subr.bf16.mxu1 %v9577_v24  ;;  %v9587_v15 = vld [vmem:[#allocation45_spill] sm:$0xff]  ;;  %v9588_v24 = vld [vmem:[#allocation46_spill] sm:$0xff] }
 0x956   : > { %4200 = vmatpush1.bf16.msra.mxu0 %v9578_v50  ;;  %4241 = vmatpush1.bf16.msra.mxu1 %v9579_v51  ;;  %v9589_v50 = vld [vmem:[#allocation47_spill] sm:$0xff]  ;;  %v9590_v51 = vld [vmem:[#allocation48_spill] sm:$0xff] }
 0x957   : > { %4201 = vmatprep.subr.bf16.mxu0 %v9580_v60  ;;  %4242 = vmatprep.subr.bf16.mxu1 %v9581_v30  ;;  %v9591_v60 = vld [vmem:[#allocation49_spill] sm:$0xff]  ;;  %v9592_v30 = vld [vmem:[#allocation50_spill] sm:$0xff] }
 0x95a   : > { %4202 = vmatpush1.bf16.msra.mxu0 %v9582_v41  ;;  %4243 = vmatpush1.bf16.msra.mxu1 %v9583_v13  ;;  %v9593_v41 = vld [vmem:[#allocation51_spill] sm:$0xff]  ;;  %v9594_v13 = vld [vmem:[#allocation52_spill] sm:$0xff] }
 0x95b   : > { %4203 = vmatprep.subr.bf16.mxu0 %v9584_v35  ;;  %4244 = vmatprep.subr.bf16.mxu1 %v9585_v12  ;;  %v9595_v35 = vld [vmem:[#allocation53_spill] sm:$0xff]  ;;  %v9596_v12 = vld [vmem:[#allocation54_spill] sm:$0xff] }
 0x95e   : > { %4204 = vmatpush1.bf16.msra.mxu0 %v9586_v52  ;;  %4245 = vmatpush1.bf16.msra.mxu1 %v9587_v15  ;;  %v9597_v52 = vld [vmem:[#allocation55_spill] sm:$0xff]  ;;  %v9598_v15 = vld [vmem:[#allocation56_spill] sm:$0xff] }
 0x95f   : > { %4205 = vmatprep.subr.bf16.mxu0 %v9588_v24  ;;  %4246 = vmatprep.subr.bf16.mxu1 %v9589_v50  ;;  %v9599_v24 = vld [vmem:[#allocation57_spill] sm:$0xff]  ;;  %v9600_v50 = vld [vmem:[#allocation58_spill] sm:$0xff] }
 0x962   : > { %4206 = vmatpush1.bf16.msra.mxu0 %v9590_v51  ;;  %4247 = vmatpush1.bf16.msra.mxu1 %v9591_v60  ;;  %v9601_v51 = vld [vmem:[#allocation59_spill] sm:$0xff]  ;;  %v9602_v60 = vld [vmem:[#allocation60_spill] sm:$0xff] }
 0x963   : > { %4207 = vmatprep.subr.bf16.mxu0 %v9592_v30  ;;  %4248 = vmatprep.subr.bf16.mxu1 %v9593_v41  ;;  %v9603_v30 = vld [vmem:[#allocation61_spill] sm:$0xff]  ;;  %v9604_v41 = vld [vmem:[#allocation62_spill] sm:$0xff] }
 0x966   : > { %4208 = vmatpush1.bf16.msra.mxu0 %v9594_v13  ;;  %4249 = vmatpush1.bf16.msra.mxu1 %v9595_v35  ;;  %v9605_v13 = vld [vmem:[#allocation63_spill] sm:$0xff]  ;;  %v9606_v35 = vld [vmem:[#allocation64_spill] sm:$0xff] }
 0x967   : > { %4209 = vmatprep.subr.bf16.mxu0 %v9596_v12  ;;  %4250 = vmatprep.subr.bf16.mxu1 %v9597_v52  ;;  %v9607_v12 = vld [vmem:[#allocation65_spill] sm:$0xff]  ;;  %v9608_v52 = vld [vmem:[#allocation66_spill] sm:$0xff] }
 0x96a   : > { %4210 = vmatpush1.bf16.msra.mxu0 %v9598_v15  ;;  %4251 = vmatpush1.bf16.msra.mxu1 %v9599_v24  ;;  %v9609_v15 = vld [vmem:[#allocation67_spill] sm:$0xff]  ;;  %v9610_v24 = vld [vmem:[#allocation68_spill] sm:$0xff] }
 0x96b   : > { %4211 = vmatprep.subr.bf16.mxu0 %v9600_v50  ;;  %4252 = vmatprep.subr.bf16.mxu1 %v9601_v51  ;;  %v9611_v50 = vld [vmem:[#allocation69_spill] sm:$0xff]  ;;  %v9612_v51 = vld [vmem:[#allocation70_spill] sm:$0xff] }
 0x96e   : > { %4212 = vmatpush1.bf16.msra.mxu0 %v9602_v60  ;;  %4253 = vmatpush1.bf16.msra.mxu1 %v9603_v30  ;;  %v9613_v60 = vld [vmem:[#allocation71_spill] sm:$0xff]  ;;  %v9614_v30 = vld [vmem:[#allocation72_spill] sm:$0xff] }
 0x96f   : > { %4213 = vmatprep.subr.bf16.mxu0 %v9604_v41  ;;  %4254 = vmatprep.subr.bf16.mxu1 %v9605_v13  ;;  %v9615_v41 = vld [vmem:[#allocation73_spill] sm:$0xff]  ;;  %v9616_v13 = vld [vmem:[#allocation74_spill] sm:$0xff] }
 0x972   : > { %4214 = vmatpush1.bf16.msra.mxu0 %v9606_v35  ;;  %4255 = vmatpush1.bf16.msra.mxu1 %v9607_v12  ;;  %v9617_v35 = vld [vmem:[#allocation75_spill] sm:$0xff]  ;;  %v9618_v12 = vld [vmem:[#allocation76_spill] sm:$0xff] }
 0x973   : > { %4215 = vmatprep.subr.bf16.mxu0 %v9608_v52  ;;  %4256 = vmatprep.subr.bf16.mxu1 %v9609_v15  ;;  %v9619_v52 = vld [vmem:[#allocation77_spill] sm:$0xff]  ;;  %v9620_v15 = vld [vmem:[#allocation78_spill] sm:$0xff] }
 0x976   : > { %4216 = vmatpush1.bf16.msra.mxu0 %v9610_v24  ;;  %4257 = vmatpush1.bf16.msra.mxu1 %v9611_v50  ;;  %v9621_v24 = vld [vmem:[#allocation79_spill] sm:$0xff]  ;;  %v9622_v50 = vld [vmem:[#allocation80_spill] sm:$0xff] }
 0x977   : > { %4217 = vmatprep.subr.bf16.mxu0 %v9612_v51  ;;  %4258 = vmatprep.subr.bf16.mxu1 %v9613_v60  ;;  %v9623_v51 = vld [vmem:[#allocation81_spill] sm:$0xff]  ;;  %v9624_v60 = vld [vmem:[#allocation82_spill] sm:$0xff] }
 0x97a   : > { %4218 = vmatpush1.bf16.msra.mxu0 %v9614_v30  ;;  %4259 = vmatpush1.bf16.msra.mxu1 %v9615_v41  ;;  %v9625_v30 = vld [vmem:[#allocation83_spill] sm:$0xff]  ;;  %v9626_v41 = vld [vmem:[#allocation84_spill] sm:$0xff] }
 0x97b   : > { %4219 = vmatprep.subr.bf16.mxu0 %v9616_v13  ;;  %4260 = vmatprep.subr.bf16.mxu1 %v9617_v35  ;;  %v9627_v13 = vld [vmem:[#allocation85_spill] sm:$0xff]  ;;  %v9628_v35 = vld [vmem:[#allocation86_spill] sm:$0xff] }
 0x97e   : > { %4220 = vmatpush1.bf16.msra.mxu0 %v9618_v12  ;;  %4261 = vmatpush1.bf16.msra.mxu1 %v9619_v52  ;;  %v9629_v12 = vld [vmem:[#allocation87_spill] sm:$0xff] }
 0x97f   : > { %4221 = vmatprep.subr.bf16.mxu0 %v9620_v15  ;;  %4262 = vmatprep.subr.bf16.mxu1 %v9621_v24 }
 0x982   : > { %4222 = vmatpush1.bf16.msra.mxu0 %v9622_v50  ;;  %4263 = vmatpush1.bf16.msra.mxu1 %v9623_v51 }
 0x983   : > { %4223 = vmatprep.subr.bf16.mxu0 %v9624_v60  ;;  %4264 = vmatprep.subr.bf16.mxu1 %v9625_v30 }
 0x986   : > { %4224 = vmatpush1.bf16.msra.mxu0 %v9626_v41  ;;  %4265 = vmatpush1.bf16.msra.mxu1 %v9627_v13 }
 0x987   : > { %4275 = vmatprep.subr.bf16.mxu0 %v9628_v35  ;;  %4316 = vmatprep.subr.bf16.mxu1 %v9629_v12 }
 0x9dc   : > { %v3995_v52 = vpop.f32.mrb[80].mxu0  ;;  %v4036_v15 = vpop.f32.mrb[80].mxu1 }
 0x9dd   : > { %v4125_v24 = vadd.f32 %v3995_v52, %v9630_v5  ;;  %v4127_v50 = vadd.f32 %v4036_v15, %v9631_v28  ;;  %v3997_v27 = vpop.f32.mrb[81].mxu0  ;;  %v4038_v51 = vpop.f32.mrb[81].mxu1 }
 0x9de   : > { %v4126_v60 = vadd.f32 %v3997_v27, %v9632_v20  ;;  %v4128_v30 = vadd.f32 %v4038_v51, %v9633_v42  ;;  %v3999_v2 = vpop.f32.mrb[82].mxu0  ;;  %v4040_v41 = vpop.f32.mrb[82].mxu1  ;;  %v9635_v51 = vld [vmem:[#allocation200_spill] sm:$0xff] }
 0x9df   : > { %v4000_v22 = vpop.f32.mrb[83].mxu0  ;;  %v4041_v13 = vpop.f32.mrb[83].mxu1  ;;  %v5334_v57 = vmul.f32 -1.442695, %v4125_v24  ;;  %v5336_v35 = vmul.f32 -1.442695, %v4127_v50 }
 0x9e0   : > { %v5335_v29 = vmul.f32 -1.442695, %v4126_v60  ;;  %v5337_v12 = vmul.f32 -1.442695, %v4128_v30  ;;  %v9634_v24 = vld [vmem:[#allocation199_spill] sm:$0xff]  ;;  %v9636_v30 = vld [vmem:[#allocation201_spill] sm:$0xff] }
 0x9e1   : > { %5725 = vpow2.f32 %v5334_v57  ;;  %v9637_v13 = vld [vmem:[#allocation202_spill] sm:$0xff] }
 0x9e2   : > { %5727 = vpow2.f32 %v5336_v35 }
 0x9e3   : > { %5729 = vpow2.f32 %v5335_v29 }
 0x9e4   : > { %5731 = vpow2.f32 %v5337_v12 }
 0x9eb   : > { %v5726_v5 = vpop.eup %5725 }
 0x9ec   : > { %v5728_v28 = vpop.eup %5727  ;;  %v4139_v11 = vadd.f32 1.0, %v5726_v5 }
 0x9ed   : > { %v5730_v52 = vpop.eup %5729  ;;  %v4151_v20 = vadd.f32 1.0, %v5728_v28 }
 0x9ee   : > { %v5732_v15 = vpop.eup %5731  ;;  %v4140_v27 = vadd.f32 1.0, %v5730_v52  ;;  %5733 = vrcp.f32 %v4139_v11 }
 0x9ef   : > { %v4152_v42 = vadd.f32 1.0, %v5732_v15  ;;  %5735 = vrcp.f32 %v4151_v20 }
 0x9f0   : > { %5737 = vrcp.f32 %v4140_v27 }
 0x9f1   : > { %5739 = vrcp.f32 %v4152_v42 }
 0x9f8   : > { %v5734_v20 = vpop.eup %5733 }
 0x9f9   : > { %v5736_v27 = vpop.eup %5735 }
 0xa1c   : > { %v4077_v22 = vpop.f32.mrb[84].mxu0  ;;  %v4118_v2 = vpop.f32.mrb[84].mxu1 }
 0xa1d   : > { %v4129_v50 = vadd.f32 %v4077_v22, %v9634_v24  ;;  %v4131_v57 = vadd.f32 %v4118_v2, %v9635_v51  ;;  %v4079_v60 = vpop.f32.mrb[85].mxu0  ;;  %v4120_v29 = vpop.f32.mrb[85].mxu1  ;;  %v4171_v51 = vmul.f32 %v5736_v27, %v8259_v21 }
 0xa1e   : > { %v4130_v41 = vadd.f32 %v4079_v60, %v9636_v30  ;;  %v4132_v35 = vadd.f32 %v4120_v29, %v9637_v13  ;;  %v4081_v12 = vpop.f32.mrb[86].mxu0  ;;  %v4122_v5 = vpop.f32.mrb[86].mxu1 }
 0xa1f   : > { %5741 = vtanh.f32 %v4129_v50  ;;  %v5338_v28 = vmul.f32 -1.442695, %v4131_v57  ;;  %v4082_v11 = vpop.f32.mrb[87].mxu0  ;;  %v4123_v52 = vpop.f32.mrb[87].mxu1 }
 0xa20   : > { %5743 = vtanh.f32 %v4130_v41  ;;  %v5339_v15 = vmul.f32 -1.442695, %v4132_v35  ;;  %v5738_v22 = vpop.eup %5737 }
 0xa21   : > { %5745 = vpow2.f32 %v5338_v28  ;;  %v5740_v2 = vpop.eup %5739 }
 0xa22   : > { %5747 = vpow2.f32 %v5339_v15  ;;  %v4172_v30 = vmul.f32 %v5740_v2, %v8261_v34 }
 0xa29   : > { %v5742_v24 = vpop.eup %5741 }
 0xa2a   : > { %v5744_v42 = vpop.eup %5743  ;;  %v4173_v60 = vmul.f32 %v5742_v24, %v5734_v20 }
 0xa2b   : > { %v5746_v29 = vpop.eup %5745  ;;  %v4174_v50 = vmul.f32 %v5744_v42, %v5738_v22 }
 0xa2c   : > { %v5748_v57 = vpop.eup %5747  ;;  %v8410_v13 = vadd.f32 %v4173_v60, %v4171_v51  ;;  %v4165_v41 = vadd.f32 1.0, %v5746_v29 }
 0xa2d   : > { %v8412_v35 = vadd.f32 %v4174_v50, %v4172_v30  ;;  %v4166_v12 = vadd.f32 1.0, %v5748_v57  ;;  %v9663_v57 = vld [vmem:[#allocation203_spill] sm:$0xff] }
 0xa2e   : > { %5749 = vtanh.f32 %v8410_v13 }
 0xa2f   : > { %5751 = vrcp.f32 %v4165_v41 }
 0xa30   : > { %5753 = vtanh.f32 %v8412_v35 }
 0xa31   : > { %5755 = vrcp.f32 %v4166_v12  ;;  %v9664_v12 = vld [vmem:[#allocation204_spill] sm:$0xff] }
 0xa38   : > { %v5750_v5 = vpop.eup %5749 }
 0xa39   : > { %v5752_v21 = vpop.eup %5751 }
 0xa3a   : > { %v5754_v28 = vpop.eup %5753  ;;  %v4179_v11 = vmul.f32 %v5752_v21, %v5750_v5 }
 0xa3b   : > { %v5756_v52 = vpop.eup %5755 }
 0xa3c   : > { %v4180_v34 = vmul.f32 %v5756_v52, %v5754_v28  ;;  %v8416_v15 = vpack.c.bf16 %v4179_v11, %v4179_v11  ;;  %v9665_v11 = vld [vmem:[#allocation205_spill] sm:$0xff] }
 0xa3e   : > { %v4182_v20 = vpack.c.bf16 %v4180_v34, %v4180_v34  ;;  %4183 = vst [vmem:[#allocation2 + $0x30] sm:$0xf] %v8416_v15  ;;  %v9666_v34 = vld [vmem:[#allocation206_spill] sm:$0xff] }
 0xa40   : > { %4184 = vst [vmem:[#allocation2 + $0x38] sm:$0xf] %v4182_v20  ;;  %4225 = vmatprep.mubr.bf16.mxu0 %v4182_v20  ;;  %4266 = vmatprep.mubr.bf16.mxu1 %v4182_v20 }
 0xa41   : > { %4226 = vmatmul.mubr.bf16.vlgmr.msra.gmra.mrb[88].mxu0 %v8416_v15  ;;  %4267 = vmatmul.mubr.bf16.vlgmr.msra.gmra.mrb[88].mxu1 %v8416_v15 }
 0xa42   : > { %4276 = vmatpush1.bf16.msra.mxu0 %v9059_v44  ;;  %4317 = vmatpush1.bf16.msra.mxu1 %v9060_v62  ;;  %v9638_v44 = vld [vmem:[#allocation129_spill] sm:$0xff]  ;;  %v9639_v62 = vld [vmem:[#allocation130_spill] sm:$0xff] }
 0xa43   : > { %4307 = vmatprep.mubr.bf16.mxu0 %v4182_v20  ;;  %4348 = vmatprep.mubr.bf16.mxu1 %v4182_v20 }
 0xa44   : > { %4277 = vmatprep.subr.bf16.mxu0 %v9061_v39  ;;  %4318 = vmatprep.subr.bf16.mxu1 %v9062_v26  ;;  %v9640_v39 = vld [vmem:[#allocation131_spill] sm:$0xff]  ;;  %v9641_v26 = vld [vmem:[#allocation132_spill] sm:$0xff] }
 0xa46   : > { %4278 = vmatpush1.bf16.msra.mxu0 %v9063_v9  ;;  %4319 = vmatpush1.bf16.msra.mxu1 %v9064_v7  ;;  %v9642_v9 = vld [vmem:[#allocation133_spill] sm:$0xff]  ;;  %v9643_v7 = vld [vmem:[#allocation134_spill] sm:$0xff] }
 0xa47   : > { %4279 = vmatprep.subr.bf16.mxu0 %v9065_v25  ;;  %4320 = vmatprep.subr.bf16.mxu1 %v9066_v10  ;;  %v9644_v25 = vld [vmem:[#allocation135_spill] sm:$0xff]  ;;  %v9645_v10 = vld [vmem:[#allocation136_spill] sm:$0xff] }
 0xa4a   : > { %4280 = vmatpush1.bf16.msra.mxu0 %v9067_v33  ;;  %4321 = vmatpush1.bf16.msra.mxu1 %v9068_v19  ;;  %v9646_v33 = vld [vmem:[#allocation137_spill] sm:$0xff]  ;;  %v9647_v19 = vld [vmem:[#allocation138_spill] sm:$0xff] }
 0xa4b   : > { %4281 = vmatprep.subr.bf16.mxu0 %v9069_v0  ;;  %4322 = vmatprep.subr.bf16.mxu1 %v9070_v47  ;;  %v9648_v0 = vld [vmem:[#allocation139_spill] sm:$0xff]  ;;  %v9649_v47 = vld [vmem:[#allocation140_spill] sm:$0xff] }
 0xa4e   : > { %4282 = vmatpush1.bf16.msra.mxu0 %v9071_v63  ;;  %4323 = vmatpush1.bf16.msra.mxu1 %v9072_v1  ;;  %v9650_v63 = vld [vmem:[#allocation141_spill] sm:$0xff]  ;;  %v9651_v1 = vld [vmem:[#allocation142_spill] sm:$0xff] }
 0xa4f   : > { %4283 = vmatprep.subr.bf16.mxu0 %v9073_v6  ;;  %4324 = vmatprep.subr.bf16.mxu1 %v9074_v8  ;;  %v9652_v6 = vld [vmem:[#allocation143_spill] sm:$0xff]  ;;  %v9653_v8 = vld [vmem:[#allocation144_spill] sm:$0xff] }
 0xa52   : > { %4284 = vmatpush1.bf16.msra.mxu0 %v9075_v58  ;;  %4325 = vmatpush1.bf16.msra.mxu1 %v9076_v56  ;;  %v9654_v58 = vld [vmem:[#allocation145_spill] sm:$0xff]  ;;  %v9655_v56 = vld [vmem:[#allocation146_spill] sm:$0xff] }
 0xa53   : > { %4285 = vmatprep.subr.bf16.mxu0 %v9163_v54  ;;  %4326 = vmatprep.subr.bf16.mxu1 %v9164_v16 }
 0xa56   : > { %4286 = vmatpush1.bf16.msra.mxu0 %v9165_v37  ;;  %4327 = vmatpush1.bf16.msra.mxu1 %v9166_v45  ;;  %v9659_v37 = vld [vmem:[#allocation175_spill] sm:$0xff] }
 0xa57   : > { %4287 = vmatprep.subr.bf16.mxu0 %v9167_v49  ;;  %4328 = vmatprep.subr.bf16.mxu1 %v9168_v31  ;;  %v9660_v49 = vld [vmem:[#allocation176_spill] sm:$0xff] }
 0xa5a   : > { %4288 = vmatpush1.bf16.msra.mxu0 %v9169_v53  ;;  %4329 = vmatpush1.bf16.msra.mxu1 %v9170_v17 }
 0xa5b   : > { %4289 = vmatprep.subr.bf16.mxu0 %v9171_v32  ;;  %4330 = vmatprep.subr.bf16.mxu1 %v9172_v23  ;;  %v9661_v32 = vld [vmem:[#allocation177_spill] sm:$0xff] }
 0xa5e   : > { %4290 = vmatpush1.bf16.msra.mxu0 %v9173_v18  ;;  %4331 = vmatpush1.bf16.msra.mxu1 %v9174_v48  ;;  %v9662_v18 = vld [vmem:[#allocation178_spill] sm:$0xff] }
 0xa5f   : > { %4291 = vmatprep.subr.bf16.mxu0 %v9175_v3  ;;  %4332 = vmatprep.subr.bf16.mxu1 %v9176_v40 }
 0xa62   : > { %4292 = vmatpush1.bf16.msra.mxu0 %v9177_v59  ;;  %4333 = vmatpush1.bf16.msra.mxu1 %v9178_v14 }
 0xa63   : > { %4293 = vmatprep.subr.bf16.mxu0 %v9179_v36  ;;  %4334 = vmatprep.subr.bf16.mxu1 %v9180_v38 }
 0xa66   : > { %4294 = vmatpush1.bf16.msra.mxu0 %v9181_v61  ;;  %4335 = vmatpush1.bf16.msra.mxu1 %v9096_v43  ;;  %v9656_v43 = vld [vmem:[#allocation147_spill] sm:$0xff] }
 0xa67   : > { %4295 = vmatprep.subr.bf16.mxu0 %v9097_v4  ;;  %4336 = vmatprep.subr.bf16.mxu1 %v9098_v55  ;;  %v9657_v4 = vld [vmem:[#allocation148_spill] sm:$0xff]  ;;  %v9658_v55 = vld [vmem:[#allocation149_spill] sm:$0xff] }
 0xa6a   : > { %4296 = vmatpush1.bf16.msra.mxu0 %v9182_v46  ;;  %4337 = vmatpush1.bf16.msra.mxu1 %v9638_v44 }
 0xa6b   : > { %4297 = vmatprep.subr.bf16.mxu0 %v9639_v62  ;;  %4338 = vmatprep.subr.bf16.mxu1 %v9640_v39 }
 0xa6e   : > { %4298 = vmatpush1.bf16.msra.mxu0 %v9641_v26  ;;  %4339 = vmatpush1.bf16.msra.mxu1 %v9642_v9 }
 0xa6f   : > { %4299 = vmatprep.subr.bf16.mxu0 %v9643_v7  ;;  %4340 = vmatprep.subr.bf16.mxu1 %v9644_v25 }
 0xa72   : > { %4300 = vmatpush1.bf16.msra.mxu0 %v9645_v10  ;;  %4341 = vmatpush1.bf16.msra.mxu1 %v9646_v33 }
 0xa73   : > { %4301 = vmatprep.subr.bf16.mxu0 %v9647_v19  ;;  %4342 = vmatprep.subr.bf16.mxu1 %v9648_v0 }
 0xa76   : > { %4302 = vmatpush1.bf16.msra.mxu0 %v9649_v47  ;;  %4343 = vmatpush1.bf16.msra.mxu1 %v9650_v63 }
 0xa77   : > { %4303 = vmatprep.subr.bf16.mxu0 %v9651_v1  ;;  %4344 = vmatprep.subr.bf16.mxu1 %v9652_v6 }
 0xa7a   : > { %4304 = vmatpush1.bf16.msra.mxu0 %v9653_v8  ;;  %4345 = vmatpush1.bf16.msra.mxu1 %v9654_v58 }
 0xa7b   : > { %4305 = vmatprep.subr.bf16.mxu0 %v9655_v56  ;;  %4346 = vmatprep.subr.bf16.mxu1 %v9656_v43 }
 0xa7e   : > { %4306 = vmatpush1.bf16.msra.mxu0 %v9657_v4  ;;  %4347 = vmatpush1.bf16.msra.mxu1 %v9658_v55 }
 0xa81   : > { %4308 = vmatmul.mubr.bf16.vlgmr.msra.gmra.mrb[92].mxu0 %v8416_v15  ;;  %4349 = vmatmul.mubr.bf16.vlgmr.msra.gmra.mrb[92].mxu1 %v8416_v15 }
 0xb14   : > { %v4227_v54 = vpop.f32.mrb[88].mxu0  ;;  %v4268_v16 = vpop.f32.mrb[88].mxu1 }
 0xb15   : > { %v4357_v45 = vadd.f32 %v4227_v54, %v9659_v37  ;;  %v4359_v31 = vadd.f32 %v4268_v16, %v9660_v49  ;;  %v4229_v53 = vpop.f32.mrb[89].mxu0  ;;  %v4270_v17 = vpop.f32.mrb[89].mxu1 }
 0xb16   : > { %v4358_v23 = vadd.f32 %v4229_v53, %v9661_v32  ;;  %v4360_v48 = vadd.f32 %v4270_v17, %v9662_v18  ;;  %v4231_v3 = vpop.f32.mrb[90].mxu0  ;;  %v4272_v40 = vpop.f32.mrb[90].mxu1  ;;  %v5789_v32 = vld [vmem:[#allocation9 + $0x4] ss:$8 sps:$4 sm:$0xff] (!%p5346_p8)   ;;  %v5792_v18 = vld [vmem:[#allocation9 + $0x14] ss:$8 sps:$4 sm:$0xff] (!%p5346_p8)  }
 0xb17   : > { %v4232_v59 = vpop.f32.mrb[91].mxu0  ;;  %v4273_v14 = vpop.f32.mrb[91].mxu1  ;;  %v5340_v36 = vmul.f32 -1.442695, %v4357_v45  ;;  %v5342_v38 = vmul.f32 -1.442695, %v4359_v31  ;;  %4631 = vmatprep.subr.bf16.mxu0 (!%p5346_p8), %v5789_v32 }
 0xb18   : > { %v5341_v61 = vmul.f32 -1.442695, %v4358_v23  ;;  %v5343_v46 = vmul.f32 -1.442695, %v4360_v48  ;;  %v5791_v23 = vld [vmem:[#allocation9] ss:$8 sps:$4 sm:$0xff] (!%p5346_p8)  }
 0xb19   : > { %5757 = vpow2.f32 %v5340_v36  ;;  %4632 = vmatpush1.bf16.msra.mxu0 (!%p5346_p8), %v5791_v23  ;;  %v5794_v48 = vld [vmem:[#allocation9 + $0x10] ss:$8 sps:$4 sm:$0xff] (!%p5346_p8)   ;;  %v5795_v3 = vld [vmem:[#allocation9 + $0x24] ss:$8 sps:$4 sm:$0xff] (!%p5346_p8)   ;;  %v5797_v40 = vld [vmem:[#allocation9 + $0x20] ss:$8 sps:$4 sm:$0xff] (!%p5346_p8)  }
 0xb1a   : > { %5759 = vpow2.f32 %v5342_v38  ;;  %4633 = vmatprep.subr.bf16.mxu0 (!%p5346_p8), %v5792_v18  ;;  %v5798_v59 = vld [vmem:[#allocation9 + $0x34] ss:$8 sps:$4 sm:$0xff] (!%p5346_p8)   ;;  %v5800_v14 = vld [vmem:[#allocation9 + $0x30] ss:$8 sps:$4 sm:$0xff] (!%p5346_p8)   ;;  %v5801_v36 = vld [vmem:[#allocation9 + $0x44] ss:$8 sps:$4 sm:$0xff] (!%p5346_p8)  }
 0xb1b   : > { %5761 = vpow2.f32 %v5341_v61  ;;  %v5803_v38 = vld [vmem:[#allocation9 + $0x40] ss:$8 sps:$4 sm:$0xff] (!%p5346_p8)   ;;  %v5804_v61 = vld [vmem:[#allocation9 + $0x54] ss:$8 sps:$4 sm:$0xff] (!%p5346_p8)  }
 0xb1c   : > { %5763 = vpow2.f32 %v5343_v46  ;;  %v5806_v46 = vld [vmem:[#allocation9 + $0x50] ss:$8 sps:$4 sm:$0xff] (!%p5346_p8)   ;;  %v5379_v18 = vld [vmem:[#allocation14] ss:$0 sm:$0xff] (!%p5346_p8) }
 0xb1d   : > { %4634 = vmatpush1.bf16.msra.mxu0 (!%p5346_p8), %v5794_v48 }
 0xb1e   : > { %4635 = vmatprep.subr.bf16.mxu0 (!%p5346_p8), %v5795_v3 }
 0xb21   : > { %4636 = vmatpush1.bf16.msra.mxu0 (!%p5346_p8), %v5797_v40 }
 0xb22   : > { %4637 = vmatprep.subr.bf16.mxu0 (!%p5346_p8), %v5798_v59 }
 0xb23   : > { %v5758_v27 = vpop.eup %5757 }
 0xb24   : > { %v5760_v22 = vpop.eup %5759  ;;  %v4371_v42 = vadd.f32 1.0, %v5758_v27  ;;  %v5807_v27 = vld [vmem:[#allocation9 + $0x64] ss:$8 sps:$4 sm:$0xff] (!%p5346_p8)  }
 0xb25   : > { %v5762_v2 = vpop.eup %5761  ;;  %v4383_v51 = vadd.f32 1.0, %v5760_v22  ;;  %4638 = vmatpush1.bf16.msra.mxu0 (!%p5346_p8), %v5800_v14  ;;  %v5809_v22 = vld [vmem:[#allocation9 + $0x60] ss:$8 sps:$4 sm:$0xff] (!%p5346_p8)  }
 0xb26   : > { %v5764_v24 = vpop.eup %5763  ;;  %v4372_v60 = vadd.f32 1.0, %v5762_v2  ;;  %5765 = vrcp.f32 %v4371_v42  ;;  %4639 = vmatprep.subr.bf16.mxu0 (!%p5346_p8), %v5801_v36  ;;  %v5810_v2 = vld [vmem:[#allocation9 + $0x74] ss:$8 sps:$4 sm:$0xff] (!%p5346_p8)   ;;  %v5838_v42 = vld [vmem:[#allocation12] sm:$0xff] (!%p5346_p8)  }
 0xb27   : > { %v4384_v29 = vadd.f32 1.0, %v5764_v24  ;;  %5767 = vrcp.f32 %v4383_v51  ;;  %v5837_v24 = vld [vmem:[#allocation12 + $0x40] sm:$0xff] (!%p5346_p8)   ;;  %v5839_v51 = vld [vmem:[#allocation12 + $0x48] sm:$0xff] (!%p5346_p8)  }
 0xb28   : > { %5769 = vrcp.f32 %v4372_v60  ;;  %5403 = vmatprep.subr.bf16.mxu1 (!%p5346_p8), %v5837_v24  ;;  %v5840_v60 = vld [vmem:[#allocation12 + $0x8] sm:$0xff] (!%p5346_p8)  }
 0xb29   : > { %5771 = vrcp.f32 %v4384_v29  ;;  %4640 = vmatpush1.bf16.msra.mxu0 (!%p5346_p8), %v5803_v38  ;;  %5404 = vmatpush3.bf16.msra.mxu1 (!%p5346_p8), %v5838_v42  ;;  %v5841_v29 = vld [vmem:[#allocation12 + $0x50] sm:$0xff] (!%p5346_p8)  }
 0xb2a   : > { %4641 = vmatprep.subr.bf16.mxu0 (!%p5346_p8), %v5804_v61  ;;  %5405 = vmatprep.subr.bf16.mxu1 (!%p5346_p8), %v5839_v51 }
 0xb2d   : > { %4642 = vmatpush1.bf16.msra.mxu0 (!%p5346_p8), %v5806_v46  ;;  %5406 = vmatpush3.bf16.msra.mxu1 (!%p5346_p8), %v5840_v60 }
 0xb2e   : > { %4643 = vmatprep.subr.bf16.mxu0 (!%p5346_p8), %v5807_v27  ;;  %5407 = vmatprep.subr.bf16.mxu1 (!%p5346_p8), %v5841_v29 }
 0xb30   : > { %v5766_v7 = vpop.eup %5765 }
 0xb31   : > { %v5768_v25 = vpop.eup %5767  ;;  %4644 = vmatpush1.bf16.msra.mxu0 (!%p5346_p8), %v5809_v22 }
 0xb32   : > { %v5770_v10 = vpop.eup %5769  ;;  %v4403_v47 = vmul.f32 %v5768_v25, %v8410_v13  ;;  %4645 = vmatprep.subr.bf16.mxu0 (!%p5346_p8), %v5810_v2  ;;  %v5830_v25 = vld [vmem:[#allocation9 + $0xd0] ss:$8 sps:$4 sm:$0xff] (!%p5346_p8)  }
 0xb33   : > { %v5772_v33 = vpop.eup %5771 }
 0xb34   : > { %v4404_v6 = vmul.f32 %v5772_v33, %v8412_v35  ;;  %v5833_v33 = vld [vmem:[#allocation9 + $0xe0] ss:$8 sps:$4 sm:$0xff] (!%p5346_p8)  }
 0xb54   : > { %v4309_v30 = vpop.f32.mrb[92].mxu0  ;;  %v4350_v50 = vpop.f32.mrb[92].mxu1 }
 0xb55   : > { %v4361_v41 = vadd.f32 %v4309_v30, %v9663_v57  ;;  %v4363_v5 = vadd.f32 %v4350_v50, %v9664_v12  ;;  %v4311_v21 = vpop.f32.mrb[93].mxu0  ;;  %v4352_v28 = vpop.f32.mrb[93].mxu1  ;;  %v5812_v30 = vld [vmem:[#allocation9 + $0x70] ss:$8 sps:$4 sm:$0xff] (!%p5346_p8)   ;;  %v5813_v50 = vld [vmem:[#allocation9 + $0x84] ss:$8 sps:$4 sm:$0xff] (!%p5346_p8)  }
 0xb56   : > { %v4362_v52 = vadd.f32 %v4311_v21, %v9665_v11  ;;  %v4364_v15 = vadd.f32 %v4352_v28, %v9666_v34  ;;  %v4313_v20 = vpop.f32.mrb[94].mxu0  ;;  %v4354_v44 = vpop.f32.mrb[94].mxu1  ;;  %v5842_v57 = vld [vmem:[#allocation12 + $0x10] sm:$0xff] (!%p5346_p8)   ;;  %4646 = vmatpush1.bf16.msra.mxu0 (!%p5346_p8), %v5812_v30  ;;  %v5815_v12 = vld [vmem:[#allocation9 + $0x80] ss:$8 sps:$4 sm:$0xff] (!%p5346_p8)  }
 0xb57   : > { %5773 = vtanh.f32 %v4361_v41  ;;  %v5344_v62 = vmul.f32 -1.442695, %v4363_v5  ;;  %v4314_v39 = vpop.f32.mrb[95].mxu0  ;;  %v4355_v26 = vpop.f32.mrb[95].mxu1  ;;  %v5843_v41 = vld [vmem:[#allocation12 + $0x58] sm:$0xff] (!%p5346_p8)   ;;  %4647 = vmatprep.subr.bf16.mxu0 (!%p5346_p8), %v5813_v50  ;;  %5408 = vmatpush3.bf16.msra.mxu1 (!%p5346_p8), %v5842_v57  ;;  %v5845_v11 = vld [vmem:[#allocation12 + $0x60] sm:$0xff] (!%p5346_p8)  }
 0xb58   : > { %5775 = vtanh.f32 %v4362_v52  ;;  %v5345_v9 = vmul.f32 -1.442695, %v4364_v15  ;;  %v5816_v5 = vld [vmem:[#allocation9 + $0x94] ss:$8 sps:$4 sm:$0xff] (!%p5346_p8)   ;;  %v5818_v21 = vld [vmem:[#allocation9 + $0x90] ss:$8 sps:$4 sm:$0xff] (!%p5346_p8)   ;;  %5409 = vmatprep.subr.bf16.mxu1 (!%p5346_p8), %v5843_v41 }
 0xb59   : > { %5777 = vpow2.f32 %v5344_v62  ;;  %v5844_v28 = vld [vmem:[#allocation12 + $0x18] sm:$0xff] (!%p5346_p8)   ;;  %v5819_v52 = vld [vmem:[#allocation9 + $0xa4] ss:$8 sps:$4 sm:$0xff] (!%p5346_p8)  }
 0xb5a   : > { %5779 = vpow2.f32 %v5345_v9  ;;  %4648 = vmatpush1.bf16.msra.mxu0 (!%p5346_p8), %v5815_v12  ;;  %v5846_v34 = vld [vmem:[#allocation12 + $0x20] sm:$0xff] (!%p5346_p8)   ;;  %v5847_v15 = vld [vmem:[#allocation12 + $0x68] sm:$0xff] (!%p5346_p8)   ;;  %v5822_v44 = vld [vmem:[#allocation9 + $0xb4] ss:$8 sps:$4 sm:$0xff] (!%p5346_p8)  }
 0xb5b   : > { %4649 = vmatprep.subr.bf16.mxu0 (!%p5346_p8), %v5816_v5  ;;  %5410 = vmatpush3.bf16.msra.mxu1 (!%p5346_p8), %v5844_v28  ;;  %v5821_v20 = vld [vmem:[#allocation9 + $0xa0] ss:$8 sps:$4 sm:$0xff] (!%p5346_p8)   ;;  %v5824_v39 = vld [vmem:[#allocation9 + $0xb0] ss:$8 sps:$4 sm:$0xff] (!%p5346_p8)   ;;  %v5825_v26 = vld [vmem:[#allocation9 + $0xc4] ss:$8 sps:$4 sm:$0xff] (!%p5346_p8)  }
 0xb5c   : > { %5411 = vmatprep.subr.bf16.mxu1 (!%p5346_p8), %v5845_v11  ;;  %v5848_v62 = vld [vmem:[#allocation12 + $0x28] sm:$0xff] (!%p5346_p8)  }
 0xb5d   : > { %v5827_v9 = vld [vmem:[#allocation9 + $0xc0] ss:$8 sps:$4 sm:$0xff] (!%p5346_p8)  }
 0xb5e   : > { %4650 = vmatpush1.bf16.msra.mxu0 (!%p5346_p8), %v5818_v21 }
 0xb5f   : > { %4651 = vmatprep.subr.bf16.mxu0 (!%p5346_p8), %v5819_v52  ;;  %5412 = vmatpush3.bf16.msra.mxu1 (!%p5346_p8), %v5846_v34 }
 0xb60   : > { %5413 = vmatprep.subr.bf16.mxu1 (!%p5346_p8), %v5847_v15 }
 0xb61   : > { %v5774_v19 = vpop.eup %5773 }
 0xb62   : > { %v5776_v0 = vpop.eup %5775  ;;  %v4405_v63 = vmul.f32 %v5774_v19, %v5766_v7  ;;  %4652 = vmatpush1.bf16.msra.mxu0 (!%p5346_p8), %v5821_v20  ;;  %v5828_v7 = vld [vmem:[#allocation9 + $0xd4] ss:$8 sps:$4 sm:$0xff] (!%p5346_p8)  }
 0xb63   : > { %v5778_v1 = vpop.eup %5777  ;;  %v4406_v8 = vmul.f32 %v5776_v0, %v5770_v10  ;;  %4653 = vmatprep.subr.bf16.mxu0 (!%p5346_p8), %v5822_v44  ;;  %5414 = vmatpush3.bf16.msra.mxu1 (!%p5346_p8), %v5848_v62  ;;  %v5831_v10 = vld [vmem:[#allocation9 + $0xe4] ss:$8 sps:$4 sm:$0xff] (!%p5346_p8)   ;;  %v5834_v19 = vld [vmem:[#allocation9 + $0xf4] ss:$8 sps:$4 sm:$0xff] (!%p5346_p8)   ;;  %v5836_v0 = vld [vmem:[#allocation9 + $0xf0] ss:$8 sps:$4 sm:$0xff] (!%p5346_p8)  }
 0xb64   : > { %v5780_v58 = vpop.eup %5779  ;;  %v4407_v56 = vadd.f32 %v4405_v63, %v4403_v47  ;;  %v4397_v43 = vadd.f32 1.0, %v5778_v1  ;;  %v5849_v47 = vld [vmem:[#allocation12 + $0x70] sm:$0xff] (!%p5346_p8)   ;;  %v5851_v1 = vld [vmem:[#allocation12 + $0x78] sm:$0xff] (!%p5346_p8)  }
 0xb65   : > { %v4408_v4 = vadd.f32 %v4406_v8, %v4404_v6  ;;  %v4398_v55 = vadd.f32 1.0, %v5780_v58  ;;  %v5850_v63 = vld [vmem:[#allocation12 + $0x30] sm:$0xff] (!%p5346_p8)   ;;  %5415 = vmatprep.subr.bf16.mxu1 (!%p5346_p8), %v5849_v47  ;;  %v5852_v6 = vld [vmem:[#allocation12 + $0x38] sm:$0xff] (!%p5346_p8)   ;;  %v9667_v58 = vld [vmem:[#allocation150_spill] sm:$0xff] (!%p5346_p8) }
 0xb66   : > { %5781 = vtanh.f32 %v4407_v56  ;;  %4654 = vmatpush1.bf16.msra.mxu0 (!%p5346_p8), %v5824_v39  ;;  %v4459_v8 = vld [vmem:[#allocation11] sm:$0x3] (!%p5346_p8)  ;;  %v9668_v56 = vsub.s32 (!%p5346_p8), 0, %v9667_v58 }
 0xb67   : > { %5783 = vrcp.f32 %v4397_v43  ;;  %4655 = vmatprep.subr.bf16.mxu0 (!%p5346_p8), %v5825_v26  ;;  %5416 = vmatpush3.bf16.msra.mxu1 (!%p5346_p8), %v5850_v63 }
 0xb68   : > { %5785 = vtanh.f32 %v4408_v4  ;;  %5417 = vmatprep.subr.bf16.mxu1 (!%p5346_p8), %v5851_v1  ;;  %v4464_v43 = vrot.slane (!%p5346_p8), %v4459_v8, %v9668_v56  ;;  %v9669_v4 = vsub.s32 (!%p5346_p8), 1, %v9667_v58 }
 0xb69   : > { %5787 = vrcp.f32 %v4398_v55 }
 0xb6a   : > { %4656 = vmatpush1.bf16.msra.mxu0 (!%p5346_p8), %v5827_v9  ;;  %v4468_v55 = vrot.slane (!%p5346_p8), %v4459_v8, %v9669_v4 }
 0xb6b   : > { %4657 = vmatprep.subr.bf16.mxu0 (!%p5346_p8), %v5828_v7  ;;  %5418 = vmatpush3.bf16.msra.mxu1 (!%p5346_p8), %v5852_v6 }
 0xb6e   : > { %4658 = vmatpush1.bf16.msra.mxu0 (!%p5346_p8), %v5830_v25 }
 0xb6f   : > { %4659 = vmatprep.subr.bf16.mxu0 (!%p5346_p8), %v5831_v10 }
 0xb70   : > { %v5782_v54 = vpop.eup %5781 }
 0xb71   : > { %v5784_v16 = vpop.eup %5783 }
 0xb72   : > { %v5786_v37 = vpop.eup %5785  ;;  %v4411_v45 = vmul.f32 %v5784_v16, %v5782_v54  ;;  %4660 = vmatpush1.bf16.msra.mxu0 (!%p5346_p8), %v5833_v33 }
 0xb73   : > { %v5788_v49 = vpop.eup %5787  ;;  %4661 = vmatprep.subr.bf16.mxu0 (!%p5346_p8), %v5834_v19 }
 0xb74   : > { %v8495_v13 = vpack.c.bf16 %v4411_v45, %v4411_v45  ;;  %v4412_v31 = vmul.f32 %v5788_v49, %v5786_v37  ;;  %4426 = sbr.rel (%p5346_p8) target bundleno = 3687 (0xe67), region = 96 }
 0xb76   : > { %v4417_v35 = vrot.slane %v8495_v13, 4  ;;  %v4414_v53 = vpack.c.bf16 %v4412_v31, %v4412_v31  ;;  %4662 = vmatpush1.bf16.msra.mxu0 (!%p5346_p8), %v5836_v0 }
 0xb78   : > { %4421 = vst [vmem:[#allocation2 + $0x30] sm:$0xf0] %v4417_v35  ;;  %v4418_v17 = vrot.slane %v4414_v53, 4  ;;  %4663 = vmatprep.mubr.bf16.mxu0 (!%p5346_p8), %v4414_v53 }
 0xb79   : > { %4664 = vmatmul.mubr.bf16.vlgmr.msra.gmra.mrb[0].mxu0 (!%p5346_p8), %v8495_v13 }
 0xb7a   : > { %4422 = vst [vmem:[#allocation2 + $0x38] sm:$0xf0] %v4418_v17 }
 0xc4c   : > { %v4665_v54 = vpop.f32.mrb[0].mxu0 }
 0xc4d   : > { %v4666_v16 = vadd.f32 %v4665_v54, %v4464_v43  ;;  %v4667_v37 = vpop.f32.mrb[1].mxu0 }
 0xc4e   : > { %v4668_v45 = vadd.f32 %v4667_v37, %v4468_v55  ;;  %v4669_v49 = vpop.f32.mrb[2].mxu0 }
 0xc4f   : > { %v4672_v13 = vmax.f32 %v4666_v16, 0.0  ;;  %v4670_v31 = vpop.f32.mrb[3].mxu0 }
 0xc50   : > { %v4673_v35 = vmax.f32 %v4668_v45, 0.0 }
 0xc51   : > { %v4674_v17 = vpack.c.bf16 %v4672_v13, %v4672_v13 }
 0xc52   : > { %v4675_v53 = vpack.c.bf16 %v4673_v35, %v4673_v35 }
 0xc54   : > { %4843 = vmatprep.mubr.bf16.mxu1 %v4675_v53 }
 0xc55   : > { %4844 = vmatmul.mubr.bf16.vlgmr.msra.gmra.mrb[0].mxu1 %v4674_v17 }
 0xd28   : > { %v5419_v32 = vpop.f32.mrb[0].mxu1 }
 0xd29   : > { %v5420_v23 = vpop.f32.mrb[1].mxu1 }
 0xd2a   : > { %v5421_v48 = vadd.f32 %v5420_v23, %v5419_v32  ;;  %v5422_v3 = vpop.f32.mrb[2].mxu1 }
 0xd2b   : > { %v5423_v40 = vpop.f32.mrb[3].mxu1 }
 0xd2c   : > { %v4846_v59 = vadd.f32 %v5421_v48, %v5379_v18 }
 0xd2e   : > { %4851 = vmax.xlane.f32.xlu0 %v4846_v59 }
 0xdbb   : > { %v4852_v14 = vpop.xlane.xlu0 %4851 }
 0xdbc   : > { %v4853_v36 = vsub.f32 %v4846_v59, %v4852_v14 }
 0xdbe   : > { %v4854_v38 = vmul.f32 1.442695, %v4853_v36 }
 0xdc0   : > { %5853 = vpow2.f32 %v4854_v38 }
 0xdca   : > { %v5854_v61 = vpop.eup %5853 }
 0xdcb   : > { %4856 = vadd.xlane.f32.xlu0 %v5854_v61 }
 0xe58   : > { %v4857_v46 = vpop.xlane.xlu0 %4856 }
 0xe59   : > { %5855 = vrcp.f32 %v4857_v46 }
 0xe63   : > { %v5856_v27 = vpop.eup %5855 }
 0xe64   : > { %v4859_v22 = vmul.f32 %v5856_v27, %v5854_v61 }
 0xe66   : > { %4860 = vst [vmem:[%s9670_s28] sm:$0xff] %v4859_v22 }
 0xe67 PF: > { %s9671_s16 = sld [smem:[#allocation20_spill]]  ;;  %s9672_s10 = sld [smem:[#allocation19_spill]] }
 0xe68   : > { %s9673_s15 = sld [smem:[#allocation21_spill]]  ;;  %s9674_s13 = smov %s6097_s14 }
 0xe6d   : > { %p25_p9 = scmp.ge.s32.totalorder %s9671_s16, 8   ;;  %s9675_s14 = smov %s9672_s10 }
 0xe6f   :  { %27 = sbr.rel (!%p25_p9) target bundleno = 14 (0xe), region = 150 }
 0xe76   :  { %4872 = vsyncpa [#allocation5], 1 }
 0xe77   :  { %4874 = vsyncpa [#allocation5 + $0x1], 1 }
 0xe78   :  { %4875 = vsyncpa [#allocation7], 1 }
 0xe79   :  { %4877 = vsyncpa [#allocation7 + $0x1], 1 }
 0xe7a   :  { %4878 = vsyncpa [#allocation10], 1 }
 0xe7b   :  { %4879 = vsyncpa [#allocation13], 1 }

</bundles_post_ra>
